<compile_context>
chip_gen: v6e
topology: v6e:2x2x1
jax: 0.10.0
libtpu: 0.0.40
codegen_flags: <defaults>
</compile_context>

<pallas_src>
import functools

import jax
import jax.numpy as jnp
import numpy as np
from jax.experimental import pallas as pl
from jax.experimental.pallas import tpu as pltpu


def _gcn_attn_kernel(dk, dv, Nh,
                     x_ref, wqkv_ref, bqkv_ref, wout_ref, bout_ref,
                     dbn_s_ref, dbn_b_ref,
                     y_ref):
    dkh = dk // Nh
    dvh = dv // Nh
    tb, V, C = x_ref.shape
    dqkv = 2 * dk + dv

    # data_bn (BatchNorm1d over C*V channels) folded into a per-(v, c) affine.
    x = x_ref[...] * dbn_s_ref[...] + dbn_b_ref[...]              # (tb, V, C)

    # qkv 1x1 conv == channel matmul over all tb*V joints at once.
    # (q-scale dkh^-0.5 is pre-folded into the q columns of W/b on the host.)
    qkv = jnp.dot(x.reshape(tb * V, C), wqkv_ref[...],
                  preferred_element_type=jnp.float32)
    qkv = (qkv + bqkv_ref[...]).reshape(tb, V, dqkv)              # (tb, V, 2dk+dv)

    y = None
    for h in range(Nh):                                           # static unroll
        qh = qkv[:, :, h * dkh:(h + 1) * dkh]                      # (tb, V, dkh)
        kh = qkv[:, :, dk + h * dkh: dk + (h + 1) * dkh]           # (tb, V, dkh)
        vh = qkv[:, :, 2 * dk + h * dvh: 2 * dk + (h + 1) * dvh]   # (tb, V, dvh)

        # All TB frames of this head in one batched contraction.
        logits = jnp.einsum('bqd,bkd->bqk', qh, kh,
                            preferred_element_type=jnp.float32)    # (tb, V, V)
        logits = logits - jnp.max(logits, axis=-1, keepdims=True)
        e = jnp.exp(logits)
        s = jnp.sum(e, axis=-1, keepdims=True)
        r = pl.reciprocal(s, approx=True)
        r = r * (2.0 - s * r)          # one Newton step -> ~f32-accurate recip
        w = e * r                      # softmax over the V joints

        oh = jnp.einsum('bqk,bkd->bqd', w, vh,
                        preferred_element_type=jnp.float32)        # (tb, V, dvh)

        # combine_heads_2d + attn_out (+BN) fused: this head contributes
        # through its dvh-row slice of the (BN-folded) output weight.
        yh = jnp.dot(oh.reshape(tb * V, dvh),
                     wout_ref[h * dvh:(h + 1) * dvh, :],
                     preferred_element_type=jnp.float32)           # (tb*V, dv)
        y = yh if y is None else y + yh

    y = jnp.maximum(y + bout_ref[...], 0.0)                        # bias + ReLU
    y_ref[...] = y.reshape(tb, V, dv)


def gcn_unit_attention(x, params, *, dk, dv, Nh, tb=256):
    """x: (N, C, T, V) float32 -> (N, dv, T, V) float32 (eval mode)."""
    N, C, T, V = x.shape
    B = N * T
    tb = max(1, min(tb, B))
    nb = -(-B // tb)
    B_pad = nb * tb

    # NCHW -> (B, V, C): channels on lanes, joints on sublanes, frames outer.
    x_bvc = jnp.transpose(x, (0, 2, 3, 1)).reshape(B, V, C)
    if B_pad != B:
        x_bvc = jnp.pad(x_bvc, ((0, B_pad - B), (0, 0), (0, 0)))

    dqkv = 2 * dk + dv
    dkh = dk // Nh

    # Fold the 1/sqrt(dkh) query scale into the q columns of the qkv conv.
    col_scale = jnp.concatenate(
        [jnp.full((dk,), dkh ** (-0.5), jnp.float32),
         jnp.ones((dk + dv,), jnp.float32)])
    w_qkv_f = params["w_qkv"] * col_scale[None, :]                 # (C, Dqkv)
    b_qkv_f = params["b_qkv"] * col_scale[None, :]                 # (1, Dqkv)

    # Fold eval-mode output BatchNorm2d into the attn_out conv (exact).
    w_out_f = params["w_out"] * params["bn_scale"]                 # (dv, dv)
    b_out_f = params["b_out"] * params["bn_scale"] + params["bn_bias"]

    flops = (B_pad * V * 2 * C * dqkv
             + B_pad * V * V * 2 * (dk + dv)
             + B_pad * V * 2 * dv * dv)
    transcendentals = B_pad * Nh * V * (V + 1)
    bytes_accessed = 4 * B_pad * V * (C + dv) + 4 * (
        C * dqkv + dqkv + dv * dv + dv + 2 * V * C)

    kernel = functools.partial(_gcn_attn_kernel, dk, dv, Nh)

    def full_spec(arr):
        return pl.BlockSpec(arr.shape, lambda i, nd=arr.ndim: (0,) * nd)

    y = pl.pallas_call(
        kernel,
        out_shape=jax.ShapeDtypeStruct((B_pad, V, dv), jnp.float32),
        grid=(nb,),
        in_specs=[
            pl.BlockSpec((tb, V, C), lambda i: (i, 0, 0)),
            full_spec(w_qkv_f),
            full_spec(b_qkv_f),
            full_spec(w_out_f),
            full_spec(b_out_f),
            full_spec(params["dbn_scale"]),
            full_spec(params["dbn_bias"]),
        ],
        out_specs=pl.BlockSpec((tb, V, dv), lambda i: (i, 0, 0)),
        compiler_params=pltpu.CompilerParams(
            dimension_semantics=("parallel",)),
        cost_estimate=pl.CostEstimate(
            flops=int(flops), transcendentals=int(transcendentals),
            bytes_accessed=int(bytes_accessed)),
    )(x_bvc, w_qkv_f, b_qkv_f, w_out_f, b_out_f,
      params["dbn_scale"], params["dbn_bias"])

    y = y[:B]
    # (B, V, dv) -> (N, T, V, dv) -> (N, dv, T, V)  (matches PyTorch output)
    return y.reshape(N, T, V, dv).transpose(0, 3, 1, 2)


def reference_forward(x, params, *, dk, dv, Nh):
    """Pure-JAX reference of the same forward pass (unfolded params)."""
    N, C, T, V = x.shape
    dkh, dvh = dk // Nh, dv // Nh
    B = N * T
    xb = jnp.transpose(x, (0, 2, 3, 1)).reshape(B, V, C)
    xb = xb * params["dbn_scale"] + params["dbn_bias"]
    qkv = xb @ params["w_qkv"] + params["b_qkv"]
    q, k, v = qkv[..., :dk], qkv[..., dk:2 * dk], qkv[..., 2 * dk:]
    q = q.reshape(B, V, Nh, dkh).transpose(0, 2, 1, 3) * (dkh ** (-0.5))
    k = k.reshape(B, V, Nh, dkh).transpose(0, 2, 1, 3)
    v = v.reshape(B, V, Nh, dvh).transpose(0, 2, 1, 3)
    logits = jnp.einsum('bhqd,bhkd->bhqk', q, k)
    w = jax.nn.softmax(logits, axis=-1)
    o = jnp.einsum('bhqk,bhkd->bhqd', w, v)
    o = o.transpose(0, 2, 1, 3).reshape(B, V, dv)
    o = o @ params["w_out"] + params["b_out"]
    y = jnp.maximum(o * params["bn_scale"] + params["bn_bias"], 0.0)
    return y.reshape(N, T, V, dv).transpose(0, 3, 1, 2)


def make_params(key, *, C, V, dk, dv):
    """Deterministic synthetic parameters with the module's shapes."""
    Dqkv = 2 * dk + dv
    ks = jax.random.split(key, 14)
    eps = 1e-5

    # qkv_conv: Conv2d(C, 2*dk+dv, 1) -> weight (Dqkv, C, 1, 1), bias (Dqkv,)
    w_qkv_oc = 0.1 * jax.random.normal(ks[0], (Dqkv, C), jnp.float32)
    b_qkv = 0.1 * jax.random.normal(ks[1], (Dqkv,), jnp.float32)
    # attn_out: Conv2d(dv, dv, 1) -> weight (dv, dv, 1, 1), bias (dv,)
    w_out_oc = 0.1 * jax.random.normal(ks[2], (dv, dv), jnp.float32)
    b_out = 0.1 * jax.random.normal(ks[3], (dv,), jnp.float32)

    # data_bn: BatchNorm1d(C * V), channel index = c*V + v  (eval mode).
    g1 = 1.0 + 0.1 * jax.random.normal(ks[4], (C * V,), jnp.float32)
    be1 = 0.1 * jax.random.normal(ks[5], (C * V,), jnp.float32)
    m1 = 0.1 * jax.random.normal(ks[6], (C * V,), jnp.float32)
    v1 = jax.random.uniform(ks[7], (C * V,), jnp.float32, 0.5, 1.5)
    s1 = g1 / jnp.sqrt(v1 + eps)
    b1 = be1 - m1 * s1

    # bn: BatchNorm2d(out_channels = dv)  (eval mode).
    g2 = 1.0 + 0.1 * jax.random.normal(ks[8], (dv,), jnp.float32)
    be2 = 0.1 * jax.random.normal(ks[9], (dv,), jnp.float32)
    m2 = 0.1 * jax.random.normal(ks[10], (dv,), jnp.float32)
    v2 = jax.random.uniform(ks[11], (dv,), jnp.float32, 0.5, 1.5)
    s2 = g2 / jnp.sqrt(v2 + eps)
    b2 = be2 - m2 * s2

    return {
        "w_qkv": w_qkv_oc.T,                       # (C, Dqkv), y = x @ W
        "b_qkv": b_qkv.reshape(1, Dqkv),
        "w_out": w_out_oc.T,                       # (dv, dv)
        "b_out": b_out.reshape(1, dv),
        "dbn_scale": s1.reshape(C, V).T,           # (V, C): element [v, c]
        "dbn_bias": b1.reshape(C, V).T,
        "bn_scale": s2.reshape(1, dv),
        "bn_bias": b2.reshape(1, dv),
    }


if __name__ == "__main__":
    # Module config: in_channels=4, out_channels=32, num_point=V=16, Nh=4,
    # dk_factor=0.25 -> dk=8, dv=out_channels=32 (only_attention=True).
    N, C, T, V = 2, 4, 8, 16
    out_channels, Nh = 32, 4
    dk = int(out_channels * 0.25)      # 8
    dv = out_channels                  # 32

    key = jax.random.PRNGKey(0)
    kx, kp = jax.random.split(key)
    x = jax.random.normal(kx, (N, C, T, V), jnp.float32)
    params = make_params(kp, C=C, V=V, dk=dk, dv=dv)

    y = gcn_unit_attention(x, params, dk=dk, dv=dv, Nh=Nh)
    y = jax.block_until_ready(y)

    y_ref = jax.block_until_ready(
        reference_forward(x, params, dk=dk, dv=dv, Nh=Nh))

    # Tolerance 1e-3 only because of the EUP approximate-reciprocal softmax
    # (Newton-refined); layout/indexing bugs would produce O(1) errors.
    np.testing.assert_allclose(np.asarray(y), np.asarray(y_ref),
                               rtol=1e-3, atol=1e-3)
    assert y.shape == (N, dv, T, V)
    print("KERNEL_OK")
</pallas_src>

<mosaic_0001>
module attributes {stable_mosaic.version = 11 : i64} {
  func.func @_gcn_attn_kernel(%arg0: i32, %arg1: memref<16x16x4xf32, #tpu.memory_space<vmem>>, %arg2: memref<4x48xf32, #tpu.memory_space<vmem>>, %arg3: memref<1x48xf32, #tpu.memory_space<vmem>>, %arg4: memref<32x32xf32, #tpu.memory_space<vmem>>, %arg5: memref<1x32xf32, #tpu.memory_space<vmem>>, %arg6: memref<16x4xf32, #tpu.memory_space<vmem>>, %arg7: memref<16x4xf32, #tpu.memory_space<vmem>>, %arg8: memref<16x16x32xf32, #tpu.memory_space<vmem>>) attributes {dimension_semantics = [#tpu.dimension_semantics<parallel>], iteration_bounds = array<i64: 1>, scalar_prefetch = 0 : i64, scratch_operands = 0 : i64, tpu.core_type = #tpu.core_type<tc>, window_params = [{transform_indices = @transform_0, window_bounds = array<i64: 16, 16, 4>}, {pipeline_mode = #tpu.pipeline_mode<synchronous>, transform_indices = @transform_1, window_bounds = array<i64: 4, 48>}, {pipeline_mode = #tpu.pipeline_mode<synchronous>, transform_indices = @transform_2, window_bounds = array<i64: 1, 48>}, {pipeline_mode = #tpu.pipeline_mode<synchronous>, transform_indices = @transform_3, window_bounds = array<i64: 32, 32>}, {pipeline_mode = #tpu.pipeline_mode<synchronous>, transform_indices = @transform_4, window_bounds = array<i64: 1, 32>}, {pipeline_mode = #tpu.pipeline_mode<synchronous>, transform_indices = @transform_5, window_bounds = array<i64: 16, 4>}, {pipeline_mode = #tpu.pipeline_mode<synchronous>, transform_indices = @transform_6, window_bounds = array<i64: 16, 4>}, {transform_indices = @transform_7, window_bounds = array<i64: 16, 16, 32>}]} {
    %c0 = arith.constant 0 : index
    %c0_0 = arith.constant 0 : index
    %c0_1 = arith.constant 0 : index
    %0 = vector.load %arg1[%c0, %c0_0, %c0_1] : memref<16x16x4xf32, #tpu.memory_space<vmem>>, vector<16x16x4xf32>
    %c0_2 = arith.constant 0 : index
    %c0_3 = arith.constant 0 : index
    %1 = vector.load %arg6[%c0_2, %c0_3] : memref<16x4xf32, #tpu.memory_space<vmem>>, vector<16x4xf32>
    %2 = vector.shape_cast %1 : vector<16x4xf32> to vector<1x16x4xf32>
    %3 = vector.broadcast %2 : vector<1x16x4xf32> to vector<16x16x4xf32>
    %4 = arith.mulf %0, %3 : vector<16x16x4xf32>
    %c0_4 = arith.constant 0 : index
    %c0_5 = arith.constant 0 : index
    %5 = vector.load %arg7[%c0_4, %c0_5] : memref<16x4xf32, #tpu.memory_space<vmem>>, vector<16x4xf32>
    %6 = vector.shape_cast %5 : vector<16x4xf32> to vector<1x16x4xf32>
    %7 = vector.broadcast %6 : vector<1x16x4xf32> to vector<16x16x4xf32>
    %8 = arith.addf %4, %7 : vector<16x16x4xf32>
    %9 = vector.shape_cast %8 : vector<16x16x4xf32> to vector<256x4xf32>
    %c0_6 = arith.constant 0 : index
    %c0_7 = arith.constant 0 : index
    %10 = vector.load %arg2[%c0_6, %c0_7] : memref<4x48xf32, #tpu.memory_space<vmem>>, vector<4x48xf32>
    %cst = arith.constant dense<0.000000e+00> : vector<256x48xf32>
    %11 = tpu.matmul %9, %10, %cst {dimension_numbers = #tpu.dot_dimension_numbers<[1], [0], [0], [1], [0, 0, 1, 1], [], []>} : vector<256x4xf32>, vector<4x48xf32>, vector<256x48xf32> -> vector<256x48xf32>
    %c0_8 = arith.constant 0 : index
    %c0_9 = arith.constant 0 : index
    %12 = vector.load %arg3[%c0_8, %c0_9] : memref<1x48xf32, #tpu.memory_space<vmem>>, vector<1x48xf32>
    %13 = vector.broadcast %12 : vector<1x48xf32> to vector<256x48xf32>
    %14 = arith.addf %11, %13 : vector<256x48xf32>
    %15 = vector.shape_cast %14 : vector<256x48xf32> to vector<16x16x48xf32>
    %16 = vector.extract_strided_slice %15 {offsets = [0, 0, 0], sizes = [16, 16, 2], strides = [1, 1, 1]} : vector<16x16x48xf32> to vector<16x16x2xf32>
    %17 = vector.extract_strided_slice %15 {offsets = [0, 0, 8], sizes = [16, 16, 2], strides = [1, 1, 1]} : vector<16x16x48xf32> to vector<16x16x2xf32>
    %18 = vector.extract_strided_slice %15 {offsets = [0, 0, 16], sizes = [16, 16, 8], strides = [1, 1, 1]} : vector<16x16x48xf32> to vector<16x16x8xf32>
    "tpu.trace_start"() <{level = 10 : i32, message = "bqd,bkd->bqk"}> : () -> ()
    %cst_10 = arith.constant dense<0.000000e+00> : vector<16x16x16xf32>
    %19 = tpu.matmul %16, %17, %cst_10 {dimension_numbers = #tpu.dot_dimension_numbers<[2], [2], [1], [1], [0, 0, 0, 1, 1, 1], [0], [0]>} : vector<16x16x2xf32>, vector<16x16x2xf32>, vector<16x16x16xf32> -> vector<16x16x16xf32>
    "tpu.trace_stop"() : () -> ()
    %cst_11 = arith.constant dense<0xFF800000> : vector<16x16xf32>
    %20 = vector.multi_reduction <maximumf>, %19, %cst_11 [2] : vector<16x16x16xf32> to vector<16x16xf32>
    %21 = vector.shape_cast %20 : vector<16x16xf32> to vector<16x16x1xf32>
    %22 = vector.broadcast %21 : vector<16x16x1xf32> to vector<16x16x16xf32>
    %23 = arith.subf %19, %22 : vector<16x16x16xf32>
    %24 = math.exp %23 : vector<16x16x16xf32>
    %cst_12 = arith.constant dense<0.000000e+00> : vector<16x16xf32>
    %25 = vector.multi_reduction <add>, %24, %cst_12 [2] : vector<16x16x16xf32> to vector<16x16xf32>
    %26 = vector.shape_cast %25 : vector<16x16xf32> to vector<16x16x1xf32>
    %27 = tpu.reciprocal %26 {approx = true} : vector<16x16x1xf32> -> vector<16x16x1xf32>
    %28 = arith.mulf %26, %27 : vector<16x16x1xf32>
    %cst_13 = arith.constant 2.000000e+00 : f32
    %29 = vector.broadcast %cst_13 : f32 to vector<16x16x1xf32>
    %30 = arith.subf %29, %28 : vector<16x16x1xf32>
    %31 = arith.mulf %27, %30 : vector<16x16x1xf32>
    %32 = vector.broadcast %31 : vector<16x16x1xf32> to vector<16x16x16xf32>
    %33 = arith.mulf %24, %32 : vector<16x16x16xf32>
    "tpu.trace_start"() <{level = 10 : i32, message = "bqk,bkd->bqd"}> : () -> ()
    %cst_14 = arith.constant dense<0.000000e+00> : vector<16x16x8xf32>
    %34 = tpu.matmul %33, %18, %cst_14 {dimension_numbers = #tpu.dot_dimension_numbers<[2], [1], [1], [2], [0, 0, 0, 1, 1, 2], [0], [0]>} : vector<16x16x16xf32>, vector<16x16x8xf32>, vector<16x16x8xf32> -> vector<16x16x8xf32>
    "tpu.trace_stop"() : () -> ()
    %35 = vector.shape_cast %34 : vector<16x16x8xf32> to vector<256x8xf32>
    %c0_15 = arith.constant 0 : index
    %c0_16 = arith.constant 0 : index
    %36 = vector.load %arg4[%c0_15, %c0_16] : memref<32x32xf32, #tpu.memory_space<vmem>>, vector<8x32xf32>
    %cst_17 = arith.constant dense<0.000000e+00> : vector<256x32xf32>
    %37 = tpu.matmul %35, %36, %cst_17 {dimension_numbers = #tpu.dot_dimension_numbers<[1], [0], [0], [1], [0, 0, 1, 1], [], []>} : vector<256x8xf32>, vector<8x32xf32>, vector<256x32xf32> -> vector<256x32xf32>
    %38 = vector.extract_strided_slice %15 {offsets = [0, 0, 2], sizes = [16, 16, 2], strides = [1, 1, 1]} : vector<16x16x48xf32> to vector<16x16x2xf32>
    %39 = vector.extract_strided_slice %15 {offsets = [0, 0, 10], sizes = [16, 16, 2], strides = [1, 1, 1]} : vector<16x16x48xf32> to vector<16x16x2xf32>
    %40 = vector.extract_strided_slice %15 {offsets = [0, 0, 24], sizes = [16, 16, 8], strides = [1, 1, 1]} : vector<16x16x48xf32> to vector<16x16x8xf32>
    "tpu.trace_start"() <{level = 10 : i32, message = "bqd,bkd->bqk"}> : () -> ()
    %cst_18 = arith.constant dense<0.000000e+00> : vector<16x16x16xf32>
    %41 = tpu.matmul %38, %39, %cst_18 {dimension_numbers = #tpu.dot_dimension_numbers<[2], [2], [1], [1], [0, 0, 0, 1, 1, 1], [0], [0]>} : vector<16x16x2xf32>, vector<16x16x2xf32>, vector<16x16x16xf32> -> vector<16x16x16xf32>
    "tpu.trace_stop"() : () -> ()
    %cst_19 = arith.constant dense<0xFF800000> : vector<16x16xf32>
    %42 = vector.multi_reduction <maximumf>, %41, %cst_19 [2] : vector<16x16x16xf32> to vector<16x16xf32>
    %43 = vector.shape_cast %42 : vector<16x16xf32> to vector<16x16x1xf32>
    %44 = vector.broadcast %43 : vector<16x16x1xf32> to vector<16x16x16xf32>
    %45 = arith.subf %41, %44 : vector<16x16x16xf32>
    %46 = math.exp %45 : vector<16x16x16xf32>
    %cst_20 = arith.constant dense<0.000000e+00> : vector<16x16xf32>
    %47 = vector.multi_reduction <add>, %46, %cst_20 [2] : vector<16x16x16xf32> to vector<16x16xf32>
    %48 = vector.shape_cast %47 : vector<16x16xf32> to vector<16x16x1xf32>
    %49 = tpu.reciprocal %48 {approx = true} : vector<16x16x1xf32> -> vector<16x16x1xf32>
    %50 = arith.mulf %48, %49 : vector<16x16x1xf32>
    %cst_21 = arith.constant 2.000000e+00 : f32
    %51 = vector.broadcast %cst_21 : f32 to vector<16x16x1xf32>
    %52 = arith.subf %51, %50 : vector<16x16x1xf32>
    %53 = arith.mulf %49, %52 : vector<16x16x1xf32>
    %54 = vector.broadcast %53 : vector<16x16x1xf32> to vector<16x16x16xf32>
    %55 = arith.mulf %46, %54 : vector<16x16x16xf32>
    "tpu.trace_start"() <{level = 10 : i32, message = "bqk,bkd->bqd"}> : () -> ()
    %cst_22 = arith.constant dense<0.000000e+00> : vector<16x16x8xf32>
    %56 = tpu.matmul %55, %40, %cst_22 {dimension_numbers = #tpu.dot_dimension_numbers<[2], [1], [1], [2], [0, 0, 0, 1, 1, 2], [0], [0]>} : vector<16x16x16xf32>, vector<16x16x8xf32>, vector<16x16x8xf32> -> vector<16x16x8xf32>
    "tpu.trace_stop"() : () -> ()
    %57 = vector.shape_cast %56 : vector<16x16x8xf32> to vector<256x8xf32>
    %c8 = arith.constant 8 : index
    %c0_23 = arith.constant 0 : index
    %58 = vector.load %arg4[%c8, %c0_23] : memref<32x32xf32, #tpu.memory_space<vmem>>, vector<8x32xf32>
    %cst_24 = arith.constant dense<0.000000e+00> : vector<256x32xf32>
    %59 = tpu.matmul %57, %58, %cst_24 {dimension_numbers = #tpu.dot_dimension_numbers<[1], [0], [0], [1], [0, 0, 1, 1], [], []>} : vector<256x8xf32>, vector<8x32xf32>, vector<256x32xf32> -> vector<256x32xf32>
    %60 = arith.addf %37, %59 : vector<256x32xf32>
    %61 = vector.extract_strided_slice %15 {offsets = [0, 0, 4], sizes = [16, 16, 2], strides = [1, 1, 1]} : vector<16x16x48xf32> to vector<16x16x2xf32>
    %62 = vector.extract_strided_slice %15 {offsets = [0, 0, 12], sizes = [16, 16, 2], strides = [1, 1, 1]} : vector<16x16x48xf32> to vector<16x16x2xf32>
    %63 = vector.extract_strided_slice %15 {offsets = [0, 0, 32], sizes = [16, 16, 8], strides = [1, 1, 1]} : vector<16x16x48xf32> to vector<16x16x8xf32>
    "tpu.trace_start"() <{level = 10 : i32, message = "bqd,bkd->bqk"}> : () -> ()
    %cst_25 = arith.constant dense<0.000000e+00> : vector<16x16x16xf32>
    %64 = tpu.matmul %61, %62, %cst_25 {dimension_numbers = #tpu.dot_dimension_numbers<[2], [2], [1], [1], [0, 0, 0, 1, 1, 1], [0], [0]>} : vector<16x16x2xf32>, vector<16x16x2xf32>, vector<16x16x16xf32> -> vector<16x16x16xf32>
    "tpu.trace_stop"() : () -> ()
    %cst_26 = arith.constant dense<0xFF800000> : vector<16x16xf32>
    %65 = vector.multi_reduction <maximumf>, %64, %cst_26 [2] : vector<16x16x16xf32> to vector<16x16xf32>
    %66 = vector.shape_cast %65 : vector<16x16xf32> to vector<16x16x1xf32>
    %67 = vector.broadcast %66 : vector<16x16x1xf32> to vector<16x16x16xf32>
    %68 = arith.subf %64, %67 : vector<16x16x16xf32>
    %69 = math.exp %68 : vector<16x16x16xf32>
    %cst_27 = arith.constant dense<0.000000e+00> : vector<16x16xf32>
    %70 = vector.multi_reduction <add>, %69, %cst_27 [2] : vector<16x16x16xf32> to vector<16x16xf32>
    %71 = vector.shape_cast %70 : vector<16x16xf32> to vector<16x16x1xf32>
    %72 = tpu.reciprocal %71 {approx = true} : vector<16x16x1xf32> -> vector<16x16x1xf32>
    %73 = arith.mulf %71, %72 : vector<16x16x1xf32>
    %cst_28 = arith.constant 2.000000e+00 : f32
    %74 = vector.broadcast %cst_28 : f32 to vector<16x16x1xf32>
    %75 = arith.subf %74, %73 : vector<16x16x1xf32>
    %76 = arith.mulf %72, %75 : vector<16x16x1xf32>
    %77 = vector.broadcast %76 : vector<16x16x1xf32> to vector<16x16x16xf32>
    %78 = arith.mulf %69, %77 : vector<16x16x16xf32>
    "tpu.trace_start"() <{level = 10 : i32, message = "bqk,bkd->bqd"}> : () -> ()
    %cst_29 = arith.constant dense<0.000000e+00> : vector<16x16x8xf32>
    %79 = tpu.matmul %78, %63, %cst_29 {dimension_numbers = #tpu.dot_dimension_numbers<[2], [1], [1], [2], [0, 0, 0, 1, 1, 2], [0], [0]>} : vector<16x16x16xf32>, vector<16x16x8xf32>, vector<16x16x8xf32> -> vector<16x16x8xf32>
    "tpu.trace_stop"() : () -> ()
    %80 = vector.shape_cast %79 : vector<16x16x8xf32> to vector<256x8xf32>
    %c16 = arith.constant 16 : index
    %c0_30 = arith.constant 0 : index
    %81 = vector.load %arg4[%c16, %c0_30] : memref<32x32xf32, #tpu.memory_space<vmem>>, vector<8x32xf32>
    %cst_31 = arith.constant dense<0.000000e+00> : vector<256x32xf32>
    %82 = tpu.matmul %80, %81, %cst_31 {dimension_numbers = #tpu.dot_dimension_numbers<[1], [0], [0], [1], [0, 0, 1, 1], [], []>} : vector<256x8xf32>, vector<8x32xf32>, vector<256x32xf32> -> vector<256x32xf32>
    %83 = arith.addf %60, %82 : vector<256x32xf32>
    %84 = vector.extract_strided_slice %15 {offsets = [0, 0, 6], sizes = [16, 16, 2], strides = [1, 1, 1]} : vector<16x16x48xf32> to vector<16x16x2xf32>
    %85 = vector.extract_strided_slice %15 {offsets = [0, 0, 14], sizes = [16, 16, 2], strides = [1, 1, 1]} : vector<16x16x48xf32> to vector<16x16x2xf32>
    %86 = vector.extract_strided_slice %15 {offsets = [0, 0, 40], sizes = [16, 16, 8], strides = [1, 1, 1]} : vector<16x16x48xf32> to vector<16x16x8xf32>
    "tpu.trace_start"() <{level = 10 : i32, message = "bqd,bkd->bqk"}> : () -> ()
    %cst_32 = arith.constant dense<0.000000e+00> : vector<16x16x16xf32>
    %87 = tpu.matmul %84, %85, %cst_32 {dimension_numbers = #tpu.dot_dimension_numbers<[2], [2], [1], [1], [0, 0, 0, 1, 1, 1], [0], [0]>} : vector<16x16x2xf32>, vector<16x16x2xf32>, vector<16x16x16xf32> -> vector<16x16x16xf32>
    "tpu.trace_stop"() : () -> ()
    %cst_33 = arith.constant dense<0xFF800000> : vector<16x16xf32>
    %88 = vector.multi_reduction <maximumf>, %87, %cst_33 [2] : vector<16x16x16xf32> to vector<16x16xf32>
    %89 = vector.shape_cast %88 : vector<16x16xf32> to vector<16x16x1xf32>
    %90 = vector.broadcast %89 : vector<16x16x1xf32> to vector<16x16x16xf32>
    %91 = arith.subf %87, %90 : vector<16x16x16xf32>
    %92 = math.exp %91 : vector<16x16x16xf32>
    %cst_34 = arith.constant dense<0.000000e+00> : vector<16x16xf32>
    %93 = vector.multi_reduction <add>, %92, %cst_34 [2] : vector<16x16x16xf32> to vector<16x16xf32>
    %94 = vector.shape_cast %93 : vector<16x16xf32> to vector<16x16x1xf32>
    %95 = tpu.reciprocal %94 {approx = true} : vector<16x16x1xf32> -> vector<16x16x1xf32>
    %96 = arith.mulf %94, %95 : vector<16x16x1xf32>
    %cst_35 = arith.constant 2.000000e+00 : f32
    %97 = vector.broadcast %cst_35 : f32 to vector<16x16x1xf32>
    %98 = arith.subf %97, %96 : vector<16x16x1xf32>
    %99 = arith.mulf %95, %98 : vector<16x16x1xf32>
    %100 = vector.broadcast %99 : vector<16x16x1xf32> to vector<16x16x16xf32>
    %101 = arith.mulf %92, %100 : vector<16x16x16xf32>
    "tpu.trace_start"() <{level = 10 : i32, message = "bqk,bkd->bqd"}> : () -> ()
    %cst_36 = arith.constant dense<0.000000e+00> : vector<16x16x8xf32>
    %102 = tpu.matmul %101, %86, %cst_36 {dimension_numbers = #tpu.dot_dimension_numbers<[2], [1], [1], [2], [0, 0, 0, 1, 1, 2], [0], [0]>} : vector<16x16x16xf32>, vector<16x16x8xf32>, vector<16x16x8xf32> -> vector<16x16x8xf32>
    "tpu.trace_stop"() : () -> ()
    %103 = vector.shape_cast %102 : vector<16x16x8xf32> to vector<256x8xf32>
    %c24 = arith.constant 24 : index
    %c0_37 = arith.constant 0 : index
    %104 = vector.load %arg4[%c24, %c0_37] : memref<32x32xf32, #tpu.memory_space<vmem>>, vector<8x32xf32>
    %cst_38 = arith.constant dense<0.000000e+00> : vector<256x32xf32>
    %105 = tpu.matmul %103, %104, %cst_38 {dimension_numbers = #tpu.dot_dimension_numbers<[1], [0], [0], [1], [0, 0, 1, 1], [], []>} : vector<256x8xf32>, vector<8x32xf32>, vector<256x32xf32> -> vector<256x32xf32>
    %106 = arith.addf %83, %105 : vector<256x32xf32>
    %c0_39 = arith.constant 0 : index
    %c0_40 = arith.constant 0 : index
    %107 = vector.load %arg5[%c0_39, %c0_40] : memref<1x32xf32, #tpu.memory_space<vmem>>, vector<1x32xf32>
    %108 = vector.broadcast %107 : vector<1x32xf32> to vector<256x32xf32>
    %109 = arith.addf %106, %108 : vector<256x32xf32>
    %cst_41 = arith.constant 0.000000e+00 : f32
    %110 = vector.broadcast %cst_41 : f32 to vector<256x32xf32>
    %111 = arith.maximumf %109, %110 : vector<256x32xf32>
    %112 = vector.shape_cast %111 : vector<256x32xf32> to vector<16x16x32xf32>
    %c0_42 = arith.constant 0 : index
    %c0_43 = arith.constant 0 : index
    %c0_44 = arith.constant 0 : index
    %113 = vector.load %arg8[%c0_42, %c0_43, %c0_44] : memref<16x16x32xf32, #tpu.memory_space<vmem>>, vector<16x16x32xf32>
    tpu.vector_store %arg8[%c0_42, %c0_43, %c0_44], %112 {strides = array<i32>} : memref<16x16x32xf32, #tpu.memory_space<vmem>>, vector<16x16x32xf32>,
    return
  }
  func.func @transform_0(%arg0: i32) -> (i32, i32, i32) {
    %c0_i32 = arith.constant 0 : i32
    %c0_i32_0 = arith.constant 0 : i32
    %c0_i32_1 = arith.constant 0 : i32
    return %arg0, %c0_i32, %c0_i32_0 : i32, i32, i32
  }
  func.func @transform_1(%arg0: i32) -> (i32, i32) {
    %c0_i32 = arith.constant 0 : i32
    %c0_i32_0 = arith.constant 0 : i32
    %c0_i32_1 = arith.constant 0 : i32
    return %c0_i32, %c0_i32_0 : i32, i32
  }
  func.func @transform_2(%arg0: i32) -> (i32, i32) {
    %c0_i32 = arith.constant 0 : i32
    %c0_i32_0 = arith.constant 0 : i32
    %c0_i32_1 = arith.constant 0 : i32
    return %c0_i32, %c0_i32_0 : i32, i32
  }
  func.func @transform_3(%arg0: i32) -> (i32, i32) {
    %c0_i32 = arith.constant 0 : i32
    %c0_i32_0 = arith.constant 0 : i32
    %c0_i32_1 = arith.constant 0 : i32
    return %c0_i32, %c0_i32_0 : i32, i32
  }
  func.func @transform_4(%arg0: i32) -> (i32, i32) {
    %c0_i32 = arith.constant 0 : i32
    %c0_i32_0 = arith.constant 0 : i32
    %c0_i32_1 = arith.constant 0 : i32
    return %c0_i32, %c0_i32_0 : i32, i32
  }
  func.func @transform_5(%arg0: i32) -> (i32, i32) {
    %c0_i32 = arith.constant 0 : i32
    %c0_i32_0 = arith.constant 0 : i32
    %c0_i32_1 = arith.constant 0 : i32
    return %c0_i32, %c0_i32_0 : i32, i32
  }
  func.func @transform_6(%arg0: i32) -> (i32, i32) {
    %c0_i32 = arith.constant 0 : i32
    %c0_i32_0 = arith.constant 0 : i32
    %c0_i32_1 = arith.constant 0 : i32
    return %c0_i32, %c0_i32_0 : i32, i32
  }
  func.func @transform_7(%arg0: i32) -> (i32, i32, i32) {
    %c0_i32 = arith.constant 0 : i32
    %c0_i32_0 = arith.constant 0 : i32
    %c0_i32_1 = arith.constant 0 : i32
    return %arg0, %c0_i32, %c0_i32_0 : i32, i32, i32
  }
}

</mosaic_0001>

<bundles_post_ra>
// kernel: tpu_custom_call.1
= control target key start
LH: loop header
LB: loop body
LE: loop exit
PB: predicated region body
PF: predicated region fallthrough
CT: control target
= control target key end

     0   :  { %vm232_vm0 = vcmask 1043456   ;;  %vm135_vm1 = vcmask 31744   ;;  %s22341_s0 = inlined_call_operand.vmem [shape: f32[16,16,4], index: 0, kind: input, shape index: {}]   ;;  %s22342_s1 = inlined_call_operand.vmem [shape: f32[4,48], index: 1, kind: input, shape index: {}]   ;;  %s22343_s2 = inlined_call_operand.vmem [shape: f32[1,48], index: 2, kind: input, shape index: {}]   ;;  %s22344_s3 = inlined_call_operand.vmem [shape: f32[32,32], index: 3, kind: input, shape index: {}]   ;;  %s22345_s4 = inlined_call_operand.vmem [shape: f32[1,32], index: 4, kind: input, shape index: {}]   ;;  %s22346_s5 = inlined_call_operand.vmem [shape: f32[16,4], index: 5, kind: input, shape index: {}]   ;;  %s22347_s6 = inlined_call_operand.vmem [shape: f32[16,4], index: 6, kind: input, shape index: {}]   ;;  %s22348_s7 = inlined_call_operand.hbm [shape: f32[16,16,32], index: 7, kind: output, shape index: {}]  }
   0x1   :  { %v127_v0 = vld [vmem:[%s22342_s1] sm:$0xf]  ;;  %v28_v5 = vld [vmem:[%s22341_s0 + $0x8] sm:$0xff]  ;;  %v29_v9 = vld [vmem:[%s22341_s0 + $0x10] sm:$0xff] }
   0x2   :  { %v27_v1 = vld [vmem:[%s22341_s0] sm:$0xff]  ;;  %16312 = vmatprep.subr.msk.mxu0 %vm232_vm0, %v127_v0  ;;  %v18085_v6 = vld [vmem:[%s22346_s5 + $0x8] sm:$0xff]  ;;  %17458 = vmatprep.subr.msk.mxu1 %vm232_vm0, %v127_v0  ;;  %v30_v10 = vld [vmem:[%s22341_s0 + $0x18] sm:$0xff] }
   0x3   :  { %v18071_v2 = vld [vmem:[%s22346_s5] sm:$0xff]  ;;  %16313 = vmatpush3.msk.msra.mxu0 %vm232_vm0, %v127_v0  ;;  %v62_v7 = vmul.f32 %v18085_v6, %v28_v5  ;;  %v18091_v8 = vld [vmem:[%s22347_s6 + $0x8] sm:$0xff]  ;;  %17459 = vmatpush3.msk.msra.mxu1 %vm232_vm0, %v127_v0  ;;  %v64_v13 = vmul.f32 %v18085_v6, %v30_v10  ;;  %v33_v18 = vld [vmem:[%s22341_s0 + $0x30] sm:$0xff] }
   0x4   :  { %v61_v3 = vmul.f32 %v18071_v2, %v27_v1  ;;  %v18077_v4 = vld [vmem:[%s22347_s6] sm:$0xff]  ;;  %v63_v12 = vmul.f32 %v18071_v2, %v29_v9  ;;  %v32_v15 = vld [vmem:[%s22341_s0 + $0x28] sm:$0xff]  ;;  %v34_v22 = vld [vmem:[%s22341_s0 + $0x38] sm:$0xff]  ;;  %v67_v24 = vmul.f32 %v18071_v2, %v33_v18 }
   0x5   :  { %v31_v14 = vld [vmem:[%s22341_s0 + $0x20] sm:$0xff]  ;;  %v96_v16 = vadd.f32 %v18091_v8, %v62_v7  ;;  %v98_v20 = vadd.f32 %v18091_v8, %v64_v13  ;;  %v66_v21 = vmul.f32 %v18085_v6, %v32_v15  ;;  %v44_v27 = vld [vmem:[%s22341_s0 + $0x88] sm:$0xff]  ;;  %v45_v28 = vld [vmem:[%s22341_s0 + $0x90] sm:$0xff]  ;;  %v68_v30 = vmul.f32 %v18085_v6, %v34_v22 }
   0x6   :  { %v95_v11 = vadd.f32 %v18077_v4, %v61_v3  ;;  %v65_v17 = vmul.f32 %v18071_v2, %v31_v14  ;;  %v97_v19 = vadd.f32 %v18077_v4, %v63_v12  ;;  %v35_v25 = vld [vmem:[%s22341_s0 + $0x40] sm:$0xff]  ;;  %v46_v29 = vld [vmem:[%s22341_s0 + $0x98] sm:$0xff]  ;;  %v36_v35 = vld [vmem:[%s22341_s0 + $0x48] sm:$0xff]  ;;  %v78_v36 = vmul.f32 %v18085_v6, %v44_v27 }
   0x7   :  { %v43_v26 = vld [vmem:[%s22341_s0 + $0x80] sm:$0xff]  ;;  %v100_v33 = vadd.f32 %v18091_v8, %v66_v21  ;;  %v69_v34 = vmul.f32 %v18071_v2, %v35_v25  ;;  %v101_v37 = vadd.f32 %v18077_v4, %v67_v24  ;;  %v79_v39 = vmul.f32 %v18071_v2, %v45_v28  ;;  %v48_v41 = vld [vmem:[%s22341_s0 + $0xa8] sm:$0xff]  ;;  %v37_v42 = vld [vmem:[%s22341_s0 + $0x50] sm:$0xff] }
   0x8   :  { %16314 = vmatprep.mubr.msk.f32.mxu0 %vm135_vm1, %v95_v11  ;;  %v99_v23 = vadd.f32 %v18077_v4, %v65_v17  ;;  %v77_v31 = vmul.f32 %v18071_v2, %v43_v26  ;;  %v47_v32 = vld [vmem:[%s22341_s0 + $0xa0] sm:$0xff]  ;;  %v80_v40 = vmul.f32 %v18085_v6, %v46_v29  ;;  %v112_v43 = vadd.f32 %v18091_v8, %v78_v36  ;;  %v49_v45 = vld [vmem:[%s22341_s0 + $0xb0] sm:$0xff] }
   0x9   :  { %16315 = vmatmul.mubr.msk.f32.vlgmr.msra.gmra.mxu0 %vm135_vm1, %v96_v16  ;;  %v81_v44 = vmul.f32 %v18071_v2, %v47_v32 }
   0xa   :  { %16317 = vmatprep.mubr.msk.f32.mxu0 %vm135_vm1, %v97_v19  ;;  %v111_v38 = vadd.f32 %v18077_v4, %v77_v31 }
   0xd   :  { %16318 = vmatmul.mubr.msk.f32.gmra.mxu0 %vm135_vm1, %v98_v20 }
   0xe   :  { %16320 = vmatprep.mubr.msk.f32.mxu0 %vm135_vm1, %v99_v23 }
   0xf   :  { %12 = vsyncpa [#allocation3], 0  ;;  %v102_v46 = vadd.f32 %v18091_v8, %v68_v30  ;;  %v70_v47 = vmul.f32 %v18085_v6, %v36_v35  ;;  %16338 = vmatprep.mubr.msk.f32.mxu1 %vm135_vm1, %v111_v38  ;;  %v113_v48 = vadd.f32 %v18077_v4, %v79_v39  ;;  %v103_v49 = vadd.f32 %v18077_v4, %v69_v34  ;;  %v38_v50 = vld [vmem:[%s22341_s0 + $0x58] sm:$0xff]  ;;  %v39_v54 = vld [vmem:[%s22341_s0 + $0x60] sm:$0xff]  ;;  %s18008_s21 = smov 120   ;;  %s18010_s22 = smov 118  }
  0x10   :  { %16339 = vmatmul.mubr.msk.f32.vlgmr.msra.gmra.mxu1 %vm135_vm1, %v112_v43  ;;  %v114_v51 = vadd.f32 %v18091_v8, %v80_v40  ;;  %v82_v52 = vmul.f32 %v18085_v6, %v48_v41  ;;  %v71_v53 = vmul.f32 %v18071_v2, %v37_v42  ;;  %v115_v55 = vadd.f32 %v18077_v4, %v81_v44  ;;  %v50_v57 = vld [vmem:[%s22341_s0 + $0xb8] sm:$0xff]  ;;  %v51_v58 = vld [vmem:[%s22341_s0 + $0xc0] sm:$0xff]  ;;  %v40_v62 = vld [vmem:[%s22341_s0 + $0x68] sm:$0xff]  ;;  %s18011_s23 = smov 126   ;;  %s18012_s24 = smov 104  }
  0x11   :  { %16321 = vmatmul.mubr.msk.f32.gmra.mxu0 %vm135_vm1, %v100_v33  ;;  %16341 = vmatprep.mubr.msk.f32.mxu1 %vm135_vm1, %v113_v48  ;;  %v83_v56 = vmul.f32 %v18071_v2, %v49_v45  ;;  %v104_v59 = vadd.f32 %v18091_v8, %v70_v47  ;;  %v72_v60 = vmul.f32 %v18085_v6, %v38_v50  ;;  %v41_v63 = vld [vmem:[%s22341_s0 + $0x70] sm:$0xff]  ;;  %v52_v9 = vld [vmem:[%s22341_s0 + $0xc8] sm:$0xff]  ;;  %v42_v14 = vld [vmem:[%s22341_s0 + $0x78] sm:$0xff]  ;;  %vm467_vm2 = vcmask 15360   ;;  %s18013_s25 = smov 116   ;;  %s18014_s26 = smov 124  }
  0x12   :  { %16323 = vmatprep.mubr.msk.f32.mxu0 %vm135_vm1, %v101_v37  ;;  %v73_v61 = vmul.f32 %v18071_v2, %v39_v54  ;;  %v116_v0 = vadd.f32 %v18091_v8, %v82_v52  ;;  %v84_v1 = vmul.f32 %v18085_v6, %v50_v57  ;;  %v105_v3 = vadd.f32 %v18077_v4, %v71_v53  ;;  %v53_v10 = vld [vmem:[%s22341_s0 + $0xd0] sm:$0xff]  ;;  %v54_v20 = vld [vmem:[%s22341_s0 + $0xd8] sm:$0xff]  ;;  %v55_v21 = vld [vmem:[%s22341_s0 + $0xe0] sm:$0xff]  ;;  %s18015_s8 = smov 96   ;;  %s18016_s9 = smov 114  }
  0x13   :  { %v117_v5 = vadd.f32 %v18077_v4, %v83_v56  ;;  %v85_v7 = vmul.f32 %v18071_v2, %v51_v58  ;;  %v74_v11 = vmul.f32 %v18085_v6, %v40_v62  ;;  %v75_v12 = vmul.f32 %v18071_v2, %v41_v63  ;;  %v56_v29 = vld [vmem:[%s22341_s0 + $0xe8] sm:$0xff]  ;;  %v57_v30 = vld [vmem:[%s22341_s0 + $0xf0] sm:$0xff]  ;;  %v58_v36 = vld [vmem:[%s22341_s0 + $0xf8] sm:$0xff]  ;;  %s18017_s1 = smov 122   ;;  %s18018_s12 = smov 88  }
  0x14   :  { %16342 = vmatmul.mubr.msk.f32.gmra.mxu1 %vm135_vm1, %v114_v51  ;;  %v106_v13 = vadd.f32 %v18091_v8, %v72_v60  ;;  %v118_v15 = vadd.f32 %v18091_v8, %v84_v1  ;;  %v86_v16 = vmul.f32 %v18085_v6, %v52_v9  ;;  %v107_v17 = vadd.f32 %v18077_v4, %v73_v61  ;;  %v18280_v40 = vld [vmem:[%s22343_s2] ss:$0 sm:$0xff]  ;;  %s18009_s2 = smov 112  }
  0x15   :  { %16324 = vmatmul.mubr.msk.f32.gmra.mxu0 %vm135_vm1, %v102_v46  ;;  %16344 = vmatprep.mubr.msk.f32.mxu1 %vm135_vm1, %v115_v55  ;;  %v119_v18 = vadd.f32 %v18077_v4, %v85_v7  ;;  %v87_v19 = vmul.f32 %v18071_v2, %v53_v10  ;;  %v76_v22 = vmul.f32 %v18085_v6, %v42_v14  ;;  %vm1886_vm3 = vcmask 130048  }
  0x16   :  { %16326 = vmatprep.mubr.msk.f32.mxu0 %vm135_vm1, %v103_v49  ;;  %v108_v23 = vadd.f32 %v18091_v8, %v74_v11  ;;  %v120_v24 = vadd.f32 %v18091_v8, %v86_v16  ;;  %v88_v25 = vmul.f32 %v18085_v6, %v54_v20  ;;  %v109_v26 = vadd.f32 %v18077_v4, %v75_v12 }
  0x17   :  { %v121_v27 = vadd.f32 %v18077_v4, %v87_v19  ;;  %v89_v28 = vmul.f32 %v18071_v2, %v55_v21  ;;  %v110_v31 = vadd.f32 %v18091_v8, %v76_v22  ;;  %v90_v33 = vmul.f32 %v18085_v6, %v56_v29 }
  0x18   :  { %16345 = vmatmul.mubr.msk.f32.gmra.mxu1 %vm135_vm1, %v116_v0  ;;  %v122_v32 = vadd.f32 %v18091_v8, %v88_v25  ;;  %v91_v35 = vmul.f32 %v18071_v2, %v57_v30  ;;  %v92_v38 = vmul.f32 %v18085_v6, %v58_v36  ;;  %vm7025_vm4 = vcmask 64512  }
  0x19   :  { %16327 = vmatmul.mubr.msk.f32.gmra.mxu0 %vm135_vm1, %v104_v59  ;;  %16347 = vmatprep.mubr.msk.f32.mxu1 %vm135_vm1, %v117_v5  ;;  %v123_v34 = vadd.f32 %v18077_v4, %v89_v28  ;;  %v124_v37 = vadd.f32 %v18091_v8, %v90_v33  ;;  %vm15039_vm5 = vcmask 261120  }
  0x1a   :  { %16329 = vmatprep.mubr.msk.f32.mxu0 %vm135_vm1, %v105_v3  ;;  %v125_v39 = vadd.f32 %v18077_v4, %v91_v35  ;;  %v126_v2 = vadd.f32 %v18091_v8, %v92_v38 }
  0x1c   :  { %16348 = vmatmul.mubr.msk.f32.gmra.mxu1 %vm135_vm1, %v118_v15 }
  0x1d   :  { %16330 = vmatmul.mubr.msk.f32.gmra.mxu0 %vm135_vm1, %v106_v13  ;;  %16350 = vmatprep.mubr.msk.f32.mxu1 %vm135_vm1, %v119_v18 }
  0x1e   :  { %16332 = vmatprep.mubr.msk.f32.mxu0 %vm135_vm1, %v107_v17 }
  0x20   :  { %16351 = vmatmul.mubr.msk.f32.gmra.mxu1 %vm135_vm1, %v120_v24 }
  0x21   :  { %16333 = vmatmul.mubr.msk.f32.gmra.mxu0 %vm135_vm1, %v108_v23  ;;  %16353 = vmatprep.mubr.msk.f32.mxu1 %vm135_vm1, %v121_v27 }
  0x22   :  { %16335 = vmatprep.mubr.msk.f32.mxu0 %vm135_vm1, %v109_v26 }
  0x24   :  { %16354 = vmatmul.mubr.msk.f32.gmra.mxu1 %vm135_vm1, %v122_v32 }
  0x25   :  { %16336 = vmatmul.mubr.msk.f32.gmra.mxu0 %vm135_vm1, %v110_v31  ;;  %16356 = vmatprep.mubr.msk.f32.mxu1 %vm135_vm1, %v123_v34 }
  0x28   :  { %16357 = vmatmul.mubr.msk.f32.gmra.mxu1 %vm135_vm1, %v124_v37 }
  0x29   :  { %16359 = vmatprep.mubr.msk.f32.mxu1 %vm135_vm1, %v125_v39 }
  0x2c   :  { %16360 = vmatmul.mubr.msk.f32.gmra.mxu1 %vm135_vm1, %v126_v2 }
  0xc9   :  { %v16316_v41 = vpop.f32.mrf.mxu0 }
  0xca   :  { %v18283_v6 = vadd.f32 %v16316_v41, %v18280_v40 }
  0xcb   :  { %v302_v42 = vpop.f32.mrf.mxu0 }
  0xcc   :  { %22538 = vst [vmem:[#allocation5_spill] sm:$0xff] %v18283_v6  ;;  %v18286_v4 = vadd.f32 %v18280_v40, %v302_v42  ;;  %465 = vrot.lane.b32.xlu0 %v18283_v6, %s18008_s21 }
  0xcd   :  { %v16319_v8 = vpop.f32.mrf.mxu0 }
  0xce   :  { %22539 = vst [vmem:[#allocation6_spill] sm:$0xff] %v18286_v4  ;;  %v18291_v43 = vadd.f32 %v16319_v8, %v18280_v40  ;;  %16366 = vmatprep.mubr.msk.f32.mxu1 %vm467_vm2, %v18286_v4 }
  0xcf   :  { %v312_v44 = vpop.f32.mrf.mxu0 }
  0xd0   :  { %22540 = vst [vmem:[#allocation7_spill] sm:$0xff] %v18291_v43  ;;  %555 = vrot.lane.b32.xlu1 %v18291_v43, %s18008_s21  ;;  %463 = vrot.lane.b32.xlu0 %v18286_v4, %s18008_s21  ;;  %v16340_v46 = vpop.f32.mrf.mxu1  ;;  %v18300_v47 = vadd.f32 %v18280_v40, %v312_v44 }
  0xd1   :  { %v16322_v45 = vpop.f32.mrf.mxu0  ;;  %v18361_v18 = vadd.f32 %v16340_v46, %v18280_v40 }
  0xd2   :  { %22541 = vst [vmem:[#allocation8_spill] sm:$0xff] %v18300_v47  ;;  %v18303_v48 = vadd.f32 %v16322_v45, %v18280_v40  ;;  %v382_v50 = vpop.f32.mrf.mxu1 }
  0xd3   :  { %v322_v49 = vpop.f32.mrf.mxu0  ;;  %v18310_v51 = vadd.f32 %v18280_v40, %v382_v50  ;;  %22554 = vst [vmem:[#allocation21_spill] sm:$0xff] %v18361_v18 }
  0xd4   :  { %22542 = vst [vmem:[#allocation9_spill] sm:$0xff] %v18303_v48  ;;  %553 = vrot.lane.b32.xlu1 %v18300_v47, %s18008_s21  ;;  %644 = vrot.lane.b32.xlu0 %v18303_v48, %s18008_s21  ;;  %v16343_v53 = vpop.f32.mrf.mxu1  ;;  %v18313_v54 = vadd.f32 %v18280_v40, %v322_v49 }
  0xd5   :  { %22543 = vst [vmem:[#allocation10_spill] sm:$0xff] %v18310_v51  ;;  %v16325_v52 = vpop.f32.mrf.mxu0  ;;  %16422 = vmatprep.mubr.msk.f32.mxu0 %vm467_vm2, %v18310_v51  ;;  %v18375_v21 = vadd.f32 %v16343_v53, %v18280_v40 }
  0xd6   :  { %22544 = vst [vmem:[#allocation11_spill] sm:$0xff] %v18313_v54  ;;  %v18316_v55 = vadd.f32 %v16325_v52, %v18280_v40  ;;  %v392_v57 = vpop.f32.mrf.mxu1 }
  0xd7   :  { %v332_v56 = vpop.f32.mrf.mxu0  ;;  %22556 = vst [vmem:[#allocation23_spill] sm:$0xff] %v18375_v21  ;;  %v18378_v23 = vadd.f32 %v18280_v40, %v392_v57 }
  0xd8   :  { %22545 = vst [vmem:[#allocation12_spill] sm:$0xff] %v18316_v55  ;;  %642 = vrot.lane.b32.xlu1 %v18313_v54, %s18008_s21  ;;  %733 = vrot.lane.b32.xlu0 %v18316_v55, %s18008_s21  ;;  %v16346_v59 = vpop.f32.mrf.mxu1  ;;  %v18325_v60 = vadd.f32 %v18280_v40, %v332_v56 }
  0xd9   :  { %v16328_v58 = vpop.f32.mrf.mxu0  ;;  %22557 = vst [vmem:[#allocation24_spill] sm:$0xff] %v18378_v23  ;;  %v18385_v24 = vadd.f32 %v16346_v59, %v18280_v40 }
  0xda   :  { %22546 = vst [vmem:[#allocation13_spill] sm:$0xff] %v18325_v60  ;;  %v18328_v61 = vadd.f32 %v16328_v58, %v18280_v40  ;;  %v402_v0 = vpop.f32.mrf.mxu1 }
  0xdb   :  { %v342_v62 = vpop.f32.mrf.mxu0  ;;  %22558 = vst [vmem:[#allocation25_spill] sm:$0xff] %v18385_v24  ;;  %v18388_v26 = vadd.f32 %v18280_v40, %v402_v0 }
  0xdc   :  { %22547 = vst [vmem:[#allocation14_spill] sm:$0xff] %v18328_v61  ;;  %731 = vrot.lane.b32.xlu1 %v18325_v60, %s18008_s21  ;;  %822 = vrot.lane.b32.xlu0 %v18328_v61, %s18008_s21  ;;  %v18335_v1 = vadd.f32 %v18280_v40, %v342_v62  ;;  %v16349_v9 = vpop.f32.mrf.mxu1 }
  0xdd   :  { %v16331_v63 = vpop.f32.mrf.mxu0  ;;  %22559 = vst [vmem:[#allocation26_spill] sm:$0xff] %v18388_v26  ;;  %v18395_v27 = vadd.f32 %v16349_v9, %v18280_v40 }
  0xde   :  { %22548 = vst [vmem:[#allocation15_spill] sm:$0xff] %v18335_v1  ;;  %v18338_v3 = vadd.f32 %v16331_v63, %v18280_v40  ;;  %v412_v14 = vpop.f32.mrf.mxu1 }
  0xdf   :  { %v352_v5 = vpop.f32.mrf.mxu0  ;;  %22560 = vst [vmem:[#allocation27_spill] sm:$0xff] %v18395_v27  ;;  %v18398_v29 = vadd.f32 %v18280_v40, %v412_v14 }
  0xe0   :  { %22549 = vst [vmem:[#allocation16_spill] sm:$0xff] %v18338_v3  ;;  %820 = vrot.lane.b32.xlu1 %v18335_v1, %s18008_s21  ;;  %911 = vrot.lane.b32.xlu0 %v18338_v3, %s18008_s21  ;;  %v18345_v10 = vadd.f32 %v18280_v40, %v352_v5  ;;  %v16352_v19 = vpop.f32.mrf.mxu1 }
  0xe1   :  { %v16334_v7 = vpop.f32.mrf.mxu0  ;;  %22561 = vst [vmem:[#allocation28_spill] sm:$0xff] %v18398_v29  ;;  %v18405_v30 = vadd.f32 %v16352_v19, %v18280_v40 }
  0xe2   :  { %22550 = vst [vmem:[#allocation17_spill] sm:$0xff] %v18345_v10  ;;  %v18348_v11 = vadd.f32 %v16334_v7, %v18280_v40  ;;  %v422_v22 = vpop.f32.mrf.mxu1 }
  0xe3   :  { %v362_v12 = vpop.f32.mrf.mxu0  ;;  %22562 = vst [vmem:[#allocation29_spill] sm:$0xff] %v18405_v30  ;;  %v18408_v32 = vadd.f32 %v18280_v40, %v422_v22 }
  0xe4   :  { %22551 = vst [vmem:[#allocation18_spill] sm:$0xff] %v18348_v11  ;;  %909 = vrot.lane.b32.xlu1 %v18345_v10, %s18008_s21  ;;  %1000 = vrot.lane.b32.xlu0 %v18348_v11, %s18008_s21  ;;  %v18355_v15 = vadd.f32 %v18280_v40, %v362_v12  ;;  %v16355_v25 = vpop.f32.mrf.mxu1 }
  0xe5   :  { %v16337_v13 = vpop.f32.mrf.mxu0  ;;  %22563 = vst [vmem:[#allocation30_spill] sm:$0xff] %v18408_v32  ;;  %v18415_v33 = vadd.f32 %v16355_v25, %v18280_v40 }
  0xe6   :  { %22552 = vst [vmem:[#allocation19_spill] sm:$0xff] %v18355_v15  ;;  %v18358_v16 = vadd.f32 %v16337_v13, %v18280_v40  ;;  %v432_v28 = vpop.f32.mrf.mxu1 }
  0xe7   :  { %v372_v17 = vpop.f32.mrf.mxu0  ;;  %22564 = vst [vmem:[#allocation31_spill] sm:$0xff] %v18415_v33  ;;  %v18418_v35 = vadd.f32 %v18280_v40, %v432_v28 }
  0xe8   :  { %22553 = vst [vmem:[#allocation20_spill] sm:$0xff] %v18358_v16  ;;  %998 = vrot.lane.b32.xlu1 %v18355_v15, %s18008_s21  ;;  %1089 = vrot.lane.b32.xlu0 %v18358_v16, %s18008_s21  ;;  %v18368_v20 = vadd.f32 %v18280_v40, %v372_v17  ;;  %v16358_v31 = vpop.f32.mrf.mxu1 }
  0xe9   :  { %22565 = vst [vmem:[#allocation32_spill] sm:$0xff] %v18418_v35  ;;  %v18425_v36 = vadd.f32 %v16358_v31, %v18280_v40 }
  0xea   :  { %22555 = vst [vmem:[#allocation22_spill] sm:$0xff] %v18368_v20  ;;  %v442_v34 = vpop.f32.mrf.mxu1 }
  0xeb   :  { %22566 = vst [vmem:[#allocation33_spill] sm:$0xff] %v18425_v36  ;;  %v18428_v38 = vadd.f32 %v18280_v40, %v442_v34 }
  0xec   :  { %1087 = vrot.lane.b32.xlu1 %v18368_v20, %s18008_s21  ;;  %1178 = vrot.lane.b32.xlu0 %v18361_v18, %s18008_s21  ;;  %v16361_v37 = vpop.f32.mrf.mxu1 }
  0xed   :  { %22567 = vst [vmem:[#allocation34_spill] sm:$0xff] %v18428_v38  ;;  %v18435_v39 = vadd.f32 %v16361_v37, %v18280_v40 }
  0xee   :  { %v452_v2 = vpop.f32.mrf.mxu1 }
  0xef   :  { %22568 = vst [vmem:[#allocation35_spill] sm:$0xff] %v18435_v39  ;;  %v18442_v41 = vadd.f32 %v18280_v40, %v452_v2 }
  0xf0   :  { %1176 = vrot.lane.b32.xlu1 %v18310_v51, %s18008_s21  ;;  %1267 = vrot.lane.b32.xlu0 %v18375_v21, %s18008_s21 }
  0xf1   :  { %22569 = vst [vmem:[#allocation36_spill] sm:$0xff] %v18442_v41 }
  0xf4   :  { %1265 = vrot.lane.b32.xlu1 %v18378_v23, %s18008_s21  ;;  %1356 = vrot.lane.b32.xlu0 %v18385_v24, %s18008_s21 }
  0xf8   :  { %1354 = vrot.lane.b32.xlu1 %v18388_v26, %s18008_s21  ;;  %1445 = vrot.lane.b32.xlu0 %v18395_v27, %s18008_s21 }
  0xfc   :  { %1443 = vrot.lane.b32.xlu1 %v18398_v29, %s18008_s21  ;;  %1534 = vrot.lane.b32.xlu0 %v18405_v30, %s18008_s21 }
 0x100   :  { %1532 = vrot.lane.b32.xlu1 %v18408_v32, %s18008_s21  ;;  %1623 = vrot.lane.b32.xlu0 %v18415_v33, %s18008_s21 }
 0x104   :  { %1621 = vrot.lane.b32.xlu1 %v18418_v35, %s18008_s21  ;;  %1712 = vrot.lane.b32.xlu0 %v18425_v36, %s18008_s21 }
 0x108   :  { %1710 = vrot.lane.b32.xlu1 %v18428_v38, %s18008_s21  ;;  %1801 = vrot.lane.b32.xlu0 %v18435_v39, %s18008_s21 }
 0x10c   :  { %1799 = vrot.lane.b32.xlu1 %v18442_v41, %s18008_s21  ;;  %2335 = vrot.lane.b32.xlu0 %v18286_v4, %s18009_s2 }
 0x110   :  { %2337 = vrot.lane.b32.xlu1 %v18283_v6, %s18009_s2  ;;  %2424 = vrot.lane.b32.xlu0 %v18291_v43, %s18009_s2 }
 0x114   :  { %2683 = vrot.lane.b32.xlu1 %v18335_v1, %s18009_s2  ;;  %2511 = vrot.lane.b32.xlu0 %v18303_v48, %s18009_s2 }
 0x118   :  { %2946 = vrot.lane.b32.xlu1 %v18358_v16, %s18009_s2  ;;  %2422 = vrot.lane.b32.xlu0 %v18300_v47, %s18009_s2 }
 0x11c   :  { %3120 = vrot.lane.b32.xlu1 %v18375_v21, %s18009_s2  ;;  %2509 = vrot.lane.b32.xlu0 %v18313_v54, %s18009_s2 }
 0x120   :  { %3118 = vrot.lane.b32.xlu1 %v18378_v23, %s18009_s2  ;;  %2598 = vrot.lane.b32.xlu0 %v18316_v55, %s18009_s2 }
 0x124   :  { %3294 = vrot.lane.b32.xlu1 %v18395_v27, %s18009_s2  ;;  %2685 = vrot.lane.b32.xlu0 %v18328_v61, %s18009_s2 }
 0x128   :  { %3292 = vrot.lane.b32.xlu1 %v18398_v29, %s18009_s2  ;;  %2596 = vrot.lane.b32.xlu0 %v18325_v60, %s18009_s2 }
 0x12c   :  { %3468 = vrot.lane.b32.xlu1 %v18415_v33, %s18009_s2  ;;  %2772 = vrot.lane.b32.xlu0 %v18338_v3, %s18009_s2 }
 0x130   :  { %3466 = vrot.lane.b32.xlu1 %v18418_v35, %s18009_s2  ;;  %2859 = vrot.lane.b32.xlu0 %v18348_v11, %s18009_s2 }
 0x134   :  { %3642 = vrot.lane.b32.xlu1 %v18435_v39, %s18009_s2  ;;  %2770 = vrot.lane.b32.xlu0 %v18345_v10, %s18009_s2 }
 0x138   :  { %3825 = vrot.lane.b32.xlu1 %v18291_v43, %s18010_s22  ;;  %2857 = vrot.lane.b32.xlu0 %v18355_v15, %s18009_s2 }
 0x13c   :  { %3730 = vrot.lane.b32.xlu1 %v18283_v6, %s18011_s23  ;;  %3033 = vrot.lane.b32.xlu0 %v18361_v18, %s18009_s2 }
 0x13e   :  { %v466_v40 = vpop.permute.xlu0 %465 }
 0x13f   :  { %16362 = vmatprep.subr.msk.mxu1 %vm467_vm2, %v466_v40 }
 0x140   :  { %16363 = vmatpush3.xpose.msk.msra.mxu1 %vm467_vm2, %v466_v40  ;;  %3916 = vrot.lane.b32.xlu1 %v18303_v48, %s18010_s22 }
 0x141   :  { %3031 = vrot.lane.b32.xlu0 %v18310_v51, %s18009_s2 }
 0x142   :  { %v556_v42 = vpop.permute.xlu1 %555  ;;  %v464_v8 = vpop.permute.xlu0 %463 }
 0x143   :  { %16364 = vmatprep.subr.msk.mxu1 %vm467_vm2, %v464_v8 }
 0x144   :  { %3821 = vrot.lane.b32.xlu1 %v18291_v43, %s18011_s23  ;;  %16365 = vmatpush3.xpose.msk.msra.mxu1 %vm467_vm2, %v464_v8 }
 0x145   :  { %3207 = vrot.lane.b32.xlu0 %v18385_v24, %s18009_s2  ;;  %16369 = vmatprep.subr.msk.mxu1 %vm467_vm2, %v556_v42 }
 0x146   :  { %v554_v44 = vpop.permute.xlu1 %553  ;;  %v645_v45 = vpop.permute.xlu0 %644 }
 0x147   :  { %16367 = vmatmul.mubr.msk.f32.vlgmr.msra.gmra.mxu1 %vm467_vm2, %v18283_v6 }
 0x148   :  { %4007 = vrot.lane.b32.xlu1 %v18316_v55, %s18010_s22  ;;  %16370 = vmatpush3.xpose.msk.msra.mxu1 %vm467_vm2, %v556_v42 }
 0x149   :  { %3205 = vrot.lane.b32.xlu0 %v18388_v26, %s18009_s2  ;;  %16373 = vmatprep.mubr.msk.f32.mxu1 %vm467_vm2, %v18300_v47 }
 0x14a   :  { %16371 = vmatprep.subr.msk.mxu1 %vm467_vm2, %v554_v44  ;;  %v643_v46 = vpop.permute.xlu1 %642  ;;  %v734_v49 = vpop.permute.xlu0 %733 }
 0x14c   :  { %3912 = vrot.lane.b32.xlu1 %v18303_v48, %s18011_s23  ;;  %16372 = vmatpush3.xpose.msk.msra.mxu1 %vm467_vm2, %v554_v44 }
 0x14d   :  { %3381 = vrot.lane.b32.xlu0 %v18405_v30, %s18009_s2  ;;  %16376 = vmatprep.subr.msk.mxu1 %vm467_vm2, %v645_v45 }
 0x14e   :  { %v732_v50 = vpop.permute.xlu1 %731  ;;  %v823_v52 = vpop.permute.xlu0 %822 }
 0x14f   :  { %16374 = vmatmul.mubr.msk.f32.vlgmr.msra.gmra.mxu1 %vm467_vm2, %v18291_v43 }
 0x150   :  { %4098 = vrot.lane.b32.xlu1 %v18328_v61, %s18010_s22  ;;  %16377 = vmatpush3.xpose.msk.msra.mxu1 %vm467_vm2, %v645_v45 }
 0x151   :  { %3379 = vrot.lane.b32.xlu0 %v18408_v32, %s18009_s2  ;;  %16380 = vmatprep.mubr.msk.f32.mxu1 %vm467_vm2, %v18313_v54 }
 0x152   :  { %16378 = vmatprep.subr.msk.mxu1 %vm467_vm2, %v643_v46  ;;  %v821_v53 = vpop.permute.xlu1 %820  ;;  %v912_v56 = vpop.permute.xlu0 %911 }
 0x154   :  { %4003 = vrot.lane.b32.xlu1 %v18316_v55, %s18011_s23  ;;  %16379 = vmatpush3.xpose.msk.msra.mxu1 %vm467_vm2, %v643_v46 }
 0x155   :  { %3555 = vrot.lane.b32.xlu0 %v18425_v36, %s18009_s2  ;;  %16383 = vmatprep.subr.msk.mxu1 %vm467_vm2, %v734_v49 }
 0x156   :  { %v910_v57 = vpop.permute.xlu1 %909  ;;  %v1001_v58 = vpop.permute.xlu0 %1000 }
 0x157   :  { %16381 = vmatmul.mubr.msk.f32.vlgmr.msra.gmra.mxu1 %vm467_vm2, %v18303_v48 }
 0x158   :  { %4189 = vrot.lane.b32.xlu1 %v18338_v3, %s18010_s22  ;;  %16384 = vmatpush3.xpose.msk.msra.mxu1 %vm467_vm2, %v734_v49 }
 0x159   :  { %3553 = vrot.lane.b32.xlu0 %v18428_v38, %s18009_s2  ;;  %16387 = vmatprep.mubr.msk.f32.mxu1 %vm467_vm2, %v18325_v60 }
 0x15a   :  { %16385 = vmatprep.subr.msk.mxu1 %vm467_vm2, %v732_v50  ;;  %v999_v59 = vpop.permute.xlu1 %998  ;;  %v18551_v62 = vpop.permute.xlu0 %1089 }
 0x15c   :  { %4094 = vrot.lane.b32.xlu1 %v18328_v61, %s18011_s23  ;;  %16386 = vmatpush3.xpose.msk.msra.mxu1 %vm467_vm2, %v732_v50 }
 0x15d   :  { %3734 = vrot.lane.b32.xlu0 %v18283_v6, %s18010_s22  ;;  %16390 = vmatprep.subr.msk.mxu1 %vm467_vm2, %v823_v52 }
 0x15e   :  { %v18559_v63 = vpop.permute.xlu1 %1087  ;;  %v1179_v0 = vpop.permute.xlu0 %1178 }
 0x15f   :  { %16388 = vmatmul.mubr.msk.f32.vlgmr.msra.gmra.mxu1 %vm467_vm2, %v18316_v55  ;;  %16418 = vmatprep.subr.msk.mxu0 %vm467_vm2, %v1179_v0 }
 0x160   :  { %4280 = vrot.lane.b32.xlu1 %v18348_v11, %s18010_s22  ;;  %16391 = vmatpush3.xpose.msk.msra.mxu1 %vm467_vm2, %v823_v52 }
 0x161   :  { %3732 = vrot.lane.b32.xlu0 %v18286_v4, %s18010_s22  ;;  %16394 = vmatprep.mubr.msk.f32.mxu1 %vm467_vm2, %v18335_v1 }
 0x162   :  { %16419 = vmatpush3.xpose.msk.msra.mxu0 %vm467_vm2, %v1179_v0  ;;  %16392 = vmatprep.subr.msk.mxu1 %vm467_vm2, %v821_v53  ;;  %v1177_v5 = vpop.permute.xlu1 %1176  ;;  %v18573_v7 = vpop.permute.xlu0 %1267 }
 0x163   :  { %16420 = vmatprep.subr.msk.mxu0 %vm467_vm2, %v1177_v5 }
 0x164   :  { %4185 = vrot.lane.b32.xlu1 %v18338_v3, %s18011_s23  ;;  %16393 = vmatpush3.xpose.msk.msra.mxu1 %vm467_vm2, %v821_v53 }
 0x165   :  { %3728 = vrot.lane.b32.xlu0 %v18286_v4, %s18011_s23  ;;  %16397 = vmatprep.subr.msk.mxu1 %vm467_vm2, %v912_v56 }
 0x166   :  { %16421 = vmatpush3.xpose.msk.msra.mxu0 %vm467_vm2, %v1177_v5  ;;  %v18583_v9 = vpop.permute.xlu1 %1265  ;;  %v1357_v12 = vpop.permute.xlu0 %1356 }
 0x167   :  { %16395 = vmatmul.mubr.msk.f32.vlgmr.msra.gmra.mxu1 %vm467_vm2, %v18328_v61  ;;  %16432 = vmatprep.subr.msk.mxu0 %vm467_vm2, %v1357_v12 }
 0x168   :  { %4371 = vrot.lane.b32.xlu1 %v18358_v16, %s18010_s22  ;;  %16398 = vmatpush3.xpose.msk.msra.mxu1 %vm467_vm2, %v912_v56 }
 0x169   :  { %16423 = vmatmul.mubr.msk.f32.vlgmr.msra.gmra.mxu0 %vm467_vm2, %v18361_v18  ;;  %3823 = vrot.lane.b32.xlu0 %v18300_v47, %s18010_s22 }
 0x16a   :  { %16401 = vmatprep.mubr.msk.f32.mxu1 %vm467_vm2, %v18345_v10  ;;  %16433 = vmatpush3.xpose.msk.msra.mxu0 %vm467_vm2, %v1357_v12  ;;  %v1355_v13 = vpop.permute.xlu1 %1354  ;;  %v18598_v14 = vpop.permute.xlu0 %1445 }
 0x16b   :  { %16436 = vmatprep.mubr.msk.f32.mxu0 %vm467_vm2, %v18388_v26  ;;  %16399 = vmatprep.subr.msk.mxu1 %vm467_vm2, %v910_v57 }
 0x16c   :  { %16434 = vmatprep.subr.msk.mxu0 %vm467_vm2, %v1355_v13  ;;  %2944 = vrot.lane.b32.xlu1 %v18368_v20, %s18009_s2 }
 0x16d   :  { %3819 = vrot.lane.b32.xlu0 %v18300_v47, %s18011_s23  ;;  %16400 = vmatpush3.xpose.msk.msra.mxu1 %vm467_vm2, %v910_v57 }
 0x16e   :  { %16435 = vmatpush3.xpose.msk.msra.mxu0 %vm467_vm2, %v1355_v13  ;;  %16404 = vmatprep.subr.msk.mxu1 %vm467_vm2, %v1001_v58  ;;  %v1444_v17 = vpop.permute.xlu1 %1443  ;;  %v1535_v19 = vpop.permute.xlu0 %1534 }
 0x16f   :  { %16446 = vmatprep.subr.msk.mxu0 %vm467_vm2, %v1535_v19 }
 0x170   :  { %16402 = vmatmul.mubr.msk.f32.vlgmr.msra.gmra.mxu1 %vm467_vm2, %v18338_v3  ;;  %3640 = vrot.lane.b32.xlu1 %v18442_v41, %s18009_s2 }
 0x171   :  { %16437 = vmatmul.mubr.msk.f32.vlgmr.msra.gmra.mxu0 %vm467_vm2, %v18385_v24  ;;  %3914 = vrot.lane.b32.xlu0 %v18313_v54, %s18010_s22 }
 0x172   :  { %16405 = vmatpush3.xpose.msk.msra.mxu1 %vm467_vm2, %v1001_v58  ;;  %16408 = vmatprep.mubr.msk.f32.mxu1 %vm467_vm2, %v18355_v15  ;;  %v1533_v22 = vpop.permute.xlu1 %1532  ;;  %v1624_v25 = vpop.permute.xlu0 %1623 }
 0x173   :  { %16447 = vmatpush3.xpose.msk.msra.mxu0 %vm467_vm2, %v1535_v19  ;;  %16450 = vmatprep.mubr.msk.f32.mxu0 %vm467_vm2, %v18408_v32 }
 0x174   :  { %16406 = vmatprep.subr.msk.mxu1 %vm467_vm2, %v999_v59  ;;  %16448 = vmatprep.subr.msk.mxu0 %vm467_vm2, %v1533_v22 }
 0x175   :  { %3910 = vrot.lane.b32.xlu0 %v18313_v54, %s18011_s23 }
 0x176   :  { %16407 = vmatpush3.xpose.msk.msra.mxu1 %vm467_vm2, %v999_v59  ;;  %v1622_v28 = vpop.permute.xlu1 %1621  ;;  %v1713_v31 = vpop.permute.xlu0 %1712 }
 0x177   :  { %16449 = vmatpush3.xpose.msk.msra.mxu0 %vm467_vm2, %v1533_v22  ;;  %16411 = vmatprep.subr.msk.mxu1 %vm467_vm2, %v18551_v62 }
 0x178   :  { %16460 = vmatprep.subr.msk.mxu0 %vm467_vm2, %v1713_v31 }
 0x179   :  { %16409 = vmatmul.mubr.msk.f32.vlgmr.msra.gmra.mxu1 %vm467_vm2, %v18348_v11  ;;  %4005 = vrot.lane.b32.xlu0 %v18325_v60, %s18010_s22 }
 0x17a   :  { %16451 = vmatmul.mubr.msk.f32.vlgmr.msra.gmra.mxu0 %vm467_vm2, %v18405_v30  ;;  %16412 = vmatpush3.xpose.msk.msra.mxu1 %vm467_vm2, %v18551_v62  ;;  %v1711_v34 = vpop.permute.xlu1 %1710  ;;  %v1802_v37 = vpop.permute.xlu0 %1801 }
 0x17b   :  { %16415 = vmatprep.mubr.msk.f32.mxu1 %vm467_vm2, %v18368_v20  ;;  %16461 = vmatpush3.xpose.msk.msra.mxu0 %vm467_vm2, %v1713_v31 }
 0x17c   :  { %16464 = vmatprep.mubr.msk.f32.mxu0 %vm467_vm2, %v18428_v38  ;;  %16413 = vmatprep.subr.msk.mxu1 %vm467_vm2, %v18559_v63 }
 0x17d   :  { %16462 = vmatprep.subr.msk.mxu0 %vm467_vm2, %v1711_v34  ;;  %4001 = vrot.lane.b32.xlu0 %v18325_v60, %s18011_s23 }
 0x17e   :  { %16414 = vmatpush3.xpose.msk.msra.mxu1 %vm467_vm2, %v18559_v63  ;;  %v1800_v2 = vpop.permute.xlu1 %1799  ;;  %v2336_v40 = vpop.permute.xlu0 %2335 }
 0x17f   :  { %16463 = vmatpush3.xpose.msk.msra.mxu0 %vm467_vm2, %v1711_v34  ;;  %16425 = vmatprep.subr.msk.mxu1 %vm467_vm2, %v18573_v7 }
 0x181   :  { %16416 = vmatmul.mubr.msk.f32.vlgmr.msra.gmra.mxu1 %vm467_vm2, %v18358_v16  ;;  %4096 = vrot.lane.b32.xlu0 %v18335_v1, %s18010_s22 }
 0x182   :  { %16465 = vmatmul.mubr.msk.f32.vlgmr.msra.gmra.mxu0 %vm467_vm2, %v18425_v36  ;;  %16426 = vmatpush3.xpose.msk.msra.mxu1 %vm467_vm2, %v18573_v7  ;;  %v2338_v42 = vpop.permute.xlu1 %2337  ;;  %v18672_v8 = vpop.permute.xlu0 %2424 }
 0x183   :  { %16429 = vmatprep.mubr.msk.f32.mxu1 %vm467_vm2, %v18378_v23  ;;  %16427 = vmatprep.subr.msk.mxu1 %vm467_vm2, %v18583_v9 }
 0x184   :  { %16474 = vmatprep.subr.mxu0 %v2338_v42 }
 0x185   :  { %4092 = vrot.lane.b32.xlu0 %v18335_v1, %s18011_s23  ;;  %16475 = vmatpush3.msra.mxu0 %v2338_v42 }
 0x186   :  { %16428 = vmatpush3.xpose.msk.msra.mxu1 %vm467_vm2, %v18583_v9  ;;  %16476 = vmatprep.subr.mxu0 %v2336_v40  ;;  %v2512_v44 = vpop.permute.xlu0 %2511  ;;  %v18718_v52 = vpop.permute.xlu1 %2683 }
 0x187   :  { %16477 = vmatpush3.msra.mxu0 %v2336_v40  ;;  %16439 = vmatprep.subr.msk.mxu1 %vm467_vm2, %v18598_v14  ;;  %22571 = vst [vmem:[#allocation38_spill] sm:$0xff] %v18718_v52 }
 0x188   :  { %16481 = vmatprep.subr.mxu0 %v18672_v8 }
 0x189   :  { %16430 = vmatmul.mubr.msk.f32.vlgmr.msra.gmra.mxu1 %vm467_vm2, %v18375_v21  ;;  %4187 = vrot.lane.b32.xlu0 %v18345_v10, %s18010_s22 }
 0x18a   :  { %16440 = vmatpush3.xpose.msk.msra.mxu1 %vm467_vm2, %v18598_v14  ;;  %16443 = vmatprep.mubr.msk.f32.mxu1 %vm467_vm2, %v18398_v29  ;;  %v18696_v45 = vpop.permute.xlu0 %2422  ;;  %v18724_v57 = vpop.permute.xlu1 %2946 }
 0x18b   :  { %16441 = vmatprep.subr.msk.mxu1 %vm467_vm2, %v1444_v17  ;;  %22572 = vst [vmem:[#allocation39_spill] sm:$0xff] %v18724_v57 }
 0x18d   :  { %4183 = vrot.lane.b32.xlu0 %v18345_v10, %s18011_s23 }
 0x18e   :  { %16442 = vmatpush3.xpose.msk.msra.mxu1 %vm467_vm2, %v1444_v17  ;;  %v2510_v46 = vpop.permute.xlu0 %2509  ;;  %v18730_v62 = vpop.permute.xlu1 %3120 }
 0x18f   :  { %16453 = vmatprep.subr.msk.mxu1 %vm467_vm2, %v1624_v25  ;;  %22573 = vst [vmem:[#allocation40_spill] sm:$0xff] %v18730_v62 }
 0x191   :  { %16444 = vmatmul.mubr.msk.f32.vlgmr.msra.gmra.mxu1 %vm467_vm2, %v18395_v27  ;;  %4278 = vrot.lane.b32.xlu0 %v18355_v15, %s18010_s22 }
 0x192   :  { %16454 = vmatpush3.xpose.msk.msra.mxu1 %vm467_vm2, %v1624_v25  ;;  %16457 = vmatprep.mubr.msk.f32.mxu1 %vm467_vm2, %v18418_v35  ;;  %v18710_v49 = vpop.permute.xlu0 %2598  ;;  %v18736_v5 = vpop.permute.xlu1 %3118 }
 0x193   :  { %16455 = vmatprep.subr.msk.mxu1 %vm467_vm2, %v1622_v28  ;;  %22575 = vst [vmem:[#allocation42_spill] sm:$0xff] %v18736_v5 }
 0x196   :  { %16456 = vmatpush3.xpose.msk.msra.mxu1 %vm467_vm2, %v1622_v28  ;;  %v18715_v50 = vpop.permute.xlu0 %2685  ;;  %v18744_v13 = vpop.permute.xlu1 %3294 }
 0x197   :  { %16467 = vmatprep.subr.msk.mxu1 %vm467_vm2, %v1802_v37  ;;  %22570 = vst [vmem:[#allocation37_spill] sm:$0xff] %v18715_v50  ;;  %22577 = vst [vmem:[#allocation44_spill] sm:$0xff] %v18744_v13 }
 0x199   :  { %16458 = vmatmul.mubr.msk.f32.vlgmr.msra.gmra.mxu1 %vm467_vm2, %v18415_v33 }
 0x19a   :  { %16468 = vmatpush3.xpose.msk.msra.mxu1 %vm467_vm2, %v1802_v37  ;;  %16471 = vmatprep.mubr.msk.f32.mxu1 %vm467_vm2, %v18442_v41  ;;  %v18734_v0 = vpop.permute.xlu0 %2596  ;;  %v18756_v28 = vpop.permute.xlu1 %3292 }
 0x19b   :  { %16469 = vmatprep.subr.msk.mxu1 %vm467_vm2, %v1800_v2  ;;  %22574 = vst [vmem:[#allocation41_spill] sm:$0xff] %v18734_v0  ;;  %22579 = vst [vmem:[#allocation46_spill] sm:$0xff] %v18756_v28 }
 0x19e   :  { %16470 = vmatpush3.xpose.msk.msra.mxu1 %vm467_vm2, %v1800_v2  ;;  %v18742_v12 = vpop.permute.xlu0 %2772  ;;  %v18762_v37 = vpop.permute.xlu1 %3468 }
 0x19f   :  { %16488 = vmatprep.subr.mxu1 %v2512_v44  ;;  %22576 = vst [vmem:[#allocation43_spill] sm:$0xff] %v18742_v12  ;;  %22581 = vst [vmem:[#allocation48_spill] sm:$0xff] %v18762_v37 }
 0x1a1   :  { %16472 = vmatmul.mubr.msk.f32.vlgmr.msra.gmra.mxu1 %vm467_vm2, %v18435_v39 }
 0x1a2   :  { %16489 = vmatpush3.msra.mxu1 %v2512_v44  ;;  %v18750_v19 = vpop.permute.xlu0 %2859 }
 0x1a3   :  { %16490 = vmatprep.subr.mxu1 %v2510_v46  ;;  %22578 = vst [vmem:[#allocation45_spill] sm:$0xff] %v18750_v19 }
 0x1a4   :  { %16491 = vmatpush3.msra.mxu1 %v2510_v46  ;;  %v18772_v46 = vpop.permute.xlu1 %3466 }
 0x1a5   :  { %16502 = vmatprep.subr.mxu1 %v18715_v50  ;;  %22583 = vst [vmem:[#allocation50_spill] sm:$0xff] %v18772_v46 }
 0x1a6   :  { %v18760_v34 = vpop.permute.xlu0 %2770 }
 0x1a7   :  { %22580 = vst [vmem:[#allocation47_spill] sm:$0xff] %v18760_v34 }
 0x1a8   :  { %v18792_v5 = vpop.permute.xlu1 %3642 }
 0x1a9   :  { %22585 = vst [vmem:[#allocation52_spill] sm:$0xff] %v18792_v5 }
 0x1aa   :  { %v18770_v44 = vpop.permute.xlu0 %2857 }
 0x1ab   :  { %22582 = vst [vmem:[#allocation49_spill] sm:$0xff] %v18770_v44 }
 0x1ac   :  { %v18800_v60 = vpop.permute.xlu1 %3825 }
 0x1ad   :  { %22587 = vst [vmem:[#allocation54_spill] sm:$0xff] %v18800_v60 }
 0x1ae   :  { %v18784_v28 = vpop.permute.xlu0 %3033 }
 0x1af   :  { %22584 = vst [vmem:[#allocation51_spill] sm:$0xff] %v18784_v28 }
 0x1b3   :  { %v18798_v1 = vpop.permute.xlu0 %3031 }
 0x1b4   :  { %22586 = vst [vmem:[#allocation53_spill] sm:$0xff] %v18798_v1 }
 0x1b7   :  { %v18808_v5 = vpop.permute.xlu0 %3207 }
 0x1b8   :  { %22588 = vst [vmem:[#allocation55_spill] sm:$0xff] %v18808_v5 }
 0x1bb   :  { %v18826_v5 = vpop.permute.xlu0 %3205 }
 0x1bc   :  { %22590 = vst [vmem:[#allocation57_spill] sm:$0xff] %v18826_v5 }
 0x1bf   :  { %v18836_v43 = vpop.permute.xlu0 %3381 }
 0x1c0   :  { %22592 = vst [vmem:[#allocation59_spill] sm:$0xff] %v18836_v43 }
 0x1c3   :  { %v18854_v6 = vpop.permute.xlu0 %3379 }
 0x1c4   :  { %22594 = vst [vmem:[#allocation61_spill] sm:$0xff] %v18854_v6 }
 0x207   :  { %v18720_v53 = vpop.f32.mrf.mxu1 }
 0x208   :  { %v1890_v56 = vsel %vm1886_vm3, %v18720_v53, -inf }
 0x209   :  { %1891 = vmax.xlane.f32.xlu1 %v1890_v56  ;;  %v18726_v58 = vpop.f32.mrf.mxu1 }
 0x20f   :  { %v18728_v59 = vpop.f32.mrf.mxu1 }
 0x210   :  { %v1896_v63 = vsel %vm1886_vm3, %v18728_v59, -inf }
 0x211   :  { %1897 = vmax.xlane.f32.xlu1 %v1896_v63  ;;  %v18738_v7 = vpop.f32.mrf.mxu1  ;;  %v1887_v63 = vsel %vm1886_vm3, %v18726_v58, -inf }
 0x217   :  { %v18740_v9 = vpop.f32.mrf.mxu1 }
 0x218   :  { %v1902_v60 = vsel %vm1886_vm3, %v18740_v9, -inf }
 0x219   :  { %v18746_v14 = vpop.f32.mrf.mxu1 }
 0x21f   :  { %v18748_v17 = vpop.f32.mrf.mxu1 }
 0x220   :  { %v1908_v22 = vsel %vm1886_vm3, %v18748_v17, -inf }
 0x221   :  { %1909 = vmax.xlane.f32.xlu1 %v1908_v22  ;;  %v18754_v25 = vpop.f32.mrf.mxu1 }
 0x222   :  { %v1905_v31 = vsel %vm1886_vm3, %v18754_v25, -inf }
 0x225   :  { %1906 = vmax.xlane.f32.xlu1 %v1905_v31 }
 0x227   :  { %v18766_v40 = vpop.f32.mrf.mxu1 }
 0x229   :  { %v18764_v2 = vpop.f32.mrf.mxu0  ;;  %v18774_v56 = vpop.f32.mrf.mxu1 }
 0x22a   :  { %v1938_v42 = vsel %vm1886_vm3, %v18764_v2, -inf }
 0x22b   :  { %1939 = vmax.xlane.f32.xlu0 %v1938_v42  ;;  %v18778_v22 = vpop.f32.mrf.mxu0 }
 0x22c   :  { %v1935_v42 = vsel %vm1886_vm3, %v18778_v22, -inf }
 0x22f   :  { %1888 = vmax.xlane.f32.xlu0 %v1887_v63 }
 0x230   :  { %v18780_v31 = vpop.f32.mrf.mxu1 }
 0x231   :  { %v1920_v37 = vsel %vm1886_vm3, %v18780_v31, -inf  ;;  %v18790_v13 = vpop.f32.mrf.mxu0 }
 0x232   :  { %1921 = vmax.xlane.f32.xlu1 %v1920_v37  ;;  %v18788_v46 = vpop.f32.mrf.mxu1  ;;  %v1950_v10 = vsel %vm1886_vm3, %v18790_v13, -inf  ;;  %v1893_v37 = vsel %vm1886_vm3, %v18738_v7, -inf }
 0x233   :  { %1936 = vmax.xlane.f32.xlu0 %v1935_v42  ;;  %v1917_v63 = vsel %vm1886_vm3, %v18788_v46, -inf  ;;  %v18804_v54 = vpop.f32.mrf.mxu0 }
 0x234   :  { %v1947_v3 = vsel %vm1886_vm3, %v18804_v54, -inf }
 0x236   :  { %1918 = vmax.xlane.f32.xlu1 %v1917_v63 }
 0x237   :  { %1951 = vmax.xlane.f32.xlu0 %v1950_v10  ;;  %v18814_v10 = vpop.permute.xlu1 %3730 }
 0x238   :  { %22589 = vst [vmem:[#allocation56_spill] sm:$0xff] %v18814_v10 }
 0x239   :  { %v18806_v42 = vpop.f32.mrf.mxu1 }
 0x23a   :  { %v18822_v47 = vpop.f32.mrf.mxu0 }
 0x23b   :  { %1894 = vmax.xlane.f32.xlu0 %v1893_v37  ;;  %v18812_v28 = vpop.f32.mrf.mxu1  ;;  %v18828_v61 = vpop.permute.xlu1 %3916 }
 0x23c   :  { %22591 = vst [vmem:[#allocation58_spill] sm:$0xff] %v18828_v61  ;;  %v18842_v5 = vpop.f32.mrf.mxu0 }
 0x23f   :  { %1948 = vmax.xlane.f32.xlu0 %v1947_v3  ;;  %v1962_v3 = vsel %vm1886_vm3, %v18822_v47, -inf  ;;  %v18846_v55 = vpop.permute.xlu1 %3821 }
 0x240   :  { %22593 = vst [vmem:[#allocation60_spill] sm:$0xff] %v18846_v55 }
 0x241   :  { %v18816_v63 = vpop.f32.mrf.mxu1 }
 0x242   :  { %v1932_v1 = vsel %vm1886_vm3, %v18816_v63, -inf  ;;  %v18852_v43 = vpop.f32.mrf.mxu0 }
 0x243   :  { %1903 = vmax.xlane.f32.xlu0 %v1902_v60  ;;  %1933 = vmax.xlane.f32.xlu1 %v1932_v1  ;;  %v18824_v37 = vpop.f32.mrf.mxu1  ;;  %v1899_v60 = vsel %vm1886_vm3, %v18746_v14, -inf }
 0x244   :  { %v1929_v10 = vsel %vm1886_vm3, %v18824_v37, -inf  ;;  %v18864_v4 = vpop.f32.mrf.mxu0 }
 0x247   :  { %1963 = vmax.xlane.f32.xlu0 %v1962_v3  ;;  %1930 = vmax.xlane.f32.xlu1 %v1929_v10  ;;  %v1959_v10 = vsel %vm1886_vm3, %v18842_v5, -inf }
 0x249   :  { %v18834_v44 = vpop.f32.mrf.mxu1 }
 0x24a   :  { %v1944_v1 = vsel %vm1886_vm3, %v18834_v44, -inf }
 0x24b   :  { %1900 = vmax.xlane.f32.xlu0 %v1899_v60  ;;  %1945 = vmax.xlane.f32.xlu1 %v1944_v1  ;;  %v18844_v61 = vpop.f32.mrf.mxu1  ;;  %v18858_v60 = vpop.permute.xlu1 %4007  ;;  %v1974_v1 = vsel %vm1886_vm3, %v18852_v43, -inf }
 0x24c   :  { %v1941_v3 = vsel %vm1886_vm3, %v18844_v61, -inf  ;;  %22595 = vst [vmem:[#allocation62_spill] sm:$0xff] %v18858_v60 }
 0x24f   :  { %1960 = vmax.xlane.f32.xlu0 %v1959_v10  ;;  %1942 = vmax.xlane.f32.xlu1 %v1941_v3  ;;  %v18868_v10 = vpop.permute.xlu0 %3555  ;;  %v1971_v3 = vsel %vm1886_vm3, %v18864_v4, -inf  ;;  %v18874_v6 = vpop.permute.xlu1 %3912 }
 0x250   :  { %22596 = vst [vmem:[#allocation63_spill] sm:$0xff] %v18868_v10  ;;  %22597 = vst [vmem:[#allocation64_spill] sm:$0xff] %v18874_v6 }
 0x251   :  { %v18856_v48 = vpop.f32.mrf.mxu1 }
 0x252   :  { %v1956_v55 = vsel %vm1886_vm3, %v18856_v48, -inf }
 0x253   :  { %1975 = vmax.xlane.f32.xlu0 %v1974_v1  ;;  %1957 = vmax.xlane.f32.xlu1 %v1956_v55  ;;  %v18866_v41 = vpop.f32.mrf.mxu1  ;;  %v1914_v1 = vsel %vm1886_vm3, %v18766_v40, -inf  ;;  %v18884_v19 = vpop.permute.xlu0 %3553 }
 0x254   :  { %v1953_v60 = vsel %vm1886_vm3, %v18866_v41, -inf  ;;  %22598 = vst [vmem:[#allocation65_spill] sm:$0xff] %v18884_v19  ;;  %v18886_v52 = vpop.permute.xlu1 %4098 }
 0x255   :  { %22599 = vst [vmem:[#allocation66_spill] sm:$0xff] %v18886_v52 }
 0x257   :  { %1972 = vmax.xlane.f32.xlu0 %v1971_v3  ;;  %1954 = vmax.xlane.f32.xlu1 %v1953_v60  ;;  %v1911_v60 = vsel %vm1886_vm3, %v18774_v56, -inf  ;;  %v18894_v50 = vpop.permute.xlu0 %3734 }
 0x258   :  { %22600 = vst [vmem:[#allocation67_spill] sm:$0xff] %v18894_v50  ;;  %v18900_v19 = vpop.permute.xlu1 %4003 }
 0x259   :  { %v18876_v62 = vpop.f32.mrf.mxu1  ;;  %22601 = vst [vmem:[#allocation68_spill] sm:$0xff] %v18900_v19 }
 0x25a   :  { %v1968_v55 = vsel %vm1886_vm3, %v18876_v62, -inf }
 0x25b   :  { %1915 = vmax.xlane.f32.xlu0 %v1914_v1  ;;  %1969 = vmax.xlane.f32.xlu1 %v1968_v55  ;;  %v18882_v10 = vpop.f32.mrf.mxu1  ;;  %v1926_v1 = vsel %vm1886_vm3, %v18806_v42, -inf }
 0x25c   :  { %v1965_v3 = vsel %vm1886_vm3, %v18882_v10, -inf  ;;  %v18908_v38 = vpop.permute.xlu1 %4189 }
 0x25d   :  { %22603 = vst [vmem:[#allocation70_spill] sm:$0xff] %v18908_v38 }
 0x25f   :  { %1912 = vmax.xlane.f32.xlu0 %v1911_v60  ;;  %1966 = vmax.xlane.f32.xlu1 %v1965_v3  ;;  %v1923_v60 = vsel %vm1886_vm3, %v18812_v28, -inf  ;;  %v18906_v3 = vpop.permute.xlu0 %3732 }
 0x260   :  { %22602 = vst [vmem:[#allocation69_spill] sm:$0xff] %v18906_v3  ;;  %v18914_v39 = vpop.permute.xlu1 %4094 }
 0x261   :  { %v18892_v6 = vpop.f32.mrf.mxu1  ;;  %22605 = vst [vmem:[#allocation72_spill] sm:$0xff] %v18914_v39 }
 0x262   :  { %v1980_v50 = vsel %vm1886_vm3, %v18892_v6, -inf }
 0x263   :  { %1927 = vmax.xlane.f32.xlu0 %v1926_v1  ;;  %v18898_v55 = vpop.f32.mrf.mxu1  ;;  %v18912_v1 = vpop.permute.xlu0 %3728 }
 0x264   :  { %v1977_v52 = vsel %vm1886_vm3, %v18898_v55, -inf  ;;  %22604 = vst [vmem:[#allocation71_spill] sm:$0xff] %v18912_v1  ;;  %v18918_v57 = vpop.permute.xlu1 %4280 }
 0x265   :  { %1978 = vmax.xlane.f32.xlu1 %v1977_v52  ;;  %22607 = vst [vmem:[#allocation74_spill] sm:$0xff] %v18918_v57 }
 0x267   :  { %1924 = vmax.xlane.f32.xlu0 %v1923_v60  ;;  %v18916_v19 = vpop.permute.xlu0 %3823 }
 0x268   :  { %22606 = vst [vmem:[#allocation73_spill] sm:$0xff] %v18916_v19  ;;  %v18922_v34 = vpop.permute.xlu1 %4185 }
 0x269   :  { %22609 = vst [vmem:[#allocation76_spill] sm:$0xff] %v18922_v34 }
 0x26b   :  { %1981 = vmax.xlane.f32.xlu0 %v1980_v50  ;;  %v18920_v52 = vpop.permute.xlu0 %3819 }
 0x26c   :  { %22608 = vst [vmem:[#allocation75_spill] sm:$0xff] %v18920_v52  ;;  %v18926_v3 = vpop.permute.xlu1 %4371 }
 0x26d   :  { %22611 = vst [vmem:[#allocation78_spill] sm:$0xff] %v18926_v3 }
 0x26f   :  { %v18924_v60 = vpop.permute.xlu0 %3914 }
 0x270   :  { %22610 = vst [vmem:[#allocation77_spill] sm:$0xff] %v18924_v60  ;;  %v18930_v35 = vpop.permute.xlu1 %2944 }
 0x271   :  { %22613 = vst [vmem:[#allocation80_spill] sm:$0xff] %v18930_v35 }
 0x273   :  { %v18928_v38 = vpop.permute.xlu0 %3910 }
 0x274   :  { %22612 = vst [vmem:[#allocation79_spill] sm:$0xff] %v18928_v38  ;;  %v18934_v1 = vpop.permute.xlu1 %3640 }
 0x275   :  { %22615 = vst [vmem:[#allocation82_spill] sm:$0xff] %v18934_v1 }
 0x277   :  { %v18932_v50 = vpop.permute.xlu0 %4005 }
 0x278   :  { %22614 = vst [vmem:[#allocation81_spill] sm:$0xff] %v18932_v50 }
 0x27b   :  { %v18936_v39 = vpop.permute.xlu0 %4001 }
 0x27c   :  { %22616 = vst [vmem:[#allocation83_spill] sm:$0xff] %v18936_v39 }
 0x27f   :  { %v18939_v34 = vpop.permute.xlu0 %4096 }
 0x280   :  { %22617 = vst [vmem:[#allocation84_spill] sm:$0xff] %v18939_v34 }
 0x283   :  { %v18941_v60 = vpop.permute.xlu0 %4092 }
 0x284   :  { %22618 = vst [vmem:[#allocation85_spill] sm:$0xff] %v18941_v60 }
 0x287   :  { %v18945_v38 = vpop.permute.xlu0 %4187 }
 0x288   :  { %22619 = vst [vmem:[#allocation86_spill] sm:$0xff] %v18945_v38 }
 0x28b   :  { %v18949_v1 = vpop.permute.xlu0 %4183 }
 0x28c   :  { %22620 = vst [vmem:[#allocation87_spill] sm:$0xff] %v18949_v1 }
 0x28f   :  { %v18951_v39 = vpop.permute.xlu0 %4278 }
 0x290   :  { %22621 = vst [vmem:[#allocation88_spill] sm:$0xff] %v18951_v39 }
 0x292   :  { %v1892_v19 = vpop.xlane.xlu1 %1891 }
 0x293   :  { %v1984_v57 = vsub.f32 %v18720_v53, %v1892_v19 }
 0x295   :  { %v2017_v52 = vmul.f32 1.442695, %v1984_v57 }
 0x297   :  { %17474 = vpow2.f32 %v2017_v52 }
 0x29a   :  { %v1898_v35 = vpop.xlane.xlu1 %1897 }
 0x29b   :  { %v1986_v19 = vsub.f32 %v18728_v59, %v1898_v35 }
 0x29d   :  { %v2021_v38 = vmul.f32 1.442695, %v1986_v19 }
 0x2a4   :  { %v18943_v3 = vpop.eup %17474 }
 0x2a5   :  { %v2082_v50 = vsel %vm1886_vm3, %v18943_v3, 0.0 }
 0x2a6   :  { %2083 = vadd.xlane.f32.xlu0 %v2082_v50 }
 0x2aa   :  { %v1910_v12 = vpop.xlane.xlu1 %1909 }
 0x2ab   :  { %v1990_v35 = vsub.f32 %v18748_v17, %v1910_v12 }
 0x2b4   :  { %v1940_v53 = vpop.xlane.xlu0 %1939 }
 0x2b5   :  { %v2000_v57 = vsub.f32 %v18764_v2, %v1940_v53  ;;  %v1907_v53 = vpop.xlane.xlu1 %1906 }
 0x2b7   :  { %v2049_v52 = vmul.f32 1.442695, %v2000_v57 }
 0x2b8   :  { %v1889_v34 = vpop.xlane.xlu0 %1888 }
 0x2b9   :  { %17476 = vpow2.f32 %v2049_v52  ;;  %v1983_v60 = vsub.f32 %v18726_v58, %v1889_v34 }
 0x2bb   :  { %v2015_v36 = vmul.f32 1.442695, %v1983_v60  ;;  %v1922_v60 = vpop.xlane.xlu1 %1921 }
 0x2bc   :  { %v1937_v0 = vpop.xlane.xlu0 %1936 }
 0x2bd   :  { %17478 = vpow2.f32 %v2015_v36  ;;  %v1999_v50 = vsub.f32 %v18778_v22, %v1937_v0  ;;  %v1989_v36 = vsub.f32 %v18754_v25, %v1907_v53  ;;  %v2029_v0 = vmul.f32 1.442695, %v1990_v35 }
 0x2be   :  { %17480 = vpow2.f32 %v2021_v38 }
 0x2bf   :  { %v2047_v1 = vmul.f32 1.442695, %v1999_v50  ;;  %v1919_v52 = vpop.xlane.xlu1 %1918 }
 0x2c0   :  { %v1952_v39 = vpop.xlane.xlu0 %1951 }
 0x2c1   :  { %17482 = vpow2.f32 %v2047_v1  ;;  %v2004_v2 = vsub.f32 %v18790_v13, %v1952_v39  ;;  %v2027_v13 = vmul.f32 1.442695, %v1989_v36 }
 0x2c3   :  { %v2057_v59 = vmul.f32 1.442695, %v2004_v2 }
 0x2c4   :  { %v1895_v57 = vpop.xlane.xlu0 %1894 }
 0x2c5   :  { %17484 = vpow2.f32 %v2057_v59  ;;  %v1985_v58 = vsub.f32 %v18738_v7, %v1895_v57  ;;  %v1994_v7 = vsub.f32 %v18780_v31, %v1922_v60  ;;  %v1993_v59 = vsub.f32 %v18788_v46, %v1919_v52 }
 0x2c6   :  { %v18960_v34 = vpop.eup %17476 }
 0x2c7   :  { %v2019_v38 = vmul.f32 1.442695, %v1985_v58  ;;  %v2130_v22 = vsel %vm1886_vm3, %v18960_v34, 0.0  ;;  %v2037_v35 = vmul.f32 1.442695, %v1994_v7 }
 0x2c8   :  { %v1949_v1 = vpop.xlane.xlu0 %1948  ;;  %2131 = vadd.xlane.f32.xlu0 %v2130_v22  ;;  %v2035_v60 = vmul.f32 1.442695, %v1993_v59 }
 0x2c9   :  { %17486 = vpow2.f32 %v2019_v38  ;;  %v2003_v39 = vsub.f32 %v18804_v54, %v1949_v1 }
 0x2ca   :  { %v18966_v12 = vpop.eup %17478  ;;  %17488 = vpow2.f32 %v2029_v0 }
 0x2cb   :  { %v18968_v17 = vpop.eup %17480  ;;  %v2055_v25 = vmul.f32 1.442695, %v2003_v39  ;;  %v2079_v19 = vsel %vm1886_vm3, %v18966_v12, 0.0 }
 0x2cc   :  { %v1904_v50 = vpop.xlane.xlu0 %1903  ;;  %2080 = vadd.xlane.f32.xlu1 %v2079_v19  ;;  %v2088_v54 = vsel %vm1886_vm3, %v18968_v17, 0.0 }
 0x2cd   :  { %17490 = vpow2.f32 %v2055_v25  ;;  %v1988_v2 = vsub.f32 %v18740_v9, %v1904_v50 }
 0x2ce   :  { %v18974_v53 = vpop.eup %17482  ;;  %17492 = vpow2.f32 %v2027_v13 }
 0x2cf   :  { %v2025_v31 = vmul.f32 1.442695, %v1988_v2  ;;  %v2127_v57 = vsel %vm1886_vm3, %v18974_v53, 0.0 }
 0x2d0   :  { %v1964_v58 = vpop.xlane.xlu0 %1963  ;;  %2128 = vadd.xlane.f32.xlu0 %v2127_v57  ;;  %2089 = vadd.xlane.f32.xlu1 %v2088_v54 }
 0x2d1   :  { %17494 = vpow2.f32 %v2025_v31  ;;  %v2008_v36 = vsub.f32 %v18822_v47, %v1964_v58 }
 0x2d2   :  { %v18982_v9 = vpop.eup %17484  ;;  %17496 = vpow2.f32 %v2037_v35 }
 0x2d3   :  { %v2065_v0 = vmul.f32 1.442695, %v2008_v36  ;;  %v2142_v38 = vsel %vm1886_vm3, %v18982_v9, 0.0 }
 0x2d4   :  { %v1901_v22 = vpop.xlane.xlu0 %1900  ;;  %2143 = vadd.xlane.f32.xlu0 %v2142_v38 }
 0x2d5   :  { %17498 = vpow2.f32 %v2065_v0  ;;  %v1987_v46 = vsub.f32 %v18746_v14, %v1901_v22 }
 0x2d6   :  { %v18987_v1 = vpop.eup %17486  ;;  %17500 = vpow2.f32 %v2035_v60 }
 0x2d7   :  { %v2023_v39 = vmul.f32 1.442695, %v1987_v46  ;;  %v2085_v47 = vsel %vm1886_vm3, %v18987_v1, 0.0  ;;  %v18991_v13 = vpop.eup %17488 }
 0x2d8   :  { %v1961_v7 = vpop.xlane.xlu0 %1960  ;;  %2086 = vadd.xlane.f32.xlu1 %v2085_v47  ;;  %v2100_v2 = vsel %vm1886_vm3, %v18991_v13, 0.0 }
 0x2d9   :  { %17502 = vpow2.f32 %v2023_v39  ;;  %v2007_v25 = vsub.f32 %v18842_v5, %v1961_v7 }
 0x2da   :  { %v18994_v19 = vpop.eup %17490 }
 0x2db   :  { %v18996_v52 = vpop.eup %17492  ;;  %v2063_v50 = vmul.f32 1.442695, %v2007_v25  ;;  %v2139_v14 = vsel %vm1886_vm3, %v18994_v19, 0.0 }
 0x2dc   :  { %v1976_v54 = vpop.xlane.xlu0 %1975  ;;  %2140 = vadd.xlane.f32.xlu0 %v2139_v14  ;;  %2101 = vadd.xlane.f32.xlu1 %v2100_v2  ;;  %v2097_v57 = vsel %vm1886_vm3, %v18996_v52, 0.0 }
 0x2dd   :  { %17504 = vpow2.f32 %v2063_v50  ;;  %v2012_v35 = vsub.f32 %v18852_v43, %v1976_v54 }
 0x2de   :  { %v19003_v59 = vpop.eup %17494 }
 0x2df   :  { %v2073_v5 = vmul.f32 1.442695, %v2012_v35  ;;  %v2094_v31 = vsel %vm1886_vm3, %v19003_v59, 0.0  ;;  %v19009_v58 = vpop.eup %17496 }
 0x2e0   :  { %v1973_v36 = vpop.xlane.xlu0 %1972  ;;  %2095 = vadd.xlane.f32.xlu0 %v2094_v31  ;;  %2098 = vadd.xlane.f32.xlu1 %v2097_v57  ;;  %v2112_v22 = vsel %vm1886_vm3, %v19009_v58, 0.0 }
 0x2e1   :  { %17506 = vpow2.f32 %v2073_v5  ;;  %v2011_v60 = vsub.f32 %v18864_v4, %v1973_v36  ;;  %v1934_v36 = vpop.xlane.xlu1 %1933 }
 0x2e2   :  { %v19012_v0 = vpop.eup %17498 }
 0x2e3   :  { %22622 = vst [vmem:[#allocation89_spill] sm:$0xff] %v19012_v0  ;;  %v2071_v43 = vmul.f32 1.442695, %v2011_v60  ;;  %v2154_v38 = vsel %vm1886_vm3, %v19012_v0, 0.0  ;;  %v19018_v46 = vpop.eup %17500 }
 0x2e4   :  { %v1916_v39 = vpop.xlane.xlu0 %1915  ;;  %2155 = vadd.xlane.f32.xlu0 %v2154_v38  ;;  %2113 = vadd.xlane.f32.xlu1 %v2112_v22  ;;  %v2109_v50 = vsel %vm1886_vm3, %v19018_v46, 0.0 }
 0x2e5   :  { %17508 = vpow2.f32 %v2071_v43  ;;  %v1992_v47 = vsub.f32 %v18766_v40, %v1916_v39 }
 0x2e6   :  { %v19021_v7 = vpop.eup %17502 }
 0x2e7   :  { %v2033_v4 = vmul.f32 1.442695, %v1992_v47  ;;  %v2091_v25 = vsel %vm1886_vm3, %v19021_v7, 0.0 }
 0x2e8   :  { %v1913_v14 = vpop.xlane.xlu0 %1912  ;;  %2092 = vadd.xlane.f32.xlu0 %v2091_v25  ;;  %2110 = vadd.xlane.f32.xlu1 %v2109_v50 }
 0x2e9   :  { %17510 = vpow2.f32 %v2033_v4  ;;  %v1991_v2 = vsub.f32 %v18774_v56, %v1913_v14 }
 0x2ea   :  { %v19028_v54 = vpop.eup %17504 }
 0x2eb   :  { %v2031_v35 = vmul.f32 1.442695, %v1991_v2  ;;  %v2151_v40 = vsel %vm1886_vm3, %v19028_v54, 0.0 }
 0x2ec   :  { %v1928_v5 = vpop.xlane.xlu0 %1927  ;;  %2152 = vadd.xlane.f32.xlu0 %v2151_v40 }
 0x2ed   :  { %17512 = vpow2.f32 %v2031_v35  ;;  %v1996_v31 = vsub.f32 %v18806_v42, %v1928_v5  ;;  %v1931_v42 = vpop.xlane.xlu1 %1930 }
 0x2ee   :  { %v19033_v57 = vpop.eup %17506 }
 0x2ef   :  { %22623 = vst [vmem:[#allocation90_spill] sm:$0xff] %v19033_v57  ;;  %v2041_v60 = vmul.f32 1.442695, %v1996_v31  ;;  %v2166_v43 = vsel %vm1886_vm3, %v19033_v57, 0.0 }
 0x2f0   :  { %v1925_v38 = vpop.xlane.xlu0 %1924  ;;  %2167 = vadd.xlane.f32.xlu0 %v2166_v43 }
 0x2f1   :  { %17514 = vpow2.f32 %v2041_v60  ;;  %v1995_v56 = vsub.f32 %v18812_v28, %v1925_v38  ;;  %v1946_v28 = vpop.xlane.xlu1 %1945  ;;  %v1998_v60 = vsub.f32 %v18816_v63, %v1934_v36 }
 0x2f2   :  { %v19038_v22 = vpop.eup %17508 }
 0x2f3   :  { %22624 = vst [vmem:[#allocation91_spill] sm:$0xff] %v19038_v22  ;;  %v2039_v39 = vmul.f32 1.442695, %v1995_v56  ;;  %v2163_v47 = vsel %vm1886_vm3, %v19038_v22, 0.0  ;;  %v2045_v38 = vmul.f32 1.442695, %v1998_v60  ;;  %v1997_v56 = vsub.f32 %v18824_v37, %v1931_v42 }
 0x2f4   :  { %2164 = vadd.xlane.f32.xlu0 %v2163_v47  ;;  %v2002_v47 = vsub.f32 %v18834_v44, %v1946_v28 }
 0x2f5   :  { %17516 = vpow2.f32 %v2039_v39  ;;  %v1943_v40 = vpop.xlane.xlu1 %1942  ;;  %v2043_v39 = vmul.f32 1.442695, %v1997_v56 }
 0x2f6   :  { %v19042_v4 = vpop.eup %17510  ;;  %17518 = vpow2.f32 %v2045_v38 }
 0x2f7   :  { %v2106_v25 = vsel %vm1886_vm3, %v19042_v4, 0.0  ;;  %17520 = vpow2.f32 %v2043_v39 }
 0x2f8   :  { %2107 = vadd.xlane.f32.xlu0 %v2106_v25 }
 0x2f9   :  { %4276 = vrot.lane.b32.xlu1 %v18348_v11, %s18011_s23  ;;  %v1958_v43 = vpop.xlane.xlu1 %1957 }
 0x2fa   :  { %v19048_v50 = vpop.eup %17512  ;;  %v2006_v0 = vsub.f32 %v18856_v48, %v1958_v43  ;;  %v1982_v43 = vpop.xlane.xlu0 %1981 }
 0x2fb   :  { %v2103_v14 = vsel %vm1886_vm3, %v19048_v50, 0.0  ;;  %v2014_v38 = vsub.f32 %v18892_v6, %v1982_v43 }
 0x2fc   :  { %2104 = vadd.xlane.f32.xlu0 %v2103_v14  ;;  %v2053_v14 = vmul.f32 1.442695, %v2002_v47  ;;  %v2061_v63 = vmul.f32 1.442695, %v2006_v0 }
 0x2fd   :  { %v1955_v25 = vpop.xlane.xlu1 %1954 }
 0x2fe   :  { %v19052_v2 = vpop.eup %17514  ;;  %17522 = vpow2.f32 %v2053_v14  ;;  %v2005_v36 = vsub.f32 %v18866_v41, %v1955_v25 }
 0x2ff   :  { %v2118_v35 = vsel %vm1886_vm3, %v19052_v2, 0.0 }
 0x300   :  { %2119 = vadd.xlane.f32.xlu0 %v2118_v35  ;;  %v2001_v35 = vsub.f32 %v18844_v61, %v1943_v40  ;;  %v2059_v44 = vmul.f32 1.442695, %v2005_v36 }
 0x301   :  { %v1970_v57 = vpop.xlane.xlu1 %1969 }
 0x302   :  { %v19056_v5 = vpop.eup %17516  ;;  %v2051_v22 = vmul.f32 1.442695, %v2001_v35  ;;  %v2010_v42 = vsub.f32 %v18876_v62, %v1970_v57 }
 0x303   :  { %v2115_v31 = vsel %vm1886_vm3, %v19056_v5, 0.0 }
 0x304   :  { %2116 = vadd.xlane.f32.xlu0 %v2115_v31  ;;  %17524 = vpow2.f32 %v2051_v22  ;;  %v19066_v31 = vpop.eup %17518  ;;  %v2069_v41 = vmul.f32 1.442695, %v2010_v42 }
 0x305   :  { %v1967_v37 = vpop.xlane.xlu1 %1966  ;;  %17526 = vpow2.f32 %v2061_v63  ;;  %v2124_v61 = vsel %vm1886_vm3, %v19066_v31, 0.0  ;;  %v19073_v28 = vpop.eup %17520 }
 0x306   :  { %v2009_v0 = vsub.f32 %v18882_v10, %v1967_v37  ;;  %17528 = vpow2.f32 %v2059_v44  ;;  %v2121_v40 = vsel %vm1886_vm3, %v19073_v28, 0.0 }
 0x307   :  { %17530 = vpow2.f32 %v2069_v41 }
 0x308   :  { %v2067_v62 = vmul.f32 1.442695, %v2009_v0 }
 0x309   :  { %v1979_v48 = vpop.xlane.xlu1 %1978 }
 0x30a   :  { %v2013_v22 = vsub.f32 %v18898_v55, %v1979_v48  ;;  %17532 = vpow2.f32 %v2067_v62  ;;  %v2077_v55 = vmul.f32 1.442695, %v2014_v38 }
 0x30b   :  { %v19079_v60 = vpop.eup %17522 }
 0x30c   :  { %v2075_v57 = vmul.f32 1.442695, %v2013_v22  ;;  %v2136_v56 = vsel %vm1886_vm3, %v19079_v60, 0.0 }
 0x30e   :  { %17534 = vpow2.f32 %v2075_v57 }
 0x30f   :  { %17536 = vpow2.f32 %v2077_v55 }
 0x311   :  { %v19084_v10 = vpop.eup %17524 }
 0x312   :  { %v2133_v39 = vsel %vm1886_vm3, %v19084_v10, 0.0  ;;  %v19088_v47 = vpop.eup %17526 }
 0x313   :  { %22625 = vst [vmem:[#allocation92_spill] sm:$0xff] %v19088_v47  ;;  %v2148_v25 = vsel %vm1886_vm3, %v19088_v47, 0.0  ;;  %v19092_v6 = vpop.eup %17528 }
 0x314   :  { %22626 = vst [vmem:[#allocation93_spill] sm:$0xff] %v19092_v6  ;;  %v2145_v14 = vsel %vm1886_vm3, %v19092_v6, 0.0  ;;  %v19096_v35 = vpop.eup %17530 }
 0x315   :  { %22627 = vst [vmem:[#allocation94_spill] sm:$0xff] %v19096_v35  ;;  %v2160_v36 = vsel %vm1886_vm3, %v19096_v35, 0.0 }
 0x317   :  { %v19098_v63 = vpop.eup %17532 }
 0x318   :  { %22628 = vst [vmem:[#allocation95_spill] sm:$0xff] %v19098_v63  ;;  %v2157_v44 = vsel %vm1886_vm3, %v19098_v63, 0.0 }
 0x31a   :  { %4274 = vrot.lane.b32.xlu0 %v18355_v15, %s18011_s23 }
 0x31b   :  { %v19102_v37 = vpop.eup %17534 }
 0x31c   :  { %22629 = vst [vmem:[#allocation96_spill] sm:$0xff] %v19102_v37  ;;  %v2169_v42 = vsel %vm1886_vm3, %v19102_v37, 0.0 }
 0x31d   :  { %2125 = vadd.xlane.f32.xlu1 %v2124_v61  ;;  %v19108_v61 = vpop.eup %17536 }
 0x31e   :  { %22630 = vst [vmem:[#allocation97_spill] sm:$0xff] %v19108_v61  ;;  %v2172_v48 = vsel %vm1886_vm3, %v19108_v61, 0.0 }
 0x321   :  { %2122 = vadd.xlane.f32.xlu1 %v2121_v40 }
 0x325   :  { %2137 = vadd.xlane.f32.xlu1 %v2136_v56 }
 0x329   :  { %2134 = vadd.xlane.f32.xlu1 %v2133_v39 }
 0x32d   :  { %2149 = vadd.xlane.f32.xlu1 %v2148_v25 }
 0x32f   :  { %v2084_v0 = vpop.xlane.xlu0 %2083 }
 0x330   :  { %17538 = vrcp.f32 %v2084_v0 }
 0x331   :  { %2146 = vadd.xlane.f32.xlu1 %v2145_v14 }
 0x335   :  { %2161 = vadd.xlane.f32.xlu1 %v2160_v36 }
 0x339   :  { %2158 = vadd.xlane.f32.xlu1 %v2157_v44  ;;  %2170 = vadd.xlane.f32.xlu0 %v2169_v42 }
 0x33d   :  { %2173 = vadd.xlane.f32.xlu1 %v2172_v48  ;;  %v17539_v62 = vpop.eup %17538 }
 0x33e   :  { %v2208_v57 = vmul.f32 %v17539_v62, %v2084_v0 }
 0x340   :  { %v2240_v39 = vsub.f32 2.0, %v2208_v57 }
 0x342   :  { %v2272_v42 = vmul.f32 %v17539_v62, %v2240_v39 }
 0x34e   :  { %4462 = vrot.lane.b32.xlu1 %v18361_v18, %s18010_s22 }
 0x34f   :  { %4369 = vrot.lane.b32.xlu0 %v18368_v20, %s18010_s22 }
 0x351   :  { %v19122_v22 = vpop.xlane.xlu0 %2131 }
 0x352   :  { %4367 = vrot.lane.b32.xlu1 %v18358_v16, %s18011_s23 }
 0x353   :  { %4365 = vrot.lane.b32.xlu0 %v18368_v20, %s18011_s23 }
 0x355   :  { %v2081_v41 = vpop.xlane.xlu1 %2080 }
 0x356   :  { %17540 = vrcp.f32 %v2081_v41  ;;  %4553 = vrot.lane.b32.xlu1 %v18375_v21, %s18010_s22 }
 0x357   :  { %4460 = vrot.lane.b32.xlu0 %v18310_v51, %s18010_s22 }
 0x359   :  { %v2090_v40 = vpop.xlane.xlu1 %2089  ;;  %v19128_v43 = vpop.xlane.xlu0 %2128 }
 0x35a   :  { %4458 = vrot.lane.b32.xlu1 %v18361_v18, %s18011_s23  ;;  %17542 = vrcp.f32 %v2090_v40 }
 0x35b   :  { %4456 = vrot.lane.b32.xlu0 %v18310_v51, %s18011_s23 }
 0x35d   :  { %v19136_v38 = vpop.xlane.xlu0 %2143 }
 0x35e   :  { %4644 = vrot.lane.b32.xlu1 %v18385_v24, %s18010_s22 }
 0x35f   :  { %4551 = vrot.lane.b32.xlu0 %v18378_v23, %s18010_s22 }
 0x361   :  { %v2087_v56 = vpop.xlane.xlu1 %2086 }
 0x362   :  { %17544 = vrcp.f32 %v2087_v56  ;;  %4549 = vrot.lane.b32.xlu1 %v18375_v21, %s18011_s23 }
 0x363   :  { %v17541_v55 = vpop.eup %17540  ;;  %4547 = vrot.lane.b32.xlu0 %v18378_v23, %s18011_s23 }
 0x364   :  { %v2207_v25 = vmul.f32 %v17541_v55, %v2081_v41 }
 0x365   :  { %v19142_v14 = vpop.xlane.xlu0 %2140  ;;  %v2102_v36 = vpop.xlane.xlu1 %2101 }
 0x366   :  { %v2239_v44 = vsub.f32 2.0, %v2207_v25  ;;  %4735 = vrot.lane.b32.xlu1 %v18395_v27, %s18010_s22  ;;  %17546 = vrcp.f32 %v2102_v36  ;;  %v2304_v25 = vmul.f32 %v18943_v3, %v2272_v42 }
 0x367   :  { %4642 = vrot.lane.b32.xlu0 %v18388_v26, %s18010_s22  ;;  %v17543_v48 = vpop.eup %17542 }
 0x368   :  { %v2271_v0 = vmul.f32 %v17541_v55, %v2239_v44  ;;  %v2210_v37 = vmul.f32 %v17543_v48, %v2090_v40 }
 0x369   :  { %v2096_v61 = vpop.xlane.xlu0 %2095  ;;  %v2099_v57 = vpop.xlane.xlu1 %2098 }
 0x36a   :  { %17548 = vrcp.f32 %v2096_v61  ;;  %4640 = vrot.lane.b32.xlu1 %v18385_v24, %s18011_s23  ;;  %v2303_v41 = vmul.f32 %v18966_v12, %v2271_v0  ;;  %v2242_v39 = vsub.f32 2.0, %v2210_v37 }
 0x36b   :  { %17550 = vrcp.f32 %v2099_v57  ;;  %4638 = vrot.lane.b32.xlu0 %v18388_v26, %s18011_s23 }
 0x36c   :  { %16478 = vmatprep.mubr.msk.f32.mxu0 %vm1886_vm3, %v2303_v41 }
 0x36d   :  { %v19155_v62 = vpop.xlane.xlu0 %2155  ;;  %16479 = vmatmul.mubr.msk.f32.vlgmr.msra.gmra.mxu0 %vm1886_vm3, %v2304_v25  ;;  %v2114_v55 = vpop.xlane.xlu1 %2113 }
 0x36e   :  { %16482 = vmatpush3.msra.mxu0 %v18672_v8  ;;  %4826 = vrot.lane.b32.xlu1 %v18405_v30, %s18010_s22  ;;  %17552 = vrcp.f32 %v2114_v55  ;;  %v2274_v8 = vmul.f32 %v17543_v48, %v2242_v39 }
 0x36f   :  { %v17545_v12 = vpop.eup %17544  ;;  %16483 = vmatprep.subr.mxu0 %v18696_v45  ;;  %4733 = vrot.lane.b32.xlu0 %v18398_v29, %s18010_s22 }
 0x370   :  { %v2209_v3 = vmul.f32 %v17545_v12, %v2087_v56  ;;  %16484 = vmatpush3.msra.mxu0 %v18696_v45 }
 0x371   :  { %16495 = vmatprep.subr.mxu0 %v18710_v49  ;;  %v2093_v40 = vpop.xlane.xlu0 %2092  ;;  %v2111_v44 = vpop.xlane.xlu1 %2110 }
 0x372   :  { %v2241_v42 = vsub.f32 2.0, %v2209_v3  ;;  %17554 = vrcp.f32 %v2093_v40  ;;  %4731 = vrot.lane.b32.xlu1 %v18395_v27, %s18011_s23  ;;  %v2306_v3 = vmul.f32 %v18968_v17, %v2274_v8  ;;  %v22631_v17 = vld [vmem:[#allocation41_spill] sm:$0xff] }
 0x373   :  { %17556 = vrcp.f32 %v2111_v44  ;;  %4729 = vrot.lane.b32.xlu0 %v18398_v29, %s18011_s23  ;;  %v17547_v37 = vpop.eup %17546 }
 0x374   :  { %v2273_v0 = vmul.f32 %v17545_v12, %v2241_v42  ;;  %v2214_v41 = vmul.f32 %v17547_v37, %v2102_v36 }
 0x375   :  { %v19170_v56 = vpop.xlane.xlu0 %2152 }
 0x376   :  { %4917 = vrot.lane.b32.xlu1 %v18415_v33, %s18010_s22  ;;  %v2305_v45 = vmul.f32 %v18987_v1, %v2273_v0  ;;  %v2246_v39 = vsub.f32 2.0, %v2214_v41  ;;  %v22632_v41 = vld [vmem:[#allocation43_spill] sm:$0xff] }
 0x377   :  { %v17549_v25 = vpop.eup %17548  ;;  %4824 = vrot.lane.b32.xlu0 %v18408_v32, %s18010_s22 }
 0x378   :  { %v17551_v48 = vpop.eup %17550  ;;  %16485 = vmatprep.mubr.msk.f32.mxu0 %vm1886_vm3, %v2305_v45  ;;  %v2212_v1 = vmul.f32 %v17549_v25, %v2096_v61  ;;  %v2278_v8 = vmul.f32 %v17547_v37, %v2246_v39 }
 0x379   :  { %v2213_v35 = vmul.f32 %v17551_v48, %v2099_v57  ;;  %v19179_v12 = vpop.xlane.xlu0 %2167  ;;  %16486 = vmatmul.mubr.msk.f32.vlgmr.msra.gmra.mxu0 %vm1886_vm3, %v2306_v3  ;;  %v22634_v3 = vld [vmem:[#allocation32_spill] sm:$0xff] }
 0x37a   :  { %16496 = vmatpush3.msra.mxu0 %v18710_v49  ;;  %4822 = vrot.lane.b32.xlu1 %v18405_v30, %s18011_s23  ;;  %v22633_v49 = vld [vmem:[#allocation33_spill] sm:$0xff]  ;;  %v2310_v37 = vmul.f32 %v18991_v13, %v2278_v8  ;;  %v22636_v8 = vld [vmem:[#allocation39_spill] sm:$0xff] }
 0x37b   :  { %v2245_v36 = vsub.f32 2.0, %v2213_v35  ;;  %16497 = vmatprep.subr.mxu0 %v22631_v17  ;;  %4820 = vrot.lane.b32.xlu0 %v18408_v32, %s18011_s23  ;;  %v17553_v42 = vpop.eup %17552  ;;  %v2244_v35 = vsub.f32 2.0, %v2212_v1 }
 0x37c   :  { %16498 = vmatpush3.msra.mxu0 %v22631_v17  ;;  %v2218_v0 = vmul.f32 %v17553_v42, %v2114_v55 }
 0x37d   :  { %v2277_v57 = vmul.f32 %v17551_v48, %v2245_v36  ;;  %16509 = vmatprep.subr.mxu0 %v22632_v41  ;;  %v19190_v45 = vpop.xlane.xlu0 %2164  ;;  %v2276_v1 = vmul.f32 %v17549_v25, %v2244_v35 }
 0x37e   :  { %5008 = vrot.lane.b32.xlu1 %v22633_v49, %s18010_s22  ;;  %v2250_v39 = vsub.f32 2.0, %v2218_v0 }
 0x37f   :  { %v17555_v61 = vpop.eup %17554  ;;  %4915 = vrot.lane.b32.xlu0 %v22634_v3, %s18010_s22  ;;  %v2309_v63 = vmul.f32 %v18996_v52, %v2277_v57  ;;  %v22637_v57 = vld [vmem:[#allocation35_spill] sm:$0xff]  ;;  %v2308_v0 = vmul.f32 %v19003_v59, %v2276_v1  ;;  %v22640_v59 = vld [vmem:[#allocation38_spill] sm:$0xff] }
 0x380   :  { %v17557_v47 = vpop.eup %17556  ;;  %v2211_v48 = vmul.f32 %v17555_v61, %v2093_v40  ;;  %v2282_v13 = vmul.f32 %v17553_v42, %v2250_v39  ;;  %v22635_v40 = vld [vmem:[#allocation47_spill] sm:$0xff] }
 0x381   :  { %v2217_v55 = vmul.f32 %v17557_v47, %v2111_v44  ;;  %16499 = vmatprep.mubr.msk.f32.mxu0 %vm1886_vm3, %v2309_v63  ;;  %v2108_v36 = vpop.xlane.xlu0 %2107 }
 0x382   :  { %v2243_v17 = vsub.f32 2.0, %v2211_v48  ;;  %17558 = vrcp.f32 %v2108_v36  ;;  %16500 = vmatmul.mubr.msk.f32.vlgmr.msra.gmra.mxu0 %vm1886_vm3, %v2310_v37  ;;  %4913 = vrot.lane.b32.xlu1 %v18415_v33, %s18011_s23  ;;  %v22643_v37 = vld [vmem:[#allocation40_spill] sm:$0xff] }
 0x383   :  { %v2249_v6 = vsub.f32 2.0, %v2217_v55  ;;  %16510 = vmatpush3.msra.mxu0 %v22632_v41  ;;  %4911 = vrot.lane.b32.xlu0 %v22634_v3, %s18011_s23  ;;  %v22638_v41 = vld [vmem:[#allocation34_spill] sm:$0xff]  ;;  %v22644_v48 = vld [vmem:[#allocation36_spill] sm:$0xff] }
 0x384   :  { %v2275_v52 = vmul.f32 %v17555_v61, %v2243_v17  ;;  %16511 = vmatprep.subr.mxu0 %v22635_v40  ;;  %v22639_v61 = vld [vmem:[#allocation37_spill] sm:$0xff] }
 0x385   :  { %v2281_v63 = vmul.f32 %v17557_v47, %v2249_v6  ;;  %16512 = vmatpush3.msra.mxu0 %v22635_v40  ;;  %v2105_v44 = vpop.xlane.xlu0 %2104  ;;  %v2314_v47 = vmul.f32 %v19009_v58, %v2282_v13  ;;  %v22641_v58 = vld [vmem:[#allocation80_spill] sm:$0xff]  ;;  %v22645_v13 = vld [vmem:[#allocation6_spill] sm:$0xff] }
 0x386   :  { %16523 = vmatprep.subr.mxu0 %v22636_v8  ;;  %17560 = vrcp.f32 %v2105_v44  ;;  %5099 = vrot.lane.b32.xlu1 %v22637_v57, %s18010_s22  ;;  %v2307_v25 = vmul.f32 %v19021_v7, %v2275_v52  ;;  %v22642_v7 = vld [vmem:[#allocation45_spill] sm:$0xff] }
 0x387   :  { %5006 = vrot.lane.b32.xlu0 %v22638_v41, %s18010_s22  ;;  %v2313_v42 = vmul.f32 %v19018_v46, %v2281_v63  ;;  %17562 = vrcp.f32 %v19128_v43 }
 0x388   :  { %16492 = vmatprep.mubr.msk.f32.mxu1 %vm1886_vm3, %v2307_v25 }
 0x389   :  { %16513 = vmatprep.mubr.msk.f32.mxu0 %vm1886_vm3, %v2313_v42  ;;  %16493 = vmatmul.mubr.msk.f32.vlgmr.msra.gmra.mxu1 %vm1886_vm3, %v2308_v0  ;;  %v2120_v6 = vpop.xlane.xlu0 %2119 }
 0x38a   :  { %16503 = vmatpush3.msra.mxu1 %v22639_v61  ;;  %17564 = vrcp.f32 %v2120_v6  ;;  %16514 = vmatmul.mubr.msk.f32.vlgmr.msra.gmra.mxu0 %vm1886_vm3, %v2314_v47  ;;  %v22647_v47 = vld [vmem:[#allocation5_spill] sm:$0xff] }
 0x38b   :  { %16524 = vmatpush3.msra.mxu0 %v22636_v8  ;;  %16504 = vmatprep.subr.mxu1 %v22640_v59  ;;  %17566 = vrcp.f32 %v19122_v22 }
 0x38c   :  { %5004 = vrot.lane.b32.xlu1 %v22633_v49, %s18011_s23  ;;  %16525 = vmatprep.subr.mxu0 %v22641_v58  ;;  %17568 = vrcp.f32 %v19142_v14 }
 0x38d   :  { %16505 = vmatpush3.msra.mxu1 %v22640_v59  ;;  %5002 = vrot.lane.b32.xlu0 %v22638_v41, %s18011_s23  ;;  %v2117_v46 = vpop.xlane.xlu0 %2116 }
 0x38e   :  { %16526 = vmatpush3.msra.mxu0 %v22641_v58  ;;  %16516 = vmatprep.subr.mxu1 %v22642_v7  ;;  %17570 = vrcp.f32 %v2117_v46 }
 0x38f   :  { %v17559_v35 = vpop.eup %17558  ;;  %16537 = vmatprep.subr.mxu0 %v22643_v37  ;;  %17572 = vrcp.f32 %v19136_v38 }
 0x390   :  { %v2216_v39 = vmul.f32 %v17559_v35, %v2108_v36  ;;  %5093 = vrot.lane.b32.xlu1 %v22644_v48, %s18011_s23  ;;  %17574 = vrcp.f32 %v19170_v56 }
 0x391   :  { %5097 = vrot.lane.b32.xlu0 %v22644_v48, %s18010_s22  ;;  %17576 = vrcp.f32 %v19155_v62 }
 0x392   :  { %v2248_v17 = vsub.f32 2.0, %v2216_v39  ;;  %17578 = vrcp.f32 %v19190_v45 }
 0x393   :  { %v17561_v55 = vpop.eup %17560  ;;  %17580 = vrcp.f32 %v19179_v12 }
 0x394   :  { %v2215_v1 = vmul.f32 %v17561_v55, %v2105_v44  ;;  %5632 = vrot.lane.b32.xlu1 %v22645_v13, %s18012_s24  ;;  %v17563_v52 = vpop.eup %17562  ;;  %v2280_v63 = vmul.f32 %v17559_v35, %v2248_v17  ;;  %v22646_v44 = vld [vmem:[#allocation9_spill] sm:$0xff] }
 0x395   :  { %5095 = vrot.lane.b32.xlu0 %v22637_v57, %s18011_s23  ;;  %v2223_v8 = vmul.f32 %v17563_v52, %v19128_v43 }
 0x396   :  { %v2247_v36 = vsub.f32 2.0, %v2215_v1  ;;  %v2312_v39 = vmul.f32 %v19042_v4, %v2280_v63  ;;  %v22650_v63 = vld [vmem:[#allocation49_spill] sm:$0xff] }
 0x397   :  { %v17565_v40 = vpop.eup %17564  ;;  %v2255_v17 = vsub.f32 2.0, %v2223_v8 }
 0x398   :  { %v2279_v25 = vmul.f32 %v17561_v55, %v2247_v36  ;;  %v2220_v0 = vmul.f32 %v17565_v40, %v2120_v6  ;;  %5808 = vrot.lane.b32.xlu1 %v22646_v44, %s18012_s24  ;;  %v17567_v42 = vpop.eup %17566  ;;  %v22648_v6 = vld [vmem:[#allocation12_spill] sm:$0xff]  ;;  %v22649_v44 = vld [vmem:[#allocation7_spill] sm:$0xff] }
 0x399   :  { %5634 = vrot.lane.b32.xlu0 %v22647_v47, %s18012_s24  ;;  %v17569_v61 = vpop.eup %17568  ;;  %v2224_v43 = vmul.f32 %v17567_v42, %v19122_v22  ;;  %v2287_v8 = vmul.f32 %v17563_v52, %v2255_v17 }
 0x39a   :  { %v2311_v59 = vmul.f32 %v19048_v50, %v2279_v25  ;;  %v2252_v35 = vsub.f32 2.0, %v2220_v0  ;;  %v2227_v36 = vmul.f32 %v17569_v61, %v19142_v14 }
 0x39b   :  { %v17571_v58 = vpop.eup %17570 }
 0x39c   :  { %v2219_v1 = vmul.f32 %v17571_v58, %v2117_v46  ;;  %5895 = vrot.lane.b32.xlu1 %v22648_v6, %s18012_s24  ;;  %16506 = vmatprep.mubr.msk.f32.mxu1 %vm1886_vm3, %v2311_v59  ;;  %v17573_v55 = vpop.eup %17572  ;;  %v2284_v22 = vmul.f32 %v17565_v40, %v2252_v35  ;;  %v2256_v46 = vsub.f32 2.0, %v2224_v43  ;;  %v22651_v59 = vld [vmem:[#allocation14_spill] sm:$0xff]  ;;  %v2259_v6 = vsub.f32 2.0, %v2227_v36  ;;  %v19273_v35 = vpop.permute.xlu1 %4276  ;;  %v22654_v36 = vld [vmem:[#allocation16_spill] sm:$0xff] }
 0x39d   :  { %5721 = vrot.lane.b32.xlu0 %v22649_v44, %s18012_s24  ;;  %16507 = vmatmul.mubr.msk.f32.vlgmr.msra.gmra.mxu1 %vm1886_vm3, %v2312_v39  ;;  %v17575_v50 = vpop.eup %17574  ;;  %v2228_v25 = vmul.f32 %v17573_v55, %v19136_v38 }
 0x39e   :  { %v2251_v4 = vsub.f32 2.0, %v2219_v1  ;;  %16517 = vmatpush3.msra.mxu1 %v22642_v7  ;;  %v17577_v14 = vpop.eup %17576  ;;  %v2231_v39 = vmul.f32 %v17575_v50, %v19170_v56  ;;  %v22652_v1 = vld [vmem:[#allocation8_spill] sm:$0xff]  ;;  %v22653_v7 = vld [vmem:[#allocation51_spill] sm:$0xff]  ;;  %v2316_v52 = vmul.f32 %v19052_v2, %v2284_v22  ;;  %v2319_v56 = vmul.f32 %v18974_v53, %v2287_v8 }
 0x39f   :  { %16518 = vmatprep.subr.mxu1 %v22650_v63  ;;  %v17579_v40 = vpop.eup %17578  ;;  %v2260_v43 = vsub.f32 2.0, %v2228_v25  ;;  %v2232_v17 = vmul.f32 %v17577_v14, %v19155_v62  ;;  %v22656_v62 = vld [vmem:[#allocation53_spill] sm:$0xff]  ;;  %v22658_v8 = vld [vmem:[#allocation55_spill] sm:$0xff] }
 0x3a0   :  { %v2283_v0 = vmul.f32 %v17571_v58, %v2251_v4  ;;  %5982 = vrot.lane.b32.xlu1 %v22651_v59, %s18012_s24  ;;  %16519 = vmatpush3.msra.mxu1 %v22650_v63  ;;  %v2288_v58 = vmul.f32 %v17567_v42, %v2256_v46  ;;  %v17581_v4 = vpop.eup %17580  ;;  %v2291_v63 = vmul.f32 %v17569_v61, %v2259_v6  ;;  %v2263_v59 = vsub.f32 2.0, %v2231_v39  ;;  %v22657_v46 = vld [vmem:[#allocation13_spill] sm:$0xff] }
 0x3a1   :  { %5719 = vrot.lane.b32.xlu0 %v22652_v1, %s18012_s24  ;;  %16530 = vmatprep.subr.mxu1 %v22653_v7  ;;  %v2235_v1 = vmul.f32 %v17579_v40, %v19190_v45  ;;  %v2292_v42 = vmul.f32 %v17573_v55, %v2260_v43  ;;  %v2264_v61 = vsub.f32 2.0, %v2232_v17  ;;  %v2236_v6 = vmul.f32 %v17581_v4, %v19179_v12  ;;  %v22666_v43 = vld [vmem:[#allocation63_spill] sm:$0xff] }
 0x3a2   :  { %v2315_v38 = vmul.f32 %v19056_v5, %v2283_v0  ;;  %v22655_v5 = vld [vmem:[#allocation11_spill] sm:$0xff]  ;;  %v2320_v53 = vmul.f32 %v18960_v34, %v2288_v58  ;;  %v2295_v45 = vmul.f32 %v17575_v50, %v2263_v59  ;;  %v2323_v25 = vmul.f32 %v18994_v19, %v2291_v63  ;;  %v22659_v0 = vld [vmem:[#allocation57_spill] sm:$0xff] }
 0x3a3   :  { %v2267_v22 = vsub.f32 2.0, %v2235_v1  ;;  %v2324_v12 = vmul.f32 %v18982_v9, %v2292_v42  ;;  %v2296_v55 = vmul.f32 %v17577_v14, %v2264_v61  ;;  %v2268_v50 = vsub.f32 2.0, %v2236_v6  ;;  %v22660_v19 = vld [vmem:[#allocation15_spill] sm:$0xff]  ;;  %v22662_v14 = vld [vmem:[#allocation89_spill] sm:$0xff] }
 0x3a4   :  { %6069 = vrot.lane.b32.xlu1 %v22654_v36, %s18012_s24  ;;  %16520 = vmatprep.mubr.msk.f32.mxu1 %vm1886_vm3, %v2315_v38  ;;  %v2327_v39 = vmul.f32 %v19028_v54, %v2295_v45  ;;  %v22661_v1 = vld [vmem:[#allocation59_spill] sm:$0xff]  ;;  %v22663_v38 = vld [vmem:[#allocation61_spill] sm:$0xff] }
 0x3a5   :  { %5806 = vrot.lane.b32.xlu0 %v22655_v5, %s18012_s24  ;;  %16521 = vmatmul.mubr.msk.f32.vlgmr.msra.gmra.mxu1 %vm1886_vm3, %v2316_v52  ;;  %v2299_v59 = vmul.f32 %v17579_v40, %v2267_v22  ;;  %v2300_v40 = vmul.f32 %v17581_v4, %v2268_v50  ;;  %v22664_v54 = vld [vmem:[#allocation17_spill] sm:$0xff]  ;;  %v22665_v52 = vld [vmem:[#allocation91_spill] sm:$0xff]  ;;  %v22667_v4 = vld [vmem:[#allocation90_spill] sm:$0xff] }
 0x3a6   :  { %16531 = vmatpush3.msra.mxu1 %v22653_v7  ;;  %16534 = vmatprep.mubr.msk.f32.mxu1 %vm1886_vm3, %v2319_v56  ;;  %v2126_v2 = vpop.xlane.xlu1 %2125  ;;  %v2328_v7 = vmul.f32 %v22662_v14, %v2296_v55  ;;  %v22669_v42 = vld [vmem:[#allocation67_spill] sm:$0xff]  ;;  %v22671_v22 = vld [vmem:[#allocation69_spill] sm:$0xff] }
 0x3a7   :  { %16532 = vmatprep.subr.mxu1 %v22656_v62  ;;  %17582 = vrcp.f32 %v2126_v2  ;;  %v2331_v58 = vmul.f32 %v22665_v52, %v2299_v59  ;;  %v2332_v63 = vmul.f32 %v22667_v4, %v2300_v40  ;;  %v22670_v6 = vld [vmem:[#allocation71_spill] sm:$0xff] }
 0x3a8   :  { %6156 = vrot.lane.b32.xlu1 %v18348_v11, %s18012_s24  ;;  %16533 = vmatpush3.msra.mxu1 %v22656_v62  ;;  %v22668_v62 = vld [vmem:[#allocation65_spill] sm:$0xff] }
 0x3a9   :  { %5893 = vrot.lane.b32.xlu0 %v22657_v46, %s18012_s24  ;;  %16544 = vmatprep.subr.mxu1 %v22658_v8 }
 0x3aa   :  { %16535 = vmatmul.mubr.msk.f32.vlgmr.msra.gmra.mxu1 %vm1886_vm3, %v2320_v53  ;;  %v2123_v34 = vpop.xlane.xlu1 %2122 }
 0x3ab   :  { %16545 = vmatpush3.msra.mxu1 %v22658_v8  ;;  %16548 = vmatprep.mubr.msk.f32.mxu1 %vm1886_vm3, %v2323_v25  ;;  %17584 = vrcp.f32 %v2123_v34 }
 0x3ac   :  { %16546 = vmatprep.subr.mxu1 %v22659_v0  ;;  %6243 = vrot.lane.b32.xlu1 %v18358_v16, %s18012_s24 }
 0x3ad   :  { %16547 = vmatpush3.msra.mxu1 %v22659_v0  ;;  %5980 = vrot.lane.b32.xlu0 %v22660_v19, %s18012_s24  ;;  %v22672_v0 = vld [vmem:[#allocation58_spill] sm:$0xff] }
 0x3ae   :  { %16558 = vmatprep.subr.mxu1 %v22661_v1  ;;  %16549 = vmatmul.mubr.msk.f32.vlgmr.msra.gmra.mxu1 %vm1886_vm3, %v2324_v12  ;;  %v2138_v9 = vpop.xlane.xlu1 %2137 }
 0x3af   :  { %16559 = vmatpush3.msra.mxu1 %v22661_v1  ;;  %16562 = vmatprep.mubr.msk.f32.mxu1 %vm1886_vm3, %v2327_v39  ;;  %17586 = vrcp.f32 %v2138_v9  ;;  %v22673_v1 = vld [vmem:[#allocation56_spill] sm:$0xff] }
 0x3b0   :  { %16560 = vmatprep.subr.mxu1 %v22663_v38  ;;  %6330 = vrot.lane.b32.xlu1 %v18361_v18, %s18012_s24 }
 0x3b1   :  { %16561 = vmatpush3.msra.mxu1 %v22663_v38  ;;  %6067 = vrot.lane.b32.xlu0 %v22664_v54, %s18012_s24 }
 0x3b2   :  { %16572 = vmatprep.subr.mxu1 %v22666_v43  ;;  %16563 = vmatmul.mubr.msk.f32.vlgmr.msra.gmra.mxu1 %vm1886_vm3, %v2328_v7  ;;  %v2135_v17 = vpop.xlane.xlu1 %2134  ;;  %v22674_v7 = vld [vmem:[#allocation79_spill] sm:$0xff] }
 0x3b3   :  { %16573 = vmatpush3.msra.mxu1 %v22666_v43  ;;  %16576 = vmatprep.mubr.msk.f32.mxu1 %vm1886_vm3, %v2331_v58  ;;  %17588 = vrcp.f32 %v2135_v17  ;;  %v22675_v58 = vld [vmem:[#allocation77_spill] sm:$0xff] }
 0x3b4   :  { %v17583_v56 = vpop.eup %17582  ;;  %16574 = vmatprep.subr.mxu1 %v22668_v62  ;;  %6417 = vrot.lane.b32.xlu1 %v18375_v21, %s18012_s24 }
 0x3b5   :  { %v2222_v53 = vmul.f32 %v17583_v56, %v2126_v2  ;;  %16575 = vmatpush3.msra.mxu1 %v22668_v62  ;;  %6154 = vrot.lane.b32.xlu0 %v18355_v15, %s18012_s24  ;;  %v22676_v62 = vld [vmem:[#allocation66_spill] sm:$0xff] }
 0x3b6   :  { %16586 = vmatprep.subr.msk.mxu1 %vm467_vm2, %v22669_v42  ;;  %16577 = vmatmul.mubr.msk.f32.vlgmr.msra.gmra.mxu1 %vm1886_vm3, %v2332_v63  ;;  %v2150_v61 = vpop.xlane.xlu1 %2149 }
 0x3b7   :  { %16587 = vmatpush3.xpose.msk.msra.mxu1 %vm467_vm2, %v22669_v42  ;;  %16590 = vmatprep.mubr.msk.f32.mxu1 %vm467_vm2, %v22670_v6  ;;  %17590 = vrcp.f32 %v2150_v61  ;;  %v2254_v2 = vsub.f32 2.0, %v2222_v53  ;;  %v22677_v42 = vld [vmem:[#allocation42_spill] sm:$0xff]  ;;  %v22678_v6 = vld [vmem:[#allocation64_spill] sm:$0xff] }
 0x3b8   :  { %v17585_v45 = vpop.eup %17584  ;;  %16588 = vmatprep.subr.msk.mxu1 %vm467_vm2, %v22671_v22  ;;  %6504 = vrot.lane.b32.xlu1 %v18385_v24, %s18012_s24 }
 0x3b9   :  { %v2221_v8 = vmul.f32 %v17585_v45, %v2123_v34  ;;  %6241 = vrot.lane.b32.xlu0 %v18368_v20, %s18012_s24  ;;  %v2286_v50 = vmul.f32 %v17583_v56, %v2254_v2  ;;  %v19353_v34 = vpop.permute.xlu0 %4274  ;;  %v22679_v2 = vld [vmem:[#allocation44_spill] sm:$0xff] }
 0x3ba   :  { %v2147_v25 = vpop.xlane.xlu1 %2146 }
 0x3bb   :  { %v2253_v12 = vsub.f32 2.0, %v2221_v8  ;;  %16589 = vmatpush3.xpose.msk.msra.mxu1 %vm467_vm2, %v22671_v22  ;;  %17592 = vrcp.f32 %v2147_v25 }
 0x3bc   :  { %v17587_v55 = vpop.eup %17586  ;;  %16600 = vmatprep.subr.msk.mxu1 %vm467_vm2, %v22672_v0  ;;  %6591 = vrot.lane.b32.xlu1 %v18395_v27, %s18012_s24 }
 0x3bd   :  { %v2285_v59 = vmul.f32 %v17585_v45, %v2253_v12  ;;  %v2226_v39 = vmul.f32 %v17587_v55, %v2138_v9  ;;  %6328 = vrot.lane.b32.xlu0 %v18310_v51, %s18012_s24  ;;  %v2318_v9 = vmul.f32 %v19066_v31, %v2286_v50  ;;  %v22681_v50 = vld [vmem:[#allocation84_spill] sm:$0xff] }
 0x3be   :  { %16591 = vmatmul.mubr.msk.f32.vlgmr.msra.gmra.mxu1 %vm467_vm2, %v22673_v1  ;;  %v2162_v14 = vpop.xlane.xlu1 %2161 }
 0x3bf   :  { %16601 = vmatpush3.xpose.msk.msra.mxu1 %vm467_vm2, %v22672_v0  ;;  %16604 = vmatprep.mubr.msk.f32.mxu1 %vm467_vm2, %v22674_v7  ;;  %17594 = vrcp.f32 %v2162_v14  ;;  %v2317_v40 = vmul.f32 %v19073_v28, %v2285_v59  ;;  %v2258_v52 = vsub.f32 2.0, %v2226_v39  ;;  %v22682_v7 = vld [vmem:[#allocation74_spill] sm:$0xff] }
 0x3c0   :  { %v17589_v38 = vpop.eup %17588  ;;  %16602 = vmatprep.subr.msk.mxu1 %vm467_vm2, %v22675_v58  ;;  %6678 = vrot.lane.b32.xlu1 %v18405_v30, %s18012_s24 }
 0x3c1   :  { %v2225_v43 = vmul.f32 %v17589_v38, %v2135_v17  ;;  %6415 = vrot.lane.b32.xlu0 %v18378_v23, %s18012_s24  ;;  %16527 = vmatprep.mubr.msk.f32.mxu0 %vm1886_vm3, %v2317_v40  ;;  %v2290_v63 = vmul.f32 %v17587_v55, %v2258_v52  ;;  %v22680_v55 = vld [vmem:[#allocation85_spill] sm:$0xff]  ;;  %v22685_v52 = vld [vmem:[#allocation48_spill] sm:$0xff] }
 0x3c2   :  { %v2171_v56 = vpop.xlane.xlu0 %2170  ;;  %16528 = vmatmul.mubr.msk.f32.vlgmr.msra.gmra.mxu0 %vm1886_vm3, %v2318_v9  ;;  %v2159_v28 = vpop.xlane.xlu1 %2158  ;;  %v22684_v9 = vld [vmem:[#allocation72_spill] sm:$0xff] }
 0x3c3   :  { %v2257_v4 = vsub.f32 2.0, %v2225_v43  ;;  %16603 = vmatpush3.xpose.msk.msra.mxu1 %vm467_vm2, %v22675_v58  ;;  %17596 = vrcp.f32 %v2171_v56  ;;  %16538 = vmatpush3.msra.mxu0 %v22643_v37  ;;  %v2322_v8 = vmul.f32 %v19079_v60, %v2290_v63  ;;  %v22687_v63 = vld [vmem:[#allocation92_spill] sm:$0xff] }
 0x3c4   :  { %v17591_v31 = vpop.eup %17590  ;;  %16614 = vmatprep.subr.msk.mxu1 %vm467_vm2, %v22676_v62  ;;  %6765 = vrot.lane.b32.xlu1 %v18415_v33, %s18012_s24  ;;  %17598 = vrcp.f32 %v2159_v28 }
 0x3c5   :  { %v2289_v17 = vmul.f32 %v17589_v38, %v2257_v4  ;;  %v2230_v53 = vmul.f32 %v17591_v31, %v2150_v61  ;;  %6502 = vrot.lane.b32.xlu0 %v18388_v26, %s18012_s24  ;;  %16539 = vmatprep.subr.mxu0 %v22677_v42 }
 0x3c6   :  { %16540 = vmatpush3.msra.mxu0 %v22677_v42  ;;  %16605 = vmatmul.mubr.msk.f32.vlgmr.msra.gmra.mxu1 %vm467_vm2, %v22678_v6  ;;  %v19384_v37 = vpop.permute.xlu0 %4369  ;;  %v2174_v45 = vpop.xlane.xlu1 %2173 }
 0x3c7   :  { %16551 = vmatprep.subr.mxu0 %v22679_v2  ;;  %16615 = vmatpush3.xpose.msk.msra.mxu1 %vm467_vm2, %v22676_v62  ;;  %17600 = vrcp.f32 %v2174_v45  ;;  %v2321_v61 = vmul.f32 %v19084_v10, %v2289_v17  ;;  %v2262_v12 = vsub.f32 2.0, %v2230_v53  ;;  %v22688_v17 = vld [vmem:[#allocation88_spill] sm:$0xff] }
 0x3c8   :  { %v17593_v22 = vpop.eup %17592  ;;  %16618 = vmatprep.mubr.msk.f32.mxu1 %vm467_vm2, %v22680_v55  ;;  %16616 = vmatprep.subr.msk.mxu1 %vm467_vm2, %v22681_v50  ;;  %v22689_v55 = vld [vmem:[#allocation50_spill] sm:$0xff] }
 0x3c9   :  { %v2229_v0 = vmul.f32 %v17593_v22, %v2147_v25  ;;  %6589 = vrot.lane.b32.xlu0 %v18398_v29, %s18012_s24  ;;  %16541 = vmatprep.mubr.msk.f32.mxu0 %vm1886_vm3, %v2321_v61  ;;  %v2294_v1 = vmul.f32 %v17591_v31, %v2262_v12  ;;  %v22683_v25 = vld [vmem:[#allocation46_spill] sm:$0xff] }
 0x3ca   :  { %v19398_v59 = vpop.permute.xlu0 %4365  ;;  %16542 = vmatmul.mubr.msk.f32.vlgmr.msra.gmra.mxu0 %vm1886_vm3, %v2322_v8  ;;  %v4463_v10 = vpop.permute.xlu1 %4462 }
 0x3cb   :  { %v2261_v39 = vsub.f32 2.0, %v2229_v0  ;;  %16617 = vmatpush3.xpose.msk.msra.mxu1 %vm467_vm2, %v22681_v50  ;;  %16552 = vmatpush3.msra.mxu0 %v22679_v2  ;;  %v2326_v62 = vmul.f32 %v22687_v63, %v2294_v1  ;;  %v22695_v63 = vld [vmem:[#allocation82_spill] sm:$0xff] }
 0x3cc   :  { %v17595_v60 = vpop.eup %17594  ;;  %16628 = vmatprep.subr.msk.mxu1 %vm467_vm2, %v22682_v7  ;;  %16553 = vmatprep.subr.mxu0 %v22683_v25 }
 0x3cd   :  { %v2293_v40 = vmul.f32 %v17593_v22, %v2261_v39  ;;  %v2234_v38 = vmul.f32 %v17595_v60, %v2162_v14  ;;  %6676 = vrot.lane.b32.xlu0 %v18408_v32, %s18012_s24  ;;  %16554 = vmatpush3.msra.mxu0 %v22683_v25  ;;  %v22686_v14 = vld [vmem:[#allocation93_spill] sm:$0xff]  ;;  %v22690_v39 = vld [vmem:[#allocation52_spill] sm:$0xff] }
 0x3ce   :  { %16619 = vmatmul.mubr.msk.f32.vlgmr.msra.gmra.mxu1 %vm467_vm2, %v22684_v9  ;;  %16565 = vmatprep.subr.mxu0 %v22685_v52  ;;  %v4461_v58 = vpop.permute.xlu0 %4460  ;;  %v19413_v43 = vpop.permute.xlu1 %4367 }
 0x3cf   :  { %16629 = vmatpush3.xpose.msk.msra.mxu1 %vm467_vm2, %v22682_v7  ;;  %16632 = vmatprep.mubr.msk.f32.mxu1 %vm467_vm2, %v19353_v34  ;;  %v2325_v4 = vmul.f32 %v22686_v14, %v2293_v40  ;;  %v2266_v42 = vsub.f32 2.0, %v2234_v38  ;;  %v22692_v40 = vld [vmem:[#allocation94_spill] sm:$0xff]  ;;  %v22693_v14 = vld [vmem:[#allocation96_spill] sm:$0xff] }
 0x3d0   :  { %v17597_v31 = vpop.eup %17596  ;;  %16630 = vmatprep.subr.msk.mxu1 %vm467_vm2, %v22688_v17 }
 0x3d1   :  { %v17599_v53 = vpop.eup %17598  ;;  %v2237_v6 = vmul.f32 %v17597_v31, %v2171_v56  ;;  %16555 = vmatprep.mubr.msk.f32.mxu0 %vm1886_vm3, %v2325_v4  ;;  %v2298_v56 = vmul.f32 %v17595_v60, %v2266_v42  ;;  %v22698_v42 = vld [vmem:[#allocation73_spill] sm:$0xff] }
 0x3d2   :  { %v2233_v2 = vmul.f32 %v17599_v53, %v2159_v28  ;;  %v4457_v61 = vpop.permute.xlu0 %4456  ;;  %16556 = vmatmul.mubr.msk.f32.vlgmr.msra.gmra.mxu0 %vm1886_vm3, %v2326_v62  ;;  %v19425_v22 = vpop.permute.xlu1 %4553 }
 0x3d3   :  { %v2269_v34 = vsub.f32 2.0, %v2237_v6  ;;  %16631 = vmatpush3.xpose.msk.msra.mxu1 %vm467_vm2, %v22688_v17  ;;  %16566 = vmatpush3.msra.mxu0 %v22685_v52  ;;  %v2330_v38 = vmul.f32 %v22692_v40, %v2298_v56  ;;  %v22702_v56 = vld [vmem:[#allocation81_spill] sm:$0xff] }
 0x3d4   :  { %v17601_v8 = vpop.eup %17600  ;;  %v2265_v12 = vsub.f32 2.0, %v2233_v2  ;;  %16642 = vmatprep.subr.msk.mxu1 %vm467_vm2, %v4463_v10  ;;  %16567 = vmatprep.subr.mxu0 %v22689_v55 }
 0x3d5   :  { %v2238_v50 = vmul.f32 %v17601_v8, %v2174_v45  ;;  %16568 = vmatpush3.msra.mxu0 %v22689_v55  ;;  %v2301_v28 = vmul.f32 %v17597_v31, %v2269_v34  ;;  %v22691_v45 = vld [vmem:[#allocation95_spill] sm:$0xff] }
 0x3d6   :  { %v2297_v0 = vmul.f32 %v17599_v53, %v2265_v12  ;;  %16633 = vmatmul.mubr.msk.f32.vlgmr.msra.gmra.mxu1 %vm467_vm2, %v19273_v35  ;;  %16579 = vmatprep.subr.mxu0 %v22690_v39  ;;  %v19436_v1 = vpop.permute.xlu0 %4551  ;;  %v4459_v7 = vpop.permute.xlu1 %4458  ;;  %v22697_v53 = vld [vmem:[#allocation75_spill] sm:$0xff]  ;;  %v22700_v12 = vld [vmem:[#allocation60_spill] sm:$0xff] }
 0x3d7   :  { %v2270_v25 = vsub.f32 2.0, %v2238_v50  ;;  %16643 = vmatpush3.xpose.msk.msra.mxu1 %vm467_vm2, %v4463_v10  ;;  %16646 = vmatprep.mubr.msk.f32.mxu1 %vm467_vm2, %v4457_v61  ;;  %v2333_v4 = vmul.f32 %v22693_v14, %v2301_v28  ;;  %v22694_v10 = vld [vmem:[#allocation97_spill] sm:$0xff]  ;;  %v22699_v61 = vld [vmem:[#allocation62_spill] sm:$0xff]  ;;  %v22701_v55 = vld [vmem:[#allocation83_spill] sm:$0xff] }
 0x3d8   :  { %16644 = vmatprep.subr.msk.mxu1 %vm467_vm2, %v4461_v58  ;;  %v2329_v60 = vmul.f32 %v22691_v45, %v2297_v0  ;;  %v22703_v0 = vld [vmem:[#allocation70_spill] sm:$0xff]  ;;  %v22705_v45 = vld [vmem:[#allocation87_spill] sm:$0xff] }
 0x3d9   :  { %v2302_v9 = vmul.f32 %v17601_v8, %v2270_v25  ;;  %v22704_v25 = vld [vmem:[#allocation68_spill] sm:$0xff] }
 0x3da   :  { %16569 = vmatprep.mubr.msk.f32.mxu0 %vm1886_vm3, %v2329_v60  ;;  %v19444_v35 = vpop.permute.xlu0 %4547  ;;  %v4645_v52 = vpop.permute.xlu1 %4644  ;;  %v22706_v60 = vld [vmem:[#allocation86_spill] sm:$0xff] }
 0x3db   :  { %16645 = vmatpush3.xpose.msk.msra.mxu1 %vm467_vm2, %v4461_v58  ;;  %16570 = vmatmul.mubr.msk.f32.vlgmr.msra.gmra.mxu0 %vm1886_vm3, %v2330_v38  ;;  %v2334_v31 = vmul.f32 %v22694_v10, %v2302_v9  ;;  %v22696_v58 = vld [vmem:[#allocation54_spill] sm:$0xff] }
 0x3dc   :  { %16580 = vmatpush3.msra.mxu0 %v22690_v39  ;;  %16583 = vmatprep.mubr.msk.f32.mxu0 %vm1886_vm3, %v2333_v4  ;;  %v22707_v9 = vld [vmem:[#allocation78_spill] sm:$0xff]  ;;  %v22708_v4 = vld [vmem:[#allocation76_spill] sm:$0xff] }
 0x3dd   :  { %16581 = vmatprep.subr.mxu0 %v22695_v63  ;;  %16656 = vmatprep.subr.msk.mxu1 %vm467_vm2, %v4645_v52 }
 0x3de   :  { %16582 = vmatpush3.msra.mxu0 %v22695_v63  ;;  %16647 = vmatmul.mubr.msk.f32.vlgmr.msra.gmra.mxu1 %vm467_vm2, %v4459_v7  ;;  %v4643_v62 = vpop.permute.xlu0 %4642  ;;  %v19456_v17 = vpop.permute.xlu1 %4549 }
 0x3df   :  { %16593 = vmatprep.subr.msk.mxu0 %vm467_vm2, %v22696_v58  ;;  %16657 = vmatpush3.xpose.msk.msra.mxu1 %vm467_vm2, %v4645_v52 }
 0x3e0   :  { %16584 = vmatmul.mubr.msk.f32.vlgmr.msra.gmra.mxu0 %vm1886_vm3, %v2334_v31  ;;  %16658 = vmatprep.subr.msk.mxu1 %vm467_vm2, %v4643_v62 }
 0x3e1   :  { %16594 = vmatpush3.xpose.msk.msra.mxu0 %vm467_vm2, %v22696_v58  ;;  %16597 = vmatprep.mubr.msk.f32.mxu0 %vm467_vm2, %v22697_v53 }
 0x3e2   :  { %16595 = vmatprep.subr.msk.mxu0 %vm467_vm2, %v22698_v42  ;;  %v4639_v6 = vpop.permute.xlu0 %4638  ;;  %v4736_v2 = vpop.permute.xlu1 %4735 }
 0x3e3   :  { %16659 = vmatpush3.xpose.msk.msra.mxu1 %vm467_vm2, %v4643_v62  ;;  %16660 = vmatprep.mubr.msk.f32.mxu1 %vm467_vm2, %v4639_v6 }
 0x3e5   :  { %16596 = vmatpush3.xpose.msk.msra.mxu0 %vm467_vm2, %v22698_v42 }
 0x3e6   :  { %16607 = vmatprep.subr.msk.mxu0 %vm467_vm2, %v22699_v61  ;;  %v4734_v34 = vpop.permute.xlu0 %4733  ;;  %v4641_v8 = vpop.permute.xlu1 %4640 }
 0x3e7   :  { %16661 = vmatmul.mubr.msk.f32.vlgmr.msra.gmra.mxu1 %vm467_vm2, %v4641_v8 }
 0x3e8   :  { %16598 = vmatmul.mubr.msk.f32.vlgmr.msra.gmra.mxu0 %vm467_vm2, %v22700_v12 }
 0x3e9   :  { %16608 = vmatpush3.xpose.msk.msra.mxu0 %vm467_vm2, %v22699_v61  ;;  %16611 = vmatprep.mubr.msk.f32.mxu0 %vm467_vm2, %v22701_v55 }
 0x3ea   :  { %16609 = vmatprep.subr.msk.mxu0 %vm467_vm2, %v22702_v56  ;;  %v4730_v50 = vpop.permute.xlu0 %4729  ;;  %v4827_v28 = vpop.permute.xlu1 %4826 }
 0x3eb   :  { %16670 = vmatprep.subr.msk.mxu1 %vm467_vm2, %v4827_v28 }
 0x3ec   :  { %16671 = vmatpush3.xpose.msk.msra.mxu1 %vm467_vm2, %v4827_v28 }
 0x3ed   :  { %16610 = vmatpush3.xpose.msk.msra.mxu0 %vm467_vm2, %v22702_v56 }
 0x3ee   :  { %16621 = vmatprep.subr.msk.mxu0 %vm467_vm2, %v22703_v0  ;;  %v4825_v39 = vpop.permute.xlu0 %4824  ;;  %v4732_v7 = vpop.permute.xlu1 %4731 }
 0x3ef   :  { %16672 = vmatprep.subr.msk.mxu1 %vm467_vm2, %v4825_v39 }
 0x3f0   :  { %16612 = vmatmul.mubr.msk.f32.vlgmr.msra.gmra.mxu0 %vm467_vm2, %v22704_v25  ;;  %16673 = vmatpush3.xpose.msk.msra.mxu1 %vm467_vm2, %v4825_v39 }
 0x3f1   :  { %16622 = vmatpush3.xpose.msk.msra.mxu0 %vm467_vm2, %v22703_v0  ;;  %16625 = vmatprep.mubr.msk.f32.mxu0 %vm467_vm2, %v22705_v45 }
 0x3f2   :  { %16623 = vmatprep.subr.msk.mxu0 %vm467_vm2, %v22706_v60  ;;  %v4821_v40 = vpop.permute.xlu0 %4820  ;;  %v4918_v38 = vpop.permute.xlu1 %4917 }
 0x3f3   :  { %16674 = vmatprep.mubr.msk.f32.mxu1 %vm467_vm2, %v4821_v40 }
 0x3f5   :  { %16624 = vmatpush3.xpose.msk.msra.mxu0 %vm467_vm2, %v22706_v60 }
 0x3f6   :  { %16635 = vmatprep.subr.msk.mxu0 %vm467_vm2, %v22707_v9  ;;  %v4916_v52 = vpop.permute.xlu0 %4915  ;;  %v4823_v14 = vpop.permute.xlu1 %4822 }
 0x3f7   :  { %16675 = vmatmul.mubr.msk.f32.vlgmr.msra.gmra.mxu1 %vm467_vm2, %v4823_v14 }
 0x3f8   :  { %16626 = vmatmul.mubr.msk.f32.vlgmr.msra.gmra.mxu0 %vm467_vm2, %v22708_v4 }
 0x3f9   :  { %16636 = vmatpush3.xpose.msk.msra.mxu0 %vm467_vm2, %v22707_v9  ;;  %16639 = vmatprep.mubr.msk.f32.mxu0 %vm467_vm2, %v19398_v59 }
 0x3fa   :  { %16637 = vmatprep.subr.msk.mxu0 %vm467_vm2, %v19384_v37  ;;  %v4912_v10 = vpop.permute.xlu0 %4911  ;;  %v5009_v31 = vpop.permute.xlu1 %5008 }
 0x3fb   :  { %16684 = vmatprep.subr.msk.mxu1 %vm467_vm2, %v5009_v31 }
 0x3fc   :  { %16685 = vmatpush3.xpose.msk.msra.mxu1 %vm467_vm2, %v5009_v31 }
 0x3fd   :  { %16638 = vmatpush3.xpose.msk.msra.mxu0 %vm467_vm2, %v19384_v37 }
 0x3fe   :  { %16649 = vmatprep.subr.msk.mxu0 %vm467_vm2, %v19425_v22  ;;  %v5007_v63 = vpop.permute.xlu0 %5006  ;;  %v4914_v62 = vpop.permute.xlu1 %4913 }
 0x3ff   :  { %16686 = vmatprep.subr.msk.mxu1 %vm467_vm2, %v5007_v63 }
 0x400   :  { %16640 = vmatmul.mubr.msk.f32.vlgmr.msra.gmra.mxu0 %vm467_vm2, %v19413_v43  ;;  %16687 = vmatpush3.xpose.msk.msra.mxu1 %vm467_vm2, %v5007_v63 }
 0x401   :  { %16650 = vmatpush3.xpose.msk.msra.mxu0 %vm467_vm2, %v19425_v22  ;;  %16653 = vmatprep.mubr.msk.f32.mxu0 %vm467_vm2, %v19444_v35 }
 0x402   :  { %16651 = vmatprep.subr.msk.mxu0 %vm467_vm2, %v19436_v1  ;;  %v5003_v37 = vpop.permute.xlu0 %5002  ;;  %v5100_v59 = vpop.permute.xlu1 %5099 }
 0x403   :  { %16688 = vmatprep.mubr.msk.f32.mxu1 %vm467_vm2, %v5003_v37 }
 0x405   :  { %16652 = vmatpush3.xpose.msk.msra.mxu0 %vm467_vm2, %v19436_v1 }
 0x406   :  { %16663 = vmatprep.subr.msk.mxu0 %vm467_vm2, %v4736_v2  ;;  %v5098_v43 = vpop.permute.xlu0 %5097  ;;  %v5005_v58 = vpop.permute.xlu1 %5004 }
 0x407   :  { %16689 = vmatmul.mubr.msk.f32.vlgmr.msra.gmra.mxu1 %vm467_vm2, %v5005_v58 }
 0x408   :  { %16654 = vmatmul.mubr.msk.f32.vlgmr.msra.gmra.mxu0 %vm467_vm2, %v19456_v17 }
 0x409   :  { %16664 = vmatpush3.xpose.msk.msra.mxu0 %vm467_vm2, %v4736_v2  ;;  %16667 = vmatprep.mubr.msk.f32.mxu0 %vm467_vm2, %v4730_v50 }
 0x40a   :  { %16665 = vmatprep.subr.msk.mxu0 %vm467_vm2, %v4734_v34  ;;  %v5096_v22 = vpop.permute.xlu0 %5095  ;;  %v5094_v35 = vpop.permute.xlu1 %5093 }
 0x40d   :  { %16666 = vmatpush3.xpose.msk.msra.mxu0 %vm467_vm2, %v4734_v34 }
 0x40e   :  { %16677 = vmatprep.subr.msk.mxu0 %vm467_vm2, %v4918_v38  ;;  %v5635_v1 = vpop.permute.xlu0 %5634  ;;  %v5633_v53 = vpop.permute.xlu1 %5632 }
 0x40f   :  { %16698 = vmatprep.subr.mxu1 %v5635_v1 }
 0x410   :  { %16668 = vmatmul.mubr.msk.f32.vlgmr.msra.gmra.mxu0 %vm467_vm2, %v4732_v7  ;;  %16699 = vmatpush3.msra.mxu1 %v5635_v1 }
 0x411   :  { %16678 = vmatpush3.xpose.msk.msra.mxu0 %vm467_vm2, %v4918_v38  ;;  %16681 = vmatprep.mubr.msk.f32.mxu0 %vm467_vm2, %v4912_v10 }
 0x412   :  { %16679 = vmatprep.subr.msk.mxu0 %vm467_vm2, %v4916_v52  ;;  %16700 = vmatprep.subr.mxu1 %v5633_v53  ;;  %v19546_v17 = vpop.permute.xlu1 %5808  ;;  %v5722_v42 = vpop.permute.xlu0 %5721 }
 0x413   :  { %16701 = vmatpush3.msra.mxu1 %v5633_v53 }
 0x414   :  { %16712 = vmatprep.subr.mxu1 %v19546_v17 }
 0x415   :  { %16680 = vmatpush3.xpose.msk.msra.mxu0 %vm467_vm2, %v4916_v52 }
 0x416   :  { %16691 = vmatprep.subr.msk.mxu0 %vm467_vm2, %v5100_v59  ;;  %v5720_v6 = vpop.permute.xlu0 %5719  ;;  %v19557_v2 = vpop.permute.xlu1 %5895 }
 0x417   :  { %22709 = vst [vmem:[#allocation41_spill] sm:$0xff] %v19557_v2 }
 0x418   :  { %16682 = vmatmul.mubr.msk.f32.vlgmr.msra.gmra.mxu0 %vm467_vm2, %v4914_v62 }
 0x419   :  { %16692 = vmatpush3.xpose.msk.msra.mxu0 %vm467_vm2, %v5100_v59  ;;  %16695 = vmatprep.mubr.msk.f32.mxu0 %vm467_vm2, %v5094_v35 }
 0x41a   :  { %16693 = vmatprep.subr.msk.mxu0 %vm467_vm2, %v5098_v43 }
 0x41d   :  { %16694 = vmatpush3.xpose.msk.msra.mxu0 %vm467_vm2, %v5098_v43 }
 0x41e   :  { %16705 = vmatprep.subr.mxu0 %v5722_v42 }
 0x420   :  { %16696 = vmatmul.mubr.msk.f32.vlgmr.msra.gmra.mxu0 %vm467_vm2, %v5096_v22 }
 0x421   :  { %16706 = vmatpush3.msra.mxu0 %v5722_v42 }
 0x422   :  { %16707 = vmatprep.subr.mxu0 %v5720_v6 }
 0x423   :  { %16708 = vmatpush3.msra.mxu0 %v5720_v6 }
 0x424   :  { %16719 = vmatprep.subr.mxu0 %v19557_v2 }
 0x42d   :  { %v19580_v7 = vpop.f32.mrf.mxu0 }
 0x42e   :  { %22720 = vst [vmem:[#allocation49_spill] sm:$0xff] %v19580_v7 }
 0x42f   :  { %v19586_v60 = vpop.f32.mrf.mxu0 }
 0x430   :  { %22723 = vst [vmem:[#allocation55_spill] sm:$0xff] %v19586_v60  ;;  %v19734_v60 = vpop.permute.xlu1 %5982 }
 0x434   :  { %v19744_v33 = vpop.permute.xlu1 %6069 }
 0x435   :  { %22743 = vst [vmem:[#allocation85_spill] sm:$0xff] %v19744_v33 }
 0x438   :  { %v19756_v27 = vpop.permute.xlu1 %6156 }
 0x439   :  { %v19588_v40 = vpop.f32.mrf.mxu0 }
 0x43a   :  { %22724 = vst [vmem:[#allocation57_spill] sm:$0xff] %v19588_v40 }
 0x43b   :  { %v19592_v9 = vpop.f32.mrf.mxu0 }
 0x43c   :  { %22726 = vst [vmem:[#allocation89_spill] sm:$0xff] %v19592_v9  ;;  %v19766_v21 = vpop.permute.xlu1 %6243 }
 0x43d   :  { %22745 = vst [vmem:[#allocation74_spill] sm:$0xff] %v19766_v21 }
 0x442   :  { %v19596_v14 = vpop.f32.mrf.mxu0 }
 0x443   :  { %22728 = vst [vmem:[#allocation91_spill] sm:$0xff] %v19596_v14 }
 0x444   :  { %v19604_v63 = vpop.f32.mrf.mxu0 }
 0x445   :  { %22729 = vst [vmem:[#allocation63_spill] sm:$0xff] %v19604_v63 }
 0x449   :  { %v19560_v61 = vpop.f32.mrf.mxu1 }
 0x44a   :  { %22710 = vst [vmem:[#allocation43_spill] sm:$0xff] %v19560_v61  ;;  %v19608_v37 = vpop.f32.mrf.mxu0  ;;  %v19716_v61 = vpop.permute.xlu0 %5806 }
 0x44b   :  { %v19562_v34 = vpop.f32.mrf.mxu1  ;;  %22730 = vst [vmem:[#allocation90_spill] sm:$0xff] %v19608_v37 }
 0x44c   :  { %22711 = vst [vmem:[#allocation47_spill] sm:$0xff] %v19562_v34  ;;  %v19612_v43 = vpop.f32.mrf.mxu0 }
 0x44d   :  { %22731 = vst [vmem:[#allocation65_spill] sm:$0xff] %v19612_v43 }
 0x45d   :  { %v19564_v8 = vpop.f32.mrf.mxu1 }
 0x45e   :  { %22712 = vst [vmem:[#allocation39_spill] sm:$0xff] %v19564_v8 }
 0x45f   :  { %v19566_v12 = vpop.f32.mrf.mxu1 }
 0x460   :  { %22713 = vst [vmem:[#allocation37_spill] sm:$0xff] %v19566_v12 }
 0x465   :  { %v19568_v55 = vpop.f32.mrf.mxu1 }
 0x466   :  { %22714 = vst [vmem:[#allocation38_spill] sm:$0xff] %v19568_v55 }
 0x467   :  { %v19570_v56 = vpop.f32.mrf.mxu1 }
 0x468   :  { %22715 = vst [vmem:[#allocation80_spill] sm:$0xff] %v19570_v56 }
 0x46a   :  { %v19572_v50 = vpop.f32.mrf.mxu1 }
 0x46b   :  { %22716 = vst [vmem:[#allocation45_spill] sm:$0xff] %v19572_v50 }
 0x46c   :  { %v19574_v28 = vpop.f32.mrf.mxu1 }
 0x46d   :  { %22717 = vst [vmem:[#allocation40_spill] sm:$0xff] %v19574_v28 }
 0x46e   :  { %v19576_v0 = vpop.f32.mrf.mxu1 }
 0x46f   :  { %22718 = vst [vmem:[#allocation6_spill] sm:$0xff] %v19576_v0 }
 0x470   :  { %v19578_v39 = vpop.f32.mrf.mxu1 }
 0x471   :  { %22719 = vst [vmem:[#allocation5_spill] sm:$0xff] %v19578_v39 }
 0x472   :  { %v19582_v25 = vpop.f32.mrf.mxu1 }
 0x473   :  { %22721 = vst [vmem:[#allocation51_spill] sm:$0xff] %v19582_v25 }
 0x474   :  { %v19584_v45 = vpop.f32.mrf.mxu1 }
 0x475   :  { %22722 = vst [vmem:[#allocation53_spill] sm:$0xff] %v19584_v45 }
 0x476   :  { %v19590_v38 = vpop.f32.mrf.mxu1 }
 0x477   :  { %22725 = vst [vmem:[#allocation59_spill] sm:$0xff] %v19590_v38 }
 0x478   :  { %v19594_v52 = vpop.f32.mrf.mxu1 }
 0x479   :  { %22727 = vst [vmem:[#allocation61_spill] sm:$0xff] %v19594_v52 }
 0x47e   :  { %v19598_v4 = vpop.f32.mrf.mxu1 }
 0x47f   :  { %v5187_v10 = vsel %vm1886_vm3, %v19598_v4, -inf }
 0x480   :  { %v19602_v31 = vpop.f32.mrf.mxu1  ;;  %5188 = vmax.xlane.f32.xlu0 %v5187_v10 }
 0x481   :  { %v5184_v62 = vsel %vm1886_vm3, %v19602_v31, -inf }
 0x482   :  { %5185 = vmax.xlane.f32.xlu1 %v5184_v62  ;;  %v19618_v35 = vpop.f32.mrf.mxu0 }
 0x483   :  { %22732 = vst [vmem:[#allocation67_spill] sm:$0xff] %v19618_v35 }
 0x484   :  { %v19622_v53 = vpop.f32.mrf.mxu0 }
 0x485   :  { %22733 = vst [vmem:[#allocation71_spill] sm:$0xff] %v19622_v53 }
 0x486   :  { %v19610_v59 = vpop.f32.mrf.mxu1 }
 0x487   :  { %v5199_v58 = vsel %vm1886_vm3, %v19610_v59, -inf }
 0x488   :  { %v19616_v22 = vpop.f32.mrf.mxu1  ;;  %5200 = vmax.xlane.f32.xlu1 %v5199_v58 }
 0x489   :  { %v5196_v1 = vsel %vm1886_vm3, %v19616_v22, -inf }
 0x48a   :  { %5197 = vmax.xlane.f32.xlu0 %v5196_v1  ;;  %v19626_v6 = vpop.f32.mrf.mxu0 }
 0x48b   :  { %22734 = vst [vmem:[#allocation69_spill] sm:$0xff] %v19626_v6 }
 0x48c   :  { %v19634_v38 = vpop.f32.mrf.mxu0 }
 0x48d   :  { %22735 = vst [vmem:[#allocation58_spill] sm:$0xff] %v19634_v38 }
 0x48e   :  { %v19624_v42 = vpop.f32.mrf.mxu1 }
 0x48f   :  { %v5211_v10 = vsel %vm1886_vm3, %v19624_v42, -inf }
 0x490   :  { %v19630_v62 = vpop.f32.mrf.mxu1  ;;  %5212 = vmax.xlane.f32.xlu1 %v5211_v10 }
 0x491   :  { %v5208_v58 = vsel %vm1886_vm3, %v19630_v62, -inf }
 0x492   :  { %5209 = vmax.xlane.f32.xlu0 %v5208_v58  ;;  %v19636_v52 = vpop.f32.mrf.mxu0 }
 0x493   :  { %22736 = vst [vmem:[#allocation56_spill] sm:$0xff] %v19636_v52 }
 0x494   :  { %v19638_v1 = vpop.f32.mrf.mxu0 }
 0x495   :  { %22737 = vst [vmem:[#allocation79_spill] sm:$0xff] %v19638_v1 }
 0x496   :  { %v19648_v6 = vpop.f32.mrf.mxu1 }
 0x49b   :  { %v19640_v25 = vpop.f32.mrf.mxu0 }
 0x49c   :  { %22738 = vst [vmem:[#allocation77_spill] sm:$0xff] %v19640_v25  ;;  %v19658_v25 = vpop.f32.mrf.mxu1 }
 0x49d   :  { %v19642_v45 = vpop.f32.mrf.mxu0 }
 0x49e   :  { %22739 = vst [vmem:[#allocation66_spill] sm:$0xff] %v19642_v45  ;;  %v19664_v45 = vpop.f32.mrf.mxu1 }
 0x4a0   :  { %v19644_v0 = vpop.f32.mrf.mxu0  ;;  %v19674_v28 = vpop.f32.mrf.mxu1 }
 0x4a1   :  { %22740 = vst [vmem:[#allocation42_spill] sm:$0xff] %v19644_v0  ;;  %v5223_v0 = vsel %vm1886_vm3, %v19648_v6, -inf }
 0x4a2   :  { %v19646_v39 = vpop.f32.mrf.mxu0 }
 0x4a3   :  { %22741 = vst [vmem:[#allocation64_spill] sm:$0xff] %v19646_v39  ;;  %v5220_v39 = vsel %vm1886_vm3, %v19658_v25, -inf }
 0x4a7   :  { %v19680_v35 = vpop.f32.mrf.mxu1 }
 0x4a8   :  { %v19650_v10 = vpop.f32.mrf.mxu0 }
 0x4a9   :  { %v5193_v58 = vsel %vm1886_vm3, %v19650_v10, -inf  ;;  %v19690_v56 = vpop.f32.mrf.mxu1 }
 0x4aa   :  { %5194 = vmax.xlane.f32.xlu1 %v5193_v58  ;;  %v19654_v38 = vpop.f32.mrf.mxu0  ;;  %v5244_v37 = vsel %vm1886_vm3, %v19690_v56, -inf }
 0x4ab   :  { %v5190_v52 = vsel %vm1886_vm3, %v19654_v38, -inf }
 0x4ac   :  { %5191 = vmax.xlane.f32.xlu0 %v5190_v52 }
 0x4ae   :  { %5224 = vmax.xlane.f32.xlu1 %v5223_v0  ;;  %v5235_v0 = vsel %vm1886_vm3, %v19664_v45, -inf }
 0x4b0   :  { %5221 = vmax.xlane.f32.xlu0 %v5220_v39  ;;  %v19666_v1 = vpop.f32.mrf.mxu0  ;;  %v5232_v39 = vsel %vm1886_vm3, %v19674_v28, -inf }
 0x4b1   :  { %v5205_v58 = vsel %vm1886_vm3, %v19666_v1, -inf }
 0x4b2   :  { %5206 = vmax.xlane.f32.xlu1 %v5205_v58  ;;  %v19670_v50 = vpop.f32.mrf.mxu0 }
 0x4b3   :  { %v5202_v52 = vsel %vm1886_vm3, %v19670_v50, -inf }
 0x4b4   :  { %5203 = vmax.xlane.f32.xlu0 %v5202_v52 }
 0x4b6   :  { %5236 = vmax.xlane.f32.xlu1 %v5235_v0  ;;  %v5247_v0 = vsel %vm1886_vm3, %v19680_v35, -inf }
 0x4b8   :  { %v19682_v53 = vpop.f32.mrf.mxu0  ;;  %5233 = vmax.xlane.f32.xlu0 %v5232_v39  ;;  %v19696_v39 = vpop.f32.mrf.mxu1 }
 0x4b9   :  { %v5217_v58 = vsel %vm1886_vm3, %v19682_v53, -inf }
 0x4ba   :  { %v19686_v55 = vpop.f32.mrf.mxu0  ;;  %5218 = vmax.xlane.f32.xlu1 %v5217_v58  ;;  %v19706_v12 = vpop.f32.mrf.mxu1 }
 0x4bb   :  { %v5214_v52 = vsel %vm1886_vm3, %v19686_v55, -inf  ;;  %v5256_v14 = vsel %vm1886_vm3, %v19706_v12, -inf }
 0x4bc   :  { %5215 = vmax.xlane.f32.xlu0 %v5214_v52 }
 0x4be   :  { %5248 = vmax.xlane.f32.xlu1 %v5247_v0  ;;  %v5259_v0 = vsel %vm1886_vm3, %v19696_v39, -inf }
 0x4c0   :  { %v19698_v43 = vpop.f32.mrf.mxu0  ;;  %5245 = vmax.xlane.f32.xlu0 %v5244_v37 }
 0x4c1   :  { %v5229_v58 = vsel %vm1886_vm3, %v19698_v43, -inf }
 0x4c2   :  { %v19702_v8 = vpop.f32.mrf.mxu0  ;;  %5230 = vmax.xlane.f32.xlu1 %v5229_v58 }
 0x4c3   :  { %v5226_v52 = vsel %vm1886_vm3, %v19702_v8, -inf }
 0x4c4   :  { %5227 = vmax.xlane.f32.xlu0 %v5226_v52 }
 0x4c6   :  { %5260 = vmax.xlane.f32.xlu1 %v5259_v0 }
 0x4c7   :  { %v19714_v63 = vpop.f32.mrf.mxu1 }
 0x4c8   :  { %v19712_v37 = vpop.f32.mrf.mxu0  ;;  %5257 = vmax.xlane.f32.xlu0 %v5256_v14  ;;  %v5271_v40 = vsel %vm1886_vm3, %v19714_v63, -inf  ;;  %v19728_v14 = vpop.permute.xlu0 %5893 }
 0x4c9   :  { %v5241_v58 = vsel %vm1886_vm3, %v19712_v37, -inf  ;;  %v19724_v0 = vpop.f32.mrf.mxu1  ;;  %22742 = vst [vmem:[#allocation44_spill] sm:$0xff] %v19728_v14 }
 0x4ca   :  { %v19720_v34 = vpop.f32.mrf.mxu0  ;;  %5242 = vmax.xlane.f32.xlu1 %v5241_v58  ;;  %v5268_v9 = vsel %vm1886_vm3, %v19724_v0, -inf }
 0x4cb   :  { %v5238_v52 = vsel %vm1886_vm3, %v19720_v34, -inf }
 0x4cc   :  { %5239 = vmax.xlane.f32.xlu0 %v5238_v52 }
 0x4ce   :  { %5272 = vmax.xlane.f32.xlu1 %v5271_v40  ;;  %v19742_v40 = vpop.permute.xlu0 %5980 }
 0x4d0   :  { %v19732_v7 = vpop.f32.mrf.mxu0  ;;  %5269 = vmax.xlane.f32.xlu0 %v5268_v9 }
 0x4d1   :  { %v5253_v58 = vsel %vm1886_vm3, %v19732_v7, -inf }
 0x4d2   :  { %v19738_v52 = vpop.f32.mrf.mxu0  ;;  %5254 = vmax.xlane.f32.xlu1 %v5253_v58  ;;  %v19752_v26 = vpop.permute.xlu0 %6067 }
 0x4d3   :  { %v5250_v32 = vsel %vm1886_vm3, %v19738_v52, -inf  ;;  %22744 = vst [vmem:[#allocation84_spill] sm:$0xff] %v19752_v26 }
 0x4d4   :  { %5251 = vmax.xlane.f32.xlu0 %v5250_v32 }
 0x4d6   :  { %v19760_v23 = vpop.permute.xlu0 %6154 }
 0x4d8   :  { %v19746_v29 = vpop.f32.mrf.mxu0 }
 0x4d9   :  { %v5265_v9 = vsel %vm1886_vm3, %v19746_v29, -inf }
 0x4da   :  { %v19750_v30 = vpop.f32.mrf.mxu0  ;;  %5266 = vmax.xlane.f32.xlu1 %v5265_v9  ;;  %v19770_v20 = vpop.permute.xlu0 %6241 }
 0x4db   :  { %v5262_v58 = vsel %vm1886_vm3, %v19750_v30, -inf  ;;  %22746 = vst [vmem:[#allocation46_spill] sm:$0xff] %v19770_v20 }
 0x4dc   :  { %5263 = vmax.xlane.f32.xlu0 %v5262_v58  ;;  %v19772_v58 = vpop.permute.xlu1 %6330 }
 0x4de   :  { %v19774_v18 = vpop.permute.xlu0 %6328 }
 0x4df   :  { %22747 = vst [vmem:[#allocation72_spill] sm:$0xff] %v19774_v18 }
 0x4e0   :  { %v19758_v32 = vpop.f32.mrf.mxu0  ;;  %v19776_v15 = vpop.permute.xlu1 %6417 }
 0x4e1   :  { %v5277_v24 = vsel %vm1886_vm3, %v19758_v32, -inf  ;;  %22748 = vst [vmem:[#allocation48_spill] sm:$0xff] %v19776_v15 }
 0x4e2   :  { %5278 = vmax.xlane.f32.xlu1 %v5277_v24  ;;  %v19764_v51 = vpop.f32.mrf.mxu0  ;;  %v19778_v16 = vpop.permute.xlu0 %6415 }
 0x4e3   :  { %v5274_v9 = vsel %vm1886_vm3, %v19764_v51, -inf  ;;  %22749 = vst [vmem:[#allocation93_spill] sm:$0xff] %v19778_v16 }
 0x4e4   :  { %5275 = vmax.xlane.f32.xlu0 %v5274_v9  ;;  %v19780_v26 = vpop.permute.xlu1 %6504 }
 0x4e5   :  { %22750 = vst [vmem:[#allocation92_spill] sm:$0xff] %v19780_v26 }
 0x4e6   :  { %v19782_v24 = vpop.permute.xlu0 %6502 }
 0x4e7   :  { %22751 = vst [vmem:[#allocation88_spill] sm:$0xff] %v19782_v24 }
 0x4e8   :  { %v19784_v54 = vpop.permute.xlu1 %6591 }
 0x4e9   :  { %22752 = vst [vmem:[#allocation50_spill] sm:$0xff] %v19784_v54 }
 0x4ea   :  { %v19786_v21 = vpop.permute.xlu0 %6589 }
 0x4eb   :  { %22753 = vst [vmem:[#allocation52_spill] sm:$0xff] %v19786_v21 }
 0x4ec   :  { %v19788_v33 = vpop.permute.xlu1 %6678 }
 0x4ed   :  { %22754 = vst [vmem:[#allocation95_spill] sm:$0xff] %v19788_v33 }
 0x4ee   :  { %v19790_v9 = vpop.permute.xlu0 %6676 }
 0x4ef   :  { %22755 = vst [vmem:[#allocation94_spill] sm:$0xff] %v19790_v9 }
 0x4f0   :  { %v19792_v20 = vpop.permute.xlu1 %6765 }
 0x4f1   :  { %22756 = vst [vmem:[#allocation96_spill] sm:$0xff] %v19792_v20 }
 0x509   :  { %v5189_v11 = vpop.xlane.xlu0 %5188 }
 0x50a   :  { %v5281_v18 = vsub.f32 %v19598_v4, %v5189_v11 }
 0x50b   :  { %v5186_v15 = vpop.xlane.xlu1 %5185 }
 0x50c   :  { %v5314_v14 = vmul.f32 1.442695, %v5281_v18  ;;  %v5280_v16 = vsub.f32 %v19602_v31, %v5186_v15 }
 0x50e   :  { %17602 = vpow2.f32 %v5314_v14  ;;  %v5312_v26 = vmul.f32 1.442695, %v5280_v16 }
 0x510   :  { %17604 = vpow2.f32 %v5312_v26 }
 0x511   :  { %v5201_v24 = vpop.xlane.xlu1 %5200 }
 0x512   :  { %v5285_v54 = vsub.f32 %v19610_v59, %v5201_v24 }
 0x513   :  { %v5198_v21 = vpop.xlane.xlu0 %5197 }
 0x514   :  { %v5322_v19 = vmul.f32 1.442695, %v5285_v54  ;;  %v5284_v33 = vsub.f32 %v19616_v22, %v5198_v21 }
 0x516   :  { %17606 = vpow2.f32 %v5322_v19  ;;  %v5320_v9 = vmul.f32 1.442695, %v5284_v33 }
 0x518   :  { %17608 = vpow2.f32 %v5320_v9 }
 0x519   :  { %v5213_v20 = vpop.xlane.xlu1 %5212 }
 0x51a   :  { %v5289_v11 = vsub.f32 %v19624_v42, %v5213_v20 }
 0x51b   :  { %v19799_v4 = vpop.eup %17602  ;;  %v5210_v18 = vpop.xlane.xlu0 %5209 }
 0x51c   :  { %v5330_v15 = vmul.f32 1.442695, %v5289_v11  ;;  %v5288_v16 = vsub.f32 %v19630_v62, %v5210_v18  ;;  %v5379_v26 = vsel %vm1886_vm3, %v19799_v4, 0.0 }
 0x51d   :  { %v19804_v31 = vpop.eup %17604  ;;  %5380 = vadd.xlane.f32.xlu1 %v5379_v26 }
 0x51e   :  { %17610 = vpow2.f32 %v5330_v15  ;;  %v5328_v21 = vmul.f32 1.442695, %v5288_v16  ;;  %v5376_v33 = vsel %vm1886_vm3, %v19804_v31, 0.0 }
 0x51f   :  { %5377 = vadd.xlane.f32.xlu0 %v5376_v33 }
 0x520   :  { %17612 = vpow2.f32 %v5328_v21 }
 0x523   :  { %v19808_v20 = vpop.eup %17606 }
 0x524   :  { %v5391_v19 = vsel %vm1886_vm3, %v19808_v20, 0.0 }
 0x525   :  { %v19812_v54 = vpop.eup %17608  ;;  %5392 = vadd.xlane.f32.xlu1 %v5391_v19 }
 0x526   :  { %v5388_v59 = vsel %vm1886_vm3, %v19812_v54, 0.0 }
 0x527   :  { %5389 = vadd.xlane.f32.xlu0 %v5388_v59 }
 0x52b   :  { %v19816_v22 = vpop.eup %17610 }
 0x52c   :  { %v5403_v42 = vsel %vm1886_vm3, %v19816_v22, 0.0 }
 0x52d   :  { %v19820_v62 = vpop.eup %17612  ;;  %5404 = vadd.xlane.f32.xlu1 %v5403_v42 }
 0x52e   :  { %v5400_v14 = vsel %vm1886_vm3, %v19820_v62, 0.0 }
 0x52f   :  { %5401 = vadd.xlane.f32.xlu0 %v5400_v14 }
 0x533   :  { %v5195_v24 = vpop.xlane.xlu1 %5194 }
 0x534   :  { %v5283_v9 = vsub.f32 %v19650_v10, %v5195_v24 }
 0x535   :  { %v5192_v11 = vpop.xlane.xlu0 %5191 }
 0x536   :  { %v5318_v18 = vmul.f32 1.442695, %v5283_v9  ;;  %v5282_v15 = vsub.f32 %v19654_v38, %v5192_v11 }
 0x537   :  { %v5225_v16 = vpop.xlane.xlu1 %5224 }
 0x538   :  { %17614 = vpow2.f32 %v5318_v18  ;;  %v5316_v26 = vmul.f32 1.442695, %v5282_v15  ;;  %v5293_v21 = vsub.f32 %v19648_v6, %v5225_v16 }
 0x539   :  { %v5222_v33 = vpop.xlane.xlu0 %5221 }
 0x53a   :  { %17616 = vpow2.f32 %v5316_v26  ;;  %v5338_v19 = vmul.f32 1.442695, %v5293_v21  ;;  %v5292_v59 = vsub.f32 %v19658_v25, %v5222_v33 }
 0x53b   :  { %v5207_v42 = vpop.xlane.xlu1 %5206 }
 0x53c   :  { %17618 = vpow2.f32 %v5338_v19  ;;  %v5336_v14 = vmul.f32 1.442695, %v5292_v59  ;;  %v5287_v2 = vsub.f32 %v19666_v1, %v5207_v42 }
 0x53d   :  { %v5204_v10 = vpop.xlane.xlu0 %5203 }
 0x53e   :  { %17620 = vpow2.f32 %v5336_v14  ;;  %v5326_v24 = vmul.f32 1.442695, %v5287_v2  ;;  %v5286_v38 = vsub.f32 %v19670_v50, %v5204_v10 }
 0x53f   :  { %v5237_v9 = vpop.xlane.xlu1 %5236 }
 0x540   :  { %17622 = vpow2.f32 %v5326_v24  ;;  %v5324_v11 = vmul.f32 1.442695, %v5286_v38  ;;  %v5297_v6 = vsub.f32 %v19664_v45, %v5237_v9 }
 0x541   :  { %v5234_v18 = vpop.xlane.xlu0 %5233 }
 0x542   :  { %17624 = vpow2.f32 %v5324_v11  ;;  %v5346_v15 = vmul.f32 1.442695, %v5297_v6  ;;  %v5296_v25 = vsub.f32 %v19674_v28, %v5234_v18 }
 0x543   :  { %v5219_v16 = vpop.xlane.xlu1 %5218 }
 0x544   :  { %17626 = vpow2.f32 %v5346_v15  ;;  %v5344_v26 = vmul.f32 1.442695, %v5296_v25  ;;  %v5291_v1 = vsub.f32 %v19682_v53, %v5219_v16 }
 0x545   :  { %v19833_v21 = vpop.eup %17614  ;;  %v5216_v2 = vpop.xlane.xlu0 %5215 }
 0x546   :  { %17628 = vpow2.f32 %v5344_v26  ;;  %v5334_v50 = vmul.f32 1.442695, %v5291_v1  ;;  %v5290_v33 = vsub.f32 %v19686_v55, %v5216_v2  ;;  %v5385_v45 = vsel %vm1886_vm3, %v19833_v21, 0.0 }
 0x547   :  { %v19838_v19 = vpop.eup %17616  ;;  %5386 = vadd.xlane.f32.xlu1 %v5385_v45  ;;  %v5249_v59 = vpop.xlane.xlu1 %5248 }
 0x548   :  { %v5332_v28 = vmul.f32 1.442695, %v5290_v33  ;;  %v5301_v42 = vsub.f32 %v19680_v35, %v5249_v59  ;;  %v5382_v53 = vsel %vm1886_vm3, %v19838_v19, 0.0  ;;  %17630 = vpow2.f32 %v5334_v50 }
 0x549   :  { %v19843_v14 = vpop.eup %17618  ;;  %v5246_v10 = vpop.xlane.xlu0 %5245  ;;  %5383 = vadd.xlane.f32.xlu0 %v5382_v53 }
 0x54a   :  { %17632 = vpow2.f32 %v5332_v28  ;;  %v5354_v55 = vmul.f32 1.442695, %v5301_v42  ;;  %v5300_v24 = vsub.f32 %v19690_v56, %v5246_v10  ;;  %v5415_v38 = vsel %vm1886_vm3, %v19843_v14, 0.0 }
 0x54b   :  { %v19848_v9 = vpop.eup %17620  ;;  %5416 = vadd.xlane.f32.xlu1 %v5415_v38  ;;  %v5231_v11 = vpop.xlane.xlu1 %5230 }
 0x54c   :  { %v5352_v35 = vmul.f32 1.442695, %v5300_v24  ;;  %v5295_v6 = vsub.f32 %v19698_v43, %v5231_v11  ;;  %v5412_v18 = vsel %vm1886_vm3, %v19848_v9, 0.0  ;;  %17634 = vpow2.f32 %v5354_v55 }
 0x54d   :  { %v19853_v15 = vpop.eup %17622  ;;  %v5228_v25 = vpop.xlane.xlu0 %5227  ;;  %5413 = vadd.xlane.f32.xlu0 %v5412_v18 }
 0x54e   :  { %17636 = vpow2.f32 %v5352_v35  ;;  %v5342_v56 = vmul.f32 1.442695, %v5295_v6  ;;  %v5294_v16 = vsub.f32 %v19702_v8, %v5228_v25  ;;  %v5397_v26 = vsel %vm1886_vm3, %v19853_v15, 0.0 }
 0x54f   :  { %v19858_v1 = vpop.eup %17624  ;;  %5398 = vadd.xlane.f32.xlu1 %v5397_v26  ;;  %v5261_v2 = vpop.xlane.xlu1 %5260 }
 0x550   :  { %v5340_v43 = vmul.f32 1.442695, %v5294_v16  ;;  %v5305_v50 = vsub.f32 %v19696_v39, %v5261_v2  ;;  %v5394_v33 = vsel %vm1886_vm3, %v19858_v1, 0.0  ;;  %17638 = vpow2.f32 %v5342_v56 }
 0x551   :  { %v19863_v45 = vpop.eup %17626  ;;  %v5258_v59 = vpop.xlane.xlu0 %5257  ;;  %5395 = vadd.xlane.f32.xlu0 %v5394_v33 }
 0x552   :  { %17640 = vpow2.f32 %v5340_v43  ;;  %v5362_v8 = vmul.f32 1.442695, %v5305_v50  ;;  %v5304_v28 = vsub.f32 %v19706_v12, %v5258_v59  ;;  %v5427_v42 = vsel %vm1886_vm3, %v19863_v45, 0.0 }
 0x553   :  { %v19868_v53 = vpop.eup %17628  ;;  %5428 = vadd.xlane.f32.xlu1 %v5427_v42  ;;  %v5243_v10 = vpop.xlane.xlu1 %5242 }
 0x554   :  { %v5360_v39 = vmul.f32 1.442695, %v5304_v28  ;;  %v5299_v55 = vsub.f32 %v19712_v37, %v5243_v10  ;;  %17642 = vpow2.f32 %v5362_v8  ;;  %v5424_v12 = vsel %vm1886_vm3, %v19868_v53, 0.0 }
 0x555   :  { %v5240_v24 = vpop.xlane.xlu0 %5239  ;;  %v19871_v38 = vpop.eup %17630 }
 0x556   :  { %17644 = vpow2.f32 %v5360_v39  ;;  %v5350_v11 = vmul.f32 1.442695, %v5299_v55  ;;  %v5298_v35 = vsub.f32 %v19720_v34, %v5240_v24  ;;  %v5409_v43 = vsel %vm1886_vm3, %v19871_v38, 0.0 }
 0x557   :  { %v19876_v6 = vpop.eup %17632  ;;  %5425 = vadd.xlane.f32.xlu1 %v5424_v12  ;;  %v5273_v18 = vpop.xlane.xlu1 %5272 }
 0x558   :  { %v5348_v25 = vmul.f32 1.442695, %v5298_v35  ;;  %v5309_v56 = vsub.f32 %v19714_v63, %v5273_v18  ;;  %v5406_v37 = vsel %vm1886_vm3, %v19876_v6, 0.0  ;;  %17646 = vpow2.f32 %v5350_v11 }
 0x559   :  { %v5270_v16 = vpop.xlane.xlu0 %5269  ;;  %5407 = vadd.xlane.f32.xlu0 %v5406_v37  ;;  %v19881_v26 = vpop.eup %17634 }
 0x55a   :  { %17648 = vpow2.f32 %v5348_v25  ;;  %v5370_v34 = vmul.f32 1.442695, %v5309_v56  ;;  %v5308_v2 = vsub.f32 %v19724_v0, %v5270_v16  ;;  %v5439_v39 = vsel %vm1886_vm3, %v19881_v26, 0.0 }
 0x55b   :  { %v19886_v50 = vpop.eup %17636  ;;  %5410 = vadd.xlane.f32.xlu1 %v5409_v43  ;;  %v5255_v33 = vpop.xlane.xlu1 %5254 }
 0x55c   :  { %v5368_v63 = vmul.f32 1.442695, %v5308_v2  ;;  %v5303_v59 = vsub.f32 %v19732_v7, %v5255_v33  ;;  %v5436_v8 = vsel %vm1886_vm3, %v19886_v50, 0.0  ;;  %17650 = vpow2.f32 %v5370_v34 }
 0x55d   :  { %v5252_v28 = vpop.xlane.xlu0 %5251  ;;  %5437 = vadd.xlane.f32.xlu0 %v5436_v8  ;;  %v19891_v42 = vpop.eup %17638 }
 0x55e   :  { %17652 = vpow2.f32 %v5368_v63  ;;  %v5358_v0 = vmul.f32 1.442695, %v5303_v59  ;;  %v5302_v10 = vsub.f32 %v19738_v52, %v5252_v28  ;;  %v5421_v35 = vsel %vm1886_vm3, %v19891_v42, 0.0 }
 0x55f   :  { %v19896_v55 = vpop.eup %17640  ;;  %5440 = vadd.xlane.f32.xlu1 %v5439_v39 }
 0x560   :  { %v5356_v24 = vmul.f32 1.442695, %v5302_v10  ;;  %v5418_v7 = vsel %vm1886_vm3, %v19896_v55, 0.0  ;;  %17654 = vpow2.f32 %v5358_v0 }
 0x561   :  { %5419 = vadd.xlane.f32.xlu0 %v5418_v7  ;;  %v19900_v11 = vpop.eup %17642 }
 0x562   :  { %17656 = vpow2.f32 %v5356_v24  ;;  %v5451_v2 = vsel %vm1886_vm3, %v19900_v11, 0.0 }
 0x563   :  { %v19904_v12 = vpop.eup %17644  ;;  %5422 = vadd.xlane.f32.xlu1 %v5421_v35  ;;  %v5267_v52 = vpop.xlane.xlu1 %5266 }
 0x564   :  { %v5307_v18 = vsub.f32 %v19746_v29, %v5267_v52  ;;  %v5448_v25 = vsel %vm1886_vm3, %v19904_v12, 0.0 }
 0x565   :  { %v5264_v56 = vpop.xlane.xlu0 %5263  ;;  %5449 = vadd.xlane.f32.xlu0 %v5448_v25  ;;  %v19909_v37 = vpop.eup %17646 }
 0x566   :  { %v5366_v16 = vmul.f32 1.442695, %v5307_v18  ;;  %v5306_v34 = vsub.f32 %v19750_v30, %v5264_v56  ;;  %v5433_v59 = vsel %vm1886_vm3, %v19909_v37, 0.0 }
 0x567   :  { %v19914_v43 = vpop.eup %17648  ;;  %5452 = vadd.xlane.f32.xlu1 %v5451_v2 }
 0x568   :  { %17658 = vpow2.f32 %v5366_v16  ;;  %v5364_v33 = vmul.f32 1.442695, %v5306_v34  ;;  %v5430_v29 = vsel %vm1886_vm3, %v19914_v43, 0.0 }
 0x569   :  { %5431 = vadd.xlane.f32.xlu0 %v5430_v29  ;;  %v19918_v63 = vpop.eup %17650 }
 0x56a   :  { %22757 = vst [vmem:[#allocation97_spill] sm:$0xff] %v19918_v63  ;;  %17660 = vpow2.f32 %v5364_v33  ;;  %v5463_v0 = vsel %vm1886_vm3, %v19918_v63, 0.0 }
 0x56b   :  { %v19922_v8 = vpop.eup %17652  ;;  %5434 = vadd.xlane.f32.xlu1 %v5433_v59  ;;  %v5279_v25 = vpop.xlane.xlu1 %5278 }
 0x56c   :  { %v5460_v30 = vsel %vm1886_vm3, %v19922_v8, 0.0  ;;  %v5311_v16 = vsub.f32 %v19758_v32, %v5279_v25 }
 0x56d   :  { %5461 = vadd.xlane.f32.xlu0 %v5460_v30  ;;  %v19926_v28 = vpop.eup %17654  ;;  %v5276_v56 = vpop.xlane.xlu0 %5275 }
 0x56e   :  { %v5445_v24 = vsel %vm1886_vm3, %v19926_v28, 0.0  ;;  %v5310_v34 = vsub.f32 %v19764_v51, %v5276_v56  ;;  %v5374_v2 = vmul.f32 1.442695, %v5311_v16 }
 0x56f   :  { %v19930_v10 = vpop.eup %17656  ;;  %5464 = vadd.xlane.f32.xlu1 %v5463_v0 }
 0x570   :  { %v5442_v39 = vsel %vm1886_vm3, %v19930_v10, 0.0  ;;  %v5372_v33 = vmul.f32 1.442695, %v5310_v34  ;;  %17662 = vpow2.f32 %v5374_v2 }
 0x571   :  { %5443 = vadd.xlane.f32.xlu0 %v5442_v39 }
 0x572   :  { %17664 = vpow2.f32 %v5372_v33 }
 0x573   :  { %5446 = vadd.xlane.f32.xlu1 %v5445_v24 }
 0x575   :  { %v19936_v7 = vpop.eup %17658 }
 0x576   :  { %22758 = vst [vmem:[#allocation82_spill] sm:$0xff] %v19936_v7  ;;  %v5457_v35 = vsel %vm1886_vm3, %v19936_v7, 0.0 }
 0x577   :  { %v19940_v52 = vpop.eup %17660  ;;  %5458 = vadd.xlane.f32.xlu1 %v5457_v35 }
 0x578   :  { %v5454_v18 = vsel %vm1886_vm3, %v19940_v52, 0.0 }
 0x579   :  { %5455 = vadd.xlane.f32.xlu0 %v5454_v18 }
 0x57d   :  { %v19950_v59 = vpop.eup %17662 }
 0x57e   :  { %22759 = vst [vmem:[#allocation54_spill] sm:$0xff] %v19950_v59  ;;  %v5469_v39 = vsel %vm1886_vm3, %v19950_v59, 0.0 }
 0x57f   :  { %v19952_v0 = vpop.eup %17664 }
 0x580   :  { %22760 = vst [vmem:[#allocation75_spill] sm:$0xff] %v19952_v0  ;;  %v5466_v32 = vsel %vm1886_vm3, %v19952_v0, 0.0 }
 0x588   :  { %6852 = vrot.lane.b32.xlu1 %v22633_v49, %s18012_s24 }
 0x58f   :  { %6763 = vrot.lane.b32.xlu0 %v22634_v3, %s18012_s24 }
 0x5a6   :  { %v5381_v29 = vpop.xlane.xlu1 %5380 }
 0x5a7   :  { %17666 = vrcp.f32 %v5381_v29 }
 0x5a8   :  { %v5378_v30 = vpop.xlane.xlu0 %5377 }
 0x5a9   :  { %17668 = vrcp.f32 %v5378_v30 }
 0x5ac   :  { %5470 = vadd.xlane.f32.xlu1 %v5469_v39 }
 0x5ae   :  { %5467 = vadd.xlane.f32.xlu0 %v5466_v32  ;;  %v5393_v51 = vpop.xlane.xlu1 %5392 }
 0x5af   :  { %17670 = vrcp.f32 %v5393_v51 }
 0x5b0   :  { %v5390_v24 = vpop.xlane.xlu0 %5389 }
 0x5b1   :  { %17672 = vrcp.f32 %v5390_v24 }
 0x5b4   :  { %v17667_v35 = vpop.eup %17666 }
 0x5b5   :  { %v5505_v18 = vmul.f32 %v17667_v35, %v5381_v29 }
 0x5b6   :  { %v17669_v25 = vpop.eup %17668  ;;  %v5405_v56 = vpop.xlane.xlu1 %5404 }
 0x5b7   :  { %v5537_v16 = vsub.f32 2.0, %v5505_v18  ;;  %v5504_v34 = vmul.f32 %v17669_v25, %v5378_v30  ;;  %17674 = vrcp.f32 %v5405_v56  ;;  %v22763_v18 = vld [vmem:[#allocation12_spill] sm:$0xff] }
 0x5b8   :  { %v5402_v2 = vpop.xlane.xlu0 %5401 }
 0x5b9   :  { %v5536_v33 = vsub.f32 2.0, %v5504_v34  ;;  %17676 = vrcp.f32 %v5402_v2  ;;  %v5569_v59 = vmul.f32 %v17667_v35, %v5537_v16  ;;  %v22764_v16 = vld [vmem:[#allocation14_spill] sm:$0xff] }
 0x5bb   :  { %v5568_v39 = vmul.f32 %v17669_v25, %v5536_v33  ;;  %v5601_v29 = vmul.f32 %v19799_v4, %v5569_v59 }
 0x5bc   :  { %v17671_v63 = vpop.eup %17670 }
 0x5bd   :  { %v5509_v3 = vmul.f32 %v17671_v63, %v5393_v51  ;;  %6939 = vrot.lane.b32.xlu1 %v22637_v57, %s18012_s24  ;;  %v5600_v32 = vmul.f32 %v19804_v31, %v5568_v39 }
 0x5be   :  { %v17673_v0 = vpop.eup %17672 }
 0x5bf   :  { %v5541_v49 = vsub.f32 2.0, %v5509_v3  ;;  %v5508_v7 = vmul.f32 %v17673_v0, %v5390_v24  ;;  %16702 = vmatprep.mubr.msk.f32.mxu1 %vm1886_vm3, %v5600_v32 }
 0x5c0   :  { %16703 = vmatmul.mubr.msk.f32.vlgmr.msra.gmra.mxu1 %vm1886_vm3, %v5601_v29 }
 0x5c1   :  { %v5540_v30 = vsub.f32 2.0, %v5508_v7  ;;  %7674 = vrot.lane.b32.xlu1 %v22647_v47, %s18013_s25  ;;  %16713 = vmatpush3.msra.mxu1 %v19546_v17  ;;  %v5573_v51 = vmul.f32 %v17671_v63, %v5541_v49 }
 0x5c2   :  { %16714 = vmatprep.subr.mxu1 %v19716_v61 }
 0x5c3   :  { %v5572_v31 = vmul.f32 %v17673_v0, %v5540_v30  ;;  %16715 = vmatpush3.msra.mxu1 %v19716_v61  ;;  %v5605_v49 = vmul.f32 %v19808_v20, %v5573_v51  ;;  %v22761_v0 = vld [vmem:[#allocation9_spill] sm:$0xff] }
 0x5c4   :  { %v17675_v4 = vpop.eup %17674  ;;  %6850 = vrot.lane.b32.xlu0 %v22638_v41, %s18012_s24  ;;  %16726 = vmatprep.subr.mxu1 %v19734_v60 }
 0x5c5   :  { %v5513_v3 = vmul.f32 %v17675_v4, %v5405_v56  ;;  %7765 = vrot.lane.b32.xlu1 %v22649_v44, %s18013_s25  ;;  %v5604_v7 = vmul.f32 %v19812_v54, %v5572_v31 }
 0x5c6   :  { %v17677_v59 = vpop.eup %17676 }
 0x5c7   :  { %v5545_v17 = vsub.f32 2.0, %v5513_v3  ;;  %v5512_v63 = vmul.f32 %v17677_v59, %v5402_v2  ;;  %16716 = vmatprep.mubr.msk.f32.mxu1 %vm1886_vm3, %v5604_v7 }
 0x5c8   :  { %6937 = vrot.lane.b32.xlu0 %v22644_v48, %s18012_s24  ;;  %16717 = vmatmul.mubr.msk.f32.vlgmr.msra.gmra.mxu1 %vm1886_vm3, %v5605_v49 }
 0x5c9   :  { %v5544_v61 = vsub.f32 2.0, %v5512_v63  ;;  %7670 = vrot.lane.b32.xlu1 %v22647_v47, %s18014_s26  ;;  %16727 = vmatpush3.msra.mxu1 %v19734_v60  ;;  %v5577_v54 = vmul.f32 %v17675_v4, %v5545_v17 }
 0x5ca   :  { %16728 = vmatprep.subr.mxu1 %v19742_v40 }
 0x5cb   :  { %v5576_v20 = vmul.f32 %v17677_v59, %v5544_v61  ;;  %16729 = vmatpush3.msra.mxu1 %v19742_v40  ;;  %v5609_v35 = vmul.f32 %v19816_v22, %v5577_v54  ;;  %v22762_v22 = vld [vmem:[#allocation8_spill] sm:$0xff] }
 0x5cc   :  { %7672 = vrot.lane.b32.xlu0 %v22645_v13, %s18013_s25  ;;  %16740 = vmatprep.subr.mxu1 %v19756_v27 }
 0x5cd   :  { %7856 = vrot.lane.b32.xlu1 %v22761_v0, %s18013_s25  ;;  %v5608_v24 = vmul.f32 %v19820_v62, %v5576_v20 }
 0x5cf   :  { %16730 = vmatprep.mubr.msk.f32.mxu1 %vm1886_vm3, %v5608_v24 }
 0x5d0   :  { %7668 = vrot.lane.b32.xlu0 %v22645_v13, %s18014_s26  ;;  %v5387_v60 = vpop.xlane.xlu1 %5386  ;;  %16731 = vmatmul.mubr.msk.f32.vlgmr.msra.gmra.mxu1 %vm1886_vm3, %v5609_v35 }
 0x5d1   :  { %17678 = vrcp.f32 %v5387_v60  ;;  %7761 = vrot.lane.b32.xlu1 %v22649_v44, %s18014_s26  ;;  %16741 = vmatpush3.msra.mxu1 %v19756_v27 }
 0x5d2   :  { %v5384_v40 = vpop.xlane.xlu0 %5383  ;;  %16742 = vmatprep.subr.mxu1 %v19760_v23 }
 0x5d3   :  { %17680 = vrcp.f32 %v5384_v40  ;;  %16743 = vmatpush3.msra.mxu1 %v19760_v23 }
 0x5d4   :  { %7763 = vrot.lane.b32.xlu0 %v22762_v22, %s18013_s25  ;;  %16754 = vmatprep.subr.mxu1 %v19772_v58  ;;  %v5417_v62 = vpop.xlane.xlu1 %5416 }
 0x5d5   :  { %17682 = vrcp.f32 %v5417_v62  ;;  %7947 = vrot.lane.b32.xlu1 %v22763_v18, %s18013_s25 }
 0x5d6   :  { %v5414_v25 = vpop.xlane.xlu0 %5413 }
 0x5d7   :  { %17684 = vrcp.f32 %v5414_v25 }
 0x5d8   :  { %7759 = vrot.lane.b32.xlu0 %v22762_v22, %s18014_s26  ;;  %v5399_v27 = vpop.xlane.xlu1 %5398 }
 0x5d9   :  { %17686 = vrcp.f32 %v5399_v27  ;;  %7852 = vrot.lane.b32.xlu1 %v22761_v0, %s18014_s26 }
 0x5da   :  { %v5396_v23 = vpop.xlane.xlu0 %5395 }
 0x5db   :  { %17688 = vrcp.f32 %v5396_v23 }
 0x5dc   :  { %7854 = vrot.lane.b32.xlu0 %v22655_v5, %s18013_s25  ;;  %v5429_v56 = vpop.xlane.xlu1 %5428 }
 0x5dd   :  { %17690 = vrcp.f32 %v5429_v56  ;;  %8038 = vrot.lane.b32.xlu1 %v22764_v16, %s18013_s25 }
 0x5de   :  { %v17679_v34 = vpop.eup %17678 }
 0x5df   :  { %v5507_v2 = vmul.f32 %v17679_v34, %v5387_v60 }
 0x5e0   :  { %v17681_v33 = vpop.eup %17680  ;;  %7850 = vrot.lane.b32.xlu0 %v22655_v5, %s18014_s26  ;;  %v5426_v39 = vpop.xlane.xlu1 %5425 }
 0x5e1   :  { %v5539_v32 = vsub.f32 2.0, %v5507_v2  ;;  %v5506_v29 = vmul.f32 %v17681_v33, %v5384_v40  ;;  %17692 = vrcp.f32 %v5426_v39  ;;  %7943 = vrot.lane.b32.xlu1 %v22763_v18, %s18014_s26 }
 0x5e2   :  { %v17683_v30 = vpop.eup %17682  ;;  %v5408_v51 = vpop.xlane.xlu0 %5407 }
 0x5e3   :  { %v5538_v31 = vsub.f32 2.0, %v5506_v29  ;;  %v5517_v4 = vmul.f32 %v17683_v30, %v5417_v62  ;;  %17694 = vrcp.f32 %v5408_v51  ;;  %v5571_v7 = vmul.f32 %v17679_v34, %v5539_v32 }
 0x5e4   :  { %v17685_v3 = vpop.eup %17684  ;;  %7945 = vrot.lane.b32.xlu0 %v22657_v46, %s18013_s25  ;;  %v20020_v59 = vpop.xlane.xlu1 %5410 }
 0x5e5   :  { %v5570_v49 = vmul.f32 %v17681_v33, %v5538_v31  ;;  %v5549_v17 = vsub.f32 2.0, %v5517_v4  ;;  %v5516_v63 = vmul.f32 %v17685_v3, %v5414_v25  ;;  %8129 = vrot.lane.b32.xlu1 %v22654_v36, %s18013_s25  ;;  %17696 = vrcp.f32 %v20020_v59 }
 0x5e6   :  { %v17687_v61 = vpop.eup %17686  ;;  %v20025_v54 = vpop.xlane.xlu0 %5437  ;;  %v5603_v60 = vmul.f32 %v19833_v21, %v5571_v7 }
 0x5e7   :  { %v5548_v20 = vsub.f32 2.0, %v5516_v63  ;;  %v5511_v24 = vmul.f32 %v17687_v61, %v5399_v27  ;;  %17698 = vrcp.f32 %v20025_v54  ;;  %v5602_v62 = vmul.f32 %v19838_v19, %v5570_v49  ;;  %v22765_v19 = vld [vmem:[#allocation41_spill] sm:$0xff]  ;;  %v22767_v49 = vld [vmem:[#allocation44_spill] sm:$0xff] }
 0x5e8   :  { %v17689_v35 = vpop.eup %17688  ;;  %7941 = vrot.lane.b32.xlu0 %v22657_v46, %s18014_s26  ;;  %v20031_v40 = vpop.xlane.xlu1 %5440  ;;  %v5581_v25 = vmul.f32 %v17683_v30, %v5549_v17 }
 0x5e9   :  { %v5580_v34 = vmul.f32 %v17685_v3, %v5548_v20  ;;  %v5543_v2 = vsub.f32 2.0, %v5511_v24  ;;  %v5510_v33 = vmul.f32 %v17689_v35, %v5396_v23  ;;  %8034 = vrot.lane.b32.xlu1 %v22764_v16, %s18014_s26  ;;  %17700 = vrcp.f32 %v20031_v40  ;;  %16709 = vmatprep.mubr.msk.f32.mxu0 %vm1886_vm3, %v5602_v62  ;;  %v22766_v23 = vld [vmem:[#allocation15_spill] sm:$0xff]  ;;  %v22769_v24 = vld [vmem:[#allocation85_spill] sm:$0xff] }
 0x5ea   :  { %v17691_v27 = vpop.eup %17690  ;;  %v20038_v21 = vpop.xlane.xlu0 %5419  ;;  %16710 = vmatmul.mubr.msk.f32.vlgmr.msra.gmra.mxu0 %vm1886_vm3, %v5603_v60  ;;  %v5613_v4 = vmul.f32 %v19843_v14, %v5581_v25  ;;  %v22770_v25 = vld [vmem:[#allocation72_spill] sm:$0xff] }
 0x5eb   :  { %v5542_v32 = vsub.f32 2.0, %v5510_v33  ;;  %v5521_v29 = vmul.f32 %v17691_v27, %v5429_v56  ;;  %17702 = vrcp.f32 %v20038_v21  ;;  %16720 = vmatpush3.msra.mxu0 %v22765_v19  ;;  %v5612_v31 = vmul.f32 %v19848_v9, %v5580_v34  ;;  %v22768_v56 = vld [vmem:[#allocation18_spill] sm:$0xff] }
 0x5ec   :  { %8036 = vrot.lane.b32.xlu0 %v22766_v23, %s18013_s25  ;;  %v20045_v30 = vpop.xlane.xlu1 %5422  ;;  %v5575_v3 = vmul.f32 %v17687_v61, %v5543_v2  ;;  %16721 = vmatprep.subr.mxu0 %v22767_v49 }
 0x5ed   :  { %v5574_v7 = vmul.f32 %v17689_v35, %v5542_v32  ;;  %17704 = vrcp.f32 %v20045_v30  ;;  %8220 = vrot.lane.b32.xlu1 %v22768_v56, %s18013_s25  ;;  %v5553_v63 = vsub.f32 2.0, %v5521_v29  ;;  %16722 = vmatpush3.msra.mxu0 %v22767_v49 }
 0x5ee   :  { %v17693_v17 = vpop.eup %17692  ;;  %16744 = vmatprep.mubr.msk.f32.mxu1 %vm1886_vm3, %v5612_v31  ;;  %v20055_v20 = vpop.xlane.xlu0 %5449  ;;  %16733 = vmatprep.subr.mxu0 %v22769_v24  ;;  %v5607_v60 = vmul.f32 %v19853_v15, %v5575_v3  ;;  %v22771_v15 = vld [vmem:[#allocation92_spill] sm:$0xff] }
 0x5ef   :  { %v5520_v9 = vmul.f32 %v17693_v17, %v5426_v39  ;;  %17706 = vrcp.f32 %v20055_v20  ;;  %16745 = vmatmul.mubr.msk.f32.vlgmr.msra.gmra.mxu1 %vm1886_vm3, %v5613_v4  ;;  %v5606_v14 = vmul.f32 %v19858_v1, %v5574_v7  ;;  %v5585_v1 = vmul.f32 %v17691_v27, %v5553_v63  ;;  %v22772_v27 = vld [vmem:[#allocation17_spill] sm:$0xff]  ;;  %v22773_v4 = vld [vmem:[#allocation84_spill] sm:$0xff] }
 0x5f0   :  { %v17695_v61 = vpop.eup %17694  ;;  %16755 = vmatpush3.msra.mxu1 %v19772_v58  ;;  %8032 = vrot.lane.b32.xlu0 %v22766_v23, %s18014_s26  ;;  %v20064_v35 = vpop.xlane.xlu1 %5452  ;;  %v22774_v3 = vld [vmem:[#allocation20_spill] sm:$0xff] }
 0x5f1   :  { %v5552_v62 = vsub.f32 2.0, %v5520_v9  ;;  %v5514_v39 = vmul.f32 %v17695_v61, %v5408_v51  ;;  %16756 = vmatprep.subr.mxu1 %v22770_v25  ;;  %17708 = vrcp.f32 %v20064_v35  ;;  %8125 = vrot.lane.b32.xlu1 %v22654_v36, %s18014_s26 }
 0x5f2   :  { %16757 = vmatpush3.msra.mxu1 %v22770_v25  ;;  %16723 = vmatprep.mubr.msk.f32.mxu0 %vm1886_vm3, %v5606_v14  ;;  %v20073_v58 = vpop.xlane.xlu0 %5431  ;;  %v17697_v34 = vpop.eup %17696 }
 0x5f3   :  { %v5584_v2 = vmul.f32 %v17693_v17, %v5552_v62  ;;  %v5546_v33 = vsub.f32 2.0, %v5514_v39  ;;  %16768 = vmatprep.subr.mxu1 %v22771_v15  ;;  %17710 = vrcp.f32 %v20073_v58  ;;  %16724 = vmatmul.mubr.msk.f32.vlgmr.msra.gmra.mxu0 %vm1886_vm3, %v5607_v60  ;;  %v5515_v32 = vmul.f32 %v17697_v34, %v20020_v59 }
 0x5f4   :  { %v17699_v51 = vpop.eup %17698  ;;  %16734 = vmatpush3.msra.mxu0 %v22769_v24  ;;  %8127 = vrot.lane.b32.xlu0 %v22772_v27, %s18013_s25  ;;  %v20082_v29 = vpop.xlane.xlu1 %5434  ;;  %v5617_v59 = vmul.f32 %v19863_v45, %v5585_v1  ;;  %v22775_v24 = vld [vmem:[#allocation74_spill] sm:$0xff] }
 0x5f5   :  { %v5578_v19 = vmul.f32 %v17695_v61, %v5546_v33  ;;  %v5524_v31 = vmul.f32 %v17699_v51, %v20025_v54  ;;  %16735 = vmatprep.subr.mxu0 %v22773_v4  ;;  %17712 = vrcp.f32 %v20082_v29  ;;  %8311 = vrot.lane.b32.xlu1 %v22774_v3, %s18013_s25  ;;  %v5616_v7 = vmul.f32 %v19868_v53, %v5584_v2 }
 0x5f6   :  { %v5547_v49 = vsub.f32 2.0, %v5515_v32  ;;  %16736 = vmatpush3.msra.mxu0 %v22773_v4  ;;  %v20092_v17 = vpop.xlane.xlu0 %5461  ;;  %v17701_v63 = vpop.eup %17700 }
 0x5f7   :  { %v5556_v9 = vsub.f32 2.0, %v5524_v31  ;;  %16747 = vmatprep.subr.mxu0 %v22775_v24  ;;  %17714 = vrcp.f32 %v20092_v17  ;;  %16758 = vmatprep.mubr.msk.f32.mxu1 %vm1886_vm3, %v5616_v7  ;;  %v5610_v54 = vmul.f32 %v19876_v6, %v5578_v19  ;;  %v5525_v53 = vmul.f32 %v17701_v63, %v20031_v40  ;;  %v22776_v40 = vld [vmem:[#allocation88_spill] sm:$0xff]  ;;  %v22779_v7 = vld [vmem:[#allocation46_spill] sm:$0xff] }
 0x5f8   :  { %v17703_v14 = vpop.eup %17702  ;;  %v5579_v61 = vmul.f32 %v17697_v34, %v5547_v49  ;;  %8123 = vrot.lane.b32.xlu0 %v22772_v27, %s18014_s26  ;;  %16759 = vmatmul.mubr.msk.f32.vlgmr.msra.gmra.mxu1 %vm1886_vm3, %v5617_v59  ;;  %v20102_v45 = vpop.xlane.xlu1 %5464  ;;  %v22780_v59 = vld [vmem:[#allocation21_spill] sm:$0xff] }
 0x5f9   :  { %v5588_v60 = vmul.f32 %v17699_v51, %v5556_v9  ;;  %v5518_v62 = vmul.f32 %v17703_v14, %v20038_v21  ;;  %16769 = vmatpush3.msra.mxu1 %v22771_v15  ;;  %8216 = vrot.lane.b32.xlu1 %v22768_v56, %s18014_s26  ;;  %v5557_v25 = vsub.f32 2.0, %v5525_v53 }
 0x5fa   :  { %v17705_v6 = vpop.eup %17704  ;;  %v5611_v39 = vmul.f32 %v19871_v38, %v5579_v61  ;;  %16737 = vmatprep.mubr.msk.f32.mxu0 %vm1886_vm3, %v5610_v54  ;;  %16770 = vmatprep.subr.mxu1 %v22776_v40  ;;  %v20111_v1 = vpop.xlane.xlu0 %5443  ;;  %v22777_v38 = vld [vmem:[#allocation95_spill] sm:$0xff]  ;;  %v22781_v54 = vld [vmem:[#allocation48_spill] sm:$0xff] }
 0x5fb   :  { %v5550_v34 = vsub.f32 2.0, %v5518_v62  ;;  %v5519_v2 = vmul.f32 %v17705_v6, %v20045_v30  ;;  %17716 = vrcp.f32 %v20111_v1  ;;  %16771 = vmatpush3.msra.mxu1 %v22776_v40  ;;  %v5620_v21 = vmul.f32 %v19886_v50, %v5588_v60  ;;  %v22778_v30 = vld [vmem:[#allocation19_spill] sm:$0xff] }
 0x5fc   :  { %v17707_v33 = vpop.eup %17706  ;;  %v5589_v15 = vmul.f32 %v17701_v63, %v5557_v25  ;;  %16738 = vmatmul.mubr.msk.f32.vlgmr.msra.gmra.mxu0 %vm1886_vm3, %v5611_v39  ;;  %16782 = vmatprep.subr.mxu1 %v22777_v38  ;;  %v20119_v51 = vpop.xlane.xlu1 %5446 }
 0x5fd   :  { %v5582_v32 = vmul.f32 %v17703_v14, %v5550_v34  ;;  %v5551_v19 = vsub.f32 2.0, %v5519_v2  ;;  %v5528_v31 = vmul.f32 %v17707_v33, %v20055_v20  ;;  %16748 = vmatpush3.msra.mxu0 %v22775_v24  ;;  %8218 = vrot.lane.b32.xlu0 %v22778_v30, %s18013_s25  ;;  %17718 = vrcp.f32 %v20119_v51 }
 0x5fe   :  { %v17709_v50 = vpop.eup %17708  ;;  %v5621_v4 = vmul.f32 %v19881_v26, %v5589_v15  ;;  %16749 = vmatprep.subr.mxu0 %v22779_v7  ;;  %8402 = vrot.lane.b32.xlu1 %v22780_v59, %s18013_s25  ;;  %v22784_v15 = vld [vmem:[#allocation93_spill] sm:$0xff] }
 0x5ff   :  { %v5583_v49 = vmul.f32 %v17705_v6, %v5551_v19  ;;  %v5560_v63 = vsub.f32 2.0, %v5528_v31  ;;  %v5529_v9 = vmul.f32 %v17709_v50, %v20064_v35  ;;  %16750 = vmatpush3.msra.mxu0 %v22779_v7  ;;  %16772 = vmatprep.mubr.msk.f32.mxu1 %vm1886_vm3, %v5620_v21  ;;  %v5614_v20 = vmul.f32 %v19896_v55, %v5582_v32  ;;  %v22782_v55 = vld [vmem:[#allocation94_spill] sm:$0xff] }
 0x600   :  { %v17711_v24 = vpop.eup %17710  ;;  %16761 = vmatprep.subr.mxu0 %v22781_v54  ;;  %16773 = vmatmul.mubr.msk.f32.vlgmr.msra.gmra.mxu1 %vm1886_vm3, %v5621_v4  ;;  %v20136_v26 = vpop.xlane.xlu1 %5458 }
 0x601   :  { %v5615_v14 = vmul.f32 %v19891_v42, %v5583_v49  ;;  %v5592_v61 = vmul.f32 %v17707_v33, %v5560_v63  ;;  %v5561_v53 = vsub.f32 2.0, %v5529_v9  ;;  %v5522_v60 = vmul.f32 %v17711_v24, %v20073_v58  ;;  %16783 = vmatpush3.msra.mxu1 %v22777_v38  ;;  %8214 = vrot.lane.b32.xlu0 %v22778_v30, %s18014_s26  ;;  %v22785_v38 = vld [vmem:[#allocation23_spill] sm:$0xff]  ;;  %v22787_v9 = vld [vmem:[#allocation10_spill] sm:$0xff] }
 0x602   :  { %v17713_v35 = vpop.eup %17712  ;;  %16784 = vmatprep.subr.mxu1 %v22782_v55  ;;  %17720 = vrcp.f32 %v20136_v26  ;;  %8307 = vrot.lane.b32.xlu1 %v22774_v3, %s18014_s26  ;;  %v5456_v62 = vpop.xlane.xlu0 %5455 }
 0x603   :  { %v5593_v6 = vmul.f32 %v17709_v50, %v5561_v53  ;;  %v5554_v42 = vsub.f32 2.0, %v5522_v60  ;;  %v5523_v39 = vmul.f32 %v17713_v35, %v20082_v29  ;;  %16751 = vmatprep.mubr.msk.f32.mxu0 %vm1886_vm3, %v5614_v20  ;;  %16785 = vmatpush3.msra.mxu1 %v22782_v55  ;;  %17722 = vrcp.f32 %v5456_v62  ;;  %v22783_v29 = vld [vmem:[#allocation22_spill] sm:$0xff]  ;;  %v22788_v20 = vld [vmem:[#allocation52_spill] sm:$0xff] }
 0x604   :  { %v17715_v58 = vpop.eup %17714  ;;  %16752 = vmatmul.mubr.msk.f32.vlgmr.msra.gmra.mxu0 %vm1886_vm3, %v5615_v14  ;;  %v5624_v25 = vmul.f32 %v19904_v12, %v5592_v61  ;;  %v6853_v33 = vpop.permute.xlu1 %6852  ;;  %v22790_v53 = vld [vmem:[#allocation96_spill] sm:$0xff]  ;;  %17724 = vrcp.f32 %v20102_v45 }
 0x605   :  { %v5625_v40 = vmul.f32 %v19900_v11, %v5593_v6  ;;  %v5586_v34 = vmul.f32 %v17711_v24, %v5554_v42  ;;  %v5555_v2 = vsub.f32 2.0, %v5523_v39  ;;  %v5532_v21 = vmul.f32 %v17715_v58, %v20092_v17  ;;  %16762 = vmatpush3.msra.mxu0 %v22781_v54  ;;  %8309 = vrot.lane.b32.xlu0 %v22783_v29, %s18013_s25  ;;  %v22786_v17 = vld [vmem:[#allocation50_spill] sm:$0xff]  ;;  %v22789_v24 = vld [vmem:[#allocation25_spill] sm:$0xff] }
 0x606   :  { %16763 = vmatprep.subr.mxu0 %v22784_v15  ;;  %8493 = vrot.lane.b32.xlu1 %v22785_v38, %s18013_s25  ;;  %v6764_v42 = vpop.permute.xlu0 %6763 }
 0x607   :  { %v5587_v32 = vmul.f32 %v17713_v35, %v5555_v2  ;;  %v5564_v19 = vsub.f32 2.0, %v5532_v21  ;;  %16764 = vmatpush3.msra.mxu0 %v22784_v15  ;;  %16786 = vmatprep.mubr.msk.f32.mxu1 %vm1886_vm3, %v5624_v25  ;;  %v5618_v11 = vmul.f32 %v19914_v43, %v5586_v34  ;;  %v22795_v34 = vld [vmem:[#allocation29_spill] sm:$0xff]  ;;  %v22797_v2 = vld [vmem:[#allocation31_spill] sm:$0xff] }
 0x608   :  { %v17717_v12 = vpop.eup %17716  ;;  %16796 = vmatprep.subr.mxu1 %v6853_v33  ;;  %16775 = vmatprep.subr.mxu0 %v22786_v17  ;;  %v22799_v15 = vld [vmem:[#allocation33_spill] sm:$0xff] }
 0x609   :  { %v5619_v31 = vmul.f32 %v19909_v37, %v5587_v32  ;;  %v5596_v50 = vmul.f32 %v17715_v58, %v5564_v19  ;;  %v5526_v4 = vmul.f32 %v17717_v12, %v20111_v1  ;;  %16787 = vmatmul.mubr.msk.f32.vlgmr.msra.gmra.mxu1 %vm1886_vm3, %v5625_v40  ;;  %8305 = vrot.lane.b32.xlu0 %v22783_v29, %s18014_s26  ;;  %v22793_v58 = vld [vmem:[#allocation82_spill] sm:$0xff] }
 0x60a   :  { %v17719_v7 = vpop.eup %17718  ;;  %16797 = vmatpush3.msra.mxu1 %v6853_v33  ;;  %8398 = vrot.lane.b32.xlu1 %v22780_v59, %s18014_s26  ;;  %v22794_v40 = vld [vmem:[#allocation26_spill] sm:$0xff] }
 0x60b   :  { %v5558_v43 = vsub.f32 2.0, %v5526_v4  ;;  %v5527_v49 = vmul.f32 %v17719_v7, %v20119_v51  ;;  %16765 = vmatprep.mubr.msk.f32.mxu0 %vm1886_vm3, %v5618_v11  ;;  %v5628_v37 = vmul.f32 %v19922_v8, %v5596_v50  ;;  %v22798_v33 = vld [vmem:[#allocation30_spill] sm:$0xff]  ;;  %v22800_v11 = vld [vmem:[#allocation32_spill] sm:$0xff]  ;;  %v22801_v4 = vld [vmem:[#allocation97_spill] sm:$0xff] }
 0x60c   :  { %16766 = vmatmul.mubr.msk.f32.vlgmr.msra.gmra.mxu0 %vm1886_vm3, %v5619_v31 }
 0x60d   :  { %v5590_v1 = vmul.f32 %v17717_v12, %v5558_v43  ;;  %v5559_v63 = vsub.f32 2.0, %v5527_v49  ;;  %16776 = vmatpush3.msra.mxu0 %v22786_v17  ;;  %8400 = vrot.lane.b32.xlu0 %v22787_v9, %s18013_s25  ;;  %v7024_v43 = vld [vmem:[%s22344_s3 + $0x8] sm:$0xff] }
 0x60e   :  { %16777 = vmatprep.subr.mxu0 %v22788_v20  ;;  %8584 = vrot.lane.b32.xlu1 %v22789_v24, %s18013_s25 }
 0x60f   :  { %v17721_v54 = vpop.eup %17720  ;;  %v5591_v51 = vmul.f32 %v17719_v7, %v5559_v63  ;;  %16778 = vmatpush3.msra.mxu0 %v22788_v20  ;;  %16800 = vmatprep.mubr.msk.f32.mxu1 %vm1886_vm3, %v5628_v37  ;;  %v5622_v8 = vmul.f32 %v19930_v10, %v5590_v1  ;;  %v3727_v1 = vld [vmem:[%s22344_s3] sm:$0xff] }
 0x610   :  { %v17723_v14 = vpop.eup %17722  ;;  %v5531_v61 = vmul.f32 %v17721_v54, %v20136_v26  ;;  %16789 = vmatprep.subr.mxu0 %v22790_v53 }
 0x611   :  { %v5623_v60 = vmul.f32 %v19926_v28, %v5591_v51  ;;  %v5530_v35 = vmul.f32 %v17723_v14, %v5456_v62  ;;  %8396 = vrot.lane.b32.xlu0 %v22787_v9, %s18014_s26  ;;  %16779 = vmatprep.mubr.msk.f32.mxu0 %vm1886_vm3, %v5622_v8  ;;  %v22791_v28 = vld [vmem:[#allocation24_spill] sm:$0xff]  ;;  %v22792_v62 = vld [vmem:[#allocation27_spill] sm:$0xff]  ;;  %v17725_v21 = vpop.eup %17724 }
 0x612   :  { %v5563_v55 = vsub.f32 2.0, %v5531_v61  ;;  %8489 = vrot.lane.b32.xlu1 %v22785_v38, %s18014_s26  ;;  %v5533_v32 = vmul.f32 %v17725_v21, %v20102_v45 }
 0x613   :  { %v5562_v6 = vsub.f32 2.0, %v5530_v35  ;;  %16780 = vmatmul.mubr.msk.f32.vlgmr.msra.gmra.mxu0 %vm1886_vm3, %v5623_v60 }
 0x614   :  { %v5595_v10 = vmul.f32 %v17721_v54, %v5563_v55  ;;  %16790 = vmatpush3.msra.mxu0 %v22790_v53  ;;  %v5565_v19 = vsub.f32 2.0, %v5533_v32 }
 0x615   :  { %v5594_v26 = vmul.f32 %v17723_v14, %v5562_v6  ;;  %8491 = vrot.lane.b32.xlu0 %v22791_v28, %s18013_s25  ;;  %16791 = vmatprep.subr.mxu0 %v6764_v42 }
 0x616   :  { %8675 = vrot.lane.b32.xlu1 %v22792_v62, %s18013_s25  ;;  %16792 = vmatpush3.msra.mxu0 %v6764_v42  ;;  %v5627_v25 = vmul.f32 %v22793_v58, %v5595_v10  ;;  %v5597_v31 = vmul.f32 %v17725_v21, %v5565_v19  ;;  %v22803_v58 = vld [vmem:[#allocation54_spill] sm:$0xff]  ;;  %v22804_v19 = vld [vmem:[#allocation55_spill] sm:$0xff] }
 0x617   :  { %v5626_v39 = vmul.f32 %v19940_v52, %v5594_v26  ;;  %v22796_v52 = vld [vmem:[#allocation28_spill] sm:$0xff]  ;;  %v22802_v26 = vld [vmem:[#allocation75_spill] sm:$0xff] }
 0x618   :  { %v5629_v7 = vmul.f32 %v22801_v4, %v5597_v31  ;;  %v22805_v31 = vld [vmem:[#allocation49_spill] sm:$0xff] }
 0x619   :  { %8487 = vrot.lane.b32.xlu0 %v22791_v28, %s18014_s26  ;;  %16793 = vmatprep.mubr.msk.f32.mxu0 %vm1886_vm3, %v5626_v39 }
 0x61a   :  { %8580 = vrot.lane.b32.xlu1 %v22789_v24, %s18014_s26  ;;  %16794 = vmatmul.mubr.msk.f32.vlgmr.msra.gmra.mxu0 %vm1886_vm3, %v5627_v25 }
 0x61d   :  { %8582 = vrot.lane.b32.xlu0 %v22794_v40, %s18013_s25 }
 0x61e   :  { %8766 = vrot.lane.b32.xlu1 %v22795_v34, %s18013_s25 }
 0x621   :  { %8578 = vrot.lane.b32.xlu0 %v22794_v40, %s18014_s26 }
 0x622   :  { %8671 = vrot.lane.b32.xlu1 %v22792_v62, %s18014_s26 }
 0x625   :  { %8673 = vrot.lane.b32.xlu0 %v22796_v52, %s18013_s25 }
 0x626   :  { %8857 = vrot.lane.b32.xlu1 %v22797_v2, %s18013_s25 }
 0x629   :  { %8669 = vrot.lane.b32.xlu0 %v22796_v52, %s18014_s26 }
 0x62a   :  { %8762 = vrot.lane.b32.xlu1 %v22795_v34, %s18014_s26 }
 0x62d   :  { %8764 = vrot.lane.b32.xlu0 %v22798_v33, %s18013_s25 }
 0x62e   :  { %8948 = vrot.lane.b32.xlu1 %v22799_v15, %s18013_s25 }
 0x631   :  { %8760 = vrot.lane.b32.xlu0 %v22798_v33, %s18014_s26 }
 0x632   :  { %8853 = vrot.lane.b32.xlu1 %v22797_v2, %s18014_s26 }
 0x635   :  { %8855 = vrot.lane.b32.xlu0 %v22800_v11, %s18013_s25  ;;  %v5471_v12 = vpop.xlane.xlu1 %5470 }
 0x636   :  { %9039 = vrot.lane.b32.xlu1 %v22637_v57, %s18013_s25  ;;  %17726 = vrcp.f32 %v5471_v12 }
 0x637   :  { %v5468_v17 = vpop.xlane.xlu0 %5467 }
 0x638   :  { %17728 = vrcp.f32 %v5468_v17 }
 0x639   :  { %8851 = vrot.lane.b32.xlu0 %v22800_v11, %s18014_s26  ;;  %v6940_v45 = vpop.permute.xlu1 %6939 }
 0x63a   :  { %8944 = vrot.lane.b32.xlu1 %v22799_v15, %s18014_s26  ;;  %16803 = vmatprep.subr.mxu0 %v6940_v45 }
 0x63b   :  { %v6851_v50 = vpop.permute.xlu0 %6850  ;;  %16804 = vmatpush3.msra.mxu0 %v6940_v45  ;;  %v22806_v45 = vld [vmem:[#allocation89_spill] sm:$0xff] }
 0x63c   :  { %16798 = vmatprep.subr.mxu1 %v6851_v50 }
 0x63d   :  { %8946 = vrot.lane.b32.xlu0 %v22638_v41, %s18013_s25  ;;  %16799 = vmatpush3.msra.mxu1 %v6851_v50  ;;  %v20246_v49 = vpop.permute.xlu1 %7674 }
 0x63e   :  { %9033 = vrot.lane.b32.xlu1 %v22644_v48, %s18014_s26  ;;  %16801 = vmatmul.mubr.msk.f32.vlgmr.msra.gmra.mxu1 %vm1886_vm3, %v5629_v7  ;;  %v22807_v7 = vld [vmem:[#allocation57_spill] sm:$0xff] }
 0x63f   :  { %16810 = vmatprep.subr.mxu1 %v7024_v43  ;;  %v6938_v37 = vpop.permute.xlu0 %6937 }
 0x640   :  { %16811 = vmatpush3.msra.mxu1 %v7024_v43  ;;  %16805 = vmatprep.subr.mxu0 %v6938_v37  ;;  %v22808_v43 = vld [vmem:[#allocation47_spill] sm:$0xff] }
 0x641   :  { %8942 = vrot.lane.b32.xlu0 %v22638_v41, %s18014_s26  ;;  %16910 = vmatprep.subr.msk.mxu1 %vm467_vm2, %v20246_v49  ;;  %v7766_v63 = vpop.permute.xlu1 %7765 }
 0x642   :  { %9572 = vrot.lane.b32.xlu1 %v22645_v13, %s18015_s8  ;;  %16806 = vmatpush3.msra.mxu0 %v6938_v37 }
 0x643   :  { %v17727_v20 = vpop.eup %17726  ;;  %v20260_v54 = vpop.permute.xlu0 %7672  ;;  %16860 = vmatprep.subr.mxu0 %v3727_v1 }
 0x644   :  { %v5535_v51 = vmul.f32 %v17727_v20, %v5471_v12 }
 0x645   :  { %v17729_v8 = vpop.eup %17728  ;;  %9037 = vrot.lane.b32.xlu0 %v22644_v48, %s18013_s25  ;;  %v20264_v14 = vpop.permute.xlu1 %7670 }
 0x646   :  { %v5567_v61 = vsub.f32 2.0, %v5535_v51  ;;  %v5534_v53 = vmul.f32 %v17729_v8, %v5468_v17  ;;  %9748 = vrot.lane.b32.xlu1 %v22761_v0, %s18015_s8 }
 0x647   :  { %v20268_v60 = vpop.permute.xlu0 %7668 }
 0x648   :  { %v5566_v35 = vsub.f32 2.0, %v5534_v53  ;;  %v5599_v55 = vmul.f32 %v17727_v20, %v5567_v61  ;;  %v22810_v20 = vld [vmem:[#allocation63_spill] sm:$0xff]  ;;  %v22812_v53 = vld [vmem:[#allocation37_spill] sm:$0xff] }
 0x649   :  { %9035 = vrot.lane.b32.xlu0 %v22637_v57, %s18014_s26  ;;  %v20272_v6 = vpop.permute.xlu1 %7856  ;;  %v22811_v61 = vld [vmem:[#allocation91_spill] sm:$0xff] }
 0x64a   :  { %v5598_v10 = vmul.f32 %v17729_v8, %v5566_v35  ;;  %9835 = vrot.lane.b32.xlu1 %v22763_v18, %s18015_s8  ;;  %v5631_v25 = vmul.f32 %v22803_v58, %v5599_v55  ;;  %v22815_v58 = vld [vmem:[#allocation90_spill] sm:$0xff] }
 0x64b   :  { %v7764_v42 = vpop.permute.xlu0 %7763 }
 0x64c   :  { %v5630_v39 = vmul.f32 %v22802_v26, %v5598_v10  ;;  %v22813_v10 = vld [vmem:[#allocation39_spill] sm:$0xff] }
 0x64d   :  { %9574 = vrot.lane.b32.xlu0 %v22647_v47, %s18015_s8  ;;  %v20280_v21 = vpop.permute.xlu1 %7761 }
 0x64e   :  { %9922 = vrot.lane.b32.xlu1 %v22764_v16, %s18015_s8  ;;  %16807 = vmatprep.mubr.msk.f32.mxu0 %vm1886_vm3, %v5630_v39 }
 0x64f   :  { %v20285_v32 = vpop.permute.xlu0 %7759  ;;  %16808 = vmatmul.mubr.msk.f32.vlgmr.msra.gmra.mxu0 %vm1886_vm3, %v5631_v25  ;;  %v22816_v25 = vld [vmem:[#allocation80_spill] sm:$0xff] }
 0x650   :  { %16861 = vmatpush3.msra.mxu0 %v3727_v1  ;;  %16862 = vmatprep.mubr.msk.f32.mxu0 %vm7025_vm4, %v22804_v19 }
 0x651   :  { %9661 = vrot.lane.b32.xlu0 %v22649_v44, %s18015_s8  ;;  %16917 = vmatprep.subr.msk.mxu0 %vm467_vm2, %v7766_v63  ;;  %v20293_v12 = vpop.permute.xlu1 %7947 }
 0x652   :  { %10009 = vrot.lane.b32.xlu1 %v22654_v36, %s18015_s8 }
 0x653   :  { %v20297_v17 = vpop.permute.xlu0 %7854  ;;  %16863 = vmatmul.mubr.msk.f32.vlgmr.msra.gmra.mxu0 %vm7025_vm4, %v22805_v31 }
 0x654   :  { %16918 = vmatpush3.xpose.msk.msra.mxu0 %vm467_vm2, %v7766_v63  ;;  %16865 = vmatprep.mubr.msk.f32.mxu0 %vm7025_vm4, %v22806_v45  ;;  %v22809_v63 = vld [vmem:[#allocation43_spill] sm:$0xff]  ;;  %v22817_v45 = vld [vmem:[#allocation38_spill] sm:$0xff] }
 0x655   :  { %9659 = vrot.lane.b32.xlu0 %v22762_v22, %s18015_s8  ;;  %16919 = vmatprep.subr.msk.mxu0 %vm467_vm2, %v7764_v42  ;;  %v20307_v50 = vpop.permute.xlu1 %7852 }
 0x656   :  { %10096 = vrot.lane.b32.xlu1 %v22768_v56, %s18015_s8  ;;  %v22835_v56 = vld [vmem:[#allocation42_spill] sm:$0xff] }
 0x657   :  { %v20311_v4 = vpop.permute.xlu0 %7850  ;;  %16866 = vmatmul.mubr.msk.f32.gmra.mxu0 %vm7025_vm4, %v22807_v7  ;;  %v22818_v7 = vld [vmem:[#allocation71_spill] sm:$0xff] }
 0x658   :  { %16920 = vmatpush3.xpose.msk.msra.mxu0 %vm467_vm2, %v7764_v42  ;;  %16868 = vmatprep.mubr.msk.f32.mxu0 %vm7025_vm4, %v22808_v43  ;;  %v22814_v42 = vld [vmem:[#allocation65_spill] sm:$0xff] }
 0x659   :  { %9746 = vrot.lane.b32.xlu0 %v22655_v5, %s18015_s8  ;;  %16931 = vmatprep.subr.msk.mxu0 %vm467_vm2, %v20293_v12  ;;  %v20322_v37 = vpop.permute.xlu1 %8038 }
 0x65a   :  { %10183 = vrot.lane.b32.xlu1 %v22774_v3, %s18015_s8  ;;  %v22829_v3 = vld [vmem:[#allocation51_spill] sm:$0xff] }
 0x65b   :  { %v20326_v1 = vpop.permute.xlu0 %7945  ;;  %16869 = vmatmul.mubr.msk.f32.gmra.mxu0 %vm7025_vm4, %v22809_v63 }
 0x65c   :  { %16871 = vmatprep.mubr.msk.f32.mxu0 %vm7025_vm4, %v22810_v20  ;;  %v22819_v20 = vld [vmem:[#allocation67_spill] sm:$0xff] }
 0x65d   :  { %9833 = vrot.lane.b32.xlu0 %v22657_v46, %s18015_s8  ;;  %v20334_v51 = vpop.permute.xlu1 %7943 }
 0x65e   :  { %10270 = vrot.lane.b32.xlu1 %v22780_v59, %s18015_s8 }
 0x65f   :  { %v20338_v8 = vpop.permute.xlu0 %7941  ;;  %16872 = vmatmul.mubr.msk.f32.gmra.mxu0 %vm7025_vm4, %v22811_v61  ;;  %v22820_v61 = vld [vmem:[#allocation40_spill] sm:$0xff] }
 0x660   :  { %16874 = vmatprep.mubr.msk.f32.mxu0 %vm7025_vm4, %v22812_v53 }
 0x661   :  { %9920 = vrot.lane.b32.xlu0 %v22766_v23, %s18015_s8  ;;  %v20346_v35 = vpop.permute.xlu1 %8129 }
 0x662   :  { %10357 = vrot.lane.b32.xlu1 %v22785_v38, %s18015_s8 }
 0x663   :  { %v20350_v55 = vpop.permute.xlu0 %8036  ;;  %16875 = vmatmul.mubr.msk.f32.gmra.mxu0 %vm7025_vm4, %v22813_v10 }
 0x664   :  { %16877 = vmatprep.mubr.msk.f32.mxu0 %vm7025_vm4, %v22814_v42  ;;  %v22821_v42 = vld [vmem:[#allocation45_spill] sm:$0xff] }
 0x665   :  { %10007 = vrot.lane.b32.xlu0 %v22772_v27, %s18015_s8  ;;  %v20358_v26 = vpop.permute.xlu1 %8034 }
 0x666   :  { %10444 = vrot.lane.b32.xlu1 %v22789_v24, %s18015_s8 }
 0x667   :  { %v20362_v39 = vpop.permute.xlu0 %8032  ;;  %16878 = vmatmul.mubr.msk.f32.gmra.mxu0 %vm7025_vm4, %v22815_v58  ;;  %v22822_v58 = vld [vmem:[#allocation58_spill] sm:$0xff] }
 0x668   :  { %16880 = vmatprep.mubr.msk.f32.mxu0 %vm7025_vm4, %v22816_v25 }
 0x669   :  { %10094 = vrot.lane.b32.xlu0 %v22778_v30, %s18015_s8  ;;  %v20370_v19 = vpop.permute.xlu1 %8220 }
 0x66a   :  { %10531 = vrot.lane.b32.xlu1 %v22792_v62, %s18015_s8  ;;  %v22826_v62 = vld [vmem:[#allocation79_spill] sm:$0xff] }
 0x66b   :  { %v20374_v31 = vpop.permute.xlu0 %8127  ;;  %16881 = vmatmul.mubr.msk.f32.gmra.mxu0 %vm7025_vm4, %v22817_v45 }
 0x66c   :  { %16883 = vmatprep.mubr.msk.f32.mxu0 %vm7025_vm4, %v22818_v7  ;;  %v22823_v7 = vld [vmem:[#allocation69_spill] sm:$0xff] }
 0x66d   :  { %10181 = vrot.lane.b32.xlu0 %v22783_v29, %s18015_s8  ;;  %v20382_v43 = vpop.permute.xlu1 %8125 }
 0x66f   :  { %v8124_v63 = vpop.permute.xlu0 %8123  ;;  %16884 = vmatmul.mubr.msk.f32.gmra.mxu0 %vm7025_vm4, %v22819_v20  ;;  %v22824_v20 = vld [vmem:[#allocation5_spill] sm:$0xff] }
 0x670   :  { %16886 = vmatprep.mubr.msk.f32.mxu0 %vm7025_vm4, %v22820_v61 }
 0x671   :  { %10268 = vrot.lane.b32.xlu0 %v22787_v9, %s18015_s8  ;;  %v20390_v53 = vpop.permute.xlu1 %8311  ;;  %v22827_v9 = vld [vmem:[#allocation56_spill] sm:$0xff] }
 0x673   :  { %v20392_v10 = vpop.permute.xlu0 %8218  ;;  %16887 = vmatmul.mubr.msk.f32.gmra.mxu0 %vm7025_vm4, %v22821_v42 }
 0x674   :  { %16889 = vmatprep.mubr.msk.f32.mxu0 %vm7025_vm4, %v22822_v58  ;;  %v22825_v58 = vld [vmem:[#allocation6_spill] sm:$0xff] }
 0x675   :  { %10355 = vrot.lane.b32.xlu0 %v22791_v28, %s18015_s8  ;;  %v20400_v25 = vpop.permute.xlu1 %8216 }
 0x677   :  { %v20402_v45 = vpop.permute.xlu0 %8214  ;;  %16890 = vmatmul.mubr.msk.f32.gmra.mxu0 %vm7025_vm4, %v22823_v7  ;;  %v22828_v7 = vld [vmem:[#allocation53_spill] sm:$0xff] }
 0x678   :  { %16892 = vmatprep.mubr.msk.f32.mxu0 %vm7025_vm4, %v22824_v20 }
 0x679   :  { %10442 = vrot.lane.b32.xlu0 %v22794_v40, %s18015_s8  ;;  %v20410_v61 = vpop.permute.xlu1 %8402 }
 0x67b   :  { %v8310_v42 = vpop.permute.xlu0 %8309  ;;  %16893 = vmatmul.mubr.msk.f32.gmra.mxu0 %vm7025_vm4, %v22825_v58  ;;  %v22830_v58 = vld [vmem:[#allocation66_spill] sm:$0xff] }
 0x67c   :  { %16895 = vmatprep.mubr.msk.f32.mxu0 %vm7025_vm4, %v22826_v62 }
 0x67d   :  { %v8308_v28 = vpop.permute.xlu1 %8307 }
 0x67f   :  { %v8306_v24 = vpop.permute.xlu0 %8305  ;;  %16896 = vmatmul.mubr.msk.f32.gmra.mxu0 %vm7025_vm4, %v22827_v9 }
 0x680   :  { %16898 = vmatprep.mubr.msk.f32.mxu0 %vm7025_vm4, %v22828_v7  ;;  %v16704_v20 = vpop.f32.mrf.mxu1  ;;  %v22831_v7 = vld [vmem:[#allocation77_spill] sm:$0xff] }
 0x681   :  { %v8494_v38 = vpop.permute.xlu1 %8493 }
 0x682   :  { %v5710_v40 = vpop.f32.mrf.mxu1 }
 0x683   :  { %v20420_v29 = vpop.permute.xlu0 %8400  ;;  %16899 = vmatmul.mubr.msk.f32.gmra.mxu0 %vm7025_vm4, %v22829_v3  ;;  %16812 = vmatprep.mubr.msk.f32.mxu1 %vm7025_vm4, %v5710_v40  ;;  %v22832_v3 = vld [vmem:[#allocation61_spill] sm:$0xff] }
 0x684   :  { %16901 = vmatprep.mubr.msk.f32.mxu0 %vm7025_vm4, %v22830_v58  ;;  %16813 = vmatmul.mubr.msk.f32.vlgmr.msra.gmra.mxu1 %vm7025_vm4, %v16704_v20  ;;  %v22833_v20 = vld [vmem:[#allocation59_spill] sm:$0xff]  ;;  %v22834_v58 = vld [vmem:[#allocation64_spill] sm:$0xff] }
 0x685   :  { %16911 = vmatpush3.xpose.msk.msra.mxu1 %vm467_vm2, %v20246_v49  ;;  %v20430_v9 = vpop.permute.xlu1 %8398 }
 0x686   :  { %16912 = vmatprep.subr.msk.mxu1 %vm467_vm2, %v20260_v54 }
 0x687   :  { %v20434_v62 = vpop.permute.xlu0 %8396  ;;  %16902 = vmatmul.mubr.msk.f32.gmra.mxu0 %vm7025_vm4, %v22831_v7 }
 0x688   :  { %16904 = vmatprep.mubr.msk.f32.mxu0 %vm7025_vm4, %v22832_v3 }
 0x689   :  { %16913 = vmatpush3.xpose.msk.msra.mxu1 %vm467_vm2, %v20260_v54  ;;  %v20442_v40 = vpop.permute.xlu1 %8584 }
 0x68a   :  { %16924 = vmatprep.subr.msk.mxu1 %vm467_vm2, %v20272_v6 }
 0x68b   :  { %v8492_v49 = vpop.permute.xlu0 %8491  ;;  %16905 = vmatmul.mubr.msk.f32.gmra.mxu0 %vm7025_vm4, %v22833_v20 }
 0x68c   :  { %16907 = vmatprep.mubr.msk.f32.mxu0 %vm7025_vm4, %v22834_v58 }
 0x68d   :  { %v8490_v59 = vpop.permute.xlu1 %8489 }
 0x68f   :  { %v8488_v7 = vpop.permute.xlu0 %8487  ;;  %16908 = vmatmul.mubr.msk.f32.gmra.mxu0 %vm7025_vm4, %v22835_v56 }
 0x690   :  { %16921 = vmatprep.mubr.msk.f32.mxu0 %vm467_vm2, %v20285_v32 }
 0x691   :  { %v8676_v54 = vpop.permute.xlu1 %8675 }
 0x693   :  { %v20454_v3 = vpop.permute.xlu0 %8582  ;;  %16922 = vmatmul.mubr.msk.f32.vlgmr.msra.gmra.mxu0 %vm467_vm2, %v20280_v21 }
 0x694   :  { %16932 = vmatpush3.xpose.msk.msra.mxu0 %vm467_vm2, %v20293_v12  ;;  %16935 = vmatprep.mubr.msk.f32.mxu0 %vm467_vm2, %v20338_v8 }
 0x695   :  { %16933 = vmatprep.subr.msk.mxu0 %vm467_vm2, %v20326_v1  ;;  %v20464_v20 = vpop.permute.xlu1 %8580 }
 0x697   :  { %v20466_v56 = vpop.permute.xlu0 %8578 }
 0x698   :  { %16934 = vmatpush3.xpose.msk.msra.mxu0 %vm467_vm2, %v20326_v1 }
 0x699   :  { %16945 = vmatprep.subr.msk.mxu0 %vm467_vm2, %v20346_v35  ;;  %v20472_v21 = vpop.permute.xlu1 %8766 }
 0x69b   :  { %16936 = vmatmul.mubr.msk.f32.vlgmr.msra.gmra.mxu0 %vm467_vm2, %v20334_v51  ;;  %v8674_v32 = vpop.permute.xlu0 %8673 }
 0x69c   :  { %16946 = vmatpush3.xpose.msk.msra.mxu0 %vm467_vm2, %v20346_v35  ;;  %16949 = vmatprep.mubr.msk.f32.mxu0 %vm467_vm2, %v8124_v63 }
 0x69d   :  { %16947 = vmatprep.subr.msk.mxu0 %vm467_vm2, %v20374_v31  ;;  %v8672_v12 = vpop.permute.xlu1 %8671 }
 0x69f   :  { %v8670_v8 = vpop.permute.xlu0 %8669 }
 0x6a0   :  { %16948 = vmatpush3.xpose.msk.msra.mxu0 %vm467_vm2, %v20374_v31 }
 0x6a1   :  { %16959 = vmatprep.subr.msk.mxu0 %vm467_vm2, %v20390_v53  ;;  %v8858_v1 = vpop.permute.xlu1 %8857 }
 0x6a3   :  { %16950 = vmatmul.mubr.msk.f32.vlgmr.msra.gmra.mxu0 %vm467_vm2, %v20382_v43  ;;  %v20487_v51 = vpop.permute.xlu0 %8764  ;;  %v16718_v43 = vpop.f32.mrf.mxu1 }
 0x6a4   :  { %16960 = vmatpush3.xpose.msk.msra.mxu0 %vm467_vm2, %v20390_v53  ;;  %16963 = vmatprep.mubr.msk.f32.mxu0 %vm467_vm2, %v8306_v24 }
 0x6a5   :  { %16961 = vmatprep.subr.msk.mxu0 %vm467_vm2, %v8310_v42  ;;  %v20493_v35 = vpop.permute.xlu1 %8762 }
 0x6a7   :  { %v20495_v63 = vpop.permute.xlu0 %8760 }
 0x6a8   :  { %16962 = vmatpush3.xpose.msk.msra.mxu0 %vm467_vm2, %v8310_v42  ;;  %v5884_v42 = vpop.f32.mrf.mxu1 }
 0x6a9   :  { %16973 = vmatprep.subr.msk.mxu0 %vm467_vm2, %v8494_v38  ;;  %v20499_v31 = vpop.permute.xlu1 %8948 }
 0x6aa   :  { %v16711_v58 = vpop.f32.mrf.mxu0 }
 0x6ab   :  { %16964 = vmatmul.mubr.msk.f32.vlgmr.msra.gmra.mxu0 %vm467_vm2, %v8308_v28  ;;  %v8856_v30 = vpop.permute.xlu0 %8855 }
 0x6ac   :  { %16974 = vmatpush3.xpose.msk.msra.mxu0 %vm467_vm2, %v8494_v38  ;;  %16977 = vmatprep.mubr.msk.f32.mxu0 %vm467_vm2, %v8488_v7  ;;  %v5797_v24 = vpop.f32.mrf.mxu0  ;;  %v16732_v38 = vpop.f32.mrf.mxu1 }
 0x6ad   :  { %16975 = vmatprep.subr.msk.mxu0 %vm467_vm2, %v8492_v49  ;;  %v8854_v53 = vpop.permute.xlu1 %8853  ;;  %16815 = vmatprep.mubr.msk.f32.mxu1 %vm7025_vm4, %v5797_v24 }
 0x6ae   :  { %16816 = vmatmul.mubr.msk.f32.gmra.mxu1 %vm7025_vm4, %v16711_v58  ;;  %v6058_v24 = vpop.f32.mrf.mxu1 }
 0x6af   :  { %v8852_v36 = vpop.permute.xlu0 %8851  ;;  %16818 = vmatprep.mubr.msk.f32.mxu1 %vm7025_vm4, %v5884_v42 }
 0x6b0   :  { %16976 = vmatpush3.xpose.msk.msra.mxu0 %vm467_vm2, %v8492_v49 }
 0x6b1   :  { %16987 = vmatprep.subr.msk.mxu0 %vm467_vm2, %v8676_v54  ;;  %v9040_v28 = vpop.permute.xlu1 %9039 }
 0x6b2   :  { %16819 = vmatmul.mubr.msk.f32.gmra.mxu1 %vm7025_vm4, %v16718_v43 }
 0x6b3   :  { %v16725_v27 = vpop.f32.mrf.mxu0  ;;  %16978 = vmatmul.mubr.msk.f32.vlgmr.msra.gmra.mxu0 %vm467_vm2, %v8490_v59  ;;  %v20512_v7 = vpop.permute.xlu0 %8946 }
 0x6b4   :  { %16988 = vmatpush3.xpose.msk.msra.mxu0 %vm467_vm2, %v8676_v54  ;;  %16991 = vmatprep.mubr.msk.f32.mxu0 %vm467_vm2, %v8670_v8  ;;  %v16746_v59 = vpop.f32.mrf.mxu1 }
 0x6b5   :  { %v5971_v58 = vpop.f32.mrf.mxu0  ;;  %16989 = vmatprep.subr.msk.mxu0 %vm467_vm2, %v8674_v32  ;;  %v20518_v49 = vpop.permute.xlu1 %8944 }
 0x6b6   :  { %16821 = vmatprep.mubr.msk.f32.mxu1 %vm7025_vm4, %v5971_v58  ;;  %v6232_v58 = vpop.f32.mrf.mxu1 }
 0x6b7   :  { %16822 = vmatmul.mubr.msk.f32.gmra.mxu1 %vm7025_vm4, %v16725_v27  ;;  %v20521_v42 = vpop.permute.xlu0 %8942 }
 0x6b8   :  { %16824 = vmatprep.mubr.msk.f32.mxu1 %vm7025_vm4, %v6058_v24  ;;  %16990 = vmatpush3.xpose.msk.msra.mxu0 %vm467_vm2, %v8674_v32 }
 0x6b9   :  { %17001 = vmatprep.subr.msk.mxu0 %vm467_vm2, %v8858_v1  ;;  %v9034_v8 = vpop.permute.xlu1 %9033 }
 0x6bb   :  { %16825 = vmatmul.mubr.msk.f32.gmra.mxu1 %vm7025_vm4, %v16732_v38  ;;  %16992 = vmatmul.mubr.msk.f32.vlgmr.msra.gmra.mxu0 %vm467_vm2, %v8672_v12  ;;  %v9038_v54 = vpop.permute.xlu0 %9037 }
 0x6bc   :  { %v16739_v43 = vpop.f32.mrf.mxu0  ;;  %17002 = vmatpush3.xpose.msk.msra.mxu0 %vm467_vm2, %v8858_v1  ;;  %17005 = vmatprep.mubr.msk.f32.mxu0 %vm467_vm2, %v8852_v36  ;;  %v16760_v1 = vpop.f32.mrf.mxu1 }
 0x6bd   :  { %17003 = vmatprep.subr.msk.mxu0 %vm467_vm2, %v8856_v30  ;;  %v20536_v12 = vpop.permute.xlu1 %9572 }
 0x6be   :  { %v6145_v27 = vpop.f32.mrf.mxu0 }
 0x6bf   :  { %16827 = vmatprep.mubr.msk.f32.mxu1 %vm7025_vm4, %v6145_v27  ;;  %v9036_v32 = vpop.permute.xlu0 %9035 }
 0x6c0   :  { %16828 = vmatmul.mubr.msk.f32.gmra.mxu1 %vm7025_vm4, %v16739_v43  ;;  %17004 = vmatpush3.xpose.msk.msra.mxu0 %vm467_vm2, %v8856_v30  ;;  %v6406_v43 = vpop.f32.mrf.mxu1 }
 0x6c1   :  { %16830 = vmatprep.mubr.msk.f32.mxu1 %vm7025_vm4, %v6232_v58  ;;  %17015 = vmatprep.subr.msk.mxu0 %vm467_vm2, %v9040_v28  ;;  %v20546_v27 = vpop.permute.xlu1 %9748 }
 0x6c3   :  { %17006 = vmatmul.mubr.msk.f32.vlgmr.msra.gmra.mxu0 %vm467_vm2, %v8854_v53  ;;  %v20539_v36 = vpop.permute.xlu0 %9574 }
 0x6c4   :  { %v16753_v38 = vpop.f32.mrf.mxu0  ;;  %16831 = vmatmul.mubr.msk.f32.gmra.mxu1 %vm7025_vm4, %v16746_v59  ;;  %17016 = vmatpush3.xpose.msk.msra.mxu0 %vm467_vm2, %v9040_v28  ;;  %v16774_v28 = vpop.f32.mrf.mxu1 }
 0x6c5   :  { %17019 = vmatprep.mubr.msk.f32.mxu0 %vm467_vm2, %v9034_v8  ;;  %17017 = vmatprep.subr.msk.mxu0 %vm467_vm2, %v9038_v54  ;;  %v20553_v8 = vpop.permute.xlu1 %9835 }
 0x6c6   :  { %v6319_v30 = vpop.f32.mrf.mxu0 }
 0x6c7   :  { %16833 = vmatprep.mubr.msk.f32.mxu1 %vm7025_vm4, %v6319_v30  ;;  %v9662_v24 = vpop.permute.xlu0 %9661 }
 0x6c8   :  { %16834 = vmatmul.mubr.msk.f32.gmra.mxu1 %vm7025_vm4, %v16753_v38  ;;  %17018 = vmatpush3.xpose.msk.msra.mxu0 %vm467_vm2, %v9038_v54  ;;  %v6580_v54 = vpop.f32.mrf.mxu1 }
 0x6c9   :  { %16836 = vmatprep.mubr.msk.f32.mxu1 %vm7025_vm4, %v6406_v43  ;;  %17029 = vmatprep.subr.mxu0 %v9662_v24 }
 0x6ca   :  { %v16788_v38 = vpop.f32.mrf.mxu1 }
 0x6cb   :  { %17020 = vmatmul.mubr.msk.f32.vlgmr.msra.gmra.mxu0 %vm467_vm2, %v9036_v32  ;;  %v9660_v53 = vpop.permute.xlu0 %9659 }
 0x6cc   :  { %v16767_v59 = vpop.f32.mrf.mxu0  ;;  %16837 = vmatmul.mubr.msk.f32.gmra.mxu1 %vm7025_vm4, %v16760_v1  ;;  %17030 = vmatpush3.msra.mxu0 %v9662_v24  ;;  %v6754_v30 = vpop.f32.mrf.mxu1 }
 0x6cd   :  { %17031 = vmatprep.subr.mxu0 %v9660_v53 }
 0x6ce   :  { %v6493_v58 = vpop.f32.mrf.mxu0  ;;  %17032 = vmatpush3.msra.mxu0 %v9660_v53 }
 0x6cf   :  { %16839 = vmatprep.mubr.msk.f32.mxu1 %vm7025_vm4, %v6493_v58  ;;  %17043 = vmatprep.subr.mxu0 %v20553_v8 }
 0x6d0   :  { %16840 = vmatmul.mubr.msk.f32.gmra.mxu1 %vm7025_vm4, %v16767_v59 }
 0x6d1   :  { %16842 = vmatprep.mubr.msk.f32.mxu1 %vm7025_vm4, %v6580_v54 }
 0x6d3   :  { %v16781_v32 = vpop.f32.mrf.mxu0 }
 0x6d4   :  { %16843 = vmatmul.mubr.msk.f32.gmra.mxu1 %vm7025_vm4, %v16774_v28 }
 0x6d5   :  { %v6667_v1 = vpop.f32.mrf.mxu0 }
 0x6d6   :  { %16845 = vmatprep.mubr.msk.f32.mxu1 %vm7025_vm4, %v6667_v1 }
 0x6d8   :  { %16846 = vmatmul.mubr.msk.f32.gmra.mxu1 %vm7025_vm4, %v16781_v32 }
 0x6d9   :  { %16848 = vmatprep.mubr.msk.f32.mxu1 %vm7025_vm4, %v6754_v30 }
 0x6da   :  { %v16795_v24 = vpop.f32.mrf.mxu0 }
 0x6dc   :  { %16849 = vmatmul.mubr.msk.f32.gmra.mxu1 %vm7025_vm4, %v16788_v38  ;;  %v6841_v43 = vpop.f32.mrf.mxu0 }
 0x6dd   :  { %16851 = vmatprep.mubr.msk.f32.mxu1 %vm7025_vm4, %v6841_v43 }
 0x6e0   :  { %16852 = vmatmul.mubr.msk.f32.gmra.mxu1 %vm7025_vm4, %v16795_v24 }
 0x6fe   :  { %v16802_v53 = vpop.f32.mrf.mxu1 }
 0x700   :  { %v6928_v59 = vpop.f32.mrf.mxu1 }
 0x701   :  { %16854 = vmatprep.mubr.msk.f32.mxu1 %vm7025_vm4, %v6928_v59 }
 0x702   :  { %16855 = vmatmul.mubr.msk.f32.gmra.mxu1 %vm7025_vm4, %v16802_v53 }
 0x70f   :  { %v16809_v28 = vpop.f32.mrf.mxu0 }
 0x711   :  { %v7015_v58 = vpop.f32.mrf.mxu0 }
 0x712   :  { %16857 = vmatprep.mubr.msk.f32.mxu1 %vm7025_vm4, %v7015_v58 }
 0x713   :  { %16858 = vmatmul.mubr.msk.f32.gmra.mxu1 %vm7025_vm4, %v16809_v28  ;;  %v20570_v54 = vpop.f32.mrf.mxu0 }
 0x714   :  { %16914 = vmatprep.mubr.msk.f32.mxu1 %vm467_vm2, %v20268_v60 }
 0x715   :  { %v20574_v32 = vpop.f32.mrf.mxu0 }
 0x716   :  { %22836 = vst [vmem:[#allocation73_spill] sm:$0xff] %v20574_v32 }
 0x717   :  { %v20576_v38 = vpop.f32.mrf.mxu0  ;;  %16915 = vmatmul.mubr.msk.f32.vlgmr.msra.gmra.mxu1 %vm467_vm2, %v20264_v14 }
 0x718   :  { %22837 = vst [vmem:[#allocation62_spill] sm:$0xff] %v20576_v38  ;;  %16925 = vmatpush3.xpose.msk.msra.mxu1 %vm467_vm2, %v20272_v6  ;;  %16928 = vmatprep.mubr.msk.f32.mxu1 %vm467_vm2, %v20311_v4 }
 0x719   :  { %16926 = vmatprep.subr.msk.mxu1 %vm467_vm2, %v20297_v17  ;;  %v20586_v1 = vpop.f32.mrf.mxu0 }
 0x71a   :  { %22838 = vst [vmem:[#allocation60_spill] sm:$0xff] %v20586_v1 }
 0x71b   :  { %v20588_v30 = vpop.f32.mrf.mxu0 }
 0x71c   :  { %22839 = vst [vmem:[#allocation83_spill] sm:$0xff] %v20588_v30  ;;  %16927 = vmatpush3.xpose.msk.msra.mxu1 %vm467_vm2, %v20297_v17 }
 0x71d   :  { %16938 = vmatprep.subr.msk.mxu1 %vm467_vm2, %v20322_v37  ;;  %v20594_v14 = vpop.f32.mrf.mxu0 }
 0x71e   :  { %22840 = vst [vmem:[#allocation81_spill] sm:$0xff] %v20594_v14 }
 0x71f   :  { %16929 = vmatmul.mubr.msk.f32.vlgmr.msra.gmra.mxu1 %vm467_vm2, %v20307_v50  ;;  %v20598_v60 = vpop.f32.mrf.mxu0 }
 0x720   :  { %22841 = vst [vmem:[#allocation70_spill] sm:$0xff] %v20598_v60  ;;  %16939 = vmatpush3.xpose.msk.msra.mxu1 %vm467_vm2, %v20322_v37  ;;  %16942 = vmatprep.mubr.msk.f32.mxu1 %vm467_vm2, %v20362_v39 }
 0x721   :  { %16940 = vmatprep.subr.msk.mxu1 %vm467_vm2, %v20350_v55  ;;  %v20606_v6 = vpop.f32.mrf.mxu0 }
 0x722   :  { %22842 = vst [vmem:[#allocation68_spill] sm:$0xff] %v20606_v6 }
 0x723   :  { %v20608_v17 = vpop.f32.mrf.mxu0 }
 0x724   :  { %22843 = vst [vmem:[#allocation87_spill] sm:$0xff] %v20608_v17  ;;  %16941 = vmatpush3.xpose.msk.msra.mxu1 %vm467_vm2, %v20350_v55 }
 0x725   :  { %16952 = vmatprep.subr.msk.mxu1 %vm467_vm2, %v20370_v19  ;;  %v20614_v50 = vpop.f32.mrf.mxu0 }
 0x726   :  { %22844 = vst [vmem:[#allocation86_spill] sm:$0xff] %v20614_v50 }
 0x727   :  { %16943 = vmatmul.mubr.msk.f32.vlgmr.msra.gmra.mxu1 %vm467_vm2, %v20358_v26  ;;  %v20618_v4 = vpop.f32.mrf.mxu0 }
 0x728   :  { %22845 = vst [vmem:[#allocation78_spill] sm:$0xff] %v20618_v4  ;;  %16953 = vmatpush3.xpose.msk.msra.mxu1 %vm467_vm2, %v20370_v19  ;;  %16956 = vmatprep.mubr.msk.f32.mxu1 %vm467_vm2, %v20402_v45 }
 0x729   :  { %16954 = vmatprep.subr.msk.mxu1 %vm467_vm2, %v20392_v10  ;;  %v20626_v37 = vpop.f32.mrf.mxu0 }
 0x72a   :  { %22846 = vst [vmem:[#allocation76_spill] sm:$0xff] %v20626_v37 }
 0x72b   :  { %v20628_v55 = vpop.f32.mrf.mxu0 }
 0x72c   :  { %22847 = vst [vmem:[#allocation41_spill] sm:$0xff] %v20628_v55  ;;  %16955 = vmatpush3.xpose.msk.msra.mxu1 %vm467_vm2, %v20392_v10 }
 0x72d   :  { %16966 = vmatprep.subr.msk.mxu1 %vm467_vm2, %v20410_v61  ;;  %v20634_v26 = vpop.f32.mrf.mxu0 }
 0x72e   :  { %22848 = vst [vmem:[#allocation44_spill] sm:$0xff] %v20634_v26 }
 0x72f   :  { %16957 = vmatmul.mubr.msk.f32.vlgmr.msra.gmra.mxu1 %vm467_vm2, %v20400_v25  ;;  %v20638_v39 = vpop.f32.mrf.mxu0 }
 0x730   :  { %22849 = vst [vmem:[#allocation85_spill] sm:$0xff] %v20638_v39  ;;  %16967 = vmatpush3.xpose.msk.msra.mxu1 %vm467_vm2, %v20410_v61  ;;  %16970 = vmatprep.mubr.msk.f32.mxu1 %vm467_vm2, %v20434_v62 }
 0x731   :  { %16968 = vmatprep.subr.msk.mxu1 %vm467_vm2, %v20420_v29  ;;  %v20646_v19 = vpop.f32.mrf.mxu0 }
 0x732   :  { %22850 = vst [vmem:[#allocation72_spill] sm:$0xff] %v20646_v19 }
 0x733   :  { %v20648_v10 = vpop.f32.mrf.mxu0 }
 0x734   :  { %22851 = vst [vmem:[#allocation92_spill] sm:$0xff] %v20648_v10  ;;  %16969 = vmatpush3.xpose.msk.msra.mxu1 %vm467_vm2, %v20420_v29 }
 0x735   :  { %16980 = vmatprep.subr.msk.mxu1 %vm467_vm2, %v20442_v40  ;;  %v20654_v25 = vpop.f32.mrf.mxu0 }
 0x736   :  { %22852 = vst [vmem:[#allocation84_spill] sm:$0xff] %v20654_v25 }
 0x737   :  { %16971 = vmatmul.mubr.msk.f32.vlgmr.msra.gmra.mxu1 %vm467_vm2, %v20430_v9  ;;  %v20658_v45 = vpop.f32.mrf.mxu0 }
 0x738   :  { %22853 = vst [vmem:[#allocation74_spill] sm:$0xff] %v20658_v45  ;;  %16981 = vmatpush3.xpose.msk.msra.mxu1 %vm467_vm2, %v20442_v40  ;;  %16984 = vmatprep.mubr.msk.f32.mxu1 %vm467_vm2, %v20466_v56 }
 0x739   :  { %16982 = vmatprep.subr.msk.mxu1 %vm467_vm2, %v20454_v3  ;;  %v20666_v29 = vpop.f32.mrf.mxu0 }
 0x73a   :  { %22854 = vst [vmem:[#allocation88_spill] sm:$0xff] %v20666_v29 }
 0x73b   :  { %v20668_v61 = vpop.f32.mrf.mxu0 }
 0x73c   :  { %22855 = vst [vmem:[#allocation95_spill] sm:$0xff] %v20668_v61  ;;  %16983 = vmatpush3.xpose.msk.msra.mxu1 %vm467_vm2, %v20454_v3 }
 0x73d   :  { %16994 = vmatprep.subr.msk.mxu1 %vm467_vm2, %v20472_v21  ;;  %v20674_v9 = vpop.f32.mrf.mxu0 }
 0x73e   :  { %22856 = vst [vmem:[#allocation46_spill] sm:$0xff] %v20674_v9 }
 0x73f   :  { %16985 = vmatmul.mubr.msk.f32.vlgmr.msra.gmra.mxu1 %vm467_vm2, %v20464_v20  ;;  %v20678_v62 = vpop.f32.mrf.mxu0 }
 0x740   :  { %22857 = vst [vmem:[#allocation48_spill] sm:$0xff] %v20678_v62  ;;  %16995 = vmatpush3.xpose.msk.msra.mxu1 %vm467_vm2, %v20472_v21  ;;  %16998 = vmatprep.mubr.msk.f32.mxu1 %vm467_vm2, %v20495_v63 }
 0x741   :  { %16996 = vmatprep.subr.msk.mxu1 %vm467_vm2, %v20487_v51  ;;  %v20686_v40 = vpop.f32.mrf.mxu0 }
 0x742   :  { %22858 = vst [vmem:[#allocation94_spill] sm:$0xff] %v20686_v40 }
 0x743   :  { %v20688_v3 = vpop.f32.mrf.mxu0 }
 0x744   :  { %22859 = vst [vmem:[#allocation93_spill] sm:$0xff] %v20688_v3  ;;  %16997 = vmatpush3.xpose.msk.msra.mxu1 %vm467_vm2, %v20487_v51  ;;  %v16814_v56 = vpop.f32.mrf.mxu1 }
 0x745   :  { %17008 = vmatprep.subr.msk.mxu1 %vm467_vm2, %v20499_v31  ;;  %v20695_v20 = vadd.f32 %v20570_v54, %v16814_v56  ;;  %v20697_v21 = vpop.f32.mrf.mxu0 }
 0x746   :  { %22861 = vst [vmem:[#allocation52_spill] sm:$0xff] %v20697_v21  ;;  %v20756_v50 = vpop.f32.mrf.mxu1 }
 0x747   :  { %22860 = vst [vmem:[#allocation50_spill] sm:$0xff] %v20695_v20  ;;  %16999 = vmatmul.mubr.msk.f32.vlgmr.msra.gmra.mxu1 %vm467_vm2, %v20493_v35  ;;  %v20701_v63 = vpop.f32.mrf.mxu0  ;;  %22868 = vst [vmem:[#allocation49_spill] sm:$0xff] %v20756_v50 }
 0x748   :  { %22862 = vst [vmem:[#allocation96_spill] sm:$0xff] %v20701_v63  ;;  %17009 = vmatpush3.xpose.msk.msra.mxu1 %vm467_vm2, %v20499_v31  ;;  %17012 = vmatprep.mubr.msk.f32.mxu1 %vm467_vm2, %v20521_v42 }
 0x749   :  { %17010 = vmatprep.subr.msk.mxu1 %vm467_vm2, %v20512_v7  ;;  %v20709_v51 = vpop.f32.mrf.mxu0 }
 0x74a   :  { %22863 = vst [vmem:[#allocation82_spill] sm:$0xff] %v20709_v51 }
 0x74b   :  { %v20711_v24 = vpop.f32.mrf.mxu0 }
 0x74c   :  { %22864 = vst [vmem:[#allocation97_spill] sm:$0xff] %v20711_v24  ;;  %17011 = vmatpush3.xpose.msk.msra.mxu1 %vm467_vm2, %v20512_v7 }
 0x74d   :  { %17022 = vmatprep.subr.mxu1 %v20539_v36  ;;  %v20716_v35 = vpop.f32.mrf.mxu0 }
 0x74e   :  { %22865 = vst [vmem:[#allocation75_spill] sm:$0xff] %v20716_v35 }
 0x74f   :  { %17013 = vmatmul.mubr.msk.f32.vlgmr.msra.gmra.mxu1 %vm467_vm2, %v20518_v49  ;;  %v20720_v31 = vpop.f32.mrf.mxu0 }
 0x750   :  { %22866 = vst [vmem:[#allocation54_spill] sm:$0xff] %v20720_v31  ;;  %17023 = vmatpush3.msra.mxu1 %v20539_v36 }
 0x751   :  { %17024 = vmatprep.subr.mxu1 %v20536_v12  ;;  %v20724_v42 = vpop.f32.mrf.mxu0 }
 0x752   :  { %22867 = vst [vmem:[#allocation55_spill] sm:$0xff] %v20724_v42  ;;  %17025 = vmatpush3.msra.mxu1 %v20536_v12 }
 0x753   :  { %17036 = vmatprep.subr.mxu1 %v20546_v27  ;;  %v20728_v7 = vpop.f32.mrf.mxu0 }
 0x754   :  { %v9133_v43 = vsel %vm1886_vm3, %v20728_v7, -inf }
 0x755   :  { %9134 = vmax.xlane.f32.xlu1 %v9133_v43  ;;  %v20732_v53 = vpop.f32.mrf.mxu0 }
 0x756   :  { %v9130_v49 = vsel %vm1886_vm3, %v20732_v53, -inf }
 0x757   :  { %9131 = vmax.xlane.f32.xlu0 %v9130_v49 }
 0x75b   :  { %v20736_v36 = vpop.f32.mrf.mxu0 }
 0x75c   :  { %v9145_v59 = vsel %vm1886_vm3, %v20736_v36, -inf }
 0x75d   :  { %9146 = vmax.xlane.f32.xlu1 %v9145_v59  ;;  %v20740_v12 = vpop.f32.mrf.mxu0 }
 0x75e   :  { %v9142_v28 = vsel %vm1886_vm3, %v20740_v12, -inf }
 0x75f   :  { %9143 = vmax.xlane.f32.xlu0 %v9142_v28 }
 0x763   :  { %v20744_v58 = vpop.f32.mrf.mxu0 }
 0x764   :  { %v9157_v54 = vsel %vm1886_vm3, %v20744_v58, -inf }
 0x765   :  { %9158 = vmax.xlane.f32.xlu1 %v9157_v54  ;;  %v20748_v56 = vpop.f32.mrf.mxu0 }
 0x766   :  { %v9154_v43 = vsel %vm1886_vm3, %v20748_v56, -inf }
 0x767   :  { %9155 = vmax.xlane.f32.xlu0 %v9154_v43 }
 0x76b   :  { %v20752_v49 = vpop.f32.mrf.mxu0 }
 0x76c   :  { %v9169_v59 = vsel %vm1886_vm3, %v20752_v49, -inf }
 0x76d   :  { %9170 = vmax.xlane.f32.xlu1 %v9169_v59  ;;  %v20758_v28 = vpop.f32.mrf.mxu0 }
 0x76e   :  { %v9166_v6 = vsel %vm1886_vm3, %v20758_v28, -inf  ;;  %v20762_v54 = vpop.f32.mrf.mxu1 }
 0x76f   :  { %22869 = vst [vmem:[#allocation89_spill] sm:$0xff] %v20762_v54  ;;  %9167 = vmax.xlane.f32.xlu0 %v9166_v6 }
 0x770   :  { %v20764_v14 = vpop.f32.mrf.mxu1 }
 0x771   :  { %22870 = vst [vmem:[#allocation57_spill] sm:$0xff] %v20764_v14 }
 0x772   :  { %v20766_v1 = vpop.f32.mrf.mxu1 }
 0x773   :  { %22871 = vst [vmem:[#allocation47_spill] sm:$0xff] %v20766_v1  ;;  %v20768_v43 = vpop.f32.mrf.mxu0 }
 0x774   :  { %v9181_v32 = vsel %vm1886_vm3, %v20768_v43, -inf  ;;  %v20772_v42 = vpop.f32.mrf.mxu1 }
 0x775   :  { %22872 = vst [vmem:[#allocation43_spill] sm:$0xff] %v20772_v42  ;;  %9182 = vmax.xlane.f32.xlu1 %v9181_v32  ;;  %v20774_v59 = vpop.f32.mrf.mxu0 }
 0x776   :  { %v9178_v50 = vsel %vm1886_vm3, %v20774_v59, -inf }
 0x777   :  { %v20778_v31 = vpop.f32.mrf.mxu1  ;;  %9179 = vmax.xlane.f32.xlu0 %v9178_v50 }
 0x778   :  { %22873 = vst [vmem:[#allocation63_spill] sm:$0xff] %v20778_v31 }
 0x779   :  { %v20780_v6 = vpop.f32.mrf.mxu1 }
 0x77a   :  { %22874 = vst [vmem:[#allocation91_spill] sm:$0xff] %v20780_v6 }
 0x77b   :  { %v20782_v14 = vpop.f32.mrf.mxu0  ;;  %v20790_v42 = vpop.f32.mrf.mxu1 }
 0x77c   :  { %v9193_v35 = vsel %vm1886_vm3, %v20782_v14, -inf  ;;  %22875 = vst [vmem:[#allocation37_spill] sm:$0xff] %v20790_v42 }
 0x77d   :  { %9194 = vmax.xlane.f32.xlu1 %v9193_v35  ;;  %v20786_v24 = vpop.f32.mrf.mxu0  ;;  %v20792_v51 = vpop.f32.mrf.mxu1 }
 0x77e   :  { %v9190_v32 = vsel %vm1886_vm3, %v20786_v24, -inf  ;;  %22876 = vst [vmem:[#allocation39_spill] sm:$0xff] %v20792_v51 }
 0x77f   :  { %9191 = vmax.xlane.f32.xlu0 %v9190_v32 }
 0x780   :  { %v20802_v21 = vpop.f32.mrf.mxu1 }
 0x781   :  { %22877 = vst [vmem:[#allocation65_spill] sm:$0xff] %v20802_v21 }
 0x782   :  { %v20804_v3 = vpop.f32.mrf.mxu1 }
 0x783   :  { %v20794_v63 = vpop.f32.mrf.mxu0  ;;  %22878 = vst [vmem:[#allocation90_spill] sm:$0xff] %v20804_v3 }
 0x784   :  { %v9205_v50 = vsel %vm1886_vm3, %v20794_v63, -inf  ;;  %v20814_v62 = vpop.f32.mrf.mxu1 }
 0x785   :  { %9206 = vmax.xlane.f32.xlu1 %v9205_v50  ;;  %v20798_v6 = vpop.f32.mrf.mxu0  ;;  %22879 = vst [vmem:[#allocation80_spill] sm:$0xff] %v20814_v62 }
 0x786   :  { %v9202_v35 = vsel %vm1886_vm3, %v20798_v6, -inf  ;;  %v20816_v9 = vpop.f32.mrf.mxu1 }
 0x787   :  { %9203 = vmax.xlane.f32.xlu0 %v9202_v35  ;;  %22880 = vst [vmem:[#allocation38_spill] sm:$0xff] %v20816_v9 }
 0x788   :  { %v20818_v61 = vpop.f32.mrf.mxu1 }
 0x789   :  { %22881 = vst [vmem:[#allocation71_spill] sm:$0xff] %v20818_v61 }
 0x78a   :  { %v20820_v35 = vpop.f32.mrf.mxu1 }
 0x78b   :  { %v20806_v40 = vpop.f32.mrf.mxu0  ;;  %22882 = vst [vmem:[#allocation67_spill] sm:$0xff] %v20820_v35 }
 0x78c   :  { %v9217_v32 = vsel %vm1886_vm3, %v20806_v40, -inf  ;;  %v20822_v29 = vpop.f32.mrf.mxu1 }
 0x78d   :  { %9218 = vmax.xlane.f32.xlu1 %v9217_v32  ;;  %v20810_v51 = vpop.f32.mrf.mxu0  ;;  %22883 = vst [vmem:[#allocation40_spill] sm:$0xff] %v20822_v29 }
 0x78e   :  { %v9214_v50 = vsel %vm1886_vm3, %v20810_v51, -inf  ;;  %v20824_v45 = vpop.f32.mrf.mxu1 }
 0x78f   :  { %9215 = vmax.xlane.f32.xlu0 %v9214_v50  ;;  %22884 = vst [vmem:[#allocation45_spill] sm:$0xff] %v20824_v45 }
 0x790   :  { %v20826_v25 = vpop.f32.mrf.mxu1 }
 0x791   :  { %22885 = vst [vmem:[#allocation58_spill] sm:$0xff] %v20826_v25  ;;  %v20848_v25 = vpop.permute.xlu0 %9746 }
 0x792   :  { %v20828_v32 = vpop.f32.mrf.mxu1 }
 0x793   :  { %22886 = vst [vmem:[#allocation69_spill] sm:$0xff] %v20828_v32 }
 0x794   :  { %v20830_v10 = vpop.f32.mrf.mxu1 }
 0x795   :  { %22887 = vst [vmem:[#allocation5_spill] sm:$0xff] %v20830_v10 }
 0x796   :  { %v20832_v19 = vpop.f32.mrf.mxu1 }
 0x797   :  { %22888 = vst [vmem:[#allocation6_spill] sm:$0xff] %v20832_v19  ;;  %v20854_v19 = vpop.permute.xlu1 %9922 }
 0x798   :  { %v20834_v39 = vpop.f32.mrf.mxu1 }
 0x799   :  { %22889 = vst [vmem:[#allocation79_spill] sm:$0xff] %v20834_v39 }
 0x79a   :  { %v20836_v50 = vpop.f32.mrf.mxu1 }
 0x79b   :  { %22890 = vst [vmem:[#allocation56_spill] sm:$0xff] %v20836_v50  ;;  %v20858_v50 = vpop.permute.xlu0 %9833 }
 0x79c   :  { %v20838_v26 = vpop.f32.mrf.mxu1 }
 0x79d   :  { %22891 = vst [vmem:[#allocation53_spill] sm:$0xff] %v20838_v26 }
 0x79e   :  { %v20840_v61 = vpop.f32.mrf.mxu1 }
 0x79f   :  { %22892 = vst [vmem:[#allocation51_spill] sm:$0xff] %v20840_v61 }
 0x7a0   :  { %v20842_v35 = vpop.f32.mrf.mxu1 }
 0x7a1   :  { %22893 = vst [vmem:[#allocation66_spill] sm:$0xff] %v20842_v35 }
 0x7a2   :  { %v20844_v29 = vpop.f32.mrf.mxu1 }
 0x7a3   :  { %22894 = vst [vmem:[#allocation77_spill] sm:$0xff] %v20844_v29 }
 0x7c2   :  { %v20846_v45 = vpop.f32.mrf.mxu1 }
 0x7c3   :  { %22895 = vst [vmem:[#allocation61_spill] sm:$0xff] %v20846_v45  ;;  %v20866_v45 = vpop.permute.xlu1 %10009 }
 0x7c4   :  { %v20850_v32 = vpop.f32.mrf.mxu1 }
 0x7c5   :  { %22896 = vst [vmem:[#allocation59_spill] sm:$0xff] %v20850_v32 }
 0x7d3   :  { %v20852_v10 = vpop.f32.mrf.mxu1 }
 0x7d4   :  { %22897 = vst [vmem:[#allocation64_spill] sm:$0xff] %v20852_v10  ;;  %v20870_v10 = vpop.permute.xlu0 %9920 }
 0x7d5   :  { %v20856_v39 = vpop.f32.mrf.mxu1  ;;  %22899 = vst [vmem:[#allocation98_spill] sm:$0xff] %v20870_v10 }
 0x7d6   :  { %22898 = vst [vmem:[#allocation42_spill] sm:$0xff] %v20856_v39  ;;  %v20874_v39 = vpop.permute.xlu1 %10096 }
 0x7d7   :  { %v20860_v26 = vpop.f32.mrf.mxu1  ;;  %22900 = vst [vmem:[#allocation99_spill] sm:$0xff] %v20874_v39 }
 0x7d8   :  { %v9127_v35 = vsel %vm1886_vm3, %v20860_v26, -inf  ;;  %v20880_v62 = vpop.permute.xlu0 %10007 }
 0x7d9   :  { %v20864_v29 = vpop.f32.mrf.mxu1  ;;  %9128 = vmax.xlane.f32.xlu0 %v9127_v35 }
 0x7da   :  { %v9124_v32 = vsel %vm1886_vm3, %v20864_v29, -inf  ;;  %v20884_v37 = vpop.permute.xlu1 %10183 }
 0x7db   :  { %9125 = vmax.xlane.f32.xlu1 %v9124_v32 }
 0x7dc   :  { %v20886_v32 = vpop.permute.xlu0 %10094 }
 0x7dd   :  { %22901 = vst [vmem:[#allocation100_spill] sm:$0xff] %v20886_v32 }
 0x7de   :  { %v20888_v3 = vpop.permute.xlu1 %10270 }
 0x7df   :  { %v20872_v61 = vpop.f32.mrf.mxu1  ;;  %22902 = vst [vmem:[#allocation101_spill] sm:$0xff] %v20888_v3 }
 0x7e0   :  { %v9139_v9 = vsel %vm1886_vm3, %v20872_v61, -inf  ;;  %v20890_v4 = vpop.permute.xlu0 %10181 }
 0x7e1   :  { %v20878_v55 = vpop.f32.mrf.mxu1  ;;  %9140 = vmax.xlane.f32.xlu1 %v9139_v9 }
 0x7e2   :  { %v9136_v35 = vsel %vm1886_vm3, %v20878_v55, -inf  ;;  %v20892_v21 = vpop.permute.xlu1 %10357 }
 0x7e3   :  { %9137 = vmax.xlane.f32.xlu0 %v9136_v35 }
 0x7e4   :  { %v20896_v9 = vpop.permute.xlu0 %10268 }
 0x7e5   :  { %22903 = vst [vmem:[#allocation102_spill] sm:$0xff] %v20896_v9 }
 0x7e6   :  { %v20898_v17 = vpop.permute.xlu1 %10444 }
 0x7e7   :  { %22904 = vst [vmem:[#allocation103_spill] sm:$0xff] %v20898_v17 }
 0x7e8   :  { %v20902_v35 = vpop.permute.xlu0 %10355 }
 0x7ea   :  { %v20904_v42 = vpop.permute.xlu1 %10531 }
 0x7ec   :  { %v20906_v60 = vpop.permute.xlu0 %10442 }
 0x7ed   :  { %22905 = vst [vmem:[#allocation104_spill] sm:$0xff] %v20906_v60 }
 0x7ee   :  { %v9135_v31 = vpop.xlane.xlu1 %9134 }
 0x7ef   :  { %v9223_v1 = vsub.f32 %v20728_v7, %v9135_v31 }
 0x7f0   :  { %v9132_v30 = vpop.xlane.xlu0 %9131 }
 0x7f1   :  { %v9222_v38 = vsub.f32 %v20732_v53, %v9132_v30  ;;  %v9258_v54 = vmul.f32 1.442695, %v9223_v1 }
 0x7f2   :  { %10618 = vrot.lane.b32.xlu1 %v22795_v34, %s18015_s8  ;;  %v9147_v20 = vpop.xlane.xlu1 %9146 }
 0x7f3   :  { %v9256_v34 = vmul.f32 1.442695, %v9222_v38  ;;  %17730 = vpow2.f32 %v9258_v54  ;;  %v9227_v17 = vsub.f32 %v20736_v36, %v9147_v20 }
 0x7f4   :  { %v9144_v9 = vpop.xlane.xlu0 %9143 }
 0x7f5   :  { %17732 = vpow2.f32 %v9256_v34  ;;  %v9226_v3 = vsub.f32 %v20740_v12, %v9144_v9  ;;  %v9266_v32 = vmul.f32 1.442695, %v9227_v17 }
 0x7f6   :  { %v9159_v16 = vpop.xlane.xlu1 %9158 }
 0x7f7   :  { %v9264_v23 = vmul.f32 1.442695, %v9226_v3  ;;  %17734 = vpow2.f32 %v9266_v32  ;;  %v9231_v38 = vsub.f32 %v20744_v58, %v9159_v16 }
 0x7f8   :  { %v9156_v30 = vpop.xlane.xlu0 %9155 }
 0x7f9   :  { %10529 = vrot.lane.b32.xlu0 %v22796_v52, %s18015_s8  ;;  %v20911_v52 = vpop.f32.mrf.mxu1  ;;  %17736 = vpow2.f32 %v9264_v23  ;;  %v9230_v34 = vsub.f32 %v20748_v56, %v9156_v30  ;;  %v9274_v3 = vmul.f32 1.442695, %v9231_v38 }
 0x7fa   :  { %v9151_v1 = vsel %vm1886_vm3, %v20911_v52, -inf  ;;  %v9171_v16 = vpop.xlane.xlu1 %9170 }
 0x7fb   :  { %v20914_v60 = vpop.f32.mrf.mxu1  ;;  %v9272_v36 = vmul.f32 1.442695, %v9230_v34  ;;  %17738 = vpow2.f32 %v9274_v3  ;;  %v9235_v54 = vsub.f32 %v20752_v49, %v9171_v16 }
 0x7fc   :  { %v9148_v17 = vsel %vm1886_vm3, %v20914_v60, -inf  ;;  %v9168_v56 = vpop.xlane.xlu0 %9167 }
 0x7fd   :  { %v20916_v31 = vpop.f32.mrf.mxu1  ;;  %17740 = vpow2.f32 %v9272_v36  ;;  %v9234_v9 = vsub.f32 %v20758_v28, %v9168_v56 }
 0x7fe   :  { %v9163_v7 = vsel %vm1886_vm3, %v20916_v31, -inf  ;;  %v9183_v49 = vpop.xlane.xlu1 %9182 }
 0x7ff   :  { %v20924_v20 = vpop.f32.mrf.mxu1  ;;  %v9280_v3 = vmul.f32 1.442695, %v9234_v9 }
 0x800   :  { %v20928_v53 = vpop.eup %17730  ;;  %v9160_v23 = vsel %vm1886_vm3, %v20924_v20, -inf  ;;  %v9180_v36 = vpop.xlane.xlu0 %9179 }
 0x801   :  { %v20934_v58 = vpop.f32.mrf.mxu1  ;;  %v9325_v32 = vsel %vm1886_vm3, %v20928_v53, 0.0 }
 0x802   :  { %v20932_v12 = vpop.eup %17732  ;;  %v9175_v34 = vsel %vm1886_vm3, %v20934_v58, -inf }
 0x803   :  { %v9322_v30 = vsel %vm1886_vm3, %v20932_v12, 0.0  ;;  %v20942_v38 = vpop.f32.mrf.mxu1 }
 0x805   :  { %v20952_v28 = vpop.f32.mrf.mxu1 }
 0x816   :  { %9152 = vmax.xlane.f32.xlu1 %v9151_v1  ;;  %v9282_v1 = vmul.f32 1.442695, %v9235_v54  ;;  %v9195_v54 = vpop.xlane.xlu1 %9194 }
 0x818   :  { %9149 = vmax.xlane.f32.xlu0 %v9148_v17  ;;  %v20946_v17 = vpop.eup %17734  ;;  %17742 = vpow2.f32 %v9282_v1  ;;  %v9243_v1 = vsub.f32 %v20782_v14, %v9195_v54 }
 0x819   :  { %v20950_v16 = vpop.eup %17736  ;;  %v9337_v56 = vsel %vm1886_vm3, %v20946_v17, 0.0  ;;  %17744 = vpow2.f32 %v9280_v3 }
 0x81a   :  { %9164 = vmax.xlane.f32.xlu1 %v9163_v7  ;;  %v9172_v7 = vsel %vm1886_vm3, %v20942_v38, -inf  ;;  %v9334_v9 = vsel %vm1886_vm3, %v20950_v16, 0.0  ;;  %v9298_v14 = vmul.f32 1.442695, %v9243_v1 }
 0x81c   :  { %9161 = vmax.xlane.f32.xlu0 %v9160_v23  ;;  %v9239_v23 = vsub.f32 %v20768_v43, %v9183_v49  ;;  %v9187_v43 = vsel %vm1886_vm3, %v20952_v28, -inf  ;;  %v20965_v49 = vpop.eup %17738 }
 0x81e   :  { %9326 = vadd.xlane.f32.xlu1 %v9325_v32  ;;  %v9238_v32 = vsub.f32 %v20774_v59, %v9180_v36  ;;  %v9290_v18 = vmul.f32 1.442695, %v9239_v23 }
 0x820   :  { %9323 = vadd.xlane.f32.xlu0 %v9322_v30  ;;  %v20960_v30 = vpop.f32.mrf.mxu1  ;;  %v9288_v3 = vmul.f32 1.442695, %v9238_v32  ;;  %17746 = vpow2.f32 %v9290_v18 }
 0x821   :  { %v9184_v36 = vsel %vm1886_vm3, %v20960_v30, -inf }
 0x822   :  { %9176 = vmax.xlane.f32.xlu1 %v9175_v34  ;;  %v9192_v34 = vpop.xlane.xlu0 %9191  ;;  %v20972_v46 = vpop.f32.mrf.mxu1  ;;  %17748 = vpow2.f32 %v9288_v3 }
 0x823   :  { %v9242_v59 = vsub.f32 %v20786_v24, %v9192_v34  ;;  %17750 = vpow2.f32 %v9298_v14  ;;  %v9199_v1 = vsel %vm1886_vm3, %v20972_v46, -inf }
 0x824   :  { %9173 = vmax.xlane.f32.xlu0 %v9172_v7  ;;  %v9207_v7 = vpop.xlane.xlu1 %9206  ;;  %v20980_v0 = vpop.f32.mrf.mxu1 }
 0x825   :  { %v9247_v54 = vsub.f32 %v20794_v63, %v9207_v7  ;;  %v9296_v24 = vmul.f32 1.442695, %v9242_v59  ;;  %v9196_v59 = vsel %vm1886_vm3, %v20980_v0, -inf }
 0x826   :  { %9338 = vadd.xlane.f32.xlu1 %v9337_v56  ;;  %v20970_v56 = vpop.eup %17740  ;;  %v9204_v23 = vpop.xlane.xlu0 %9203 }
 0x827   :  { %v9246_v32 = vsub.f32 %v20798_v6, %v9204_v23  ;;  %v9346_v34 = vsel %vm1886_vm3, %v20970_v56, 0.0  ;;  %v9306_v18 = vmul.f32 1.442695, %v9247_v54  ;;  %v20985_v7 = vpop.eup %17742  ;;  %17752 = vpow2.f32 %v9296_v24  ;;  %v20992_v23 = vpop.f32.mrf.mxu1 }
 0x828   :  { %9335 = vadd.xlane.f32.xlu0 %v9334_v9  ;;  %v9349_v9 = vsel %vm1886_vm3, %v20965_v49, 0.0  ;;  %v9361_v14 = vsel %vm1886_vm3, %v20985_v7, 0.0 }
 0x829   :  { %v9304_v3 = vmul.f32 1.442695, %v9246_v32  ;;  %17754 = vpow2.f32 %v9306_v18 }
 0x82a   :  { %9188 = vmax.xlane.f32.xlu1 %v9187_v43  ;;  %v9219_v43 = vpop.xlane.xlu1 %9218  ;;  %v9216_v5 = vpop.xlane.xlu0 %9215 }
 0x82b   :  { %v9251_v63 = vsub.f32 %v20806_v40, %v9219_v43  ;;  %v9250_v6 = vsub.f32 %v20810_v51, %v9216_v5  ;;  %17756 = vpow2.f32 %v9304_v3  ;;  %v20998_v5 = vpop.f32.mrf.mxu1  ;;  %v9211_v51 = vsel %vm1886_vm3, %v20992_v23, -inf }
 0x82c   :  { %9185 = vmax.xlane.f32.xlu0 %v9184_v36  ;;  %v20990_v36 = vpop.eup %17744  ;;  %v9208_v24 = vsel %vm1886_vm3, %v20998_v5, -inf }
 0x82d   :  { %v9314_v40 = vmul.f32 1.442695, %v9251_v63  ;;  %v9312_v54 = vmul.f32 1.442695, %v9250_v6  ;;  %v21002_v43 = vpop.eup %17746 }
 0x82e   :  { %9350 = vadd.xlane.f32.xlu1 %v9349_v9  ;;  %v9358_v9 = vsel %vm1886_vm3, %v20990_v36, 0.0 }
 0x82f   :  { %17758 = vpow2.f32 %v9314_v40  ;;  %v21006_v32 = vpop.eup %17748 }
 0x830   :  { %9347 = vadd.xlane.f32.xlu0 %v9346_v34  ;;  %17760 = vpow2.f32 %v9312_v54  ;;  %v9373_v34 = vsel %vm1886_vm3, %v21002_v43, 0.0  ;;  %v21010_v18 = vpop.eup %17750  ;;  %v9370_v63 = vsel %vm1886_vm3, %v21006_v32, 0.0 }
 0x831   :  { %v9385_v3 = vsel %vm1886_vm3, %v21010_v18, 0.0 }
 0x832   :  { %9200 = vmax.xlane.f32.xlu1 %v9199_v1 }
 0x834   :  { %9197 = vmax.xlane.f32.xlu0 %v9196_v59  ;;  %v21014_v1 = vpop.eup %17752 }
 0x835   :  { %v9382_v59 = vsel %vm1886_vm3, %v21014_v1, 0.0 }
 0x836   :  { %9362 = vadd.xlane.f32.xlu1 %v9361_v14  ;;  %v21018_v6 = vpop.eup %17754 }
 0x837   :  { %22906 = vst [vmem:[#allocation105_spill] sm:$0xff] %v21018_v6  ;;  %v9397_v14 = vsel %vm1886_vm3, %v21018_v6, 0.0 }
 0x838   :  { %9359 = vadd.xlane.f32.xlu0 %v9358_v9  ;;  %v21022_v40 = vpop.eup %17756 }
 0x839   :  { %v9394_v9 = vsel %vm1886_vm3, %v21022_v40, 0.0 }
 0x83a   :  { %9212 = vmax.xlane.f32.xlu1 %v9211_v51 }
 0x83c   :  { %9209 = vmax.xlane.f32.xlu0 %v9208_v24  ;;  %v21026_v54 = vpop.eup %17758 }
 0x83d   :  { %22907 = vst [vmem:[#allocation106_spill] sm:$0xff] %v21026_v54  ;;  %v21030_v51 = vpop.eup %17760  ;;  %v9409_v24 = vsel %vm1886_vm3, %v21026_v54, 0.0 }
 0x83e   :  { %9374 = vadd.xlane.f32.xlu1 %v9373_v34  ;;  %22908 = vst [vmem:[#allocation107_spill] sm:$0xff] %v21030_v51  ;;  %v9406_v34 = vsel %vm1886_vm3, %v21030_v51, 0.0 }
 0x840   :  { %9371 = vadd.xlane.f32.xlu0 %v9370_v63 }
 0x842   :  { %9386 = vadd.xlane.f32.xlu1 %v9385_v3 }
 0x844   :  { %9383 = vadd.xlane.f32.xlu0 %v9382_v59 }
 0x846   :  { %9398 = vadd.xlane.f32.xlu1 %v9397_v14 }
 0x848   :  { %9395 = vadd.xlane.f32.xlu0 %v9394_v9 }
 0x84a   :  { %9410 = vadd.xlane.f32.xlu1 %v9409_v24 }
 0x84c   :  { %9407 = vadd.xlane.f32.xlu0 %v9406_v34 }
 0x862   :  { %v9129_v63 = vpop.xlane.xlu0 %9128 }
 0x863   :  { %v9221_v3 = vsub.f32 %v20860_v26, %v9129_v63 }
 0x864   :  { %v9126_v59 = vpop.xlane.xlu1 %9125 }
 0x865   :  { %v9254_v6 = vmul.f32 1.442695, %v9221_v3  ;;  %v9220_v14 = vsub.f32 %v20864_v29, %v9126_v59 }
 0x867   :  { %17762 = vpow2.f32 %v9254_v6  ;;  %v9252_v44 = vmul.f32 1.442695, %v9220_v14 }
 0x869   :  { %17764 = vpow2.f32 %v9252_v44 }
 0x86a   :  { %v9141_v22 = vpop.xlane.xlu1 %9140 }
 0x86b   :  { %v9225_v9 = vsub.f32 %v20872_v61, %v9141_v22 }
 0x86c   :  { %v9138_v39 = vpop.xlane.xlu0 %9137 }
 0x86d   :  { %v9262_v54 = vmul.f32 1.442695, %v9225_v9  ;;  %v9224_v24 = vsub.f32 %v20878_v55, %v9138_v39 }
 0x86e   :  { %v21056_v61 = vpop.permute.xlu1 %10618 }
 0x86f   :  { %17766 = vpow2.f32 %v9262_v54  ;;  %v9260_v51 = vmul.f32 1.442695, %v9224_v24  ;;  %22909 = vst [vmem:[#allocation108_spill] sm:$0xff] %v21056_v61 }
 0x870   :  { %v21058_v6 = vpop.permute.xlu0 %10529 }
 0x871   :  { %17768 = vpow2.f32 %v9260_v51 }
 0x874   :  { %v21040_v34 = vpop.eup %17762 }
 0x875   :  { %v9319_v26 = vsel %vm1886_vm3, %v21040_v34, 0.0 }
 0x876   :  { %v21044_v63 = vpop.eup %17764  ;;  %9320 = vadd.xlane.f32.xlu1 %v9319_v26 }
 0x877   :  { %v9316_v44 = vsel %vm1886_vm3, %v21044_v63, 0.0 }
 0x878   :  { %9317 = vadd.xlane.f32.xlu0 %v9316_v44 }
 0x87c   :  { %v21048_v22 = vpop.eup %17766 }
 0x87d   :  { %v9331_v55 = vsel %vm1886_vm3, %v21048_v22, 0.0 }
 0x87e   :  { %v21052_v39 = vpop.eup %17768  ;;  %9332 = vadd.xlane.f32.xlu1 %v9331_v55 }
 0x87f   :  { %v9328_v29 = vsel %vm1886_vm3, %v21052_v39, 0.0 }
 0x880   :  { %9329 = vadd.xlane.f32.xlu0 %v9328_v29 }
 0x89f   :  { %v9153_v54 = vpop.xlane.xlu1 %9152 }
 0x8a0   :  { %v9229_v51 = vsub.f32 %v20911_v52, %v9153_v54 }
 0x8a1   :  { %v9150_v3 = vpop.xlane.xlu0 %9149 }
 0x8a2   :  { %v9270_v59 = vmul.f32 1.442695, %v9229_v51  ;;  %v9228_v14 = vsub.f32 %v20914_v60, %v9150_v3 }
 0x8a3   :  { %v9165_v9 = vpop.xlane.xlu1 %9164 }
 0x8a4   :  { %17770 = vpow2.f32 %v9270_v59  ;;  %v9268_v24 = vmul.f32 1.442695, %v9228_v14  ;;  %v9233_v26 = vsub.f32 %v20916_v31, %v9165_v9 }
 0x8a5   :  { %v9162_v44 = vpop.xlane.xlu0 %9161 }
 0x8a6   :  { %17772 = vpow2.f32 %v9268_v24  ;;  %v9278_v55 = vmul.f32 1.442695, %v9233_v26  ;;  %v9232_v29 = vsub.f32 %v20924_v20, %v9162_v44 }
 0x8a7   :  { %v9327_v61 = vpop.xlane.xlu1 %9326 }
 0x8a8   :  { %17774 = vpow2.f32 %v9278_v55  ;;  %v9276_v48 = vmul.f32 1.442695, %v9232_v29 }
 0x8a9   :  { %17776 = vrcp.f32 %v9327_v61  ;;  %v9324_v10 = vpop.xlane.xlu0 %9323 }
 0x8aa   :  { %17778 = vpow2.f32 %v9276_v48 }
 0x8ab   :  { %17780 = vrcp.f32 %v9324_v10  ;;  %v9177_v52 = vpop.xlane.xlu1 %9176 }
 0x8ac   :  { %v9237_v60 = vsub.f32 %v20934_v58, %v9177_v52 }
 0x8ad   :  { %v9174_v54 = vpop.xlane.xlu0 %9173 }
 0x8ae   :  { %v9286_v51 = vmul.f32 1.442695, %v9237_v60  ;;  %v9236_v3 = vsub.f32 %v20942_v38, %v9174_v54 }
 0x8af   :  { %v9339_v31 = vpop.xlane.xlu1 %9338 }
 0x8b0   :  { %17782 = vpow2.f32 %v9286_v51  ;;  %v9284_v59 = vmul.f32 1.442695, %v9236_v3 }
 0x8b1   :  { %v21066_v14 = vpop.eup %17770  ;;  %17784 = vrcp.f32 %v9339_v31  ;;  %v9336_v20 = vpop.xlane.xlu0 %9335 }
 0x8b2   :  { %22910 = vst [vmem:[#allocation109_spill] sm:$0xff] %v21066_v14  ;;  %17786 = vpow2.f32 %v9284_v59  ;;  %v9343_v9 = vsel %vm1886_vm3, %v21066_v14, 0.0 }
 0x8b3   :  { %v21070_v48 = vpop.eup %17772  ;;  %17788 = vrcp.f32 %v9336_v20  ;;  %9344 = vadd.xlane.f32.xlu1 %v9343_v9  ;;  %v9189_v58 = vpop.xlane.xlu1 %9188 }
 0x8b4   :  { %22911 = vst [vmem:[#allocation110_spill] sm:$0xff] %v21070_v48  ;;  %v9241_v24 = vsub.f32 %v20952_v28, %v9189_v58  ;;  %v9340_v38 = vsel %vm1886_vm3, %v21070_v48, 0.0 }
 0x8b5   :  { %v21075_v26 = vpop.eup %17774  ;;  %v9186_v44 = vpop.xlane.xlu0 %9185  ;;  %9341 = vadd.xlane.f32.xlu0 %v9340_v38 }
 0x8b6   :  { %22912 = vst [vmem:[#allocation111_spill] sm:$0xff] %v21075_v26  ;;  %v17777_v55 = vpop.eup %17776  ;;  %v9294_v29 = vmul.f32 1.442695, %v9241_v24  ;;  %v9240_v52 = vsub.f32 %v20960_v30, %v9186_v44  ;;  %v9355_v60 = vsel %vm1886_vm3, %v21075_v26, 0.0 }
 0x8b7   :  { %v21080_v54 = vpop.eup %17778  ;;  %v9447_v51 = vmul.f32 %v17777_v55, %v9327_v61  ;;  %9356 = vadd.xlane.f32.xlu1 %v9355_v60  ;;  %v9351_v3 = vpop.xlane.xlu1 %9350 }
 0x8b8   :  { %22913 = vst [vmem:[#allocation112_spill] sm:$0xff] %v21080_v54  ;;  %v17781_v28 = vpop.eup %17780  ;;  %17790 = vpow2.f32 %v9294_v29  ;;  %v9292_v59 = vmul.f32 1.442695, %v9240_v52  ;;  %v9352_v9 = vsel %vm1886_vm3, %v21080_v54, 0.0 }
 0x8b9   :  { %v9479_v58 = vsub.f32 2.0, %v9447_v51  ;;  %v9446_v38 = vmul.f32 %v17781_v28, %v9324_v10  ;;  %17792 = vrcp.f32 %v9351_v3  ;;  %v9348_v24 = vpop.xlane.xlu0 %9347  ;;  %9353 = vadd.xlane.f32.xlu0 %v9352_v9 }
 0x8ba   :  { %17794 = vpow2.f32 %v9292_v59 }
 0x8bb   :  { %v9478_v30 = vsub.f32 2.0, %v9446_v38  ;;  %17796 = vrcp.f32 %v9348_v24  ;;  %v9201_v44 = vpop.xlane.xlu1 %9200  ;;  %v9511_v26 = vmul.f32 %v17777_v55, %v9479_v58 }
 0x8bc   :  { %v9245_v61 = vsub.f32 %v20972_v46, %v9201_v44 }
 0x8bd   :  { %v21085_v60 = vpop.eup %17782  ;;  %v9510_v14 = vmul.f32 %v17781_v28, %v9478_v30  ;;  %v9198_v29 = vpop.xlane.xlu0 %9197  ;;  %v9543_v46 = vmul.f32 %v20928_v53, %v9511_v26 }
 0x8be   :  { %v17785_v52 = vpop.eup %17784  ;;  %v9302_v48 = vmul.f32 1.442695, %v9245_v61  ;;  %v9244_v54 = vsub.f32 %v20980_v0, %v9198_v29  ;;  %v9367_v10 = vsel %vm1886_vm3, %v21085_v60, 0.0 }
 0x8bf   :  { %v21090_v51 = vpop.eup %17786  ;;  %v9451_v59 = vmul.f32 %v17785_v52, %v9339_v31  ;;  %9368 = vadd.xlane.f32.xlu1 %v9367_v10  ;;  %v9363_v9 = vpop.xlane.xlu1 %9362  ;;  %v9542_v55 = vmul.f32 %v20932_v12, %v9510_v14 }
 0x8c0   :  { %v17789_v58 = vpop.eup %17788  ;;  %17798 = vpow2.f32 %v9302_v48  ;;  %v9300_v28 = vmul.f32 1.442695, %v9244_v54  ;;  %v9364_v31 = vsel %vm1886_vm3, %v21090_v51, 0.0 }
 0x8c1   :  { %v9483_v38 = vsub.f32 2.0, %v9451_v59  ;;  %v9450_v30 = vmul.f32 %v17789_v58, %v9336_v20  ;;  %17800 = vrcp.f32 %v9363_v9  ;;  %17033 = vmatprep.mubr.msk.f32.mxu0 %vm1886_vm3, %v9542_v55  ;;  %v9360_v0 = vpop.xlane.xlu0 %9359 }
 0x8c2   :  { %17802 = vpow2.f32 %v9300_v28  ;;  %17034 = vmatmul.mubr.msk.f32.vlgmr.msra.gmra.mxu0 %vm1886_vm3, %v9543_v46 }
 0x8c3   :  { %v9482_v44 = vsub.f32 2.0, %v9450_v30  ;;  %17804 = vrcp.f32 %v9360_v0  ;;  %17044 = vmatpush3.msra.mxu0 %v20553_v8  ;;  %9365 = vadd.xlane.f32.xlu1 %v9364_v31  ;;  %v21099_v53 = vpop.xlane.xlu1 %9212  ;;  %v9515_v12 = vmul.f32 %v17785_v52, %v9483_v38 }
 0x8c4   :  { %17045 = vmatprep.subr.mxu0 %v20858_v50 }
 0x8c5   :  { %v21102_v14 = vpop.eup %17790  ;;  %v9514_v20 = vmul.f32 %v17789_v58, %v9482_v44  ;;  %17046 = vmatpush3.msra.mxu0 %v20858_v50  ;;  %v21105_v48 = vpop.xlane.xlu0 %9209  ;;  %v9547_v59 = vmul.f32 %v20946_v17, %v9515_v12 }
 0x8c6   :  { %v17793_v26 = vpop.eup %17792  ;;  %17057 = vmatprep.subr.mxu0 %v20866_v45  ;;  %v9379_v54 = vsel %vm1886_vm3, %v21102_v14, 0.0 }
 0x8c7   :  { %v21110_v8 = vpop.eup %17794  ;;  %v9455_v61 = vmul.f32 %v17793_v26, %v9351_v3  ;;  %9380 = vadd.xlane.f32.xlu1 %v9379_v54  ;;  %v9375_v29 = vpop.xlane.xlu1 %9374  ;;  %v9546_v52 = vmul.f32 %v20950_v16, %v9514_v20 }
 0x8c8   :  { %v17797_v10 = vpop.eup %17796  ;;  %v9376_v50 = vsel %vm1886_vm3, %v21110_v8, 0.0  ;;  %17806 = vrcp.f32 %v9375_v29 }
 0x8c9   :  { %v9487_v55 = vsub.f32 2.0, %v9455_v61  ;;  %v9454_v58 = vmul.f32 %v17797_v10, %v9348_v24  ;;  %17047 = vmatprep.mubr.msk.f32.mxu0 %vm1886_vm3, %v9546_v52  ;;  %v9372_v46 = vpop.xlane.xlu0 %9371  ;;  %9377 = vadd.xlane.f32.xlu0 %v9376_v50 }
 0x8ca   :  { %17048 = vmatmul.mubr.msk.f32.vlgmr.msra.gmra.mxu0 %vm1886_vm3, %v9547_v59  ;;  %17808 = vrcp.f32 %v9372_v46 }
 0x8cb   :  { %v9486_v3 = vsub.f32 2.0, %v9454_v58  ;;  %17058 = vmatpush3.msra.mxu0 %v20866_v45  ;;  %v9387_v16 = vpop.xlane.xlu1 %9386  ;;  %v9519_v28 = vmul.f32 %v17793_v26, %v9487_v55 }
 0x8cc   :  { %17059 = vmatprep.subr.mxu0 %v20880_v62  ;;  %17810 = vrcp.f32 %v9387_v16 }
 0x8cd   :  { %v21120_v17 = vpop.eup %17798  ;;  %v9518_v38 = vmul.f32 %v17797_v10, %v9486_v3  ;;  %17060 = vmatpush3.msra.mxu0 %v20880_v62  ;;  %v9384_v24 = vpop.xlane.xlu0 %9383  ;;  %v9551_v26 = vmul.f32 %v20965_v49, %v9519_v28 }
 0x8ce   :  { %v17801_v30 = vpop.eup %17800  ;;  %17071 = vmatprep.subr.mxu0 %v20884_v37  ;;  %17812 = vrcp.f32 %v9384_v24  ;;  %v9391_v31 = vsel %vm1886_vm3, %v21120_v17, 0.0 }
 0x8cf   :  { %v21126_v44 = vpop.eup %17802  ;;  %v9459_v45 = vmul.f32 %v17801_v30, %v9363_v9  ;;  %9392 = vadd.xlane.f32.xlu1 %v9391_v31  ;;  %v9550_v12 = vmul.f32 %v20970_v56, %v9518_v38 }
 0x8d0   :  { %v17805_v20 = vpop.eup %17804  ;;  %v9388_v62 = vsel %vm1886_vm3, %v21126_v44, 0.0 }
 0x8d1   :  { %v9491_v54 = vsub.f32 2.0, %v9459_v45  ;;  %v9458_v61 = vmul.f32 %v17805_v20, %v9360_v0  ;;  %17061 = vmatprep.mubr.msk.f32.mxu0 %vm1886_vm3, %v9550_v12  ;;  %v9396_v52 = vpop.xlane.xlu0 %9395  ;;  %9389 = vadd.xlane.f32.xlu0 %v9388_v62 }
 0x8d2   :  { %17814 = vrcp.f32 %v9396_v52  ;;  %17062 = vmatmul.mubr.msk.f32.vlgmr.msra.gmra.mxu0 %vm1886_vm3, %v9551_v26 }
 0x8d3   :  { %v9490_v10 = vsub.f32 2.0, %v9458_v61  ;;  %17072 = vmatpush3.msra.mxu0 %v20884_v37  ;;  %v9523_v9 = vmul.f32 %v17801_v30, %v9491_v54 }
 0x8d4   :  { %17073 = vmatprep.subr.mxu0 %v20890_v4 }
 0x8d5   :  { %v9522_v56 = vmul.f32 %v17805_v20, %v9490_v10  ;;  %17074 = vmatpush3.msra.mxu0 %v20890_v4  ;;  %v17807_v49 = vpop.eup %17806  ;;  %v9555_v55 = vmul.f32 %v20985_v7, %v9523_v9 }
 0x8d6   :  { %17085 = vmatprep.subr.mxu0 %v20892_v21  ;;  %v9463_v0 = vmul.f32 %v17807_v49, %v9375_v29 }
 0x8d7   :  { %v9554_v59 = vmul.f32 %v20990_v36, %v9522_v56  ;;  %v17809_v50 = vpop.eup %17808 }
 0x8d8   :  { %v9495_v3 = vsub.f32 2.0, %v9463_v0  ;;  %v9462_v28 = vmul.f32 %v17809_v50, %v9372_v46 }
 0x8d9   :  { %v17811_v58 = vpop.eup %17810  ;;  %17075 = vmatprep.mubr.msk.f32.mxu0 %vm1886_vm3, %v9554_v59 }
 0x8da   :  { %v9467_v37 = vmul.f32 %v17811_v58, %v9387_v16  ;;  %17076 = vmatmul.mubr.msk.f32.vlgmr.msra.gmra.mxu0 %vm1886_vm3, %v9555_v55  ;;  %v9494_v30 = vsub.f32 2.0, %v9462_v28  ;;  %v9527_v4 = vmul.f32 %v17807_v49, %v9495_v3 }
 0x8db   :  { %v17813_v38 = vpop.eup %17812  ;;  %17086 = vmatpush3.msra.mxu0 %v20892_v21 }
 0x8dc   :  { %v9499_v31 = vsub.f32 2.0, %v9467_v37  ;;  %v9466_v29 = vmul.f32 %v17813_v38, %v9384_v24  ;;  %17087 = vmatprep.subr.mxu0 %v20902_v35  ;;  %v9526_v36 = vmul.f32 %v17809_v50, %v9494_v30  ;;  %v9559_v45 = vmul.f32 %v21002_v43, %v9527_v4 }
 0x8dd   :  { %17088 = vmatpush3.msra.mxu0 %v20902_v35 }
 0x8de   :  { %v9498_v7 = vsub.f32 2.0, %v9466_v29  ;;  %17099 = vmatprep.subr.mxu0 %v20904_v42  ;;  %v9558_v16 = vmul.f32 %v21006_v32, %v9526_v36  ;;  %v9531_v12 = vmul.f32 %v17811_v58, %v9499_v31 }
 0x8df   :  { %v17815_v46 = vpop.eup %17814 }
 0x8e0   :  { %v9530_v20 = vmul.f32 %v17813_v38, %v9498_v7  ;;  %v9470_v26 = vmul.f32 %v17815_v46, %v9396_v52  ;;  %10705 = vrot.lane.b32.xlu1 %v22797_v2, %s18015_s8  ;;  %17089 = vmatprep.mubr.msk.f32.mxu0 %vm1886_vm3, %v9558_v16  ;;  %v9563_v24 = vmul.f32 %v21010_v18, %v9531_v12  ;;  %v22919_v16 = vld [vmem:[#allocation11_spill] sm:$0xff]  ;;  %v22921_v12 = vld [vmem:[#allocation13_spill] sm:$0xff] }
 0x8e1   :  { %17090 = vmatmul.mubr.msk.f32.vlgmr.msra.gmra.mxu0 %vm1886_vm3, %v9559_v45  ;;  %v9248_v18 = vsub.f32 %v20998_v5, %v21105_v48  ;;  %v22920_v45 = vld [vmem:[#allocation9_spill] sm:$0xff] }
 0x8e2   :  { %v9502_v21 = vsub.f32 2.0, %v9470_v26  ;;  %v9562_v35 = vmul.f32 %v21014_v1, %v9530_v20  ;;  %17100 = vmatpush3.msra.mxu0 %v20904_v42  ;;  %v9249_v42 = vsub.f32 %v20992_v23, %v21099_v53  ;;  %v22922_v20 = vld [vmem:[#allocation12_spill] sm:$0xff] }
 0x8e3   :  { %17101 = vmatprep.subr.mxu0 %v21058_v6  ;;  %v9308_v62 = vmul.f32 1.442695, %v9248_v18  ;;  %v22925_v18 = vld [vmem:[#allocation17_spill] sm:$0xff] }
 0x8e4   :  { %v9534_v32 = vmul.f32 %v17815_v46, %v9502_v21  ;;  %17103 = vmatprep.mubr.msk.f32.mxu0 %vm1886_vm3, %v9562_v35  ;;  %17102 = vmatpush3.msra.mxu0 %v21058_v6  ;;  %v9310_v1 = vmul.f32 1.442695, %v9249_v42  ;;  %v21167_v6 = vpop.xlane.xlu1 %9398 }
 0x8e5   :  { %17104 = vmatmul.mubr.msk.f32.vlgmr.msra.gmra.mxu0 %vm1886_vm3, %v9563_v24  ;;  %v22923_v24 = vld [vmem:[#allocation15_spill] sm:$0xff] }
 0x8e6   :  { %v9566_v43 = vmul.f32 %v21022_v40, %v9534_v32  ;;  %17816 = vpow2.f32 %v9310_v1  ;;  %v21171_v40 = vpop.xlane.xlu0 %9407 }
 0x8e7   :  { %10616 = vrot.lane.b32.xlu0 %v22798_v33, %s18015_s8  ;;  %17818 = vpow2.f32 %v9308_v62 }
 0x8e8   :  { %17117 = vmatprep.mubr.msk.f32.mxu0 %vm1886_vm3, %v9566_v43  ;;  %v21169_v54 = vpop.xlane.xlu1 %9410  ;;  %v22924_v43 = vld [vmem:[#allocation14_spill] sm:$0xff] }
 0x8f3   :  { %v21173_v52 = vpop.eup %17816 }
 0x8f4   :  { %v21175_v9 = vpop.eup %17818  ;;  %v9403_v23 = vsel %vm1886_vm3, %v21173_v52, 0.0 }
 0x8f5   :  { %v9400_v5 = vsel %vm1886_vm3, %v21175_v9, 0.0 }
 0x8ff   :  { %v9321_v61 = vpop.xlane.xlu1 %9320 }
 0x900   :  { %17820 = vrcp.f32 %v9321_v61 }
 0x901   :  { %v9318_v10 = vpop.xlane.xlu0 %9317 }
 0x902   :  { %17822 = vrcp.f32 %v9318_v10 }
 0x904   :  { %9404 = vadd.xlane.f32.xlu1 %v9403_v23 }
 0x906   :  { %9401 = vadd.xlane.f32.xlu0 %v9400_v5 }
 0x907   :  { %v9333_v53 = vpop.xlane.xlu1 %9332 }
 0x908   :  { %17824 = vrcp.f32 %v9333_v53 }
 0x909   :  { %v9330_v48 = vpop.xlane.xlu0 %9329 }
 0x90a   :  { %17826 = vrcp.f32 %v9330_v48 }
 0x90d   :  { %v17821_v56 = vpop.eup %17820 }
 0x90e   :  { %v9445_v49 = vmul.f32 %v17821_v56, %v9321_v61 }
 0x90f   :  { %v17823_v0 = vpop.eup %17822 }
 0x910   :  { %v9477_v59 = vsub.f32 2.0, %v9445_v49  ;;  %v9444_v50 = vmul.f32 %v17823_v0, %v9318_v10  ;;  %v22926_v10 = vld [vmem:[#allocation16_spill] sm:$0xff] }
 0x912   :  { %v9476_v55 = vsub.f32 2.0, %v9444_v50  ;;  %v9509_v58 = vmul.f32 %v17821_v56, %v9477_v59 }
 0x914   :  { %v9508_v3 = vmul.f32 %v17823_v0, %v9476_v55  ;;  %v9541_v4 = vmul.f32 %v21040_v34, %v9509_v58 }
 0x915   :  { %v17825_v28 = vpop.eup %17824  ;;  %10792 = vrot.lane.b32.xlu1 %v22799_v15, %s18015_s8 }
 0x916   :  { %v9449_v37 = vmul.f32 %v17825_v28, %v9333_v53  ;;  %v9540_v38 = vmul.f32 %v21044_v63, %v9508_v3 }
 0x917   :  { %v17827_v30 = vpop.eup %17826 }
 0x918   :  { %v9481_v31 = vsub.f32 2.0, %v9449_v37  ;;  %v9448_v29 = vmul.f32 %v17827_v30, %v9330_v48  ;;  %17026 = vmatprep.mubr.msk.f32.mxu1 %vm1886_vm3, %v9540_v38 }
 0x919   :  { %10879 = vrot.lane.b32.xlu1 %v22637_v57, %s18015_s8  ;;  %17027 = vmatmul.mubr.msk.f32.vlgmr.msra.gmra.mxu1 %vm1886_vm3, %v9541_v4 }
 0x91a   :  { %v9480_v36 = vsub.f32 2.0, %v9448_v29  ;;  %17037 = vmatpush3.msra.mxu1 %v20546_v27  ;;  %v9513_v7 = vmul.f32 %v17825_v28, %v9481_v31  ;;  %v22914_v27 = vld [vmem:[#allocation98_spill] sm:$0xff]  ;;  %v22927_v28 = vld [vmem:[#allocation19_spill] sm:$0xff]  ;;  %v22929_v31 = vld [vmem:[#allocation109_spill] sm:$0xff] }
 0x91b   :  { %17038 = vmatprep.subr.mxu1 %v20848_v25 }
 0x91c   :  { %v9512_v46 = vmul.f32 %v17827_v30, %v9480_v36  ;;  %10703 = vrot.lane.b32.xlu0 %v22800_v11, %s18015_s8  ;;  %17039 = vmatpush3.msra.mxu1 %v20848_v25  ;;  %v9545_v63 = vmul.f32 %v21048_v22, %v9513_v7  ;;  %v22915_v25 = vld [vmem:[#allocation36_spill] sm:$0xff]  ;;  %v22916_v22 = vld [vmem:[#allocation99_spill] sm:$0xff]  ;;  %v22928_v30 = vld [vmem:[#allocation110_spill] sm:$0xff] }
 0x91d   :  { %11324 = vrot.lane.b32.xlu1 %v22647_v47, %s18016_s9  ;;  %17050 = vmatprep.subr.mxu1 %v20854_v19  ;;  %v22930_v36 = vld [vmem:[#allocation18_spill] sm:$0xff] }
 0x91e   :  { %v9544_v34 = vmul.f32 %v21052_v39, %v9512_v46  ;;  %v22917_v39 = vld [vmem:[#allocation8_spill] sm:$0xff] }
 0x920   :  { %10790 = vrot.lane.b32.xlu0 %v22638_v41, %s18015_s8  ;;  %17040 = vmatprep.mubr.msk.f32.mxu1 %vm1886_vm3, %v9544_v34 }
 0x921   :  { %11318 = vrot.lane.b32.xlu1 %v22645_v13, %s18017_s1  ;;  %17041 = vmatmul.mubr.msk.f32.vlgmr.msra.gmra.mxu1 %vm1886_vm3, %v9545_v63 }
 0x922   :  { %17051 = vmatpush3.msra.mxu1 %v20854_v19  ;;  %v22918_v19 = vld [vmem:[#allocation7_spill] sm:$0xff] }
 0x923   :  { %17052 = vmatprep.subr.mxu1 %v22914_v27 }
 0x924   :  { %17053 = vmatpush3.msra.mxu1 %v22914_v27  ;;  %10877 = vrot.lane.b32.xlu0 %v22915_v25, %s18015_s8  ;;  %v22931_v27 = vld [vmem:[#allocation112_spill] sm:$0xff] }
 0x925   :  { %17064 = vmatprep.subr.mxu1 %v22916_v22  ;;  %11320 = vrot.lane.b32.xlu1 %v22647_v47, %s18017_s1 }
 0x928   :  { %11322 = vrot.lane.b32.xlu0 %v22645_v13, %s18016_s9 }
 0x929   :  { %11409 = vrot.lane.b32.xlu1 %v22917_v39, %s18017_s1 }
 0x92c   :  { %11415 = vrot.lane.b32.xlu0 %v22918_v19, %s18016_s9 }
 0x92d   :  { %11411 = vrot.lane.b32.xlu1 %v22918_v19, %s18017_s1 }
 0x930   :  { %11413 = vrot.lane.b32.xlu0 %v22917_v39, %s18016_s9 }
 0x931   :  { %11500 = vrot.lane.b32.xlu1 %v22919_v16, %s18017_s1 }
 0x934   :  { %11506 = vrot.lane.b32.xlu0 %v22920_v45, %s18016_s9 }
 0x935   :  { %11502 = vrot.lane.b32.xlu1 %v22920_v45, %s18017_s1 }
 0x938   :  { %11504 = vrot.lane.b32.xlu0 %v22919_v16, %s18016_s9 }
 0x939   :  { %11591 = vrot.lane.b32.xlu1 %v22921_v12, %s18017_s1 }
 0x93c   :  { %11597 = vrot.lane.b32.xlu0 %v22922_v20, %s18016_s9  ;;  %v9345_v26 = vpop.xlane.xlu1 %9344 }
 0x93d   :  { %17828 = vrcp.f32 %v9345_v26  ;;  %11593 = vrot.lane.b32.xlu1 %v22922_v20, %s18017_s1 }
 0x93e   :  { %v9342_v21 = vpop.xlane.xlu0 %9341 }
 0x93f   :  { %17830 = vrcp.f32 %v9342_v21 }
 0x940   :  { %11595 = vrot.lane.b32.xlu0 %v22921_v12, %s18016_s9  ;;  %v9357_v35 = vpop.xlane.xlu1 %9356 }
 0x941   :  { %17832 = vrcp.f32 %v9357_v35  ;;  %11682 = vrot.lane.b32.xlu1 %v22923_v24, %s18017_s1 }
 0x942   :  { %v9354_v32 = vpop.xlane.xlu0 %9353 }
 0x943   :  { %17834 = vrcp.f32 %v9354_v32 }
 0x944   :  { %11688 = vrot.lane.b32.xlu0 %v22924_v43, %s18016_s9 }
 0x945   :  { %11684 = vrot.lane.b32.xlu1 %v22924_v43, %s18017_s1 }
 0x948   :  { %11686 = vrot.lane.b32.xlu0 %v22923_v24, %s18016_s9  ;;  %v9369_v42 = vpop.xlane.xlu1 %9368 }
 0x949   :  { %17836 = vrcp.f32 %v9369_v42  ;;  %11773 = vrot.lane.b32.xlu1 %v22925_v18, %s18017_s1 }
 0x94a   :  { %v17829_v1 = vpop.eup %17828 }
 0x94b   :  { %v9453_v62 = vmul.f32 %v17829_v1, %v9345_v26 }
 0x94c   :  { %v17831_v61 = vpop.eup %17830  ;;  %11779 = vrot.lane.b32.xlu0 %v22926_v10, %s18016_s9  ;;  %v9366_v23 = vpop.xlane.xlu1 %9365 }
 0x94d   :  { %v9485_v5 = vsub.f32 2.0, %v9453_v62  ;;  %v9452_v53 = vmul.f32 %v17831_v61, %v9342_v21  ;;  %17838 = vrcp.f32 %v9366_v23  ;;  %11775 = vrot.lane.b32.xlu1 %v22926_v10, %s18017_s1  ;;  %v22932_v21 = vld [vmem:[#allocation100_spill] sm:$0xff]  ;;  %v22934_v62 = vld [vmem:[#allocation21_spill] sm:$0xff] }
 0x94e   :  { %v17833_v48 = vpop.eup %17832 }
 0x94f   :  { %v9484_v56 = vsub.f32 2.0, %v9452_v53  ;;  %v9457_v49 = vmul.f32 %v17833_v48, %v9357_v35  ;;  %v9517_v59 = vmul.f32 %v17829_v1, %v9485_v5 }
 0x950   :  { %v17835_v0 = vpop.eup %17834  ;;  %11777 = vrot.lane.b32.xlu0 %v22925_v18, %s18016_s9  ;;  %v9381_v50 = vpop.xlane.xlu1 %9380 }
 0x951   :  { %v9516_v55 = vmul.f32 %v17831_v61, %v9484_v56  ;;  %v9489_v58 = vsub.f32 2.0, %v9457_v49  ;;  %v9456_v3 = vmul.f32 %v17835_v0, %v9354_v32  ;;  %11864 = vrot.lane.b32.xlu1 %v22927_v28, %s18017_s1  ;;  %17840 = vrcp.f32 %v9381_v50  ;;  %v22933_v32 = vld [vmem:[#allocation111_spill] sm:$0xff] }
 0x952   :  { %v9378_v37 = vpop.xlane.xlu0 %9377  ;;  %v9549_v29 = vmul.f32 %v22929_v31, %v9517_v59  ;;  %v22940_v31 = vld [vmem:[#allocation23_spill] sm:$0xff] }
 0x953   :  { %v9488_v38 = vsub.f32 2.0, %v9456_v3  ;;  %17842 = vrcp.f32 %v9378_v37  ;;  %v9548_v4 = vmul.f32 %v22928_v30, %v9516_v55  ;;  %v9521_v7 = vmul.f32 %v17833_v48, %v9489_v58  ;;  %v22936_v48 = vld [vmem:[#allocation20_spill] sm:$0xff]  ;;  %v22938_v58 = vld [vmem:[#allocation103_spill] sm:$0xff]  ;;  %v22939_v30 = vld [vmem:[#allocation22_spill] sm:$0xff] }
 0x954   :  { %11870 = vrot.lane.b32.xlu0 %v22930_v36, %s18016_s9 }
 0x955   :  { %v9520_v46 = vmul.f32 %v17835_v0, %v9488_v38  ;;  %11866 = vrot.lane.b32.xlu1 %v22930_v36, %s18017_s1  ;;  %17054 = vmatprep.mubr.msk.f32.mxu1 %vm1886_vm3, %v9548_v4  ;;  %v9553_v1 = vmul.f32 %v22933_v32, %v9521_v7  ;;  %v22937_v0 = vld [vmem:[#allocation102_spill] sm:$0xff]  ;;  %v22942_v32 = vld [vmem:[#allocation108_spill] sm:$0xff] }
 0x956   :  { %v17837_v34 = vpop.eup %17836  ;;  %17055 = vmatmul.mubr.msk.f32.vlgmr.msra.gmra.mxu1 %vm1886_vm3, %v9549_v29 }
 0x957   :  { %v9461_v63 = vmul.f32 %v17837_v34, %v9369_v42  ;;  %17065 = vmatpush3.msra.mxu1 %v22916_v22  ;;  %v9552_v26 = vmul.f32 %v22931_v27, %v9520_v46  ;;  %v22935_v22 = vld [vmem:[#allocation101_spill] sm:$0xff] }
 0x958   :  { %17066 = vmatprep.subr.mxu1 %v22932_v21  ;;  %11868 = vrot.lane.b32.xlu0 %v22927_v28, %s18016_s9  ;;  %v9393_v35 = vpop.xlane.xlu1 %9392 }
 0x959   :  { %17067 = vmatpush3.msra.mxu1 %v22932_v21  ;;  %17844 = vrcp.f32 %v9393_v35  ;;  %12052 = vrot.lane.b32.xlu1 %v22934_v62, %s18016_s9  ;;  %v9493_v42 = vsub.f32 2.0, %v9461_v63 }
 0x95a   :  { %v17839_v61 = vpop.eup %17838  ;;  %17068 = vmatprep.mubr.msk.f32.mxu1 %vm1886_vm3, %v9552_v26  ;;  %17078 = vmatprep.subr.mxu1 %v22935_v22  ;;  %v9390_v5 = vpop.xlane.xlu0 %9389 }
 0x95b   :  { %v9460_v53 = vmul.f32 %v17839_v61, %v9366_v23  ;;  %17846 = vrcp.f32 %v9390_v5  ;;  %17069 = vmatmul.mubr.msk.f32.vlgmr.msra.gmra.mxu1 %vm1886_vm3, %v9553_v1  ;;  %v9525_v59 = vmul.f32 %v17837_v34, %v9493_v42  ;;  %v22943_v1 = vld [vmem:[#allocation10_spill] sm:$0xff] }
 0x95c   :  { %17079 = vmatpush3.msra.mxu1 %v22935_v22  ;;  %11961 = vrot.lane.b32.xlu0 %v22936_v48, %s18016_s9  ;;  %v10706_v56 = vpop.permute.xlu1 %10705  ;;  %v22944_v22 = vld [vmem:[#allocation25_spill] sm:$0xff]  ;;  %17848 = vrcp.f32 %v21167_v6 }
 0x95d   :  { %v9492_v49 = vsub.f32 2.0, %v9460_v53  ;;  %17080 = vmatprep.subr.mxu1 %v22937_v0  ;;  %11957 = vrot.lane.b32.xlu1 %v22936_v48, %s18017_s1  ;;  %v9557_v7 = vmul.f32 %v21085_v60, %v9525_v59  ;;  %17850 = vrcp.f32 %v21171_v40  ;;  %v22949_v59 = vld [vmem:[#allocation28_spill] sm:$0xff] }
 0x95e   :  { %17081 = vmatpush3.msra.mxu1 %v22937_v0  ;;  %17113 = vmatprep.subr.mxu0 %v10706_v56  ;;  %v17841_v23 = vpop.eup %17840  ;;  %v10617_v53 = vpop.permute.xlu0 %10616  ;;  %v22946_v0 = vld [vmem:[#allocation27_spill] sm:$0xff]  ;;  %17852 = vrcp.f32 %v21169_v54 }
 0x95f   :  { %v9524_v55 = vmul.f32 %v17839_v61, %v9492_v49  ;;  %17092 = vmatprep.subr.mxu1 %v22938_v58  ;;  %17114 = vmatpush3.msra.mxu0 %v10706_v56  ;;  %v9465_v38 = vmul.f32 %v17841_v23, %v9381_v50  ;;  %v22945_v49 = vld [vmem:[#allocation24_spill] sm:$0xff] }
 0x960   :  { %v17843_v3 = vpop.eup %17842  ;;  %11959 = vrot.lane.b32.xlu0 %v22939_v30, %s18016_s9 }
 0x961   :  { %v9464_v4 = vmul.f32 %v17843_v3, %v9378_v37  ;;  %12143 = vrot.lane.b32.xlu1 %v22940_v31, %s18016_s9  ;;  %v9556_v29 = vmul.f32 %v21090_v51, %v9524_v55  ;;  %v9497_v46 = vsub.f32 2.0, %v9465_v38  ;;  %v22941_v51 = vld [vmem:[#allocation104_spill] sm:$0xff] }
 0x963   :  { %v9496_v34 = vsub.f32 2.0, %v9464_v4  ;;  %17082 = vmatprep.mubr.msk.f32.mxu1 %vm1886_vm3, %v9556_v29  ;;  %v9529_v63 = vmul.f32 %v17841_v23, %v9497_v46 }
 0x964   :  { %11955 = vrot.lane.b32.xlu0 %v22939_v30, %s18017_s1  ;;  %17083 = vmatmul.mubr.msk.f32.vlgmr.msra.gmra.mxu1 %vm1886_vm3, %v9557_v7 }
 0x965   :  { %v9528_v50 = vmul.f32 %v17843_v3, %v9496_v34  ;;  %17093 = vmatpush3.msra.mxu1 %v22938_v58  ;;  %12048 = vrot.lane.b32.xlu1 %v22934_v62, %s18017_s1  ;;  %v9561_v21 = vmul.f32 %v21102_v14, %v9529_v63 }
 0x966   :  { %v17845_v37 = vpop.eup %17844  ;;  %17094 = vmatprep.subr.mxu1 %v22941_v51 }
 0x967   :  { %v9469_v60 = vmul.f32 %v17845_v37, %v9393_v35  ;;  %17095 = vmatpush3.msra.mxu1 %v22941_v51  ;;  %v9560_v27 = vmul.f32 %v21110_v8, %v9528_v50 }
 0x968   :  { %v17847_v26 = vpop.eup %17846  ;;  %17106 = vmatprep.subr.mxu1 %v22942_v32  ;;  %12050 = vrot.lane.b32.xlu0 %v22943_v1, %s18016_s9 }
 0x969   :  { %v9501_v61 = vsub.f32 2.0, %v9469_v60  ;;  %v9468_v42 = vmul.f32 %v17847_v26, %v9390_v5  ;;  %12234 = vrot.lane.b32.xlu1 %v22944_v22, %s18016_s9  ;;  %17096 = vmatprep.mubr.msk.f32.mxu1 %vm1886_vm3, %v9560_v27  ;;  %v17849_v23 = vpop.eup %17848  ;;  %v22951_v27 = vld [vmem:[#allocation107_spill] sm:$0xff] }
 0x96a   :  { %17097 = vmatmul.mubr.msk.f32.vlgmr.msra.gmra.mxu1 %vm1886_vm3, %v9561_v21  ;;  %v17851_v55 = vpop.eup %17850  ;;  %v9471_v58 = vmul.f32 %v17849_v23, %v21167_v6 }
 0x96b   :  { %v9500_v35 = vsub.f32 2.0, %v9468_v42  ;;  %17107 = vmatpush3.msra.mxu1 %v22942_v32  ;;  %v9533_v8 = vmul.f32 %v17845_v37, %v9501_v61  ;;  %v9474_v3 = vmul.f32 %v17851_v55, %v21171_v40  ;;  %v17853_v4 = vpop.eup %17852  ;;  %v22950_v37 = vld [vmem:[#allocation105_spill] sm:$0xff]  ;;  %v10964_v32 = vld [vmem:[%s22344_s3 + $0x10] sm:$0xff] }
 0x96c   :  { %17108 = vmatprep.subr.mxu1 %v10617_v53  ;;  %12046 = vrot.lane.b32.xlu0 %v22943_v1, %s18017_s1  ;;  %v9503_v38 = vsub.f32 2.0, %v9471_v58  ;;  %v9475_v34 = vmul.f32 %v17853_v4, %v21169_v54 }
 0x96d   :  { %v9532_v14 = vmul.f32 %v17847_v26, %v9500_v35  ;;  %17109 = vmatpush3.msra.mxu1 %v10617_v53  ;;  %12139 = vrot.lane.b32.xlu1 %v22940_v31, %s18017_s1  ;;  %v9565_v56 = vmul.f32 %v21120_v17, %v9533_v8  ;;  %v22947_v17 = vld [vmem:[#allocation26_spill] sm:$0xff]  ;;  %v9506_v29 = vsub.f32 2.0, %v9474_v3 }
 0x96e   :  { %v9535_v46 = vmul.f32 %v17849_v23, %v9503_v38  ;;  %v9507_v60 = vsub.f32 2.0, %v9475_v34  ;;  %v22952_v8 = vld [vmem:[#allocation106_spill] sm:$0xff] }
 0x96f   :  { %v9564_v5 = vmul.f32 %v21126_v44, %v9532_v14  ;;  %v22948_v44 = vld [vmem:[#allocation29_spill] sm:$0xff]  ;;  %v9538_v40 = vmul.f32 %v17851_v55, %v9506_v29 }
 0x970   :  { %12141 = vrot.lane.b32.xlu0 %v22945_v49, %s18016_s9  ;;  %v9567_v51 = vmul.f32 %v22950_v37, %v9535_v46  ;;  %v9539_v61 = vmul.f32 %v17853_v4, %v9507_v60 }
 0x971   :  { %12325 = vrot.lane.b32.xlu1 %v22946_v0, %s18016_s9  ;;  %17110 = vmatprep.mubr.msk.f32.mxu1 %vm1886_vm3, %v9564_v5  ;;  %v9570_v26 = vmul.f32 %v22951_v27, %v9538_v40 }
 0x972   :  { %17111 = vmatmul.mubr.msk.f32.vlgmr.msra.gmra.mxu1 %vm1886_vm3, %v9565_v56  ;;  %v9571_v14 = vmul.f32 %v22952_v8, %v9539_v61 }
 0x974   :  { %12137 = vrot.lane.b32.xlu0 %v22945_v49, %s18017_s1 }
 0x975   :  { %12230 = vrot.lane.b32.xlu1 %v22944_v22, %s18017_s1 }
 0x978   :  { %12232 = vrot.lane.b32.xlu0 %v22947_v17, %s18016_s9 }
 0x979   :  { %12416 = vrot.lane.b32.xlu1 %v22948_v44, %s18016_s9 }
 0x97c   :  { %12228 = vrot.lane.b32.xlu0 %v22947_v17, %s18017_s1 }
 0x97d   :  { %12321 = vrot.lane.b32.xlu1 %v22946_v0, %s18017_s1 }
 0x980   :  { %12323 = vrot.lane.b32.xlu0 %v22949_v59, %s18016_s9 }
 0x981   :  { %12507 = vrot.lane.b32.xlu1 %v22797_v2, %s18016_s9 }
 0x984   :  { %12319 = vrot.lane.b32.xlu0 %v22949_v59, %s18017_s1 }
 0x985   :  { %12412 = vrot.lane.b32.xlu1 %v22948_v44, %s18017_s1 }
 0x988   :  { %12414 = vrot.lane.b32.xlu0 %v22798_v33, %s18016_s9 }
 0x989   :  { %12598 = vrot.lane.b32.xlu1 %v22799_v15, %s18016_s9 }
 0x98c   :  { %12410 = vrot.lane.b32.xlu0 %v22798_v33, %s18017_s1  ;;  %v23009_v33 = vld [vmem:[#allocation48_spill] sm:$0xff] }
 0x98d   :  { %12503 = vrot.lane.b32.xlu1 %v22797_v2, %s18017_s1  ;;  %v9405_v7 = vpop.xlane.xlu1 %9404 }
 0x98e   :  { %17854 = vrcp.f32 %v9405_v7 }
 0x98f   :  { %v9402_v6 = vpop.xlane.xlu0 %9401 }
 0x990   :  { %17856 = vrcp.f32 %v9402_v6  ;;  %12505 = vrot.lane.b32.xlu0 %v22800_v11, %s18016_s9 }
 0x991   :  { %12689 = vrot.lane.b32.xlu1 %v22637_v57, %s18016_s9  ;;  %v10793_v63 = vpop.permute.xlu1 %10792 }
 0x992   :  { %17120 = vmatprep.subr.mxu1 %v10793_v63 }
 0x993   :  { %v10704_v50 = vpop.permute.xlu0 %10703  ;;  %17121 = vmatpush3.msra.mxu1 %v10793_v63 }
 0x994   :  { %12501 = vrot.lane.b32.xlu0 %v22800_v11, %s18017_s1  ;;  %17115 = vmatprep.subr.mxu0 %v10704_v50 }
 0x995   :  { %12594 = vrot.lane.b32.xlu1 %v22799_v15, %s18017_s1  ;;  %17116 = vmatpush3.msra.mxu0 %v10704_v50  ;;  %v10880_v54 = vpop.permute.xlu1 %10879 }
 0x996   :  { %17118 = vmatmul.mubr.msk.f32.vlgmr.msra.gmra.mxu0 %vm1886_vm3, %v9567_v51  ;;  %17127 = vmatprep.subr.mxu0 %v10880_v54  ;;  %v17035_v51 = vpop.f32.mrf.mxu0 }
 0x997   :  { %v10791_v21 = vpop.permute.xlu0 %10790  ;;  %17128 = vmatpush3.msra.mxu0 %v10880_v54  ;;  %17131 = vmatprep.mubr.msk.f32.mxu0 %vm1886_vm3, %v9570_v26 }
 0x998   :  { %12596 = vrot.lane.b32.xlu0 %v22638_v41, %s18016_s9  ;;  %17122 = vmatprep.subr.mxu1 %v10791_v21  ;;  %v9737_v27 = vpop.f32.mrf.mxu0 }
 0x999   :  { %12683 = vrot.lane.b32.xlu1 %v22915_v25, %s18017_s1  ;;  %17123 = vmatpush3.msra.mxu1 %v10791_v21  ;;  %v11325_v42 = vpop.permute.xlu1 %11324 }
 0x99a   :  { %17134 = vmatprep.subr.mxu1 %v10964_v32  ;;  %v17049_v21 = vpop.f32.mrf.mxu0 }
 0x99b   :  { %v17855_v35 = vpop.eup %17854  ;;  %v10878_v53 = vpop.permute.xlu0 %10877 }
 0x99c   :  { %v9473_v5 = vmul.f32 %v17855_v35, %v9405_v7  ;;  %12592 = vrot.lane.b32.xlu0 %v22638_v41, %s18017_s1  ;;  %17129 = vmatprep.subr.mxu0 %v10878_v53 }
 0x99d   :  { %v17857_v56 = vpop.eup %17856  ;;  %13222 = vrot.lane.b32.xlu1 %v22645_v13, %s18018_s12  ;;  %17130 = vmatpush3.msra.mxu0 %v10878_v53  ;;  %v11319_v23 = vpop.permute.xlu1 %11318 }
 0x99e   :  { %v9505_v55 = vsub.f32 2.0, %v9473_v5  ;;  %v9472_v58 = vmul.f32 %v17857_v56, %v9402_v6  ;;  %17132 = vmatmul.mubr.msk.f32.vlgmr.msra.gmra.mxu0 %vm1886_vm3, %v9571_v14  ;;  %17184 = vmatprep.subr.msk.mxu0 %vm467_vm2, %v11325_v42  ;;  %v9911_v53 = vpop.f32.mrf.mxu0 }
 0x99f   :  { %v11323_v3 = vpop.permute.xlu0 %11322  ;;  %17185 = vmatpush3.xpose.msk.msra.mxu0 %vm467_vm2, %v11325_v42  ;;  %17188 = vmatprep.mubr.msk.f32.mxu0 %vm467_vm2, %v11319_v23 }
 0x9a0   :  { %v9504_v38 = vsub.f32 2.0, %v9472_v58  ;;  %12687 = vrot.lane.b32.xlu0 %v22915_v25, %s18016_s9  ;;  %17186 = vmatprep.subr.msk.mxu0 %vm467_vm2, %v11323_v3  ;;  %v9537_v13 = vmul.f32 %v17855_v35, %v9505_v55 }
 0x9a1   :  { %13398 = vrot.lane.b32.xlu1 %v22920_v45, %s18018_s12  ;;  %v11321_v4 = vpop.permute.xlu1 %11320 }
 0x9a2   :  { %v9536_v29 = vmul.f32 %v17857_v56, %v9504_v38  ;;  %v9569_v46 = vmul.f32 %v21173_v52, %v9537_v13 }
 0x9a3   :  { %v11416_v7 = vpop.permute.xlu0 %11415  ;;  %17187 = vmatpush3.xpose.msk.msra.mxu0 %vm467_vm2, %v11323_v3 }
 0x9a4   :  { %12685 = vrot.lane.b32.xlu0 %v22637_v57, %s18017_s1  ;;  %17191 = vmatprep.subr.msk.mxu0 %vm467_vm2, %v11416_v7  ;;  %v9568_v6 = vmul.f32 %v21175_v9, %v9536_v29 }
 0x9a5   :  { %13485 = vrot.lane.b32.xlu1 %v22922_v20, %s18018_s12  ;;  %v11410_v34 = vpop.permute.xlu1 %11409 }
 0x9a6   :  { %17124 = vmatprep.mubr.msk.f32.mxu1 %vm1886_vm3, %v9568_v6  ;;  %17189 = vmatmul.mubr.msk.f32.vlgmr.msra.gmra.mxu0 %vm467_vm2, %v11321_v4 }
 0x9a7   :  { %v11414_v45 = vpop.permute.xlu0 %11413  ;;  %17125 = vmatmul.mubr.msk.f32.vlgmr.msra.gmra.mxu1 %vm1886_vm3, %v9569_v46  ;;  %17192 = vmatpush3.xpose.msk.msra.mxu0 %vm467_vm2, %v11416_v7 }
 0x9a8   :  { %17195 = vmatprep.mubr.msk.f32.mxu0 %vm467_vm2, %v11410_v34  ;;  %13224 = vrot.lane.b32.xlu0 %v22647_v47, %s18018_s12 }
 0x9a9   :  { %17193 = vmatprep.subr.msk.mxu0 %vm467_vm2, %v11414_v45  ;;  %13572 = vrot.lane.b32.xlu1 %v22924_v43, %s18018_s12  ;;  %v11412_v52 = vpop.permute.xlu1 %11411 }
 0x9aa   :  { %17135 = vmatpush3.msra.mxu1 %v10964_v32 }
 0x9ab   :  { %v11507_v9 = vpop.permute.xlu0 %11506  ;;  %17194 = vmatpush3.xpose.msk.msra.mxu0 %vm467_vm2, %v11414_v45 }
 0x9ac   :  { %13311 = vrot.lane.b32.xlu0 %v22918_v19, %s18018_s12  ;;  %17198 = vmatprep.subr.msk.mxu0 %vm467_vm2, %v11507_v9 }
 0x9ad   :  { %13659 = vrot.lane.b32.xlu1 %v22926_v10, %s18018_s12  ;;  %v11501_v20 = vpop.permute.xlu1 %11500 }
 0x9ae   :  { %17196 = vmatmul.mubr.msk.f32.vlgmr.msra.gmra.mxu0 %vm467_vm2, %v11412_v52 }
 0x9af   :  { %v11505_v47 = vpop.permute.xlu0 %11504  ;;  %17199 = vmatpush3.xpose.msk.msra.mxu0 %vm467_vm2, %v11507_v9  ;;  %17202 = vmatprep.mubr.msk.f32.mxu0 %vm467_vm2, %v11501_v20 }
 0x9b0   :  { %13309 = vrot.lane.b32.xlu0 %v22917_v39, %s18018_s12  ;;  %17200 = vmatprep.subr.msk.mxu0 %vm467_vm2, %v11505_v47 }
 0x9b1   :  { %13746 = vrot.lane.b32.xlu1 %v22930_v36, %s18018_s12  ;;  %v11503_v19 = vpop.permute.xlu1 %11502 }
 0x9b3   :  { %v11598_v43 = vpop.permute.xlu0 %11597  ;;  %17201 = vmatpush3.xpose.msk.msra.mxu0 %vm467_vm2, %v11505_v47 }
 0x9b4   :  { %13396 = vrot.lane.b32.xlu0 %v22919_v16, %s18018_s12  ;;  %17205 = vmatprep.subr.msk.mxu0 %vm467_vm2, %v11598_v43 }
 0x9b5   :  { %13833 = vrot.lane.b32.xlu1 %v22936_v48, %s18018_s12  ;;  %v11592_v10 = vpop.permute.xlu1 %11591 }
 0x9b6   :  { %17203 = vmatmul.mubr.msk.f32.vlgmr.msra.gmra.mxu0 %vm467_vm2, %v11503_v19 }
 0x9b7   :  { %v11596_v39 = vpop.permute.xlu0 %11595  ;;  %17206 = vmatpush3.xpose.msk.msra.mxu0 %vm467_vm2, %v11598_v43  ;;  %17209 = vmatprep.mubr.msk.f32.mxu0 %vm467_vm2, %v11592_v10 }
 0x9b8   :  { %13483 = vrot.lane.b32.xlu0 %v22921_v12, %s18018_s12  ;;  %17207 = vmatprep.subr.msk.mxu0 %vm467_vm2, %v11596_v39 }
 0x9b9   :  { %13920 = vrot.lane.b32.xlu1 %v22934_v62, %s18018_s12  ;;  %v11594_v16 = vpop.permute.xlu1 %11593 }
 0x9bb   :  { %v11689_v36 = vpop.permute.xlu0 %11688  ;;  %17208 = vmatpush3.xpose.msk.msra.mxu0 %vm467_vm2, %v11596_v39 }
 0x9bc   :  { %13570 = vrot.lane.b32.xlu0 %v22923_v24, %s18018_s12  ;;  %17212 = vmatprep.subr.msk.mxu0 %vm467_vm2, %v11689_v36 }
 0x9bd   :  { %14007 = vrot.lane.b32.xlu1 %v22940_v31, %s18018_s12  ;;  %v11683_v48 = vpop.permute.xlu1 %11682 }
 0x9be   :  { %17210 = vmatmul.mubr.msk.f32.vlgmr.msra.gmra.mxu0 %vm467_vm2, %v11594_v16  ;;  %v17063_v16 = vpop.f32.mrf.mxu0 }
 0x9bf   :  { %v11687_v12 = vpop.permute.xlu0 %11686  ;;  %17213 = vmatpush3.xpose.msk.msra.mxu0 %vm467_vm2, %v11689_v36  ;;  %17216 = vmatprep.mubr.msk.f32.mxu0 %vm467_vm2, %v11683_v48 }
 0x9c0   :  { %13657 = vrot.lane.b32.xlu0 %v22925_v18, %s18018_s12  ;;  %17214 = vmatprep.subr.msk.mxu0 %vm467_vm2, %v11687_v12 }
 0x9c1   :  { %14094 = vrot.lane.b32.xlu1 %v22944_v22, %s18018_s12  ;;  %v11685_v24 = vpop.permute.xlu1 %11684 }
 0x9c3   :  { %v11780_v62 = vpop.permute.xlu0 %11779  ;;  %17215 = vmatpush3.xpose.msk.msra.mxu0 %vm467_vm2, %v11687_v12 }
 0x9c4   :  { %13744 = vrot.lane.b32.xlu0 %v22927_v28, %s18018_s12  ;;  %17219 = vmatprep.subr.msk.mxu0 %vm467_vm2, %v11780_v62 }
 0x9c5   :  { %14181 = vrot.lane.b32.xlu1 %v22946_v0, %s18018_s12  ;;  %v11774_v31 = vpop.permute.xlu1 %11773 }
 0x9c6   :  { %17217 = vmatmul.mubr.msk.f32.vlgmr.msra.gmra.mxu0 %vm467_vm2, %v11685_v24 }
 0x9c7   :  { %v11778_v18 = vpop.permute.xlu0 %11777  ;;  %17220 = vmatpush3.xpose.msk.msra.mxu0 %vm467_vm2, %v11780_v62  ;;  %17223 = vmatprep.mubr.msk.f32.mxu0 %vm467_vm2, %v11774_v31  ;;  %v10085_v62 = vpop.f32.mrf.mxu0 }
 0x9c8   :  { %13831 = vrot.lane.b32.xlu0 %v22939_v30, %s18018_s12  ;;  %17221 = vmatprep.subr.msk.mxu0 %vm467_vm2, %v11778_v18 }
 0x9c9   :  { %v11776_v22 = vpop.permute.xlu1 %11775 }
 0x9cb   :  { %v11871_v28 = vpop.permute.xlu0 %11870  ;;  %17222 = vmatpush3.xpose.msk.msra.mxu0 %vm467_vm2, %v11778_v18 }
 0x9cc   :  { %13918 = vrot.lane.b32.xlu0 %v22943_v1, %s18018_s12  ;;  %17226 = vmatprep.subr.msk.mxu0 %vm467_vm2, %v11871_v28 }
 0x9cd   :  { %v11865_v0 = vpop.permute.xlu1 %11864 }
 0x9ce   :  { %17224 = vmatmul.mubr.msk.f32.vlgmr.msra.gmra.mxu0 %vm467_vm2, %v11776_v22 }
 0x9cf   :  { %v11869_v40 = vpop.permute.xlu0 %11868  ;;  %17227 = vmatpush3.xpose.msk.msra.mxu0 %vm467_vm2, %v11871_v28  ;;  %17230 = vmatprep.mubr.msk.f32.mxu0 %vm467_vm2, %v11865_v0  ;;  %v17077_v28 = vpop.f32.mrf.mxu0 }
 0x9d0   :  { %14005 = vrot.lane.b32.xlu0 %v22945_v49, %s18018_s12  ;;  %17228 = vmatprep.subr.msk.mxu0 %vm467_vm2, %v11869_v40 }
 0x9d1   :  { %v11867_v30 = vpop.permute.xlu1 %11866 }
 0x9d3   :  { %v11962_v63 = vpop.permute.xlu0 %11961  ;;  %17229 = vmatpush3.xpose.msk.msra.mxu0 %vm467_vm2, %v11869_v40 }
 0x9d4   :  { %14092 = vrot.lane.b32.xlu0 %v22947_v17, %s18018_s12  ;;  %17233 = vmatprep.subr.msk.mxu0 %vm467_vm2, %v11962_v63 }
 0x9d5   :  { %v12053_v1 = vpop.permute.xlu1 %12052 }
 0x9d6   :  { %17231 = vmatmul.mubr.msk.f32.vlgmr.msra.gmra.mxu0 %vm467_vm2, %v11867_v30  ;;  %17240 = vmatprep.subr.msk.mxu1 %vm467_vm2, %v12053_v1  ;;  %v10259_v30 = vpop.f32.mrf.mxu0 }
 0x9d7   :  { %v11960_v50 = vpop.permute.xlu0 %11959  ;;  %17234 = vmatpush3.xpose.msk.msra.mxu0 %vm467_vm2, %v11962_v63 }
 0x9d8   :  { %17235 = vmatprep.subr.msk.mxu0 %vm467_vm2, %v11960_v50 }
 0x9d9   :  { %v11958_v49 = vpop.permute.xlu1 %11957  ;;  %v17028_v37 = vpop.f32.mrf.mxu1 }
 0x9db   :  { %v11956_v60 = vpop.permute.xlu0 %11955  ;;  %17236 = vmatpush3.xpose.msk.msra.mxu0 %vm467_vm2, %v11960_v50  ;;  %v9650_v54 = vpop.f32.mrf.mxu1 }
 0x9dc   :  { %17237 = vmatprep.mubr.msk.f32.mxu0 %vm467_vm2, %v11956_v60  ;;  %17136 = vmatprep.mubr.msk.f32.mxu1 %vm7025_vm4, %v9650_v54  ;;  %v17091_v50 = vpop.f32.mrf.mxu0 }
 0x9dd   :  { %v12144_v17 = vpop.permute.xlu1 %12143  ;;  %17137 = vmatmul.mubr.msk.f32.vlgmr.msra.gmra.mxu1 %vm7025_vm4, %v17028_v37 }
 0x9de   :  { %17238 = vmatmul.mubr.msk.f32.vlgmr.msra.gmra.mxu0 %vm467_vm2, %v11958_v49  ;;  %17241 = vmatpush3.xpose.msk.msra.mxu1 %vm467_vm2, %v12053_v1  ;;  %v10433_v60 = vpop.f32.mrf.mxu0 }
 0x9df   :  { %17247 = vmatprep.subr.msk.mxu0 %vm467_vm2, %v12144_v17  ;;  %v12051_v26 = vpop.permute.xlu0 %12050  ;;  %17139 = vmatprep.mubr.msk.f32.mxu1 %vm7025_vm4, %v9737_v27 }
 0x9e0   :  { %17248 = vmatpush3.xpose.msk.msra.mxu0 %vm467_vm2, %v12144_v17  ;;  %17242 = vmatprep.subr.msk.mxu1 %vm467_vm2, %v12051_v26 }
 0x9e1   :  { %v17042_v32 = vpop.f32.mrf.mxu1  ;;  %v21489_v61 = vpop.permute.xlu1 %12048  ;;  %17140 = vmatmul.mubr.msk.f32.gmra.mxu1 %vm7025_vm4, %v17035_v51 }
 0x9e2   :  { %17243 = vmatpush3.xpose.msk.msra.mxu1 %vm467_vm2, %v12051_v26  ;;  %v17105_v26 = vpop.f32.mrf.mxu0 }
 0x9e3   :  { %v21493_v42 = vpop.permute.xlu0 %12046  ;;  %v9824_v35 = vpop.f32.mrf.mxu1 }
 0x9e4   :  { %17142 = vmatprep.mubr.msk.f32.mxu1 %vm7025_vm4, %v9824_v35 }
 0x9e5   :  { %v21496_v8 = vpop.permute.xlu1 %12234  ;;  %17143 = vmatmul.mubr.msk.f32.gmra.mxu1 %vm7025_vm4, %v17042_v32  ;;  %v10607_v32 = vpop.f32.mrf.mxu0 }
 0x9e6   :  { %17254 = vmatprep.subr.msk.mxu1 %vm467_vm2, %v21496_v8  ;;  %17145 = vmatprep.mubr.msk.f32.mxu1 %vm7025_vm4, %v9911_v53 }
 0x9e7   :  { %v12142_v14 = vpop.permute.xlu0 %12141 }
 0x9e8   :  { %17249 = vmatprep.subr.msk.mxu0 %vm467_vm2, %v12142_v14 }
 0x9e9   :  { %17250 = vmatpush3.xpose.msk.msra.mxu0 %vm467_vm2, %v12142_v14  ;;  %v12140_v5 = vpop.permute.xlu1 %12139  ;;  %17146 = vmatmul.mubr.msk.f32.gmra.mxu1 %vm7025_vm4, %v17049_v21 }
 0x9eb   :  { %v12138_v56 = vpop.permute.xlu0 %12137 }
 0x9ec   :  { %17251 = vmatprep.mubr.msk.f32.mxu0 %vm467_vm2, %v12138_v56 }
 0x9ed   :  { %17252 = vmatmul.mubr.msk.f32.vlgmr.msra.gmra.mxu0 %vm467_vm2, %v12140_v5  ;;  %v12326_v23 = vpop.permute.xlu1 %12325 }
 0x9ee   :  { %17261 = vmatprep.subr.msk.mxu0 %vm467_vm2, %v12326_v23 }
 0x9ef   :  { %v21508_v55 = vpop.permute.xlu0 %12232  ;;  %17262 = vmatpush3.xpose.msk.msra.mxu0 %vm467_vm2, %v12326_v23 }
 0x9f1   :  { %v21511_v58 = vpop.permute.xlu1 %12230 }
 0x9f3   :  { %v21513_v3 = vpop.permute.xlu0 %12228 }
 0x9f5   :  { %v21515_v38 = vpop.permute.xlu1 %12416 }
 0x9f7   :  { %v12324_v13 = vpop.permute.xlu0 %12323 }
 0x9f8   :  { %17263 = vmatprep.subr.msk.mxu0 %vm467_vm2, %v12324_v13 }
 0x9f9   :  { %17264 = vmatpush3.xpose.msk.msra.mxu0 %vm467_vm2, %v12324_v13  ;;  %v12322_v4 = vpop.permute.xlu1 %12321 }
 0x9fb   :  { %v12320_v29 = vpop.permute.xlu0 %12319 }
 0x9fc   :  { %17265 = vmatprep.mubr.msk.f32.mxu0 %vm467_vm2, %v12320_v29 }
 0x9fd   :  { %17266 = vmatmul.mubr.msk.f32.vlgmr.msra.gmra.mxu0 %vm467_vm2, %v12322_v4  ;;  %v12508_v7 = vpop.permute.xlu1 %12507 }
 0x9fe   :  { %17275 = vmatprep.subr.msk.mxu0 %vm467_vm2, %v12508_v7 }
 0x9ff   :  { %v21522_v6 = vpop.permute.xlu0 %12414  ;;  %17276 = vmatpush3.xpose.msk.msra.mxu0 %vm467_vm2, %v12508_v7 }
 0xa01   :  { %v21525_v46 = vpop.permute.xlu1 %12412 }
 0xa03   :  { %v21527_v34 = vpop.permute.xlu0 %12410 }
 0xa05   :  { %v21529_v45 = vpop.permute.xlu1 %12598 }
 0xa07   :  { %v12506_v52 = vpop.permute.xlu0 %12505 }
 0xa08   :  { %17277 = vmatprep.subr.msk.mxu0 %vm467_vm2, %v12506_v52 }
 0xa09   :  { %17278 = vmatpush3.xpose.msk.msra.mxu0 %vm467_vm2, %v12506_v52  ;;  %v12504_v9 = vpop.permute.xlu1 %12503 }
 0xa0b   :  { %v12502_v20 = vpop.permute.xlu0 %12501 }
 0xa0c   :  { %17279 = vmatprep.mubr.msk.f32.mxu0 %vm467_vm2, %v12502_v20 }
 0xa0d   :  { %17280 = vmatmul.mubr.msk.f32.vlgmr.msra.gmra.mxu0 %vm467_vm2, %v12504_v9  ;;  %v12690_v47 = vpop.permute.xlu1 %12689 }
 0xa0e   :  { %17289 = vmatprep.subr.msk.mxu0 %vm467_vm2, %v12690_v47 }
 0xa0f   :  { %v21536_v19 = vpop.permute.xlu0 %12596  ;;  %17290 = vmatpush3.xpose.msk.msra.mxu0 %vm467_vm2, %v12690_v47 }
 0xa11   :  { %v21539_v43 = vpop.permute.xlu1 %12594 }
 0xa13   :  { %v21541_v10 = vpop.permute.xlu0 %12592 }
 0xa15   :  { %v12684_v39 = vpop.permute.xlu1 %12683 }
 0xa16   :  { %v17056_v36 = vpop.f32.mrf.mxu1  ;;  %17293 = vmatprep.mubr.msk.f32.mxu0 %vm467_vm2, %v12684_v39 }
 0xa17   :  { %v12688_v48 = vpop.permute.xlu0 %12687 }
 0xa18   :  { %v9998_v12 = vpop.f32.mrf.mxu1  ;;  %17291 = vmatprep.subr.msk.mxu0 %vm467_vm2, %v12688_v48 }
 0xa19   :  { %17148 = vmatprep.mubr.msk.f32.mxu1 %vm7025_vm4, %v9998_v12  ;;  %17292 = vmatpush3.xpose.msk.msra.mxu0 %vm467_vm2, %v12688_v48  ;;  %v21547_v24 = vpop.permute.xlu1 %13222 }
 0xa1a   :  { %17149 = vmatmul.mubr.msk.f32.gmra.mxu1 %vm7025_vm4, %v17056_v36 }
 0xa1b   :  { %v17070_v31 = vpop.f32.mrf.mxu1  ;;  %v12686_v18 = vpop.permute.xlu0 %12685  ;;  %17151 = vmatprep.mubr.msk.f32.mxu1 %vm7025_vm4, %v10085_v62 }
 0xa1c   :  { %17294 = vmatmul.mubr.msk.f32.vlgmr.msra.gmra.mxu0 %vm467_vm2, %v12686_v18 }
 0xa1d   :  { %v13399_v22 = vpop.permute.xlu1 %13398  ;;  %v10172_v0 = vpop.f32.mrf.mxu1 }
 0xa1e   :  { %17152 = vmatmul.mubr.msk.f32.gmra.mxu1 %vm7025_vm4, %v17063_v16  ;;  %17310 = vmatprep.subr.mxu0 %v13399_v22 }
 0xa1f   :  { %v21553_v40 = vpop.permute.xlu0 %13224  ;;  %17154 = vmatprep.mubr.msk.f32.mxu1 %vm7025_vm4, %v10172_v0  ;;  %17311 = vmatpush3.msra.mxu0 %v13399_v22  ;;  %v22953_v22 = vld [vmem:[#allocation50_spill] sm:$0xff] }
 0xa21   :  { %v21561_v37 = vpop.permute.xlu1 %13485 }
 0xa22   :  { %17155 = vmatmul.mubr.msk.f32.gmra.mxu1 %vm7025_vm4, %v17070_v31 }
 0xa23   :  { %v21557_v63 = vpop.permute.xlu0 %13311  ;;  %17157 = vmatprep.mubr.msk.f32.mxu1 %vm7025_vm4, %v10259_v30 }
 0xa24   :  { %v17084_v1 = vpop.f32.mrf.mxu1 }
 0xa25   :  { %v21568_v27 = vpop.permute.xlu1 %13572 }
 0xa26   :  { %v10346_v49 = vpop.f32.mrf.mxu1  ;;  %17158 = vmatmul.mubr.msk.f32.gmra.mxu1 %vm7025_vm4, %v17077_v28 }
 0xa27   :  { %v21563_v51 = vpop.permute.xlu0 %13309  ;;  %17160 = vmatprep.mubr.msk.f32.mxu1 %vm7025_vm4, %v10346_v49 }
 0xa2a   :  { %v17098_v54 = vpop.f32.mrf.mxu1  ;;  %17161 = vmatmul.mubr.msk.f32.gmra.mxu1 %vm7025_vm4, %v17084_v1  ;;  %v22956_v1 = vld [vmem:[#allocation89_spill] sm:$0xff] }
 0xa2b   :  { %v13397_v17 = vpop.permute.xlu0 %13396  ;;  %17163 = vmatprep.mubr.msk.f32.mxu1 %vm7025_vm4, %v10433_v60 }
 0xa2c   :  { %17312 = vmatprep.subr.mxu0 %v13397_v17  ;;  %v10520_v21 = vpop.f32.mrf.mxu1 }
 0xa2d   :  { %17313 = vmatpush3.msra.mxu0 %v13397_v17 }
 0xa2e   :  { %17164 = vmatmul.mubr.msk.f32.gmra.mxu1 %vm7025_vm4, %v17091_v50  ;;  %17324 = vmatprep.subr.mxu0 %v21568_v27  ;;  %v22957_v50 = vld [vmem:[#allocation62_spill] sm:$0xff] }
 0xa2f   :  { %17166 = vmatprep.mubr.msk.f32.mxu1 %vm7025_vm4, %v10520_v21  ;;  %v7525_v49 = vadd.f32 %v22957_v50, %v22956_v1 }
 0xa32   :  { %v17112_v35 = vpop.f32.mrf.mxu1  ;;  %17167 = vmatmul.mubr.msk.f32.gmra.mxu1 %vm7025_vm4, %v17098_v54 }
 0xa33   :  { %17169 = vmatprep.mubr.msk.f32.mxu1 %vm7025_vm4, %v10607_v32  ;;  %v22960_v32 = vld [vmem:[#allocation47_spill] sm:$0xff] }
 0xa34   :  { %v10694_v53 = vpop.f32.mrf.mxu1 }
 0xa36   :  { %17170 = vmatmul.mubr.msk.f32.gmra.mxu1 %vm7025_vm4, %v17105_v26 }
 0xa37   :  { %17172 = vmatprep.mubr.msk.f32.mxu1 %vm7025_vm4, %v10694_v53 }
 0xa3a   :  { %17173 = vmatmul.mubr.msk.f32.gmra.mxu1 %vm7025_vm4, %v17112_v35  ;;  %v22961_v35 = vld [vmem:[#allocation83_spill] sm:$0xff] }
 0xa3b   :  { %v7535_v53 = vadd.f32 %v22961_v35, %v22960_v32  ;;  %v22968_v32 = vld [vmem:[#allocation37_spill] sm:$0xff]  ;;  %v22969_v35 = vld [vmem:[#allocation87_spill] sm:$0xff] }
 0xa56   :  { %v17119_v14 = vpop.f32.mrf.mxu0 }
 0xa58   :  { %v10781_v5 = vpop.f32.mrf.mxu0 }
 0xa59   :  { %17175 = vmatprep.mubr.msk.f32.mxu1 %vm7025_vm4, %v10781_v5 }
 0xa5a   :  { %17176 = vmatmul.mubr.msk.f32.gmra.mxu1 %vm7025_vm4, %v17119_v14 }
 0xa5e   :  { %v17133_v56 = vpop.f32.mrf.mxu0 }
 0xa60   :  { %v10955_v23 = vpop.f32.mrf.mxu0 }
 0xa66   :  { %v21580_v13 = vpop.f32.mrf.mxu0 }
 0xa67   :  { %v17126_v4 = vpop.f32.mrf.mxu1  ;;  %v12777_v29 = vsel %vm1886_vm3, %v21580_v13, -inf }
 0xa68   :  { %12778 = vmax.xlane.f32.xlu0 %v12777_v29  ;;  %v21584_v7 = vpop.f32.mrf.mxu0 }
 0xa69   :  { %v10868_v52 = vpop.f32.mrf.mxu1  ;;  %v12774_v9 = vsel %vm1886_vm3, %v21584_v7, -inf }
 0xa6a   :  { %17178 = vmatprep.mubr.msk.f32.mxu1 %vm7025_vm4, %v10868_v52  ;;  %12775 = vmax.xlane.f32.xlu1 %v12774_v9 }
 0xa6b   :  { %17179 = vmatmul.mubr.msk.f32.gmra.mxu1 %vm7025_vm4, %v17126_v4  ;;  %v22965_v4 = vld [vmem:[#allocation70_spill] sm:$0xff] }
 0xa6c   :  { %17181 = vmatprep.mubr.msk.f32.mxu1 %vm7025_vm4, %v10955_v23  ;;  %v22964_v23 = vld [vmem:[#allocation63_spill] sm:$0xff] }
 0xa6d   :  { %v7545_v29 = vadd.f32 %v22965_v4, %v22964_v23 }
 0xa6e   :  { %v21591_v20 = vpop.f32.mrf.mxu0 }
 0xa6f   :  { %17182 = vmatmul.mubr.msk.f32.gmra.mxu1 %vm7025_vm4, %v17133_v56  ;;  %v12783_v47 = vsel %vm1886_vm3, %v21591_v20, -inf }
 0xa70   :  { %17244 = vmatprep.mubr.msk.f32.mxu1 %vm467_vm2, %v21493_v42  ;;  %12784 = vmax.xlane.f32.xlu1 %v12783_v47  ;;  %v21598_v39 = vpop.f32.mrf.mxu0 }
 0xa71   :  { %v12780_v16 = vsel %vm1886_vm3, %v21598_v39, -inf }
 0xa72   :  { %12781 = vmax.xlane.f32.xlu0 %v12780_v16 }
 0xa73   :  { %17245 = vmatmul.mubr.msk.f32.vlgmr.msra.gmra.mxu1 %vm467_vm2, %v21489_v61 }
 0xa74   :  { %17255 = vmatpush3.xpose.msk.msra.mxu1 %vm467_vm2, %v21496_v8  ;;  %17258 = vmatprep.mubr.msk.f32.mxu1 %vm467_vm2, %v21513_v3 }
 0xa75   :  { %17256 = vmatprep.subr.msk.mxu1 %vm467_vm2, %v21508_v55 }
 0xa76   :  { %v21610_v42 = vpop.f32.mrf.mxu0 }
 0xa77   :  { %v12789_v36 = vsel %vm1886_vm3, %v21610_v42, -inf }
 0xa78   :  { %17257 = vmatpush3.xpose.msk.msra.mxu1 %vm467_vm2, %v21508_v55  ;;  %12790 = vmax.xlane.f32.xlu1 %v12789_v36  ;;  %v21616_v48 = vpop.f32.mrf.mxu0 }
 0xa79   :  { %17268 = vmatprep.subr.msk.mxu1 %vm467_vm2, %v21515_v38  ;;  %v12786_v61 = vsel %vm1886_vm3, %v21616_v48, -inf }
 0xa7a   :  { %12787 = vmax.xlane.f32.xlu0 %v12786_v61 }
 0xa7b   :  { %17259 = vmatmul.mubr.msk.f32.vlgmr.msra.gmra.mxu1 %vm467_vm2, %v21511_v58 }
 0xa7c   :  { %17269 = vmatpush3.xpose.msk.msra.mxu1 %vm467_vm2, %v21515_v38  ;;  %17272 = vmatprep.mubr.msk.f32.mxu1 %vm467_vm2, %v21527_v34 }
 0xa7d   :  { %17270 = vmatprep.subr.msk.mxu1 %vm467_vm2, %v21522_v6 }
 0xa7e   :  { %v21630_v8 = vpop.f32.mrf.mxu0 }
 0xa7f   :  { %v12795_v55 = vsel %vm1886_vm3, %v21630_v8, -inf }
 0xa80   :  { %17271 = vmatpush3.xpose.msk.msra.mxu1 %vm467_vm2, %v21522_v6  ;;  %12796 = vmax.xlane.f32.xlu1 %v12795_v55  ;;  %v21636_v3 = vpop.f32.mrf.mxu0 }
 0xa81   :  { %17282 = vmatprep.subr.msk.mxu1 %vm467_vm2, %v21529_v45  ;;  %v12792_v58 = vsel %vm1886_vm3, %v21636_v3, -inf }
 0xa82   :  { %12793 = vmax.xlane.f32.xlu0 %v12792_v58 }
 0xa83   :  { %17273 = vmatmul.mubr.msk.f32.vlgmr.msra.gmra.mxu1 %vm467_vm2, %v21525_v46 }
 0xa84   :  { %17283 = vmatpush3.xpose.msk.msra.mxu1 %vm467_vm2, %v21529_v45  ;;  %17286 = vmatprep.mubr.msk.f32.mxu1 %vm467_vm2, %v21541_v10 }
 0xa85   :  { %17284 = vmatprep.subr.msk.mxu1 %vm467_vm2, %v21536_v19 }
 0xa86   :  { %v21650_v38 = vpop.f32.mrf.mxu0 }
 0xa87   :  { %v12801_v6 = vsel %vm1886_vm3, %v21650_v38, -inf }
 0xa88   :  { %17285 = vmatpush3.xpose.msk.msra.mxu1 %vm467_vm2, %v21536_v19  ;;  %12802 = vmax.xlane.f32.xlu1 %v12801_v6  ;;  %v21656_v34 = vpop.f32.mrf.mxu0 }
 0xa89   :  { %17296 = vmatprep.subr.mxu1 %v21553_v40  ;;  %v12798_v46 = vsel %vm1886_vm3, %v21656_v34, -inf }
 0xa8a   :  { %12799 = vmax.xlane.f32.xlu0 %v12798_v46 }
 0xa8b   :  { %17287 = vmatmul.mubr.msk.f32.vlgmr.msra.gmra.mxu1 %vm467_vm2, %v21539_v43 }
 0xa8c   :  { %17297 = vmatpush3.msra.mxu1 %v21553_v40 }
 0xa8d   :  { %17298 = vmatprep.subr.mxu1 %v21547_v24 }
 0xa8e   :  { %17299 = vmatpush3.msra.mxu1 %v21547_v24  ;;  %v21666_v45 = vpop.f32.mrf.mxu0 }
 0xa8f   :  { %17303 = vmatprep.subr.mxu1 %v21557_v63  ;;  %v12807_v19 = vsel %vm1886_vm3, %v21666_v45, -inf }
 0xa90   :  { %12808 = vmax.xlane.f32.xlu1 %v12807_v19  ;;  %v21671_v10 = vpop.f32.mrf.mxu0  ;;  %v21728_v19 = vpop.permute.xlu0 %13483 }
 0xa91   :  { %v12804_v12 = vsel %vm1886_vm3, %v21671_v10, -inf }
 0xa92   :  { %12805 = vmax.xlane.f32.xlu0 %v12804_v12 }
 0xa94   :  { %v21730_v12 = vpop.permute.xlu0 %13570 }
 0xa96   :  { %v21675_v43 = vpop.f32.mrf.mxu0 }
 0xa97   :  { %v12813_v62 = vsel %vm1886_vm3, %v21675_v43, -inf }
 0xa98   :  { %12814 = vmax.xlane.f32.xlu1 %v12813_v62  ;;  %v21679_v24 = vpop.f32.mrf.mxu0  ;;  %v21732_v62 = vpop.permute.xlu1 %13659 }
 0xa99   :  { %v12810_v31 = vsel %vm1886_vm3, %v21679_v24, -inf }
 0xa9a   :  { %12811 = vmax.xlane.f32.xlu0 %v12810_v31 }
 0xa9c   :  { %v21744_v50 = vpop.permute.xlu1 %13746 }
 0xa9d   :  { %v17138_v18 = vpop.f32.mrf.mxu1 }
 0xa9e   :  { %v21684_v28 = vadd.f32 %v17138_v18, %v22953_v22  ;;  %v21686_v0 = vpop.f32.mrf.mxu0  ;;  %v21738_v22 = vpop.permute.xlu0 %13657 }
 0xa9f   :  { %v21688_v40 = vpop.f32.mrf.mxu1  ;;  %v12819_v30 = vsel %vm1886_vm3, %v21686_v0, -inf }
 0xaa0   :  { %22954 = vst [vmem:[#allocation98_spill] sm:$0xff] %v21684_v28  ;;  %22955 = vst [vmem:[#allocation99_spill] sm:$0xff] %v21688_v40  ;;  %12820 = vmax.xlane.f32.xlu1 %v12819_v30  ;;  %v21694_v60 = vpop.f32.mrf.mxu0 }
 0xaa1   :  { %v17141_v54 = vpop.f32.mrf.mxu1  ;;  %v12816_v17 = vsel %vm1886_vm3, %v21694_v60, -inf }
 0xaa2   :  { %v21698_v26 = vadd.f32 %v17141_v54, %v7525_v49  ;;  %12817 = vmax.xlane.f32.xlu0 %v12816_v17  ;;  %v21746_v49 = vpop.permute.xlu0 %13744  ;;  %v21748_v54 = vpop.permute.xlu1 %13833 }
 0xaa3   :  { %v21700_v21 = vpop.f32.mrf.mxu1 }
 0xaa4   :  { %22958 = vst [vmem:[#allocation8_spill] sm:$0xff] %v21698_v26  ;;  %22959 = vst [vmem:[#allocation7_spill] sm:$0xff] %v21700_v21  ;;  %v22980_v26 = vld [vmem:[#allocation38_spill] sm:$0xff]  ;;  %v22981_v21 = vld [vmem:[#allocation44_spill] sm:$0xff] }
 0xaa5   :  { %v17144_v14 = vpop.f32.mrf.mxu1  ;;  %v7570_v28 = vadd.f32 %v22981_v21, %v22980_v26  ;;  %v22989_v26 = vld [vmem:[#allocation40_spill] sm:$0xff] }
 0xaa6   :  { %v21704_v5 = vadd.f32 %v17144_v14, %v7535_v53  ;;  %v7555_v53 = vadd.f32 %v22969_v35, %v22968_v32  ;;  %v21754_v23 = vpop.permute.xlu0 %13831  ;;  %v22974_v35 = vld [vmem:[#allocation90_spill] sm:$0xff]  ;;  %v22990_v21 = vld [vmem:[#allocation92_spill] sm:$0xff] }
 0xaa7   :  { %v21706_v56 = vpop.f32.mrf.mxu1  ;;  %v7595_v57 = vadd.f32 %v22990_v21, %v22989_v26  ;;  %v22999_v26 = vld [vmem:[#allocation69_spill] sm:$0xff]  ;;  %v23000_v21 = vld [vmem:[#allocation88_spill] sm:$0xff] }
 0xaa8   :  { %22962 = vst [vmem:[#allocation11_spill] sm:$0xff] %v21704_v5  ;;  %22963 = vst [vmem:[#allocation9_spill] sm:$0xff] %v21706_v56  ;;  %v7600_v15 = vadd.f32 %v23000_v21, %v22999_v26 }
 0xaa9   :  { %v17147_v52 = vpop.f32.mrf.mxu1 }
 0xaaa   :  { %v21710_v9 = vadd.f32 %v17147_v52, %v7545_v29  ;;  %v21778_v5 = vpop.permute.xlu0 %13918 }
 0xaab   :  { %v21750_v17 = vpop.f32.mrf.mxu1 }
 0xaac   :  { %22966 = vst [vmem:[#allocation13_spill] sm:$0xff] %v21710_v9  ;;  %22967 = vst [vmem:[#allocation12_spill] sm:$0xff] %v21750_v17  ;;  %v22975_v9 = vld [vmem:[#allocation76_spill] sm:$0xff] }
 0xaad   :  { %v21712_v47 = vpop.f32.mrf.mxu0 }
 0xaae   :  { %v12831_v16 = vsel %vm1886_vm3, %v21712_v47, -inf }
 0xaaf   :  { %12832 = vmax.xlane.f32.xlu1 %v12831_v16  ;;  %v21716_v36 = vpop.f32.mrf.mxu0  ;;  %v22972_v16 = vld [vmem:[#allocation65_spill] sm:$0xff] }
 0xab0   :  { %v12828_v61 = vsel %vm1886_vm3, %v21716_v36, -inf }
 0xab1   :  { %12829 = vmax.xlane.f32.xlu0 %v12828_v61  ;;  %v22973_v61 = vld [vmem:[#allocation78_spill] sm:$0xff] }
 0xabd   :  { %v21720_v55 = vpop.f32.mrf.mxu0 }
 0xabe   :  { %v12843_v58 = vsel %vm1886_vm3, %v21720_v55, -inf }
 0xabf   :  { %12844 = vmax.xlane.f32.xlu1 %v12843_v58  ;;  %v21724_v6 = vpop.f32.mrf.mxu0  ;;  %v7565_v58 = vadd.f32 %v22973_v61, %v22972_v16  ;;  %v22977_v16 = vld [vmem:[#allocation80_spill] sm:$0xff]  ;;  %v22978_v61 = vld [vmem:[#allocation41_spill] sm:$0xff] }
 0xac0   :  { %v12840_v46 = vsel %vm1886_vm3, %v21724_v6, -inf  ;;  %v7575_v17 = vadd.f32 %v22978_v61, %v22977_v16  ;;  %v22986_v16 = vld [vmem:[#allocation67_spill] sm:$0xff]  ;;  %v22987_v61 = vld [vmem:[#allocation72_spill] sm:$0xff] }
 0xac1   :  { %12841 = vmax.xlane.f32.xlu0 %v12840_v46  ;;  %v21764_v46 = vpop.permute.xlu1 %13920  ;;  %v7580_v41 = vadd.f32 %v22987_v61, %v22986_v16  ;;  %v22995_v16 = vld [vmem:[#allocation58_spill] sm:$0xff] }
 0xac2   :  { %v22996_v61 = vld [vmem:[#allocation74_spill] sm:$0xff] }
 0xac3   :  { %v7605_v11 = vadd.f32 %v22996_v61, %v22995_v16 }
 0xac5   :  { %v21784_v40 = vpop.permute.xlu1 %14007 }
 0xacd   :  { %v21734_v31 = vpop.f32.mrf.mxu0 }
 0xace   :  { %v12855_v18 = vsel %vm1886_vm3, %v21734_v31, -inf }
 0xacf   :  { %12856 = vmax.xlane.f32.xlu1 %v12855_v18  ;;  %v21740_v30 = vpop.f32.mrf.mxu0 }
 0xad0   :  { %v12852_v1 = vsel %vm1886_vm3, %v21740_v30, -inf }
 0xad1   :  { %12853 = vmax.xlane.f32.xlu0 %v12852_v1 }
 0xada   :  { %v17150_v14 = vpop.f32.mrf.mxu1 }
 0xadb   :  { %v21756_v4 = vadd.f32 %v17150_v14, %v7555_v53  ;;  %v7560_v53 = vadd.f32 %v22975_v9, %v22974_v35  ;;  %v22984_v35 = vld [vmem:[#allocation85_spill] sm:$0xff] }
 0xadc   :  { %v21758_v29 = vpop.f32.mrf.mxu1  ;;  %v21760_v52 = vpop.f32.mrf.mxu0 }
 0xadd   :  { %22970 = vst [vmem:[#allocation15_spill] sm:$0xff] %v21756_v4  ;;  %22971 = vst [vmem:[#allocation14_spill] sm:$0xff] %v21758_v29  ;;  %v12867_v18 = vsel %vm1886_vm3, %v21760_v52, -inf }
 0xade   :  { %v17153_v1 = vpop.f32.mrf.mxu1  ;;  %12868 = vmax.xlane.f32.xlu1 %v12867_v18  ;;  %v21768_v32 = vpop.f32.mrf.mxu0 }
 0xadf   :  { %v21772_v14 = vadd.f32 %v17153_v1, %v7565_v58  ;;  %v12864_v4 = vsel %vm1886_vm3, %v21768_v32, -inf  ;;  %v22983_v1 = vld [vmem:[#allocation71_spill] sm:$0xff] }
 0xae0   :  { %v11177_v29 = vpop.f32.mrf.mxu1  ;;  %12865 = vmax.xlane.f32.xlu0 %v12864_v4 }
 0xae1   :  { %22976 = vst [vmem:[#allocation17_spill] sm:$0xff] %v21772_v14  ;;  %v21780_v56 = vadd.f32 %v11177_v29, %v7560_v53  ;;  %v7585_v14 = vadd.f32 %v22984_v35, %v22983_v1  ;;  %v21794_v29 = vpop.permute.xlu0 %14005  ;;  %v22992_v1 = vld [vmem:[#allocation45_spill] sm:$0xff] }
 0xae2   :  { %v17156_v18 = vpop.f32.mrf.mxu1 }
 0xae3   :  { %22979 = vst [vmem:[#allocation16_spill] sm:$0xff] %v21780_v56  ;;  %v21786_v9 = vadd.f32 %v17156_v18, %v7575_v17  ;;  %v21800_v17 = vpop.permute.xlu1 %14094 }
 0xae4   :  { %v11187_v58 = vpop.f32.mrf.mxu1 }
 0xae5   :  { %22982 = vst [vmem:[#allocation19_spill] sm:$0xff] %v21786_v9  ;;  %v21790_v4 = vadd.f32 %v11187_v58, %v7570_v28  ;;  %v22993_v28 = vld [vmem:[#allocation84_spill] sm:$0xff] }
 0xae6   :  { %v17159_v25 = vpop.f32.mrf.mxu1  ;;  %v7590_v58 = vadd.f32 %v22993_v28, %v22992_v1  ;;  %v23002_v1 = vld [vmem:[#allocation5_spill] sm:$0xff] }
 0xae7   :  { %22985 = vst [vmem:[#allocation110_spill] sm:$0xff] %v21790_v4  ;;  %v21796_v53 = vadd.f32 %v17159_v25, %v7585_v14  ;;  %v21810_v25 = vpop.permute.xlu0 %14092 }
 0xae8   :  { %v11197_v56 = vpop.f32.mrf.mxu1  ;;  %22997 = vst [vmem:[#allocation100_spill] sm:$0xff] %v21810_v25 }
 0xae9   :  { %22988 = vst [vmem:[#allocation109_spill] sm:$0xff] %v21796_v53  ;;  %v21802_v18 = vadd.f32 %v11197_v56, %v7580_v41  ;;  %v21816_v41 = vpop.permute.xlu1 %14181 }
 0xaea   :  { %v17162_v9 = vpop.f32.mrf.mxu1 }
 0xaeb   :  { %22991 = vst [vmem:[#allocation18_spill] sm:$0xff] %v21802_v18  ;;  %v21806_v35 = vadd.f32 %v17162_v9, %v7595_v57  ;;  %v23003_v57 = vld [vmem:[#allocation95_spill] sm:$0xff] }
 0xaec   :  { %v11207_v4 = vpop.f32.mrf.mxu1  ;;  %v7615_v9 = vadd.f32 %v23003_v57, %v23002_v1 }
 0xaed   :  { %22994 = vst [vmem:[#allocation112_spill] sm:$0xff] %v21806_v35  ;;  %v21812_v14 = vadd.f32 %v11207_v4, %v7590_v58  ;;  %v23005_v4 = vld [vmem:[#allocation6_spill] sm:$0xff] }
 0xaee   :  { %v17165_v53 = vpop.f32.mrf.mxu1  ;;  %v23006_v58 = vld [vmem:[#allocation46_spill] sm:$0xff] }
 0xaef   :  { %22998 = vst [vmem:[#allocation111_spill] sm:$0xff] %v21812_v14  ;;  %v21818_v56 = vadd.f32 %v17165_v53, %v7605_v11  ;;  %v7610_v14 = vadd.f32 %v23006_v58, %v23005_v4 }
 0xaf0   :  { %v11217_v18 = vpop.f32.mrf.mxu1 }
 0xaf1   :  { %23001 = vst [vmem:[#allocation21_spill] sm:$0xff] %v21818_v56  ;;  %v21822_v28 = vadd.f32 %v11217_v18, %v7600_v15  ;;  %v12779_v35 = vpop.xlane.xlu0 %12778  ;;  %v23008_v56 = vld [vmem:[#allocation79_spill] sm:$0xff] }
 0xaf2   :  { %v12871_v16 = vsub.f32 %v21580_v13, %v12779_v35  ;;  %v17168_v61 = vpop.f32.mrf.mxu1  ;;  %v7625_v2 = vadd.f32 %v23009_v33, %v23008_v56  ;;  %v23011_v13 = vld [vmem:[#allocation56_spill] sm:$0xff]  ;;  %v23012_v35 = vld [vmem:[#allocation94_spill] sm:$0xff]  ;;  %v23017_v56 = vld [vmem:[#allocation51_spill] sm:$0xff] }
 0xaf3   :  { %23004 = vst [vmem:[#allocation101_spill] sm:$0xff] %v21822_v28  ;;  %v21827_v25 = vadd.f32 %v17168_v61, %v7615_v9  ;;  %v12776_v26 = vpop.xlane.xlu1 %12775  ;;  %v7620_v57 = vadd.f32 %v23012_v35, %v23011_v13  ;;  %v23014_v61 = vld [vmem:[#allocation53_spill] sm:$0xff] }
 0xaf4   :  { %v12904_v21 = vmul.f32 1.442695, %v12871_v16  ;;  %v12870_v11 = vsub.f32 %v21584_v7, %v12776_v26  ;;  %v11227_v53 = vpop.f32.mrf.mxu1  ;;  %v23015_v16 = vld [vmem:[#allocation93_spill] sm:$0xff]  ;;  %v23018_v26 = vld [vmem:[#allocation52_spill] sm:$0xff] }
 0xaf5   :  { %23007 = vst [vmem:[#allocation20_spill] sm:$0xff] %v21827_v25  ;;  %v21832_v1 = vadd.f32 %v11227_v53, %v7610_v14  ;;  %v7635_v4 = vadd.f32 %v23015_v16, %v23014_v61 }
 0xaf6   :  { %17858 = vpow2.f32 %v12904_v21  ;;  %v12902_v15 = vmul.f32 1.442695, %v12870_v11  ;;  %v17171_v18 = vpop.f32.mrf.mxu1  ;;  %v7630_v21 = vadd.f32 %v23018_v26, %v23017_v56 }
 0xaf7   :  { %23010 = vst [vmem:[#allocation102_spill] sm:$0xff] %v21832_v1  ;;  %v21836_v28 = vadd.f32 %v17171_v18, %v7625_v2 }
 0xaf8   :  { %17860 = vpow2.f32 %v12902_v15  ;;  %v11237_v9 = vpop.f32.mrf.mxu1 }
 0xaf9   :  { %23013 = vst [vmem:[#allocation103_spill] sm:$0xff] %v21836_v28  ;;  %v21840_v7 = vadd.f32 %v11237_v9, %v7620_v57  ;;  %v12785_v58 = vpop.xlane.xlu1 %12784 }
 0xafa   :  { %v12873_v33 = vsub.f32 %v21591_v20, %v12785_v58  ;;  %v17174_v14 = vpop.f32.mrf.mxu1 }
 0xafb   :  { %23016 = vst [vmem:[#allocation22_spill] sm:$0xff] %v21840_v7  ;;  %v21845_v11 = vadd.f32 %v17174_v14, %v7635_v4  ;;  %v12782_v53 = vpop.xlane.xlu0 %12781 }
 0xafc   :  { %v12908_v13 = vmul.f32 1.442695, %v12873_v33  ;;  %v12872_v2 = vsub.f32 %v21598_v39, %v12782_v53  ;;  %v11247_v15 = vpop.f32.mrf.mxu1 }
 0xafd   :  { %23019 = vst [vmem:[#allocation23_spill] sm:$0xff] %v21845_v11  ;;  %v21848_v18 = vadd.f32 %v11247_v15, %v7630_v21 }
 0xafe   :  { %17862 = vpow2.f32 %v12908_v13  ;;  %v12906_v35 = vmul.f32 1.442695, %v12872_v2 }
 0xaff   :  { %23020 = vst [vmem:[#allocation104_spill] sm:$0xff] %v21848_v18 }
 0xb00   :  { %17864 = vpow2.f32 %v12906_v35 }
 0xb01   :  { %v12791_v57 = vpop.xlane.xlu1 %12790 }
 0xb02   :  { %v12875_v9 = vsub.f32 %v21610_v42, %v12791_v57 }
 0xb03   :  { %v21851_v20 = vpop.eup %17858  ;;  %v12788_v61 = vpop.xlane.xlu0 %12787 }
 0xb04   :  { %v12912_v16 = vmul.f32 1.442695, %v12875_v9  ;;  %v12874_v4 = vsub.f32 %v21616_v48, %v12788_v61  ;;  %v12969_v58 = vsel %vm1886_vm3, %v21851_v20, 0.0 }
 0xb05   :  { %v21856_v33 = vpop.eup %17860  ;;  %12970 = vadd.xlane.f32.xlu1 %v12969_v58 }
 0xb06   :  { %17866 = vpow2.f32 %v12912_v16  ;;  %v12910_v39 = vmul.f32 1.442695, %v12874_v4  ;;  %v12966_v14 = vsel %vm1886_vm3, %v21856_v33, 0.0 }
 0xb07   :  { %12967 = vadd.xlane.f32.xlu0 %v12966_v14 }
 0xb08   :  { %17868 = vpow2.f32 %v12910_v39 }
 0xb09   :  { %v12797_v42 = vpop.xlane.xlu1 %12796 }
 0xb0a   :  { %v12877_v56 = vsub.f32 %v21630_v8, %v12797_v42  ;;  %v23022_v42 = vld [vmem:[#allocation96_spill] sm:$0xff] }
 0xb0b   :  { %v21861_v26 = vpop.eup %17862  ;;  %v12794_v21 = vpop.xlane.xlu0 %12793 }
 0xb0c   :  { %v12916_v48 = vmul.f32 1.442695, %v12877_v56  ;;  %v12876_v53 = vsub.f32 %v21636_v3, %v12794_v21  ;;  %v12975_v13 = vsel %vm1886_vm3, %v21861_v26, 0.0 }
 0xb0d   :  { %v21866_v2 = vpop.eup %17864  ;;  %12976 = vadd.xlane.f32.xlu1 %v12975_v13  ;;  %v23023_v13 = vld [vmem:[#allocation77_spill] sm:$0xff] }
 0xb0e   :  { %17870 = vpow2.f32 %v12916_v48  ;;  %v12914_v15 = vmul.f32 1.442695, %v12876_v53  ;;  %v12972_v35 = vsel %vm1886_vm3, %v21866_v2, 0.0 }
 0xb0f   :  { %12973 = vadd.xlane.f32.xlu0 %v12972_v35 }
 0xb10   :  { %17872 = vpow2.f32 %v12914_v15  ;;  %v23024_v15 = vld [vmem:[#allocation82_spill] sm:$0xff] }
 0xb11   :  { %v12803_v8 = vpop.xlane.xlu1 %12802  ;;  %v7640_v35 = vadd.f32 %v23024_v15, %v23023_v13 }
 0xb12   :  { %v12879_v57 = vsub.f32 %v21650_v38, %v12803_v8  ;;  %v23021_v38 = vld [vmem:[#allocation66_spill] sm:$0xff] }
 0xb13   :  { %v21871_v9 = vpop.eup %17866  ;;  %v12800_v61 = vpop.xlane.xlu0 %12799  ;;  %v7645_v56 = vadd.f32 %v23022_v42, %v23021_v38 }
 0xb14   :  { %v12920_v3 = vmul.f32 1.442695, %v12879_v57  ;;  %v12878_v16 = vsub.f32 %v21656_v34, %v12800_v61  ;;  %v12981_v4 = vsel %vm1886_vm3, %v21871_v9, 0.0 }
 0xb15   :  { %v21876_v58 = vpop.eup %17868  ;;  %12982 = vadd.xlane.f32.xlu1 %v12981_v4 }
 0xb16   :  { %17874 = vpow2.f32 %v12920_v3  ;;  %v12918_v39 = vmul.f32 1.442695, %v12878_v16  ;;  %v12978_v14 = vsel %vm1886_vm3, %v21876_v58, 0.0 }
 0xb17   :  { %12979 = vadd.xlane.f32.xlu0 %v12978_v14 }
 0xb18   :  { %17876 = vpow2.f32 %v12918_v39 }
 0xb19   :  { %v12809_v21 = vpop.xlane.xlu1 %12808 }
 0xb1a   :  { %v12881_v48 = vsub.f32 %v21666_v45, %v12809_v21  ;;  %v17177_v34 = vpop.f32.mrf.mxu1 }
 0xb1b   :  { %v21883_v53 = vpop.eup %17870  ;;  %v21887_v8 = vadd.f32 %v17177_v34, %v7645_v56  ;;  %v12806_v57 = vpop.xlane.xlu0 %12805 }
 0xb1c   :  { %v12924_v61 = vmul.f32 1.442695, %v12881_v48  ;;  %v12880_v3 = vsub.f32 %v21671_v10, %v12806_v57  ;;  %v11257_v16 = vpop.f32.mrf.mxu1  ;;  %v12987_v4 = vsel %vm1886_vm3, %v21883_v53, 0.0 }
 0xb1d   :  { %23025 = vst [vmem:[#allocation108_spill] sm:$0xff] %v21887_v8  ;;  %v21892_v39 = vpop.eup %17872  ;;  %v21894_v14 = vadd.f32 %v11257_v16, %v7640_v35  ;;  %12988 = vadd.xlane.f32.xlu1 %v12987_v4 }
 0xb1e   :  { %17878 = vpow2.f32 %v12924_v61  ;;  %v12922_v45 = vmul.f32 1.442695, %v12880_v3  ;;  %v12984_v38 = vsel %vm1886_vm3, %v21892_v39, 0.0  ;;  %v23027_v61 = vld [vmem:[#allocation61_spill] sm:$0xff] }
 0xb1f   :  { %23026 = vst [vmem:[#allocation10_spill] sm:$0xff] %v21894_v14  ;;  %12985 = vadd.xlane.f32.xlu0 %v12984_v38  ;;  %v23028_v3 = vld [vmem:[#allocation97_spill] sm:$0xff]  ;;  %v23030_v38 = vld [vmem:[#allocation75_spill] sm:$0xff] }
 0xb20   :  { %17880 = vpow2.f32 %v12922_v45  ;;  %v7655_v16 = vadd.f32 %v23028_v3, %v23027_v61  ;;  %v23029_v45 = vld [vmem:[#allocation59_spill] sm:$0xff]  ;;  %v23032_v61 = vld [vmem:[#allocation64_spill] sm:$0xff]  ;;  %v23033_v3 = vld [vmem:[#allocation54_spill] sm:$0xff] }
 0xb21   :  { %v12815_v42 = vpop.xlane.xlu1 %12814 }
 0xb22   :  { %v12883_v56 = vsub.f32 %v21675_v43, %v12815_v42  ;;  %v7650_v42 = vadd.f32 %v23030_v38, %v23029_v45  ;;  %v23036_v38 = vld [vmem:[#allocation55_spill] sm:$0xff] }
 0xb23   :  { %v21899_v10 = vpop.eup %17874  ;;  %v12812_v21 = vpop.xlane.xlu0 %12811 }
 0xb24   :  { %v12928_v48 = vmul.f32 1.442695, %v12883_v56  ;;  %v12882_v34 = vsub.f32 %v21679_v24, %v12812_v21  ;;  %v12993_v13 = vsel %vm1886_vm3, %v21899_v10, 0.0 }
 0xb25   :  { %v21904_v15 = vpop.eup %17876  ;;  %12994 = vadd.xlane.f32.xlu1 %v12993_v13 }
 0xb26   :  { %17882 = vpow2.f32 %v12928_v48  ;;  %v12926_v35 = vmul.f32 1.442695, %v12882_v34  ;;  %v12990_v57 = vsel %vm1886_vm3, %v21904_v15, 0.0 }
 0xb27   :  { %12991 = vadd.xlane.f32.xlu0 %v12990_v57 }
 0xb28   :  { %17884 = vpow2.f32 %v12926_v35 }
 0xb29   :  { %v12821_v43 = vpop.xlane.xlu1 %12820 }
 0xb2a   :  { %v12885_v4 = vsub.f32 %v21686_v0, %v12821_v43  ;;  %v7665_v0 = vadd.f32 %v23033_v3, %v23032_v61 }
 0xb2b   :  { %v21911_v24 = vpop.eup %17878  ;;  %v17180_v56 = vpop.f32.mrf.mxu1 }
 0xb2c   :  { %v12818_v21 = vpop.xlane.xlu0 %12817  ;;  %v12932_v48 = vmul.f32 1.442695, %v12885_v4  ;;  %v21915_v34 = vadd.f32 %v17180_v56, %v7655_v16  ;;  %v12999_v35 = vsel %vm1886_vm3, %v21911_v24, 0.0 }
 0xb2d   :  { %v12884_v13 = vsub.f32 %v21694_v60, %v12818_v21  ;;  %v21920_v57 = vpop.eup %17880  ;;  %v11267_v43 = vpop.f32.mrf.mxu1  ;;  %13000 = vadd.xlane.f32.xlu1 %v12999_v35  ;;  %v23035_v60 = vld [vmem:[#allocation42_spill] sm:$0xff] }
 0xb2e   :  { %23031 = vst [vmem:[#allocation25_spill] sm:$0xff] %v21915_v34  ;;  %17886 = vpow2.f32 %v12932_v48  ;;  %v21924_v45 = vadd.f32 %v11267_v43, %v7650_v42  ;;  %v12996_v16 = vsel %vm1886_vm3, %v21920_v57, 0.0  ;;  %v7660_v56 = vadd.f32 %v23036_v38, %v23035_v60 }
 0xb2f   :  { %v12930_v14 = vmul.f32 1.442695, %v12884_v13  ;;  %v17183_v4 = vpop.f32.mrf.mxu1  ;;  %12997 = vadd.xlane.f32.xlu0 %v12996_v16 }
 0xb30   :  { %23034 = vst [vmem:[#allocation24_spill] sm:$0xff] %v21924_v45  ;;  %v21930_v21 = vadd.f32 %v17183_v4, %v7665_v0 }
 0xb31   :  { %17888 = vpow2.f32 %v12930_v14  ;;  %v11277_v34 = vpop.f32.mrf.mxu1 }
 0xb32   :  { %23037 = vst [vmem:[#allocation27_spill] sm:$0xff] %v21930_v21  ;;  %v21932_v8 = vadd.f32 %v11277_v34, %v7660_v56 }
 0xb33   :  { %v21934_v61 = vpop.eup %17882 }
 0xb34   :  { %23038 = vst [vmem:[#allocation26_spill] sm:$0xff] %v21932_v8  ;;  %v13005_v42 = vsel %vm1886_vm3, %v21934_v61, 0.0 }
 0xb35   :  { %v21938_v48 = vpop.eup %17884  ;;  %13006 = vadd.xlane.f32.xlu1 %v13005_v42 }
 0xb36   :  { %v13002_v13 = vsel %vm1886_vm3, %v21938_v48, 0.0 }
 0xb37   :  { %13003 = vadd.xlane.f32.xlu0 %v13002_v13 }
 0xb38   :  { %v12833_v35 = vpop.xlane.xlu1 %12832 }
 0xb39   :  { %v12889_v14 = vsub.f32 %v21712_v47, %v12833_v35 }
 0xb3a   :  { %v12830_v3 = vpop.xlane.xlu0 %12829 }
 0xb3b   :  { %v21943_v0 = vpop.eup %17886  ;;  %v12940_v34 = vmul.f32 1.442695, %v12889_v14  ;;  %v12888_v43 = vsub.f32 %v21716_v36, %v12830_v3 }
 0xb3c   :  { %v13011_v16 = vsel %vm1886_vm3, %v21943_v0, 0.0 }
 0xb3d   :  { %17890 = vpow2.f32 %v12940_v34  ;;  %v12938_v60 = vmul.f32 1.442695, %v12888_v43  ;;  %13012 = vadd.xlane.f32.xlu1 %v13011_v16 }
 0xb3e   :  { %v21948_v4 = vpop.eup %17888 }
 0xb3f   :  { %v13008_v38 = vsel %vm1886_vm3, %v21948_v4, 0.0  ;;  %17892 = vpow2.f32 %v12938_v60 }
 0xb40   :  { %13009 = vadd.xlane.f32.xlu0 %v13008_v38 }
 0xb48   :  { %v12845_v47 = vpop.xlane.xlu1 %12844 }
 0xb49   :  { %v12893_v56 = vsub.f32 %v21720_v55, %v12845_v47 }
 0xb4a   :  { %v21953_v42 = vpop.eup %17890  ;;  %v12842_v13 = vpop.xlane.xlu0 %12841 }
 0xb4b   :  { %v12948_v36 = vmul.f32 1.442695, %v12893_v56  ;;  %v12892_v35 = vsub.f32 %v21724_v6, %v12842_v13  ;;  %v13023_v14 = vsel %vm1886_vm3, %v21953_v42, 0.0 }
 0xb4c   :  { %v21958_v3 = vpop.eup %17892  ;;  %13024 = vadd.xlane.f32.xlu1 %v13023_v14 }
 0xb4d   :  { %17894 = vpow2.f32 %v12948_v36  ;;  %v12946_v34 = vmul.f32 1.442695, %v12892_v35  ;;  %v13020_v43 = vsel %vm1886_vm3, %v21958_v3, 0.0 }
 0xb4e   :  { %13021 = vadd.xlane.f32.xlu0 %v13020_v43 }
 0xb4f   :  { %17896 = vpow2.f32 %v12946_v34 }
 0xb58   :  { %v12857_v55 = vpop.xlane.xlu1 %12856 }
 0xb59   :  { %v12897_v16 = vsub.f32 %v21734_v31, %v12857_v55 }
 0xb5a   :  { %v21963_v60 = vpop.eup %17894  ;;  %v12854_v38 = vpop.xlane.xlu0 %12853 }
 0xb5b   :  { %23039 = vst [vmem:[#allocation29_spill] sm:$0xff] %v21963_v60  ;;  %v12956_v6 = vmul.f32 1.442695, %v12897_v16  ;;  %v12896_v47 = vsub.f32 %v21740_v30, %v12854_v38  ;;  %v13035_v56 = vsel %vm1886_vm3, %v21963_v60, 0.0 }
 0xb5c   :  { %v21968_v13 = vpop.eup %17896  ;;  %13036 = vadd.xlane.f32.xlu1 %v13035_v56 }
 0xb5d   :  { %17898 = vpow2.f32 %v12956_v6  ;;  %v12954_v36 = vmul.f32 1.442695, %v12896_v47  ;;  %v13032_v35 = vsel %vm1886_vm3, %v21968_v13, 0.0 }
 0xb5e   :  { %13033 = vadd.xlane.f32.xlu0 %v13032_v35 }
 0xb5f   :  { %17900 = vpow2.f32 %v12954_v36 }
 0xb67   :  { %v12869_v31 = vpop.xlane.xlu1 %12868 }
 0xb68   :  { %v12901_v14 = vsub.f32 %v21760_v52, %v12869_v31  ;;  %v21982_v52 = vpop.f32.mrf.mxu1 }
 0xb69   :  { %v12866_v34 = vpop.xlane.xlu0 %12865 }
 0xb6a   :  { %v21973_v43 = vpop.eup %17898  ;;  %v12964_v30 = vmul.f32 1.442695, %v12901_v14  ;;  %v12900_v55 = vsub.f32 %v21768_v32, %v12866_v34  ;;  %v21984_v56 = vpop.f32.mrf.mxu1 }
 0xb6b   :  { %23040 = vst [vmem:[#allocation28_spill] sm:$0xff] %v21973_v43  ;;  %v13047_v16 = vsel %vm1886_vm3, %v21973_v43, 0.0 }
 0xb6c   :  { %v21978_v38 = vpop.eup %17900  ;;  %17902 = vpow2.f32 %v12964_v30  ;;  %v12962_v6 = vmul.f32 1.442695, %v12900_v55  ;;  %13048 = vadd.xlane.f32.xlu1 %v13047_v16  ;;  %v21988_v32 = vpop.f32.mrf.mxu1  ;;  %v12825_v30 = vsel %vm1886_vm3, %v21982_v52, -inf  ;;  %v12822_v16 = vsel %vm1886_vm3, %v21984_v56, -inf }
 0xb6d   :  { %23041 = vst [vmem:[#allocation105_spill] sm:$0xff] %v21978_v38  ;;  %v13044_v47 = vsel %vm1886_vm3, %v21978_v38, 0.0 }
 0xb6e   :  { %17904 = vpow2.f32 %v12962_v6  ;;  %13045 = vadd.xlane.f32.xlu0 %v13044_v47  ;;  %v21996_v34 = vpop.f32.mrf.mxu1  ;;  %v12837_v6 = vsel %vm1886_vm3, %v21988_v32, -inf }
 0xb70   :  { %v22000_v55 = vpop.f32.mrf.mxu1 }
 0xb71   :  { %v12849_v8 = vsel %vm1886_vm3, %v22000_v55, -inf }
 0xb72   :  { %v22006_v47 = vpop.f32.mrf.mxu1 }
 0xb79   :  { %v21986_v36 = vpop.eup %17902 }
 0xb7a   :  { %23042 = vst [vmem:[#allocation107_spill] sm:$0xff] %v21986_v36  ;;  %v13059_v35 = vsel %vm1886_vm3, %v21986_v36, 0.0 }
 0xb7b   :  { %v21992_v31 = vpop.eup %17904  ;;  %13060 = vadd.xlane.f32.xlu1 %v13059_v35  ;;  %v12834_v35 = vsel %vm1886_vm3, %v21996_v34, -inf }
 0xb7c   :  { %23043 = vst [vmem:[#allocation106_spill] sm:$0xff] %v21992_v31  ;;  %v13056_v14 = vsel %vm1886_vm3, %v21992_v31, 0.0 }
 0xb7d   :  { %13057 = vadd.xlane.f32.xlu0 %v13056_v14  ;;  %v22010_v14 = vpop.f32.mrf.mxu1 }
 0xb7e   :  { %23044 = vst [vmem:[#allocation50_spill] sm:$0xff] %v22010_v14  ;;  %v12861_v21 = vsel %vm1886_vm3, %v22010_v14, -inf }
 0xb7f   :  { %12826 = vmax.xlane.f32.xlu1 %v12825_v30  ;;  %v12846_v30 = vsel %vm1886_vm3, %v22006_v47, -inf }
 0xb81   :  { %12823 = vmax.xlane.f32.xlu0 %v12822_v16  ;;  %v22016_v16 = vpop.f32.mrf.mxu1 }
 0xb82   :  { %23045 = vst [vmem:[#allocation89_spill] sm:$0xff] %v22016_v16 }
 0xb83   :  { %12838 = vmax.xlane.f32.xlu1 %v12837_v6  ;;  %v12858_v6 = vsel %vm1886_vm3, %v22016_v16, -inf }
 0xb85   :  { %12835 = vmax.xlane.f32.xlu0 %v12834_v35 }
 0xb87   :  { %12850 = vmax.xlane.f32.xlu1 %v12849_v8 }
 0xb89   :  { %12847 = vmax.xlane.f32.xlu0 %v12846_v30 }
 0xb8b   :  { %12862 = vmax.xlane.f32.xlu1 %v12861_v21 }
 0xb8d   :  { %12859 = vmax.xlane.f32.xlu0 %v12858_v6 }
 0xb8e   :  { %v12971_v45 = vpop.xlane.xlu1 %12970 }
 0xb8f   :  { %17906 = vrcp.f32 %v12971_v45 }
 0xb90   :  { %v12968_v35 = vpop.xlane.xlu0 %12967 }
 0xb91   :  { %17908 = vrcp.f32 %v12968_v35 }
 0xb96   :  { %v12977_v18 = vpop.xlane.xlu1 %12976 }
 0xb97   :  { %17910 = vrcp.f32 %v12977_v18 }
 0xb98   :  { %v12974_v8 = vpop.xlane.xlu0 %12973 }
 0xb99   :  { %17912 = vrcp.f32 %v12974_v8 }
 0xb9c   :  { %v17907_v11 = vpop.eup %17906  ;;  %14268 = vrot.lane.b32.xlu1 %v22948_v44, %s18018_s12 }
 0xb9d   :  { %v13095_v30 = vmul.f32 %v17907_v11, %v12971_v45 }
 0xb9e   :  { %v17909_v7 = vpop.eup %17908  ;;  %v12983_v28 = vpop.xlane.xlu1 %12982 }
 0xb9f   :  { %v13127_v21 = vsub.f32 2.0, %v13095_v30  ;;  %v13094_v1 = vmul.f32 %v17909_v7, %v12968_v35  ;;  %17914 = vrcp.f32 %v12983_v28 }
 0xba0   :  { %v12980_v25 = vpop.xlane.xlu0 %12979 }
 0xba1   :  { %v13126_v6 = vsub.f32 2.0, %v13094_v1  ;;  %17916 = vrcp.f32 %v12980_v25  ;;  %v13159_v36 = vmul.f32 %v17907_v11, %v13127_v21 }
 0xba3   :  { %v13158_v31 = vmul.f32 %v17909_v7, %v13126_v6  ;;  %14179 = vrot.lane.b32.xlu0 %v22949_v59, %s18018_s12  ;;  %v13191_v44 = vmul.f32 %v21851_v20, %v13159_v36 }
 0xba4   :  { %v17911_v43 = vpop.eup %17910 }
 0xba5   :  { %v13190_v14 = vmul.f32 %v21856_v33, %v13158_v31  ;;  %v13097_v16 = vmul.f32 %v17911_v43, %v12977_v18 }
 0xba6   :  { %v17913_v38 = vpop.eup %17912  ;;  %v12989_v45 = vpop.xlane.xlu1 %12988 }
 0xba7   :  { %v13129_v60 = vsub.f32 2.0, %v13097_v16  ;;  %v13096_v30 = vmul.f32 %v17913_v38, %v12974_v8  ;;  %17918 = vrcp.f32 %v12989_v45  ;;  %17300 = vmatprep.mubr.msk.f32.mxu1 %vm1886_vm3, %v13190_v14 }
 0xba8   :  { %v12986_v1 = vpop.xlane.xlu0 %12985  ;;  %17301 = vmatmul.mubr.msk.f32.vlgmr.msra.gmra.mxu1 %vm1886_vm3, %v13191_v44 }
 0xba9   :  { %v13128_v7 = vsub.f32 2.0, %v13096_v30  ;;  %17920 = vrcp.f32 %v12986_v1  ;;  %17304 = vmatpush3.msra.mxu1 %v21557_v63  ;;  %v13161_v59 = vmul.f32 %v17911_v43, %v13129_v60 }
 0xbaa   :  { %17305 = vmatprep.subr.mxu1 %v21563_v51 }
 0xbab   :  { %v13160_v11 = vmul.f32 %v17913_v38, %v13128_v7  ;;  %17306 = vmatpush3.msra.mxu1 %v21563_v51  ;;  %v13193_v31 = vmul.f32 %v21861_v26, %v13161_v59 }
 0xbac   :  { %v17915_v18 = vpop.eup %17914  ;;  %17317 = vmatprep.subr.mxu1 %v21561_v37 }
 0xbad   :  { %v13192_v20 = vmul.f32 %v21866_v2, %v13160_v11  ;;  %v13099_v33 = vmul.f32 %v17915_v18, %v12983_v28 }
 0xbae   :  { %v17917_v36 = vpop.eup %17916  ;;  %v12995_v14 = vpop.xlane.xlu1 %12994 }
 0xbaf   :  { %v13131_v16 = vsub.f32 2.0, %v13099_v33  ;;  %v13098_v35 = vmul.f32 %v17917_v36, %v12980_v25  ;;  %17922 = vrcp.f32 %v12995_v14  ;;  %17307 = vmatprep.mubr.msk.f32.mxu1 %vm1886_vm3, %v13192_v20 }
 0xbb0   :  { %v12992_v63 = vpop.xlane.xlu0 %12991  ;;  %17308 = vmatmul.mubr.msk.f32.vlgmr.msra.gmra.mxu1 %vm1886_vm3, %v13193_v31 }
 0xbb1   :  { %v13130_v60 = vsub.f32 2.0, %v13098_v35  ;;  %17924 = vrcp.f32 %v12992_v63  ;;  %17318 = vmatpush3.msra.mxu1 %v21561_v37  ;;  %v13163_v51 = vmul.f32 %v17915_v18, %v13131_v16 }
 0xbb2   :  { %17319 = vmatprep.subr.mxu1 %v21728_v19 }
 0xbb3   :  { %v13162_v28 = vmul.f32 %v17917_v36, %v13130_v60  ;;  %17320 = vmatpush3.msra.mxu1 %v21728_v19  ;;  %v13195_v38 = vmul.f32 %v21871_v9, %v13163_v51 }
 0xbb4   :  { %v17919_v26 = vpop.eup %17918  ;;  %17331 = vmatprep.subr.mxu1 %v21732_v62 }
 0xbb5   :  { %v13194_v25 = vmul.f32 %v21876_v58, %v13162_v28  ;;  %v13101_v2 = vmul.f32 %v17919_v26, %v12989_v45 }
 0xbb6   :  { %v17921_v43 = vpop.eup %17920  ;;  %v13001_v8 = vpop.xlane.xlu1 %13000 }
 0xbb7   :  { %v13133_v21 = vsub.f32 2.0, %v13101_v2  ;;  %v13100_v6 = vmul.f32 %v17921_v43, %v12986_v1  ;;  %17926 = vrcp.f32 %v13001_v8  ;;  %17314 = vmatprep.mubr.msk.f32.mxu0 %vm1886_vm3, %v13194_v25 }
 0xbb8   :  { %v12998_v37 = vpop.xlane.xlu0 %12997  ;;  %17315 = vmatmul.mubr.msk.f32.vlgmr.msra.gmra.mxu0 %vm1886_vm3, %v13195_v38 }
 0xbb9   :  { %v13132_v44 = vsub.f32 2.0, %v13100_v6  ;;  %17928 = vrcp.f32 %v12998_v37  ;;  %17325 = vmatpush3.msra.mxu0 %v21568_v27  ;;  %v13165_v19 = vmul.f32 %v17919_v26, %v13133_v21 }
 0xbba   :  { %17326 = vmatprep.subr.mxu0 %v21730_v12 }
 0xbbb   :  { %v13164_v58 = vmul.f32 %v17921_v43, %v13132_v44  ;;  %17327 = vmatpush3.msra.mxu0 %v21730_v12  ;;  %v13197_v7 = vmul.f32 %v21883_v53, %v13165_v19 }
 0xbbc   :  { %v17923_v9 = vpop.eup %17922  ;;  %17338 = vmatprep.subr.mxu0 %v21744_v50 }
 0xbbd   :  { %v13196_v45 = vmul.f32 %v21892_v39, %v13164_v58  ;;  %v13103_v30 = vmul.f32 %v17923_v9, %v12995_v14 }
 0xbbe   :  { %v17925_v1 = vpop.eup %17924  ;;  %v13007_v59 = vpop.xlane.xlu1 %13006 }
 0xbbf   :  { %v13135_v11 = vsub.f32 2.0, %v13103_v30  ;;  %v13102_v18 = vmul.f32 %v17925_v1, %v12992_v63  ;;  %17930 = vrcp.f32 %v13007_v59  ;;  %17321 = vmatprep.mubr.msk.f32.mxu1 %vm1886_vm3, %v13196_v45 }
 0xbc0   :  { %v13004_v27 = vpop.xlane.xlu0 %13003  ;;  %17322 = vmatmul.mubr.msk.f32.vlgmr.msra.gmra.mxu1 %vm1886_vm3, %v13197_v7 }
 0xbc1   :  { %v13134_v20 = vsub.f32 2.0, %v13102_v18  ;;  %17932 = vrcp.f32 %v13004_v27  ;;  %17332 = vmatpush3.msra.mxu1 %v21732_v62  ;;  %v13167_v12 = vmul.f32 %v17923_v9, %v13135_v11 }
 0xbc2   :  { %17333 = vmatprep.subr.mxu1 %v21738_v22 }
 0xbc3   :  { %v13166_v39 = vmul.f32 %v17925_v1, %v13134_v20  ;;  %17334 = vmatpush3.msra.mxu1 %v21738_v22  ;;  %v13199_v14 = vmul.f32 %v21899_v10, %v13167_v12 }
 0xbc4   :  { %v17927_v53 = vpop.eup %17926  ;;  %17345 = vmatprep.subr.mxu1 %v21748_v54 }
 0xbc5   :  { %v13198_v33 = vmul.f32 %v21904_v15, %v13166_v39  ;;  %v13105_v36 = vmul.f32 %v17927_v53, %v13001_v8 }
 0xbc6   :  { %v17929_v31 = vpop.eup %17928  ;;  %v13013_v16 = vpop.xlane.xlu1 %13012 }
 0xbc7   :  { %v13137_v35 = vsub.f32 2.0, %v13105_v36  ;;  %v13104_v63 = vmul.f32 %v17929_v31, %v12998_v37  ;;  %17934 = vrcp.f32 %v13013_v16  ;;  %17328 = vmatprep.mubr.msk.f32.mxu0 %vm1886_vm3, %v13198_v33 }
 0xbc8   :  { %17329 = vmatmul.mubr.msk.f32.vlgmr.msra.gmra.mxu0 %vm1886_vm3, %v13199_v14 }
 0xbc9   :  { %v13010_v62 = vpop.xlane.xlu0 %13009  ;;  %v13136_v60 = vsub.f32 2.0, %v13104_v63  ;;  %17339 = vmatpush3.msra.mxu0 %v21744_v50  ;;  %v13169_v22 = vmul.f32 %v17927_v53, %v13137_v35 }
 0xbca   :  { %17936 = vrcp.f32 %v13010_v62  ;;  %17340 = vmatprep.subr.mxu0 %v21746_v49 }
 0xbcb   :  { %v13168_v15 = vmul.f32 %v17929_v31, %v13136_v60  ;;  %17341 = vmatpush3.msra.mxu0 %v21746_v49  ;;  %v13201_v25 = vmul.f32 %v21911_v24, %v13169_v22 }
 0xbcc   :  { %v17931_v10 = vpop.eup %17930  ;;  %17352 = vmatprep.subr.mxu0 %v21764_v46 }
 0xbcd   :  { %v13200_v51 = vmul.f32 %v21920_v57, %v13168_v15  ;;  %v13107_v28 = vmul.f32 %v17931_v10, %v13007_v59 }
 0xbce   :  { %v17933_v26 = vpop.eup %17932 }
 0xbcf   :  { %v13139_v2 = vsub.f32 2.0, %v13107_v28  ;;  %v13106_v43 = vmul.f32 %v17933_v26, %v13004_v27  ;;  %17335 = vmatprep.mubr.msk.f32.mxu1 %vm1886_vm3, %v13200_v51 }
 0xbd0   :  { %17336 = vmatmul.mubr.msk.f32.vlgmr.msra.gmra.mxu1 %vm1886_vm3, %v13201_v25 }
 0xbd1   :  { %v13138_v50 = vsub.f32 2.0, %v13106_v43  ;;  %17346 = vmatpush3.msra.mxu1 %v21748_v54  ;;  %v13171_v38 = vmul.f32 %v17931_v10, %v13139_v2 }
 0xbd2   :  { %17347 = vmatprep.subr.mxu1 %v21754_v23 }
 0xbd3   :  { %v13170_v49 = vmul.f32 %v17933_v26, %v13138_v50  ;;  %17348 = vmatpush3.msra.mxu1 %v21754_v23  ;;  %v13203_v37 = vmul.f32 %v21934_v61, %v13171_v38 }
 0xbd4   :  { %v17935_v57 = vpop.eup %17934  ;;  %17359 = vmatprep.subr.mxu1 %v21784_v40 }
 0xbd5   :  { %v13202_v24 = vmul.f32 %v21938_v48, %v13170_v49  ;;  %v13109_v8 = vmul.f32 %v17935_v57, %v13013_v16  ;;  %v13025_v21 = vpop.xlane.xlu1 %13024 }
 0xbd6   :  { %17938 = vrcp.f32 %v13025_v21 }
 0xbd7   :  { %v17937_v6 = vpop.eup %17936  ;;  %v13141_v44 = vsub.f32 2.0, %v13109_v8  ;;  %v13022_v54 = vpop.xlane.xlu0 %13021  ;;  %17342 = vmatprep.mubr.msk.f32.mxu0 %vm1886_vm3, %v13202_v24 }
 0xbd8   :  { %v13108_v19 = vmul.f32 %v17937_v6, %v13010_v62  ;;  %17940 = vrcp.f32 %v13022_v54  ;;  %17343 = vmatmul.mubr.msk.f32.vlgmr.msra.gmra.mxu0 %vm1886_vm3, %v13203_v37 }
 0xbd9   :  { %17353 = vmatpush3.msra.mxu0 %v21764_v46  ;;  %v13173_v58 = vmul.f32 %v17935_v57, %v13141_v44  ;;  %v23047_v44 = vld [vmem:[#allocation105_spill] sm:$0xff] }
 0xbda   :  { %v13140_v23 = vsub.f32 2.0, %v13108_v19  ;;  %17354 = vmatprep.subr.mxu0 %v21778_v5 }
 0xbdb   :  { %17355 = vmatpush3.msra.mxu0 %v21778_v5  ;;  %v13205_v9 = vmul.f32 %v21943_v0, %v13173_v58 }
 0xbdc   :  { %v13172_v48 = vmul.f32 %v17937_v6, %v13140_v23  ;;  %17366 = vmatprep.subr.mxu0 %v21800_v17 }
 0xbde   :  { %v13204_v61 = vmul.f32 %v21948_v4, %v13172_v48 }
 0xbe0   :  { %17349 = vmatprep.mubr.msk.f32.mxu1 %vm1886_vm3, %v13204_v61 }
 0xbe1   :  { %17350 = vmatmul.mubr.msk.f32.vlgmr.msra.gmra.mxu1 %vm1886_vm3, %v13205_v9 }
 0xbe2   :  { %17360 = vmatpush3.msra.mxu1 %v21784_v40 }
 0xbe3   :  { %17361 = vmatprep.subr.mxu1 %v21794_v29  ;;  %v17939_v46 = vpop.eup %17938 }
 0xbe4   :  { %17362 = vmatpush3.msra.mxu1 %v21794_v29  ;;  %v13113_v45 = vmul.f32 %v17939_v46, %v13025_v21  ;;  %v23046_v21 = vld [vmem:[#allocation29_spill] sm:$0xff] }
 0xbe5   :  { %17373 = vmatprep.subr.mxu1 %v21816_v41  ;;  %v17941_v5 = vpop.eup %17940  ;;  %v13037_v12 = vpop.xlane.xlu1 %13036 }
 0xbe6   :  { %v13145_v30 = vsub.f32 2.0, %v13113_v45  ;;  %v13112_v1 = vmul.f32 %v17941_v5, %v13022_v54 }
 0xbe7   :  { %v13034_v4 = vpop.xlane.xlu0 %13033 }
 0xbe8   :  { %v13144_v7 = vsub.f32 2.0, %v13112_v1  ;;  %17942 = vrcp.f32 %v13034_v4  ;;  %v13177_v0 = vmul.f32 %v17939_v46, %v13145_v30  ;;  %v23049_v30 = vld [vmem:[#allocation30_spill] sm:$0xff] }
 0xbe9   :  { %17944 = vrcp.f32 %v13037_v12 }
 0xbea   :  { %v13176_v59 = vmul.f32 %v17941_v5, %v13144_v7  ;;  %v13209_v40 = vmul.f32 %v21953_v42, %v13177_v0  ;;  %v23048_v5 = vld [vmem:[#allocation31_spill] sm:$0xff]  ;;  %v23051_v0 = vld [vmem:[#allocation50_spill] sm:$0xff] }
 0xbec   :  { %v13208_v11 = vmul.f32 %v21958_v3, %v13176_v59 }
 0xbee   :  { %17363 = vmatprep.mubr.msk.f32.mxu1 %vm1886_vm3, %v13208_v11 }
 0xbef   :  { %17364 = vmatmul.mubr.msk.f32.vlgmr.msra.gmra.mxu1 %vm1886_vm3, %v13209_v40 }
 0xbf0   :  { %17374 = vmatpush3.msra.mxu1 %v21816_v41 }
 0xbf5   :  { %v17943_v29 = vpop.eup %17942  ;;  %v22097_v3 = vpop.xlane.xlu1 %13048 }
 0xbf6   :  { %v13116_v18 = vmul.f32 %v17943_v29, %v13034_v4  ;;  %v17945_v35 = vpop.eup %17944  ;;  %v23050_v4 = vld [vmem:[#allocation89_spill] sm:$0xff] }
 0xbf7   :  { %v13046_v53 = vpop.xlane.xlu0 %13045  ;;  %v13117_v15 = vmul.f32 %v17945_v35, %v13037_v12  ;;  %v23052_v12 = vld [vmem:[#allocation33_spill] sm:$0xff] }
 0xbf8   :  { %v13148_v27 = vsub.f32 2.0, %v13116_v18  ;;  %17946 = vrcp.f32 %v13046_v53 }
 0xbf9   :  { %v13149_v2 = vsub.f32 2.0, %v13117_v15 }
 0xbfa   :  { %v13180_v20 = vmul.f32 %v17943_v29, %v13148_v27 }
 0xbfb   :  { %v13181_v57 = vmul.f32 %v17945_v35, %v13149_v2 }
 0xbfc   :  { %v13212_v39 = vmul.f32 %v21968_v13, %v13180_v20 }
 0xbfd   :  { %v13213_v6 = vmul.f32 %v23046_v21, %v13181_v57 }
 0xbfe   :  { %17377 = vmatprep.mubr.msk.f32.mxu1 %vm1886_vm3, %v13212_v39  ;;  %v23053_v39 = vld [vmem:[#allocation32_spill] sm:$0xff] }
 0xc04   :  { %v22099_v42 = vpop.xlane.xlu1 %13060 }
 0xc05   :  { %v17947_v63 = vpop.eup %17946 }
 0xc06   :  { %v22101_v33 = vpop.xlane.xlu0 %13057  ;;  %v13120_v28 = vmul.f32 %v17947_v63, %v13046_v53  ;;  %v23054_v53 = vld [vmem:[#allocation35_spill] sm:$0xff] }
 0xc08   :  { %v12827_v36 = vpop.xlane.xlu1 %12826  ;;  %v13152_v38 = vsub.f32 2.0, %v13120_v28 }
 0xc09   :  { %v12887_v41 = vsub.f32 %v21982_v52, %v12827_v36  ;;  %v23055_v36 = vld [vmem:[#allocation34_spill] sm:$0xff] }
 0xc0a   :  { %v12824_v31 = vpop.xlane.xlu0 %12823  ;;  %v13184_v24 = vmul.f32 %v17947_v63, %v13152_v38 }
 0xc0b   :  { %v12936_v14 = vmul.f32 1.442695, %v12887_v41  ;;  %v12886_v16 = vsub.f32 %v21984_v56, %v12824_v31  ;;  %v23056_v41 = vld [vmem:[#allocation36_spill] sm:$0xff] }
 0xc0c   :  { %v12839_v13 = vpop.xlane.xlu1 %12838 }
 0xc0d   :  { %17948 = vpow2.f32 %v12936_v14  ;;  %v12934_v62 = vmul.f32 1.442695, %v12886_v16  ;;  %v12891_v60 = vsub.f32 %v21988_v32, %v12839_v13 }
 0xc0e   :  { %v12836_v22 = vpop.xlane.xlu0 %12835 }
 0xc0f   :  { %17950 = vpow2.f32 %v12934_v62  ;;  %v12944_v10 = vmul.f32 1.442695, %v12891_v60  ;;  %v12890_v51 = vsub.f32 %v21996_v34, %v12836_v22 }
 0xc10   :  { %v12851_v26 = vpop.xlane.xlu1 %12850 }
 0xc11   :  { %v12942_v52 = vmul.f32 1.442695, %v12890_v51  ;;  %v12895_v25 = vsub.f32 %v22000_v55, %v12851_v26  ;;  %17952 = vpow2.f32 %v12944_v10 }
 0xc12   :  { %v12848_v56 = vpop.xlane.xlu0 %12847 }
 0xc13   :  { %17954 = vpow2.f32 %v12942_v52  ;;  %v12952_v43 = vmul.f32 1.442695, %v12895_v25  ;;  %v12894_v50 = vsub.f32 %v22006_v47, %v12848_v56  ;;  %v13216_v47 = vmul.f32 %v23047_v44, %v13184_v24 }
 0xc14   :  { %v12863_v1 = vpop.xlane.xlu1 %12862 }
 0xc15   :  { %v12950_v32 = vmul.f32 1.442695, %v12894_v50  ;;  %17956 = vpow2.f32 %v12952_v43  ;;  %v12899_v59 = vsub.f32 %v23051_v0, %v12863_v1 }
 0xc16   :  { %v12860_v49 = vpop.xlane.xlu0 %12859 }
 0xc17   :  { %17958 = vpow2.f32 %v12950_v32  ;;  %v12898_v7 = vsub.f32 %v23050_v4, %v12860_v49  ;;  %v12960_v40 = vmul.f32 1.442695, %v12899_v59 }
 0xc18   :  { %v14269_v31 = vpop.permute.xlu1 %14268 }
 0xc19   :  { %v12958_v11 = vmul.f32 1.442695, %v12898_v7 }
 0xc1a   :  { %v22109_v34 = vpop.eup %17948  ;;  %v14180_v8 = vpop.permute.xlu0 %14179 }
 0xc1b   :  { %17375 = vmatprep.subr.mxu1 %v14180_v8  ;;  %v13017_v55 = vsel %vm1886_vm3, %v22109_v34, 0.0  ;;  %17960 = vpow2.f32 %v12958_v11 }
 0xc1c   :  { %v22114_v37 = vpop.eup %17950  ;;  %17376 = vmatpush3.msra.mxu1 %v14180_v8  ;;  %13018 = vadd.xlane.f32.xlu1 %v13017_v55  ;;  %17962 = vpow2.f32 %v12960_v40 }
 0xc1d   :  { %17378 = vmatmul.mubr.msk.f32.vlgmr.msra.gmra.mxu1 %vm1886_vm3, %v13213_v6  ;;  %v13014_v54 = vsel %vm1886_vm3, %v22114_v37, 0.0 }
 0xc1e   :  { %17391 = vmatprep.mubr.msk.f32.mxu1 %vm1886_vm3, %v13216_v47  ;;  %v22119_v19 = vpop.eup %17952 }
 0xc1f   :  { %v13029_v61 = vsel %vm1886_vm3, %v22119_v19, 0.0 }
 0xc20   :  { %v22123_v23 = vpop.eup %17954  ;;  %13015 = vadd.xlane.f32.xlu1 %v13014_v54 }
 0xc21   :  { %v13026_v58 = vsel %vm1886_vm3, %v22123_v23, 0.0 }
 0xc22   :  { %13027 = vadd.xlane.f32.xlu0 %v13026_v58  ;;  %v22127_v48 = vpop.eup %17956 }
 0xc23   :  { %v13041_v45 = vsel %vm1886_vm3, %v22127_v48, 0.0 }
 0xc24   :  { %v22131_v9 = vpop.eup %17958  ;;  %13030 = vadd.xlane.f32.xlu1 %v13029_v61 }
 0xc25   :  { %v13038_v46 = vsel %vm1886_vm3, %v22131_v9, 0.0 }
 0xc26   :  { %13039 = vadd.xlane.f32.xlu0 %v13038_v46 }
 0xc28   :  { %13042 = vadd.xlane.f32.xlu1 %v13041_v45  ;;  %v22143_v29 = vpop.eup %17960 }
 0xc29   :  { %v22145_v18 = vpop.eup %17962  ;;  %v13050_v27 = vsel %vm1886_vm3, %v22143_v29, 0.0 }
 0xc2a   :  { %v13053_v20 = vsel %vm1886_vm3, %v22145_v18, 0.0 }
 0xc39   :  { %14355 = vrot.lane.b32.xlu1 %v23048_v5, %s18018_s12 }
 0xc3c   :  { %14266 = vrot.lane.b32.xlu0 %v23049_v30, %s18018_s12 }
 0xc5b   :  { %13051 = vadd.xlane.f32.xlu0 %v13050_v27 }
 0xc5d   :  { %13054 = vadd.xlane.f32.xlu1 %v13053_v20  ;;  %v23058_v20 = vld [vmem:[#allocation28_spill] sm:$0xff] }
 0xc6e   :  { %14442 = vrot.lane.b32.xlu1 %v23052_v12, %s18018_s12 }
 0xc71   :  { %14353 = vrot.lane.b32.xlu0 %v23053_v39, %s18018_s12 }
 0xc72   :  { %14529 = vrot.lane.b32.xlu1 %v23054_v53, %s18018_s12  ;;  %v23059_v53 = vld [vmem:[#allocation106_spill] sm:$0xff] }
 0xc75   :  { %14440 = vrot.lane.b32.xlu0 %v23055_v36, %s18018_s12 }
 0xc79   :  { %14527 = vrot.lane.b32.xlu0 %v23056_v41, %s18018_s12 }
 0xca5   :  { %v13019_v14 = vpop.xlane.xlu1 %13018 }
 0xca6   :  { %17964 = vrcp.f32 %v13019_v14 }
 0xca9   :  { %v13016_v16 = vpop.xlane.xlu1 %13015 }
 0xcaa   :  { %17966 = vrcp.f32 %v13016_v16 }
 0xcab   :  { %v13028_v35 = vpop.xlane.xlu0 %13027 }
 0xcac   :  { %17968 = vrcp.f32 %v13028_v35 }
 0xcad   :  { %v13031_v13 = vpop.xlane.xlu1 %13030 }
 0xcae   :  { %17970 = vrcp.f32 %v13031_v13 }
 0xcaf   :  { %v13040_v63 = vpop.xlane.xlu0 %13039 }
 0xcb0   :  { %17972 = vrcp.f32 %v13040_v63 }
 0xcb1   :  { %v13043_v62 = vpop.xlane.xlu1 %13042 }
 0xcb2   :  { %17974 = vrcp.f32 %v13043_v62 }
 0xcb3   :  { %v17965_v60 = vpop.eup %17964  ;;  %v14267_v5 = vpop.permute.xlu0 %14266  ;;  %17976 = vrcp.f32 %v22097_v3 }
 0xcb4   :  { %v13111_v22 = vmul.f32 %v17965_v60, %v13019_v14  ;;  %17978 = vrcp.f32 %v22101_v33 }
 0xcb5   :  { %v14356_v15 = vpop.permute.xlu1 %14355  ;;  %17980 = vrcp.f32 %v22099_v42 }
 0xcb6   :  { %17387 = vmatprep.subr.mxu1 %v14356_v15  ;;  %v13143_v51 = vsub.f32 2.0, %v13111_v22 }
 0xcb7   :  { %v17967_v10 = vpop.eup %17966  ;;  %17388 = vmatpush3.msra.mxu1 %v14356_v15  ;;  %v17302_v15 = vpop.f32.mrf.mxu1 }
 0xcb8   :  { %v13110_v28 = vmul.f32 %v17967_v10, %v13016_v16  ;;  %v13175_v2 = vmul.f32 %v17965_v60, %v13143_v51  ;;  %v23060_v16 = vld [vmem:[#allocation107_spill] sm:$0xff] }
 0xcb9   :  { %v17969_v26 = vpop.eup %17968 }
 0xcba   :  { %v13142_v52 = vsub.f32 2.0, %v13110_v28  ;;  %v13114_v25 = vmul.f32 %v17969_v26, %v13028_v35  ;;  %v13207_v6 = vmul.f32 %v22109_v34, %v13175_v2 }
 0xcbb   :  { %v17971_v56 = vpop.eup %17970 }
 0xcbc   :  { %v13174_v43 = vmul.f32 %v17967_v10, %v13142_v52  ;;  %v13146_v50 = vsub.f32 2.0, %v13114_v25  ;;  %v13115_v38 = vmul.f32 %v17971_v56, %v13031_v13  ;;  %v13300_v52 = vpop.f32.mrf.mxu1 }
 0xcbd   :  { %v17973_v32 = vpop.eup %17972 }
 0xcbe   :  { %v13206_v49 = vmul.f32 %v22114_v37, %v13174_v43  ;;  %v13178_v57 = vmul.f32 %v17969_v26, %v13146_v50  ;;  %v13147_v24 = vsub.f32 2.0, %v13115_v38  ;;  %v13118_v8 = vmul.f32 %v17973_v32, %v13040_v63  ;;  %v23057_v37 = vld [vmem:[#allocation100_spill] sm:$0xff]  ;;  %v17316_v43 = vpop.f32.mrf.mxu0 }
 0xcbf   :  { %v17975_v21 = vpop.eup %17974 }
 0xcc0   :  { %v13210_v55 = vmul.f32 %v22123_v23, %v13178_v57  ;;  %v13179_v44 = vmul.f32 %v17971_v56, %v13147_v24  ;;  %v13150_v47 = vsub.f32 2.0, %v13118_v8  ;;  %v13119_v54 = vmul.f32 %v17975_v21, %v13043_v62  ;;  %17356 = vmatprep.mubr.msk.f32.mxu0 %vm1886_vm3, %v13206_v49  ;;  %v17309_v56 = vpop.f32.mrf.mxu1  ;;  %v13474_v50 = vpop.f32.mrf.mxu0 }
 0xcc1   :  { %17357 = vmatmul.mubr.msk.f32.vlgmr.msra.gmra.mxu0 %vm1886_vm3, %v13207_v6 }
 0xcc2   :  { %v13211_v58 = vmul.f32 %v22119_v19, %v13179_v44  ;;  %v13182_v61 = vmul.f32 %v17973_v32, %v13150_v47  ;;  %v13151_v46 = vsub.f32 2.0, %v13119_v54  ;;  %17367 = vmatpush3.msra.mxu0 %v21800_v17  ;;  %17370 = vmatprep.mubr.msk.f32.mxu0 %vm1886_vm3, %v13210_v55  ;;  %v17977_v17 = vpop.eup %17976  ;;  %v13387_v2 = vpop.f32.mrf.mxu1 }
 0xcc3   :  { %17368 = vmatprep.subr.mxu0 %v23057_v37  ;;  %v17979_v19 = vpop.eup %17978  ;;  %v17330_v38 = vpop.f32.mrf.mxu0 }
 0xcc4   :  { %v13214_v34 = vmul.f32 %v22131_v9, %v13182_v61  ;;  %v13183_v23 = vmul.f32 %v17975_v21, %v13151_v46  ;;  %17369 = vmatpush3.msra.mxu0 %v23057_v37  ;;  %v13121_v9 = vmul.f32 %v17977_v17, %v22097_v3  ;;  %v17981_v1 = vpop.eup %17980 }
 0xcc5   :  { %17380 = vmatprep.subr.mxu0 %v14269_v31  ;;  %17371 = vmatmul.mubr.msk.f32.vlgmr.msra.gmra.mxu0 %vm1886_vm3, %v13211_v58  ;;  %v13125_v59 = vmul.f32 %v17981_v1, %v22099_v42  ;;  %v14614_v42 = vld [vmem:[%s22344_s3 + $0x18] sm:$0xff]  ;;  %v13648_v32 = vpop.f32.mrf.mxu0 }
 0xcc6   :  { %v13215_v45 = vmul.f32 %v22127_v48, %v13183_v23  ;;  %17381 = vmatpush3.msra.mxu0 %v14269_v31  ;;  %17384 = vmatprep.mubr.msk.f32.mxu0 %vm1886_vm3, %v13214_v34  ;;  %v13124_v48 = vmul.f32 %v17979_v19, %v22101_v33  ;;  %v13153_v30 = vsub.f32 2.0, %v13121_v9 }
 0xcc7   :  { %17382 = vmatprep.subr.mxu0 %v14267_v5  ;;  %v13157_v39 = vsub.f32 2.0, %v13125_v59  ;;  %v17344_v24 = vpop.f32.mrf.mxu0  ;;  %v23063_v59 = vld [vmem:[#allocation99_spill] sm:$0xff] }
 0xcc8   :  { %17383 = vmatpush3.msra.mxu0 %v14267_v5  ;;  %v13156_v4 = vsub.f32 2.0, %v13124_v48  ;;  %v13185_v0 = vmul.f32 %v17977_v17, %v13153_v30  ;;  %v23061_v48 = vld [vmem:[#allocation49_spill] sm:$0xff] }
 0xcc9   :  { %17385 = vmatmul.mubr.msk.f32.vlgmr.msra.gmra.mxu0 %vm1886_vm3, %v13215_v45  ;;  %v13189_v41 = vmul.f32 %v17981_v1, %v13157_v39  ;;  %v13822_v8 = vpop.f32.mrf.mxu0  ;;  %v23062_v30 = vld [vmem:[#allocation73_spill] sm:$0xff]  ;;  %v23066_v39 = vld [vmem:[#allocation60_spill] sm:$0xff] }
 0xcca   :  { %v13188_v11 = vmul.f32 %v17979_v19, %v13156_v4  ;;  %v13217_v12 = vmul.f32 %v23058_v20, %v13185_v0  ;;  %v7510_v1 = vadd.f32 %v23062_v30, %v23061_v48  ;;  %v22229_v0 = vld [vmem:[%s22345_s4] ss:$0 sm:$0xff]  ;;  %s18019_s4 = smov [#allocation2]  }
 0xccb   :  { %v13221_v35 = vmul.f32 %v23060_v16, %v13189_v41  ;;  %v23068_v16 = vld [vmem:[#allocation8_spill] sm:$0xff]  ;;  %s15077_s16 = sshll.u32 %s18019_s4, 4  ;;  %s15078_s16 = int_to_ptr.vmem [resolvable:$true] %s15077_s16 }
 0xccc   :  { %v13220_v3 = vmul.f32 %v23059_v53, %v13188_v11  ;;  %v11286_v11 = vadd.f32 %v23063_v59, %v7510_v1  ;;  %s17986_s17 = scalar_lea.vmem %s15078_s16, 4096  ;;  %p17991_p1 = scmp.lt.s32.totalorder %s15078_s16, %s15078_s16 }
 0xccd   :  { %p17987_p0 = scmp.ne.s32.totalorder %s15078_s16, %s17986_s17  ;;  %p17992_p2 = scmp.lt.s32.totalorder %s17986_s17, %s17986_s17 }
 0xccf   :  { %p17993_p3 = por %p17992_p2, %p17991_p1 }
 0xcd1   :  { %p17994_p4 = pnand %p17993_p3, %p17987_p0 }
 0xce4   :  { %v13052_v7 = vpop.xlane.xlu0 %13051 }
 0xce5   :  { %17982 = vrcp.f32 %v13052_v7 }
 0xce6   :  { %v13055_v40 = vpop.xlane.xlu1 %13054 }
 0xce7   :  { %17984 = vrcp.f32 %v13055_v40 }
 0xce8   :  { %v14354_v27 = vpop.permute.xlu0 %14353 }
 0xce9   :  { %17389 = vmatprep.subr.mxu1 %v14354_v27 }
 0xcea   :  { %17390 = vmatpush3.msra.mxu1 %v14354_v27  ;;  %v14443_v33 = vpop.permute.xlu1 %14442 }
 0xceb   :  { %17392 = vmatmul.mubr.msk.f32.vlgmr.msra.gmra.mxu1 %vm1886_vm3, %v13217_v12  ;;  %17394 = vmatprep.subr.mxu0 %v14443_v33  ;;  %v23065_v12 = vld [vmem:[#allocation57_spill] sm:$0xff] }
 0xcec   :  { %v14441_v36 = vpop.permute.xlu0 %14440  ;;  %17395 = vmatpush3.msra.mxu0 %v14443_v33  ;;  %17405 = vmatprep.mubr.msk.f32.mxu1 %vm1886_vm3, %v13220_v3  ;;  %v7520_v53 = vadd.f32 %v23066_v39, %v23065_v12 }
 0xced   :  { %17396 = vmatprep.subr.mxu0 %v14441_v36 }
 0xcee   :  { %17397 = vmatpush3.msra.mxu0 %v14441_v36  ;;  %v14530_v31 = vpop.permute.xlu1 %14529 }
 0xcef   :  { %17401 = vmatprep.subr.mxu1 %v14530_v31  ;;  %17408 = vmatprep.subr.mxu0 %v14614_v42 }
 0xcf0   :  { %v14528_v14 = vpop.permute.xlu0 %14527  ;;  %17402 = vmatpush3.msra.mxu1 %v14530_v31 }
 0xcf1   :  { %17403 = vmatprep.subr.mxu1 %v14528_v14 }
 0xcf2   :  { %v17983_v13 = vpop.eup %17982  ;;  %17404 = vmatpush3.msra.mxu1 %v14528_v14 }
 0xcf3   :  { %v13122_v63 = vmul.f32 %v17983_v13, %v13052_v7  ;;  %17406 = vmatmul.mubr.msk.f32.vlgmr.msra.gmra.mxu1 %vm1886_vm3, %v13221_v35 }
 0xcf4   :  { %v17985_v62 = vpop.eup %17984 }
 0xcf5   :  { %v13154_v60 = vsub.f32 2.0, %v13122_v63  ;;  %v13123_v22 = vmul.f32 %v17985_v62, %v13055_v40  ;;  %v23064_v40 = vld [vmem:[#allocation98_spill] sm:$0xff]  ;;  %v23069_v63 = vld [vmem:[#allocation43_spill] sm:$0xff] }
 0xcf7   :  { %v13186_v10 = vmul.f32 %v17983_v13, %v13154_v60  ;;  %v13155_v51 = vsub.f32 2.0, %v13123_v22 }
 0xcf9   :  { %v13218_v28 = vmul.f32 %v22143_v29, %v13186_v10  ;;  %v13187_v26 = vmul.f32 %v17985_v62, %v13155_v51  ;;  %v17323_v29 = vpop.f32.mrf.mxu1  ;;  %v23070_v62 = vld [vmem:[#allocation81_spill] sm:$0xff] }
 0xcfa   :  { %v7530_v60 = vadd.f32 %v23070_v62, %v23069_v63  ;;  %v23084_v63 = vld [vmem:[#allocation110_spill] sm:$0xff] }
 0xcfb   :  { %v13219_v25 = vmul.f32 %v22145_v18, %v13187_v26  ;;  %17398 = vmatprep.mubr.msk.f32.mxu0 %vm1886_vm3, %v13218_v28  ;;  %v13561_v18 = vpop.f32.mrf.mxu1  ;;  %v23071_v28 = vld [vmem:[#allocation9_spill] sm:$0xff] }
 0xcfc   :  { %v11290_v26 = vadd.f32 %v23071_v28, %v7530_v60 }
 0xcfd   :  { %17399 = vmatmul.mubr.msk.f32.vlgmr.msra.gmra.mxu0 %vm1886_vm3, %v13219_v25  ;;  %v17337_v49 = vpop.f32.mrf.mxu1 }
 0xcfe   :  { %17410 = vmatprep.mubr.msk.f32.mxu0 %vm7025_vm4, %v13300_v52  ;;  %17409 = vmatpush3.msra.mxu0 %v14614_v42  ;;  %v23067_v42 = vld [vmem:[#allocation7_spill] sm:$0xff] }
 0xcff   :  { %v13735_v57 = vpop.f32.mrf.mxu1  ;;  %v11288_v41 = vadd.f32 %v23067_v42, %v7520_v53 }
 0xd01   :  { %17411 = vmatmul.mubr.msk.f32.vlgmr.msra.gmra.mxu0 %vm7025_vm4, %v17302_v15  ;;  %v17351_v21 = vpop.f32.mrf.mxu1 }
 0xd02   :  { %17413 = vmatprep.mubr.msk.f32.mxu0 %vm7025_vm4, %v13387_v2 }
 0xd03   :  { %v13909_v6 = vpop.f32.mrf.mxu1 }
 0xd05   :  { %17414 = vmatmul.mubr.msk.f32.gmra.mxu0 %vm7025_vm4, %v17309_v56  ;;  %v17365_v55 = vpop.f32.mrf.mxu1  ;;  %v23072_v56 = vld [vmem:[#allocation11_spill] sm:$0xff] }
 0xd06   :  { %17416 = vmatprep.mubr.msk.f32.mxu0 %vm7025_vm4, %v13474_v50  ;;  %v23073_v50 = vld [vmem:[#allocation91_spill] sm:$0xff] }
 0xd07   :  { %v14083_v54 = vpop.f32.mrf.mxu1 }
 0xd09   :  { %17417 = vmatmul.mubr.msk.f32.gmra.mxu0 %vm7025_vm4, %v17316_v43  ;;  %v17379_v61 = vpop.f32.mrf.mxu1 }
 0xd0a   :  { %17419 = vmatprep.mubr.msk.f32.mxu0 %vm7025_vm4, %v13561_v18 }
 0xd0b   :  { %v14257_v37 = vpop.f32.mrf.mxu1 }
 0xd0d   :  { %17420 = vmatmul.mubr.msk.f32.gmra.mxu0 %vm7025_vm4, %v17323_v29  ;;  %v23074_v29 = vld [vmem:[#allocation68_spill] sm:$0xff] }
 0xd0e   :  { %17422 = vmatprep.mubr.msk.f32.mxu0 %vm7025_vm4, %v13648_v32  ;;  %v7540_v18 = vadd.f32 %v23074_v29, %v23073_v50 }
 0xd11   :  { %17423 = vmatmul.mubr.msk.f32.gmra.mxu0 %vm7025_vm4, %v17330_v38 }
 0xd12   :  { %17425 = vmatprep.mubr.msk.f32.mxu0 %vm7025_vm4, %v13735_v57 }
 0xd15   :  { %17426 = vmatmul.mubr.msk.f32.gmra.mxu0 %vm7025_vm4, %v17337_v49 }
 0xd16   :  { %17428 = vmatprep.mubr.msk.f32.mxu0 %vm7025_vm4, %v13822_v8 }
 0xd19   :  { %17429 = vmatmul.mubr.msk.f32.gmra.mxu0 %vm7025_vm4, %v17344_v24  ;;  %v23075_v24 = vld [vmem:[#allocation12_spill] sm:$0xff] }
 0xd1a   :  { %17431 = vmatprep.mubr.msk.f32.mxu0 %vm7025_vm4, %v13909_v6  ;;  %v11292_v8 = vadd.f32 %v23075_v24, %v7540_v18  ;;  %v23087_v18 = vld [vmem:[#allocation112_spill] sm:$0xff] }
 0xd1d   :  { %17432 = vmatmul.mubr.msk.f32.gmra.mxu0 %vm7025_vm4, %v17351_v21 }
 0xd81   :  { %v17358_v44 = vpop.f32.mrf.mxu0 }
 0xd83   :  { %v13996_v47 = vpop.f32.mrf.mxu0 }
 0xd84   :  { %17434 = vmatprep.mubr.msk.f32.mxu0 %vm7025_vm4, %v13996_v47 }
 0xd85   :  { %v17372_v58 = vpop.f32.mrf.mxu0  ;;  %17435 = vmatmul.mubr.msk.f32.gmra.mxu0 %vm7025_vm4, %v17358_v44 }
 0xd86   :  { %17437 = vmatprep.mubr.msk.f32.mxu0 %vm7025_vm4, %v14083_v54  ;;  %v23077_v54 = vld [vmem:[#allocation39_spill] sm:$0xff] }
 0xd87   :  { %v14170_v46 = vpop.f32.mrf.mxu0 }
 0xd89   :  { %17438 = vmatmul.mubr.msk.f32.gmra.mxu0 %vm7025_vm4, %v17365_v55  ;;  %v17386_v34 = vpop.f32.mrf.mxu0  ;;  %v23076_v55 = vld [vmem:[#allocation13_spill] sm:$0xff] }
 0xd8a   :  { %17440 = vmatprep.mubr.msk.f32.mxu0 %vm7025_vm4, %v14170_v46 }
 0xd8b   :  { %v14344_v23 = vpop.f32.mrf.mxu0 }
 0xd8d   :  { %17441 = vmatmul.mubr.msk.f32.gmra.mxu0 %vm7025_vm4, %v17372_v58  ;;  %v23078_v58 = vld [vmem:[#allocation86_spill] sm:$0xff] }
 0xd8e   :  { %17443 = vmatprep.mubr.msk.f32.mxu0 %vm7025_vm4, %v14257_v37 }
 0xd91   :  { %17444 = vmatmul.mubr.msk.f32.gmra.mxu0 %vm7025_vm4, %v17379_v61  ;;  %v7550_v61 = vadd.f32 %v23078_v58, %v23077_v54 }
 0xd92   :  { %17446 = vmatprep.mubr.msk.f32.mxu0 %vm7025_vm4, %v14344_v23 }
 0xd95   :  { %17447 = vmatmul.mubr.msk.f32.gmra.mxu0 %vm7025_vm4, %v17386_v34 }
 0xdab   :  { %v17393_v45 = vpop.f32.mrf.mxu1 }
 0xdad   :  { %v14431_v5 = vpop.f32.mrf.mxu1 }
 0xdae   :  { %17449 = vmatprep.mubr.msk.f32.mxu0 %vm7025_vm4, %v14431_v5 }
 0xdaf   :  { %17450 = vmatmul.mubr.msk.f32.gmra.mxu0 %vm7025_vm4, %v17393_v45  ;;  %v23079_v45 = vld [vmem:[#allocation14_spill] sm:$0xff] }
 0xdb0   :  { %v11294_v5 = vadd.f32 %v23079_v45, %v7550_v61  ;;  %v23090_v61 = vld [vmem:[#allocation101_spill] sm:$0xff]  ;;  %v23091_v45 = vld [vmem:[#allocation20_spill] sm:$0xff] }
 0xdb3   :  { %v17407_v17 = vpop.f32.mrf.mxu1 }
 0xdb5   :  { %v14605_v4 = vpop.f32.mrf.mxu1 }
 0xdbd   :  { %v17400_v19 = vpop.f32.mrf.mxu0 }
 0xdbf   :  { %v14518_v9 = vpop.f32.mrf.mxu0 }
 0xdc0   :  { %17452 = vmatprep.mubr.msk.f32.mxu0 %vm7025_vm4, %v14518_v9  ;;  %v23080_v9 = vld [vmem:[#allocation15_spill] sm:$0xff] }
 0xdc1   :  { %v17412_v7 = vpop.f32.mrf.mxu0  ;;  %17453 = vmatmul.mubr.msk.f32.gmra.mxu0 %vm7025_vm4, %v17400_v19 }
 0xdc2   :  { %v14937_v27 = vadd.f32 %v17412_v7, %v23064_v40  ;;  %17455 = vmatprep.mubr.msk.f32.mxu0 %vm7025_vm4, %v14605_v4 }
 0xdc3   :  { %v14777_v20 = vpop.f32.mrf.mxu0 }
 0xdc4   :  { %v14976_v3 = vadd.f32 %v22229_v0, %v14937_v27  ;;  %v14936_v33 = vadd.f32 %v14777_v20, %v11286_v11  ;;  %v23081_v27 = vld [vmem:[#allocation17_spill] sm:$0xff] }
 0xdc5   :  { %v17415_v36 = vpop.f32.mrf.mxu0  ;;  %17456 = vmatmul.mubr.msk.f32.gmra.mxu0 %vm7025_vm4, %v17407_v17 }
 0xdc6   :  { %v15008_v31 = vmax.f32 %v14976_v3, 0.0  ;;  %v14975_v14 = vadd.f32 %v22229_v0, %v14936_v33  ;;  %v14939_v35 = vadd.f32 %v17415_v36, %v23068_v16  ;;  %v23082_v3 = vld [vmem:[#allocation16_spill] sm:$0xff] }
 0xdc7   :  { %v14787_v13 = vpop.f32.mrf.mxu0 }
 0xdc8   :  { %15041 = vst.msk [vmem:[#allocation2 + $0x8] sm:$0xff] %vm15039_vm5, %v15008_v31  ;;  %v15007_v22 = vmax.f32 %v14975_v14, 0.0  ;;  %v14978_v15 = vadd.f32 %v22229_v0, %v14939_v35  ;;  %v14938_v10 = vadd.f32 %v14787_v13, %v11288_v41  ;;  %v23083_v31 = vld [vmem:[#allocation19_spill] sm:$0xff] }
 0xdc9   :  { %v17418_v51 = vpop.f32.mrf.mxu0 }
 0xdca   :  { %15040 = vst.msk [vmem:[#allocation2] sm:$0xff] %vm15039_vm5, %v15007_v22  ;;  %v15010_v52 = vmax.f32 %v14978_v15, 0.0  ;;  %v14977_v25 = vadd.f32 %v22229_v0, %v14938_v10  ;;  %v14941_v2 = vadd.f32 %v17418_v51, %v23072_v56  ;;  %v23085_v10 = vld [vmem:[#allocation109_spill] sm:$0xff] }
 0xdcb   :  { %v14797_v43 = vpop.f32.mrf.mxu0 }
 0xdcc   :  { %15043 = vst.msk [vmem:[#allocation2 + $0x18] sm:$0xff] %vm15039_vm5, %v15010_v52  ;;  %v15009_v38 = vmax.f32 %v14977_v25, 0.0  ;;  %v14980_v32 = vadd.f32 %v22229_v0, %v14941_v2  ;;  %v14940_v49 = vadd.f32 %v14797_v43, %v11290_v26  ;;  %v23086_v25 = vld [vmem:[#allocation18_spill] sm:$0xff] }
 0xdcd   :  { %v17421_v57 = vpop.f32.mrf.mxu0 }
 0xdce   :  { %15042 = vst.msk [vmem:[#allocation2 + $0x10] sm:$0xff] %vm15039_vm5, %v15009_v38  ;;  %v15012_v21 = vmax.f32 %v14980_v32, 0.0  ;;  %v14979_v6 = vadd.f32 %v22229_v0, %v14940_v49  ;;  %v14943_v44 = vadd.f32 %v17421_v57, %v23076_v55  ;;  %v23088_v57 = vld [vmem:[#allocation111_spill] sm:$0xff]  ;;  %v23089_v55 = vld [vmem:[#allocation21_spill] sm:$0xff] }
 0xdcf   :  { %v14807_v47 = vpop.f32.mrf.mxu0 }
 0xdd0   :  { %15045 = vst.msk [vmem:[#allocation2 + $0x28] sm:$0xff] %vm15039_vm5, %v15012_v21  ;;  %v15011_v46 = vmax.f32 %v14979_v6, 0.0  ;;  %v14982_v37 = vadd.f32 %v22229_v0, %v14943_v44  ;;  %v14942_v34 = vadd.f32 %v14807_v47, %v11292_v8 }
 0xdd1   :  { %v17424_v23 = vpop.f32.mrf.mxu0 }
 0xdd2   :  { %15044 = vst.msk [vmem:[#allocation2 + $0x20] sm:$0xff] %vm15039_vm5, %v15011_v46  ;;  %v15014_v17 = vmax.f32 %v14982_v37, 0.0  ;;  %v14981_v19 = vadd.f32 %v22229_v0, %v14942_v34  ;;  %v14945_v48 = vadd.f32 %v17424_v23, %v23080_v9 }
 0xdd3   :  { %v14817_v30 = vpop.f32.mrf.mxu0 }
 0xdd4   :  { %15047 = vst.msk [vmem:[#allocation2 + $0x38] sm:$0xff] %vm15039_vm5, %v15014_v17  ;;  %v15013_v1 = vmax.f32 %v14981_v19, 0.0  ;;  %v14984_v4 = vadd.f32 %v22229_v0, %v14945_v48  ;;  %v14944_v7 = vadd.f32 %v14817_v30, %v11294_v5  ;;  %v23092_v48 = vld [vmem:[#allocation102_spill] sm:$0xff] }
 0xdd5   :  { %v17427_v59 = vpop.f32.mrf.mxu0 }
 0xdd6   :  { %15046 = vst.msk [vmem:[#allocation2 + $0x30] sm:$0xff] %vm15039_vm5, %v15013_v1  ;;  %v15016_v11 = vmax.f32 %v14984_v4, 0.0  ;;  %v14983_v40 = vadd.f32 %v22229_v0, %v14944_v7  ;;  %v14947_v20 = vadd.f32 %v17427_v59, %v23081_v27  ;;  %v23093_v59 = vld [vmem:[#allocation103_spill] sm:$0xff] }
 0xdd7   :  { %v14827_v12 = vpop.f32.mrf.mxu0 }
 0xdd8   :  { %15049 = vst.msk [vmem:[#allocation2 + $0x48] sm:$0xff] %vm15039_vm5, %v15016_v11  ;;  %v15015_v39 = vmax.f32 %v14983_v40, 0.0  ;;  %v14986_v53 = vadd.f32 %v22229_v0, %v14947_v20  ;;  %v14946_v33 = vadd.f32 %v14827_v12, %v23082_v3  ;;  %v23094_v12 = vld [vmem:[#allocation22_spill] sm:$0xff] }
 0xdd9   :  { %v17430_v36 = vpop.f32.mrf.mxu0 }
 0xdda   :  { %15048 = vst.msk [vmem:[#allocation2 + $0x40] sm:$0xff] %vm15039_vm5, %v15015_v39  ;;  %v15018_v42 = vmax.f32 %v14986_v53, 0.0  ;;  %v14985_v41 = vadd.f32 %v22229_v0, %v14946_v33  ;;  %v14949_v14 = vadd.f32 %v17430_v36, %v23083_v31  ;;  %v23095_v36 = vld [vmem:[#allocation23_spill] sm:$0xff] }
 0xddb   :  { %v14837_v16 = vpop.f32.mrf.mxu0 }
 0xddc   :  { %15051 = vst.msk [vmem:[#allocation2 + $0x58] sm:$0xff] %vm15039_vm5, %v15018_v42  ;;  %v15017_v35 = vmax.f32 %v14985_v41, 0.0  ;;  %v14988_v13 = vadd.f32 %v22229_v0, %v14949_v14  ;;  %v14948_v62 = vadd.f32 %v14837_v16, %v23084_v63  ;;  %v23096_v16 = vld [vmem:[#allocation104_spill] sm:$0xff] }
 0xddd   :  { %v17433_v60 = vpop.f32.mrf.mxu0 }
 0xdde   :  { %15050 = vst.msk [vmem:[#allocation2 + $0x50] sm:$0xff] %vm15039_vm5, %v15017_v35  ;;  %v15020_v22 = vmax.f32 %v14988_v13, 0.0  ;;  %v14987_v15 = vadd.f32 %v22229_v0, %v14948_v62  ;;  %v14951_v51 = vadd.f32 %v17433_v60, %v23085_v10 }
 0xddf   :  { %v14847_v28 = vpop.f32.mrf.mxu0 }
 0xde0   :  { %15053 = vst.msk [vmem:[#allocation2 + $0x68] sm:$0xff] %vm15039_vm5, %v15020_v22  ;;  %v15019_v26 = vmax.f32 %v14987_v15, 0.0  ;;  %v14990_v52 = vadd.f32 %v22229_v0, %v14951_v51  ;;  %v14950_v56 = vadd.f32 %v14847_v28, %v23086_v25  ;;  %v23097_v22 = vld [vmem:[#allocation108_spill] sm:$0xff]  ;;  %v23098_v28 = vld [vmem:[#allocation10_spill] sm:$0xff] }
 0xde2   :  { %15052 = vst.msk [vmem:[#allocation2 + $0x60] sm:$0xff] %vm15039_vm5, %v15019_v26  ;;  %v15022_v2 = vmax.f32 %v14990_v52, 0.0  ;;  %v14989_v43 = vadd.f32 %v22229_v0, %v14950_v56 }
 0xde4   :  { %15055 = vst.msk [vmem:[#allocation2 + $0x78] sm:$0xff] %vm15039_vm5, %v15022_v2  ;;  %v15021_v50 = vmax.f32 %v14989_v43, 0.0  ;;  %v23099_v43 = vld [vmem:[#allocation25_spill] sm:$0xff] }
 0xde6   :  { %15054 = vst.msk [vmem:[#allocation2 + $0x70] sm:$0xff] %vm15039_vm5, %v15021_v50 }
 0xe45   :  { %v17436_v29 = vpop.f32.mrf.mxu0 }
 0xe46   :  { %v14953_v38 = vadd.f32 %v17436_v29, %v23087_v18 }
 0xe47   :  { %v14857_v32 = vpop.f32.mrf.mxu0 }
 0xe48   :  { %v14992_v49 = vadd.f32 %v22229_v0, %v14953_v38  ;;  %v14952_v24 = vadd.f32 %v14857_v32, %v23088_v57  ;;  %v23100_v38 = vld [vmem:[#allocation24_spill] sm:$0xff] }
 0xe49   :  { %v17439_v8 = vpop.f32.mrf.mxu0 }
 0xe4a   :  { %v15024_v21 = vmax.f32 %v14992_v49, 0.0  ;;  %v14991_v6 = vadd.f32 %v22229_v0, %v14952_v24  ;;  %v14955_v44 = vadd.f32 %v17439_v8, %v23089_v55  ;;  %v23101_v8 = vld [vmem:[#allocation27_spill] sm:$0xff] }
 0xe4b   :  { %v14867_v47 = vpop.f32.mrf.mxu0 }
 0xe4c   :  { %15057 = vst.msk [vmem:[#allocation2 + $0x88] sm:$0xff] %vm15039_vm5, %v15024_v21  ;;  %v15023_v54 = vmax.f32 %v14991_v6, 0.0  ;;  %v14994_v58 = vadd.f32 %v22229_v0, %v14955_v44  ;;  %v14954_v46 = vadd.f32 %v14867_v47, %v23090_v61  ;;  %v23102_v47 = vld [vmem:[#allocation26_spill] sm:$0xff] }
 0xe4d   :  { %v17442_v37 = vpop.f32.mrf.mxu0 }
 0xe4e   :  { %15056 = vst.msk [vmem:[#allocation2 + $0x80] sm:$0xff] %vm15039_vm5, %v15023_v54  ;;  %v15026_v34 = vmax.f32 %v14994_v58, 0.0  ;;  %v14993_v23 = vadd.f32 %v22229_v0, %v14954_v46  ;;  %v14957_v5 = vadd.f32 %v17442_v37, %v23091_v45 }
 0xe4f   :  { %v14877_v17 = vpop.f32.mrf.mxu0 }
 0xe50   :  { %15059 = vst.msk [vmem:[#allocation2 + $0x98] sm:$0xff] %vm15039_vm5, %v15026_v34  ;;  %v15025_v19 = vmax.f32 %v14993_v23, 0.0  ;;  %v14996_v9 = vadd.f32 %v22229_v0, %v14957_v5  ;;  %v14956_v30 = vadd.f32 %v14877_v17, %v23092_v48 }
 0xe51   :  { %v17445_v1 = vpop.f32.mrf.mxu0 }
 0xe52   :  { %15058 = vst.msk [vmem:[#allocation2 + $0x90] sm:$0xff] %vm15039_vm5, %v15025_v19  ;;  %v15028_v4 = vmax.f32 %v14996_v9, 0.0  ;;  %v14995_v7 = vadd.f32 %v22229_v0, %v14956_v30  ;;  %v14959_v11 = vadd.f32 %v17445_v1, %v23093_v59 }
 0xe53   :  { %v14887_v40 = vpop.f32.mrf.mxu0 }
 0xe54   :  { %15061 = vst.msk [vmem:[#allocation2 + $0xa8] sm:$0xff] %vm15039_vm5, %v15028_v4  ;;  %v15027_v27 = vmax.f32 %v14995_v7, 0.0  ;;  %v14998_v20 = vadd.f32 %v22229_v0, %v14959_v11  ;;  %v14958_v39 = vadd.f32 %v14887_v40, %v23094_v12 }
 0xe55   :  { %v17448_v53 = vpop.f32.mrf.mxu0 }
 0xe56   :  { %15060 = vst.msk [vmem:[#allocation2 + $0xa0] sm:$0xff] %vm15039_vm5, %v15027_v27  ;;  %v15030_v3 = vmax.f32 %v14998_v20, 0.0  ;;  %v14997_v33 = vadd.f32 %v22229_v0, %v14958_v39  ;;  %v14961_v42 = vadd.f32 %v17448_v53, %v23095_v36 }
 0xe57   :  { %v14897_v41 = vpop.f32.mrf.mxu0 }
 0xe58   :  { %15063 = vst.msk [vmem:[#allocation2 + $0xb8] sm:$0xff] %vm15039_vm5, %v15030_v3  ;;  %v15029_v31 = vmax.f32 %v14997_v33, 0.0  ;;  %v15000_v14 = vadd.f32 %v22229_v0, %v14961_v42  ;;  %v14960_v35 = vadd.f32 %v14897_v41, %v23096_v16 }
 0xe5a   :  { %15062 = vst.msk [vmem:[#allocation2 + $0xb0] sm:$0xff] %vm15039_vm5, %v15029_v31  ;;  %v15032_v13 = vmax.f32 %v15000_v14, 0.0  ;;  %v14999_v63 = vadd.f32 %v22229_v0, %v14960_v35 }
 0xe5c   :  { %15065 = vst.msk [vmem:[#allocation2 + $0xc8] sm:$0xff] %vm15039_vm5, %v15032_v13  ;;  %v15031_v62 = vmax.f32 %v14999_v63, 0.0 }
 0xe5e   :  { %15064 = vst.msk [vmem:[#allocation2 + $0xc0] sm:$0xff] %vm15039_vm5, %v15031_v62 }
 0xe6f   :  { %v17451_v60 = vpop.f32.mrf.mxu0 }
 0xe70   :  { %v14963_v15 = vadd.f32 %v17451_v60, %v23097_v22 }
 0xe71   :  { %v14907_v10 = vpop.f32.mrf.mxu0 }
 0xe72   :  { %v15002_v51 = vadd.f32 %v22229_v0, %v14963_v15  ;;  %v14962_v26 = vadd.f32 %v14907_v10, %v23098_v28 }
 0xe74   :  { %v15034_v52 = vmax.f32 %v15002_v51, 0.0  ;;  %v15001_v25 = vadd.f32 %v22229_v0, %v14962_v26 }
 0xe76   :  { %15067 = vst.msk [vmem:[#allocation2 + $0xd8] sm:$0xff] %vm15039_vm5, %v15034_v52  ;;  %v15033_v56 = vmax.f32 %v15001_v25, 0.0 }
 0xe78   :  { %15066 = vst.msk [vmem:[#allocation2 + $0xd0] sm:$0xff] %vm15039_vm5, %v15033_v56 }
 0xe81   :  { %v17454_v2 = vpop.f32.mrf.mxu0 }
 0xe82   :  { %v14965_v50 = vadd.f32 %v17454_v2, %v23099_v43 }
 0xe83   :  { %v14917_v29 = vpop.f32.mrf.mxu0 }
 0xe84   :  { %v15004_v18 = vadd.f32 %v22229_v0, %v14965_v50  ;;  %v14964_v32 = vadd.f32 %v14917_v29, %v23100_v38 }
 0xe85   :  { %v17457_v49 = vpop.f32.mrf.mxu0 }
 0xe86   :  { %v15036_v57 = vmax.f32 %v15004_v18, 0.0  ;;  %v15003_v24 = vadd.f32 %v22229_v0, %v14964_v32  ;;  %v14967_v21 = vadd.f32 %v17457_v49, %v23101_v8 }
 0xe87   :  { %v14927_v6 = vpop.f32.mrf.mxu0 }
 0xe88   :  { %15069 = vst.msk [vmem:[#allocation2 + $0xe8] sm:$0xff] %vm15039_vm5, %v15036_v57  ;;  %v15035_v55 = vmax.f32 %v15003_v24, 0.0  ;;  %v15006_v44 = vadd.f32 %v22229_v0, %v14967_v21  ;;  %v14966_v54 = vadd.f32 %v14927_v6, %v23102_v47 }
 0xe8a   :  { %15068 = vst.msk [vmem:[#allocation2 + $0xe0] sm:$0xff] %vm15039_vm5, %v15035_v55  ;;  %v15038_v58 = vmax.f32 %v15006_v44, 0.0  ;;  %v15005_v61 = vadd.f32 %v22229_v0, %v14966_v54 }
 0xe8c   :  { %15071 = vst.msk [vmem:[#allocation2 + $0xf8] sm:$0xff] %vm15039_vm5, %v15038_v58  ;;  %v15037_v46 = vmax.f32 %v15005_v61, 0.0 }
 0xe8e   :  { %15070 = vst.msk [vmem:[#allocation2 + $0xf0] sm:$0xff] %vm15039_vm5, %v15037_v46 }
 0xe8f   :  { %17997 = shalt.err (!%p17994_p4)
}
 0xe90   :  { %s18020_s5 = smov 128   ;;  %s18021_s18 = smov 8  }
 0xe91   :  { %15083 = dma.vmem_to_hbm [thread:$0]  %s15078_s16, 4096, %s22348_s7, [#allocation3], %s18020_s5, %s18020_s5, %s18021_s18  }
 0xe92   :  { %18006 = dma.done.wait [#allocation3], 4096  }
 0xe93   :  { %18007 = vsyncadd [#allocation3], 4294963200 }
 0xe94   :  { %15087 = vsyncpa [#allocation3], 1 }

</bundles_post_ra>
